<compile_context>
chip_gen: v6e
topology: v6e:2x2x1
jax: 0.10.0
libtpu: 0.0.40
codegen_flags: <defaults>
</compile_context>

<pallas_src>
import functools

import numpy as np

import jax
import jax.numpy as jnp
from jax.experimental import pallas as pl
from jax.experimental.pallas import tpu as pltpu


# ------------------------------------------------------------------------------- kernel


def _forward_kernel(plan, patches_ref, w64_ref, w128_ref, w256_ref,
                    b64_ref, b128_ref, b256_ref, t_ref, out_ref):
    """Entire GeoLocalizationNet forward; batch folded into the row (M) dimension."""
    wrefs = {64: w64_ref, 128: w128_ref, 256: w256_ref}
    brefs = {64: b64_ref, 128: b128_ref, 256: b256_ref}

    def conv(x, cv, relu=True, residual=None):
        # x: (rows_in, Cin) f32/bf16.  Select-then-matmul:
        #   Xg = G_bf16 @ x_bf16   (0/1 one-hot rows -> exact gather incl. zero padding)
        #   y  = sum_t Xg[t] @ W_t (bf16 MXU dots, f32 accumulation)
        xb = x.astype(jnp.bfloat16)
        w_ref = wrefs[cv["grp"]]
        woff, cin, n = cv["w_off"], cv["cin"], cv["n_act"]
        if cv["t_off"] is None:
            # Identity selection (stem patches, or 3x3 conv on a 1x1 map): single dot.
            w = w_ref[woff:woff + cv["k_rows"], :]
            acc = jnp.dot(xb, w, preferred_element_type=jnp.float32)
        else:
            so, si = cv["s_out"], cv["s_in"]
            g = t_ref[cv["t_off"]:cv["t_off"] + n * so, 0:si]        # bf16 0/1 selection
            xg = jnp.dot(g, xb, preferred_element_type=jnp.float32)  # exact gather (f32)
            acc = None
            for t in range(n):
                xt = xg[t * so:(t + 1) * so, :].astype(jnp.bfloat16)
                wt = w_ref[woff + t * cin: woff + (t + 1) * cin, :]
                d = jnp.dot(xt, wt, preferred_element_type=jnp.float32)
                acc = d if acc is None else acc + d
        acc = acc + brefs[cv["grp"]][cv["b_idx"]:cv["b_idx"] + 1, :]  # folded-BN bias (f32)
        if residual is not None:
            acc = acc + residual
        if relu:
            acc = jnp.maximum(acc, 0.0)
        return acc

    def maxpool(x, pv):
        # 3x3 / stride 2 / pad 1.  Padding taps contribute zero rows, which equals
        # PyTorch's -inf padding here because x is post-ReLU (>= 0) and every window
        # contains at least one real element.
        xb = x.astype(jnp.bfloat16)
        so, si, n = pv["s_out"], pv["s_in"], pv["n"]
        g = t_ref[pv["t_off"]:pv["t_off"] + n * so, 0:si]
        xg = jnp.dot(g, xb, preferred_element_type=jnp.float32)
        out = None
        for t in range(n):
            tap = xg[t * so:(t + 1) * so, :]
            out = tap if out is None else jnp.maximum(out, tap)
        return out

    # ---- stem: conv1 (7x7/2) + folded BN + ReLU, then maxpool (3x3/2) ----
    x = conv(patches_ref[...], plan["conv1"], relu=True)
    x = maxpool(x, plan["pool"])

    # ---- ResNet-18 layer1 / layer2 / layer3 (BasicBlocks, conv5 removed) ----
    for name in ("layer1", "layer2", "layer3"):
        for bp in plan[name]:
            identity = x
            out = conv(x, bp["conv1"], relu=True)
            if bp["down"] is not None:
                identity = conv(x, bp["down"], relu=False)
            x = conv(out, bp["conv2"], relu=True, residual=identity)

    # ---- aggregation: L2Norm(channels) -> AdaptiveAvgPool2d(1) -> Flatten ----
    n2 = jnp.sum(x * x, axis=-1, keepdims=True)
    xn = x * jax.lax.rsqrt(jnp.maximum(n2, 1e-24))   # == x / max(||x||_2, 1e-12)
    bsz, s_last, feat = plan["batch"], plan["s_last"], plan["features_dim"]
    if s_last == 1:
        out_ref[...] = xn
    else:
        out_ref[...] = jnp.mean(xn.reshape(bsz, s_last, feat), axis=1)


# ------------------------------------------------------------------------- model prep


def _tap_matrices(h_in, w_in, k, stride, pad):
    """T[t] is a 0/1 (S_out, S_in) matrix: T[t, a, b] = 1 iff output position `a` reads
    input position `b` through tap t = dy*k + dx.  Padding taps give all-zero rows."""
    h_out = (h_in + 2 * pad - k) // stride + 1
    w_out = (w_in + 2 * pad - k) // stride + 1
    T = np.zeros((k * k, h_out * w_out, h_in * w_in), np.float32)
    for dy in range(k):
        for dx in range(k):
            t = dy * k + dx
            for a in range(h_out * w_out):
                r = stride * (a // w_out) + dy - pad
                c = stride * (a % w_out) + dx - pad
                if 0 <= r < h_in and 0 <= c < w_in:
                    T[t, a, r * w_in + c] = 1.0
    return T, h_out, w_out


def prepare_model(params, h=16, w=16, batch=2):
    """Fold eval-mode BN into the conv weights, prune inactive taps, build block-diagonal
    (over batch) tap-selection matrices, and pack everything into a few slabs."""
    ALIGN = 16                                   # bf16 sublane tile
    w_buf = {64: [], 128: [], 256: []}
    w_pos = {64: 0, 128: 0, 256: 0}
    b_buf = {64: [], 128: [], 256: []}
    t_buf = []
    t_pos = [0]
    eye_b = np.eye(batch, dtype=np.float32)

    def add_weight(cout, w2d):                   # w2d: (rows, cout) f32
        rows = w2d.shape[0]
        pad_r = (-rows) % ALIGN
        if pad_r:
            w2d = np.concatenate([w2d, np.zeros((pad_r, cout), np.float32)], axis=0)
        off = w_pos[cout]
        w_buf[cout].append(w2d)
        w_pos[cout] += w2d.shape[0]
        return off

    def add_bias(cout, b1d):
        idx = len(b_buf[cout])
        b_buf[cout].append(np.asarray(b1d, np.float32).reshape(1, cout))
        return idx

    def add_T(g2d):                              # (rows, s_in_b) f32 0/1
        rows = g2d.shape[0]
        pad_r = (-rows) % ALIGN
        if pad_r:
            g2d = np.concatenate([g2d, np.zeros((pad_r, g2d.shape[1]), np.float32)], axis=0)
        off = t_pos[0]
        t_buf.append(g2d)
        t_pos[0] += g2d.shape[0]
        return off

    def prep_conv(cv, h_in, w_in, stride, pad):
        wf = (np.asarray(cv["w"], np.float32)
              * np.asarray(cv["scale"], np.float32)[None, None, None, :])   # fold BN scale
        k, _, cin, cout = wf.shape
        T, h_out, w_out = _tap_matrices(h_in, w_in, k, stride, pad)
        active = [t for t in range(k * k) if T[t].any()]
        n_act = len(active)
        w_taps = wf.reshape(k * k, cin, cout)
        w_stack = np.concatenate([w_taps[t] for t in active], axis=0)       # (n_act*cin, cout)
        s_out, s_in = h_out * w_out, h_in * w_in
        T_act = T[active]
        identity = (n_act == 1 and s_out == s_in
                    and np.array_equal(T_act[0], np.eye(s_in, dtype=np.float32)))
        entry = {
            "grp": int(cout), "cin": int(cin), "cout": int(cout), "n_act": int(n_act),
            "w_off": add_weight(cout, w_stack),
            "b_idx": add_bias(cout, cv["bias"]),
            "k_rows": int(n_act * cin),
            "t_off": None,
        }
        if not identity:
            G = np.concatenate([np.kron(eye_b, T_act[t]) for t in range(n_act)], axis=0)
            entry["t_off"] = add_T(G)
            entry["s_out"] = int(batch * s_out)
            entry["s_in"] = int(batch * s_in)
        return entry, h_out, w_out

    plan = {"features_dim": 256, "batch": int(batch)}

    # conv1 (7x7 / stride 2 / pad 3): patches come from the wrapper, single matmul with
    # weight layout (k*k*cin, cout) matching the (dy, dx, cin) patch column order.
    c1 = params["conv1"]
    w_stem = (np.asarray(c1["w"], np.float32)
              * np.asarray(c1["scale"], np.float32)[None, None, None, :])
    k1, _, cin1, cout1 = w_stem.shape
    plan["conv1"] = {
        "grp": int(cout1), "cin": int(cin1), "cout": int(cout1), "n_act": 1,
        "w_off": add_weight(cout1, w_stem.reshape(k1 * k1 * cin1, cout1)),
        "b_idx": add_bias(cout1, c1["bias"]),
        "k_rows": int(k1 * k1 * cin1),
        "t_off": None,
    }
    h_c = (h + 2 * 3 - 7) // 2 + 1
    w_c = (w + 2 * 3 - 7) // 2 + 1
    plan["s1"] = h_c * w_c
    plan["k_stem"] = k1 * k1 * cin1

    # maxpool 3x3 / stride 2 / pad 1
    T_pool, h_p, w_p = _tap_matrices(h_c, w_c, 3, 2, 1)
    G_pool = np.concatenate([np.kron(eye_b, T_pool[t]) for t in range(T_pool.shape[0])], axis=0)
    plan["pool"] = {"t_off": add_T(G_pool), "n": int(T_pool.shape[0]),
                    "s_out": int(batch * h_p * w_p), "s_in": int(batch * h_c * w_c)}
    h_c, w_c = h_p, w_p

    # residual layers (ResNet-18 layer1..layer3; conv5/avgpool/fc are removed)
    for name, strides in (("layer1", (1, 1)), ("layer2", (2, 1)), ("layer3", (2, 1))):
        blocks = []
        for i, s in enumerate(strides):
            bparams = params[name][i]
            bp = {}
            bp["conv1"], h_a, w_a = prep_conv(bparams["conv1"], h_c, w_c, s, 1)
            bp["conv2"], h_b, w_b = prep_conv(bparams["conv2"], h_a, w_a, 1, 1)
            if "down" in bparams:
                bp["down"], _, _ = prep_conv(bparams["down"], h_c, w_c, s, 0)
            else:
                bp["down"] = None
            h_c, w_c = h_b, w_b
            blocks.append(bp)
        plan[name] = blocks

    plan["s_last"] = h_c * w_c

    # ---- pack slabs ----
    def _cat(lst, cols, dtype):
        if not lst:
            lst = [np.zeros((ALIGN, cols), np.float32)]
        return jnp.asarray(np.concatenate(lst, axis=0), dtype)

    t_width = max((g.shape[1] for g in t_buf), default=128)
    t_width = ((t_width + 127) // 128) * 128
    t_padded = [np.pad(g, ((0, 0), (0, t_width - g.shape[1]))) for g in t_buf]

    consts = [
        _cat(w_buf[64], 64, jnp.bfloat16),
        _cat(w_buf[128], 128, jnp.bfloat16),
        _cat(w_buf[256], 256, jnp.bfloat16),
        _cat(b_buf[64], 64, jnp.float32),
        _cat(b_buf[128], 128, jnp.float32),
        _cat(b_buf[256], 256, jnp.float32),
        _cat(t_padded, t_width, jnp.bfloat16),
    ]
    return plan, consts


# ------------------------------------------------------------------------------ wrapper


def _im2col_stem(x, k=7, stride=2, pad=3):
    """(B,H,W,3) -> (B, Ho*Wo, k*k*3) patches for the 7x7/2 stem conv (input only, one-time)."""
    b, h, w, c = x.shape
    xp = jnp.pad(x, ((0, 0), (pad, pad), (pad, pad), (0, 0)))
    h_out = (h + 2 * pad - k) // stride + 1
    w_out = (w + 2 * pad - k) // stride + 1
    cols = []
    for dy in range(k):
        for dx in range(k):
            cols.append(jax.lax.slice(
                xp, (0, dy, dx, 0),
                (b, dy + stride * (h_out - 1) + 1, dx + stride * (w_out - 1) + 1, c),
                (1, stride, stride, 1)))
    patches = jnp.concatenate(cols, axis=-1)                    # (B, Ho, Wo, k*k*3)
    return patches.reshape(b, h_out * w_out, k * k * c)


def geolocalization_net(x_nchw, plan, consts):
    """Forward pass.  x_nchw: (B, 3, H, W) like the PyTorch module."""
    bsz = x_nchw.shape[0]
    assert bsz == plan["batch"], "prepare_model() batch must match the input batch"
    x = jnp.transpose(x_nchw, (0, 2, 3, 1)).astype(jnp.float32)        # NHWC
    # TODO(synk): build the stem patches inside the kernel at real resolutions.
    patches = _im2col_stem(x).reshape(bsz * plan["s1"], plan["k_stem"]).astype(jnp.bfloat16)

    kernel = functools.partial(_forward_kernel, plan)
    vmem = pl.BlockSpec(memory_space=pltpu.MemorySpace.VMEM)
    out = pl.pallas_call(
        kernel,
        out_shape=jax.ShapeDtypeStruct((bsz, plan["features_dim"]), jnp.float32),
        in_specs=[vmem] * (1 + len(consts)),
        out_specs=vmem,
        compiler_params=pltpu.CompilerParams(vmem_limit_bytes=32 * 1024 * 1024),
    )(patches, *consts)
    return out


# --------------------------------------------------------------------------- parameters


def _make_conv_bn(key, k, cin, cout):
    """Deterministic synthetic conv weight + eval-mode BN folded to scale/bias."""
    kw, kg, kb, km, kv = jax.random.split(key, 5)
    fan_in = k * k * cin
    w = jax.random.normal(kw, (k, k, cin, cout), jnp.float32) * (2.0 / fan_in) ** 0.5
    gamma = jax.random.uniform(kg, (cout,), jnp.float32, 0.5, 1.5)
    beta = jax.random.normal(kb, (cout,), jnp.float32) * 0.1
    mean = jax.random.normal(km, (cout,), jnp.float32) * 0.1
    var = jax.random.uniform(kv, (cout,), jnp.float32, 0.5, 1.5)
    eps = 1e-5
    scale = gamma * jax.lax.rsqrt(var + eps)
    bias = beta - mean * scale
    return {"w": w, "scale": scale, "bias": bias}


def init_params(key):
    keys = iter(jax.random.split(key, 16))
    p = {"conv1": _make_conv_bn(next(keys), 7, 3, 64)}

    def block(cin, cout, stride):
        d = {
            "conv1": _make_conv_bn(next(keys), 3, cin, cout),
            "conv2": _make_conv_bn(next(keys), 3, cout, cout),
        }
        if stride != 1 or cin != cout:
            d["down"] = _make_conv_bn(next(keys), 1, cin, cout)
        return d

    p["layer1"] = [block(64, 64, 1), block(64, 64, 1)]
    p["layer2"] = [block(64, 128, 2), block(128, 128, 1)]
    p["layer3"] = [block(128, 256, 2), block(256, 256, 1)]
    return p


# --------------------------------------------------------------------------------- main


if __name__ == "__main__":
    key = jax.random.PRNGKey(0)
    kx, kp = jax.random.split(key)
    x = jax.random.normal(kx, (2, 3, 16, 16), jnp.float32)    # NCHW like the PyTorch module
    params = init_params(kp)
    plan, consts = prepare_model(params, h=16, w=16, batch=2)

    @jax.jit
    def fwd(inp):
        return geolocalization_net(inp, plan, consts)

    out = jax.block_until_ready(fwd(x))
    assert out.shape == (2, 256), out.shape
    assert bool(jnp.all(jnp.isfinite(out)))
    print("KERNEL_OK")
</pallas_src>

<mosaic_0001>
module attributes {stable_mosaic.version = 11 : i64} {
  func.func @_forward_kernel(%arg0: memref<128x147xbf16, #tpu.memory_space<vmem>>, %arg1: memref<2464x64xbf16, #tpu.memory_space<vmem>>, %arg2: memref<4096x128xbf16, #tpu.memory_space<vmem>>, %arg3: memref<1408x256xbf16, #tpu.memory_space<vmem>>, %arg4: memref<5x64xf32, #tpu.memory_space<vmem>>, %arg5: memref<5x128xf32, #tpu.memory_space<vmem>>, %arg6: memref<5x256xf32, #tpu.memory_space<vmem>>, %arg7: memref<1808x128xbf16, #tpu.memory_space<vmem>>, %arg8: memref<2x256xf32, #tpu.memory_space<vmem>>) attributes {dimension_semantics = [], scalar_prefetch = 0 : i64, scratch_operands = 0 : i64, tpu.core_type = #tpu.core_type<tc>} {
    %c0 = arith.constant 0 : index
    %c0_0 = arith.constant 0 : index
    %0 = vector.load %arg0[%c0, %c0_0] : memref<128x147xbf16, #tpu.memory_space<vmem>>, vector<128x147xbf16>
    %c0_1 = arith.constant 0 : index
    %c0_2 = arith.constant 0 : index
    %1 = vector.load %arg1[%c0_1, %c0_2] : memref<2464x64xbf16, #tpu.memory_space<vmem>>, vector<147x64xbf16>
    %cst = arith.constant dense<0.000000e+00> : vector<128x64xf32>
    %2 = tpu.matmul %0, %1, %cst {dimension_numbers = #tpu.dot_dimension_numbers<[1], [0], [0], [1], [0, 0, 1, 1], [], []>} : vector<128x147xbf16>, vector<147x64xbf16>, vector<128x64xf32> -> vector<128x64xf32>
    %c0_3 = arith.constant 0 : index
    %c0_4 = arith.constant 0 : index
    %3 = vector.load %arg4[%c0_3, %c0_4] : memref<5x64xf32, #tpu.memory_space<vmem>>, vector<1x64xf32>
    %4 = vector.broadcast %3 : vector<1x64xf32> to vector<128x64xf32>
    %5 = arith.addf %2, %4 : vector<128x64xf32>
    %cst_5 = arith.constant 0.000000e+00 : f32
    %6 = vector.broadcast %cst_5 : f32 to vector<128x64xf32>
    %7 = arith.maximumf %5, %6 : vector<128x64xf32>
    %8 = arith.truncf %7 : vector<128x64xf32> to vector<128x64xbf16>
    %c0_6 = arith.constant 0 : index
    %c0_7 = arith.constant 0 : index
    %9 = vector.load %arg7[%c0_6, %c0_7] : memref<1808x128xbf16, #tpu.memory_space<vmem>>, vector<288x128xbf16>
    %cst_8 = arith.constant dense<0.000000e+00> : vector<288x64xf32>
    %10 = tpu.matmul %9, %8, %cst_8 {dimension_numbers = #tpu.dot_dimension_numbers<[1], [0], [0], [1], [0, 0, 1, 1], [], []>} : vector<288x128xbf16>, vector<128x64xbf16>, vector<288x64xf32> -> vector<288x64xf32>
    %11 = vector.extract_strided_slice %10 {offsets = [0, 0], sizes = [32, 64], strides = [1, 1]} : vector<288x64xf32> to vector<32x64xf32>
    %12 = vector.extract_strided_slice %10 {offsets = [32, 0], sizes = [32, 64], strides = [1, 1]} : vector<288x64xf32> to vector<32x64xf32>
    %13 = arith.maximumf %11, %12 : vector<32x64xf32>
    %14 = vector.extract_strided_slice %10 {offsets = [64, 0], sizes = [32, 64], strides = [1, 1]} : vector<288x64xf32> to vector<32x64xf32>
    %15 = arith.maximumf %13, %14 : vector<32x64xf32>
    %16 = vector.extract_strided_slice %10 {offsets = [96, 0], sizes = [32, 64], strides = [1, 1]} : vector<288x64xf32> to vector<32x64xf32>
    %17 = arith.maximumf %15, %16 : vector<32x64xf32>
    %18 = vector.extract_strided_slice %10 {offsets = [128, 0], sizes = [32, 64], strides = [1, 1]} : vector<288x64xf32> to vector<32x64xf32>
    %19 = arith.maximumf %17, %18 : vector<32x64xf32>
    %20 = vector.extract_strided_slice %10 {offsets = [160, 0], sizes = [32, 64], strides = [1, 1]} : vector<288x64xf32> to vector<32x64xf32>
    %21 = arith.maximumf %19, %20 : vector<32x64xf32>
    %22 = vector.extract_strided_slice %10 {offsets = [192, 0], sizes = [32, 64], strides = [1, 1]} : vector<288x64xf32> to vector<32x64xf32>
    %23 = arith.maximumf %21, %22 : vector<32x64xf32>
    %24 = vector.extract_strided_slice %10 {offsets = [224, 0], sizes = [32, 64], strides = [1, 1]} : vector<288x64xf32> to vector<32x64xf32>
    %25 = arith.maximumf %23, %24 : vector<32x64xf32>
    %26 = vector.extract_strided_slice %10 {offsets = [256, 0], sizes = [32, 64], strides = [1, 1]} : vector<288x64xf32> to vector<32x64xf32>
    %27 = arith.maximumf %25, %26 : vector<32x64xf32>
    %28 = arith.truncf %27 : vector<32x64xf32> to vector<32x64xbf16>
    %c288 = arith.constant 288 : index
    %c0_9 = arith.constant 0 : index
    %29 = vector.load %arg7[%c288, %c0_9] : memref<1808x128xbf16, #tpu.memory_space<vmem>>, vector<288x32xbf16>
    %cst_10 = arith.constant dense<0.000000e+00> : vector<288x64xf32>
    %30 = tpu.matmul %29, %28, %cst_10 {dimension_numbers = #tpu.dot_dimension_numbers<[1], [0], [0], [1], [0, 0, 1, 1], [], []>} : vector<288x32xbf16>, vector<32x64xbf16>, vector<288x64xf32> -> vector<288x64xf32>
    %31 = vector.extract_strided_slice %30 {offsets = [0, 0], sizes = [32, 64], strides = [1, 1]} : vector<288x64xf32> to vector<32x64xf32>
    %32 = arith.truncf %31 : vector<32x64xf32> to vector<32x64xbf16>
    %c160 = arith.constant 160 : index
    %c0_11 = arith.constant 0 : index
    %33 = vector.load %arg1[%c160, %c0_11] : memref<2464x64xbf16, #tpu.memory_space<vmem>>, vector<64x64xbf16>
    %cst_12 = arith.constant dense<0.000000e+00> : vector<32x64xf32>
    %34 = tpu.matmul %32, %33, %cst_12 {dimension_numbers = #tpu.dot_dimension_numbers<[1], [0], [0], [1], [0, 0, 1, 1], [], []>} : vector<32x64xbf16>, vector<64x64xbf16>, vector<32x64xf32> -> vector<32x64xf32>
    %35 = vector.extract_strided_slice %30 {offsets = [32, 0], sizes = [32, 64], strides = [1, 1]} : vector<288x64xf32> to vector<32x64xf32>
    %36 = arith.truncf %35 : vector<32x64xf32> to vector<32x64xbf16>
    %c224 = arith.constant 224 : index
    %c0_13 = arith.constant 0 : index
    %37 = vector.load %arg1[%c224, %c0_13] : memref<2464x64xbf16, #tpu.memory_space<vmem>>, vector<64x64xbf16>
    %cst_14 = arith.constant dense<0.000000e+00> : vector<32x64xf32>
    %38 = tpu.matmul %36, %37, %cst_14 {dimension_numbers = #tpu.dot_dimension_numbers<[1], [0], [0], [1], [0, 0, 1, 1], [], []>} : vector<32x64xbf16>, vector<64x64xbf16>, vector<32x64xf32> -> vector<32x64xf32>
    %39 = arith.addf %34, %38 : vector<32x64xf32>
    %40 = vector.extract_strided_slice %30 {offsets = [64, 0], sizes = [32, 64], strides = [1, 1]} : vector<288x64xf32> to vector<32x64xf32>
    %41 = arith.truncf %40 : vector<32x64xf32> to vector<32x64xbf16>
    %c288_15 = arith.constant 288 : index
    %c0_16 = arith.constant 0 : index
    %42 = vector.load %arg1[%c288_15, %c0_16] : memref<2464x64xbf16, #tpu.memory_space<vmem>>, vector<64x64xbf16>
    %cst_17 = arith.constant dense<0.000000e+00> : vector<32x64xf32>
    %43 = tpu.matmul %41, %42, %cst_17 {dimension_numbers = #tpu.dot_dimension_numbers<[1], [0], [0], [1], [0, 0, 1, 1], [], []>} : vector<32x64xbf16>, vector<64x64xbf16>, vector<32x64xf32> -> vector<32x64xf32>
    %44 = arith.addf %39, %43 : vector<32x64xf32>
    %45 = vector.extract_strided_slice %30 {offsets = [96, 0], sizes = [32, 64], strides = [1, 1]} : vector<288x64xf32> to vector<32x64xf32>
    %46 = arith.truncf %45 : vector<32x64xf32> to vector<32x64xbf16>
    %c352 = arith.constant 352 : index
    %c0_18 = arith.constant 0 : index
    %47 = vector.load %arg1[%c352, %c0_18] : memref<2464x64xbf16, #tpu.memory_space<vmem>>, vector<64x64xbf16>
    %cst_19 = arith.constant dense<0.000000e+00> : vector<32x64xf32>
    %48 = tpu.matmul %46, %47, %cst_19 {dimension_numbers = #tpu.dot_dimension_numbers<[1], [0], [0], [1], [0, 0, 1, 1], [], []>} : vector<32x64xbf16>, vector<64x64xbf16>, vector<32x64xf32> -> vector<32x64xf32>
    %49 = arith.addf %44, %48 : vector<32x64xf32>
    %50 = vector.extract_strided_slice %30 {offsets = [128, 0], sizes = [32, 64], strides = [1, 1]} : vector<288x64xf32> to vector<32x64xf32>
    %51 = arith.truncf %50 : vector<32x64xf32> to vector<32x64xbf16>
    %c416 = arith.constant 416 : index
    %c0_20 = arith.constant 0 : index
    %52 = vector.load %arg1[%c416, %c0_20] : memref<2464x64xbf16, #tpu.memory_space<vmem>>, vector<64x64xbf16>
    %cst_21 = arith.constant dense<0.000000e+00> : vector<32x64xf32>
    %53 = tpu.matmul %51, %52, %cst_21 {dimension_numbers = #tpu.dot_dimension_numbers<[1], [0], [0], [1], [0, 0, 1, 1], [], []>} : vector<32x64xbf16>, vector<64x64xbf16>, vector<32x64xf32> -> vector<32x64xf32>
    %54 = arith.addf %49, %53 : vector<32x64xf32>
    %55 = vector.extract_strided_slice %30 {offsets = [160, 0], sizes = [32, 64], strides = [1, 1]} : vector<288x64xf32> to vector<32x64xf32>
    %56 = arith.truncf %55 : vector<32x64xf32> to vector<32x64xbf16>
    %c480 = arith.constant 480 : index
    %c0_22 = arith.constant 0 : index
    %57 = vector.load %arg1[%c480, %c0_22] : memref<2464x64xbf16, #tpu.memory_space<vmem>>, vector<64x64xbf16>
    %cst_23 = arith.constant dense<0.000000e+00> : vector<32x64xf32>
    %58 = tpu.matmul %56, %57, %cst_23 {dimension_numbers = #tpu.dot_dimension_numbers<[1], [0], [0], [1], [0, 0, 1, 1], [], []>} : vector<32x64xbf16>, vector<64x64xbf16>, vector<32x64xf32> -> vector<32x64xf32>
    %59 = arith.addf %54, %58 : vector<32x64xf32>
    %60 = vector.extract_strided_slice %30 {offsets = [192, 0], sizes = [32, 64], strides = [1, 1]} : vector<288x64xf32> to vector<32x64xf32>
    %61 = arith.truncf %60 : vector<32x64xf32> to vector<32x64xbf16>
    %c544 = arith.constant 544 : index
    %c0_24 = arith.constant 0 : index
    %62 = vector.load %arg1[%c544, %c0_24] : memref<2464x64xbf16, #tpu.memory_space<vmem>>, vector<64x64xbf16>
    %cst_25 = arith.constant dense<0.000000e+00> : vector<32x64xf32>
    %63 = tpu.matmul %61, %62, %cst_25 {dimension_numbers = #tpu.dot_dimension_numbers<[1], [0], [0], [1], [0, 0, 1, 1], [], []>} : vector<32x64xbf16>, vector<64x64xbf16>, vector<32x64xf32> -> vector<32x64xf32>
    %64 = arith.addf %59, %63 : vector<32x64xf32>
    %65 = vector.extract_strided_slice %30 {offsets = [224, 0], sizes = [32, 64], strides = [1, 1]} : vector<288x64xf32> to vector<32x64xf32>
    %66 = arith.truncf %65 : vector<32x64xf32> to vector<32x64xbf16>
    %c608 = arith.constant 608 : index
    %c0_26 = arith.constant 0 : index
    %67 = vector.load %arg1[%c608, %c0_26] : memref<2464x64xbf16, #tpu.memory_space<vmem>>, vector<64x64xbf16>
    %cst_27 = arith.constant dense<0.000000e+00> : vector<32x64xf32>
    %68 = tpu.matmul %66, %67, %cst_27 {dimension_numbers = #tpu.dot_dimension_numbers<[1], [0], [0], [1], [0, 0, 1, 1], [], []>} : vector<32x64xbf16>, vector<64x64xbf16>, vector<32x64xf32> -> vector<32x64xf32>
    %69 = arith.addf %64, %68 : vector<32x64xf32>
    %70 = vector.extract_strided_slice %30 {offsets = [256, 0], sizes = [32, 64], strides = [1, 1]} : vector<288x64xf32> to vector<32x64xf32>
    %71 = arith.truncf %70 : vector<32x64xf32> to vector<32x64xbf16>
    %c672 = arith.constant 672 : index
    %c0_28 = arith.constant 0 : index
    %72 = vector.load %arg1[%c672, %c0_28] : memref<2464x64xbf16, #tpu.memory_space<vmem>>, vector<64x64xbf16>
    %cst_29 = arith.constant dense<0.000000e+00> : vector<32x64xf32>
    %73 = tpu.matmul %71, %72, %cst_29 {dimension_numbers = #tpu.dot_dimension_numbers<[1], [0], [0], [1], [0, 0, 1, 1], [], []>} : vector<32x64xbf16>, vector<64x64xbf16>, vector<32x64xf32> -> vector<32x64xf32>
    %74 = arith.addf %69, %73 : vector<32x64xf32>
    %c1 = arith.constant 1 : index
    %c0_30 = arith.constant 0 : index
    %75 = vector.load %arg4[%c1, %c0_30] : memref<5x64xf32, #tpu.memory_space<vmem>>, vector<1x64xf32>
    %76 = vector.broadcast %75 : vector<1x64xf32> to vector<32x64xf32>
    %77 = arith.addf %74, %76 : vector<32x64xf32>
    %cst_31 = arith.constant 0.000000e+00 : f32
    %78 = vector.broadcast %cst_31 : f32 to vector<32x64xf32>
    %79 = arith.maximumf %77, %78 : vector<32x64xf32>
    %80 = arith.truncf %79 : vector<32x64xf32> to vector<32x64xbf16>
    %c576 = arith.constant 576 : index
    %c0_32 = arith.constant 0 : index
    %81 = vector.load %arg7[%c576, %c0_32] : memref<1808x128xbf16, #tpu.memory_space<vmem>>, vector<288x32xbf16>
    %cst_33 = arith.constant dense<0.000000e+00> : vector<288x64xf32>
    %82 = tpu.matmul %81, %80, %cst_33 {dimension_numbers = #tpu.dot_dimension_numbers<[1], [0], [0], [1], [0, 0, 1, 1], [], []>} : vector<288x32xbf16>, vector<32x64xbf16>, vector<288x64xf32> -> vector<288x64xf32>
    %83 = vector.extract_strided_slice %82 {offsets = [0, 0], sizes = [32, 64], strides = [1, 1]} : vector<288x64xf32> to vector<32x64xf32>
    %84 = arith.truncf %83 : vector<32x64xf32> to vector<32x64xbf16>
    %c736 = arith.constant 736 : index
    %c0_34 = arith.constant 0 : index
    %85 = vector.load %arg1[%c736, %c0_34] : memref<2464x64xbf16, #tpu.memory_space<vmem>>, vector<64x64xbf16>
    %cst_35 = arith.constant dense<0.000000e+00> : vector<32x64xf32>
    %86 = tpu.matmul %84, %85, %cst_35 {dimension_numbers = #tpu.dot_dimension_numbers<[1], [0], [0], [1], [0, 0, 1, 1], [], []>} : vector<32x64xbf16>, vector<64x64xbf16>, vector<32x64xf32> -> vector<32x64xf32>
    %87 = vector.extract_strided_slice %82 {offsets = [32, 0], sizes = [32, 64], strides = [1, 1]} : vector<288x64xf32> to vector<32x64xf32>
    %88 = arith.truncf %87 : vector<32x64xf32> to vector<32x64xbf16>
    %c800 = arith.constant 800 : index
    %c0_36 = arith.constant 0 : index
    %89 = vector.load %arg1[%c800, %c0_36] : memref<2464x64xbf16, #tpu.memory_space<vmem>>, vector<64x64xbf16>
    %cst_37 = arith.constant dense<0.000000e+00> : vector<32x64xf32>
    %90 = tpu.matmul %88, %89, %cst_37 {dimension_numbers = #tpu.dot_dimension_numbers<[1], [0], [0], [1], [0, 0, 1, 1], [], []>} : vector<32x64xbf16>, vector<64x64xbf16>, vector<32x64xf32> -> vector<32x64xf32>
    %91 = arith.addf %86, %90 : vector<32x64xf32>
    %92 = vector.extract_strided_slice %82 {offsets = [64, 0], sizes = [32, 64], strides = [1, 1]} : vector<288x64xf32> to vector<32x64xf32>
    %93 = arith.truncf %92 : vector<32x64xf32> to vector<32x64xbf16>
    %c864 = arith.constant 864 : index
    %c0_38 = arith.constant 0 : index
    %94 = vector.load %arg1[%c864, %c0_38] : memref<2464x64xbf16, #tpu.memory_space<vmem>>, vector<64x64xbf16>
    %cst_39 = arith.constant dense<0.000000e+00> : vector<32x64xf32>
    %95 = tpu.matmul %93, %94, %cst_39 {dimension_numbers = #tpu.dot_dimension_numbers<[1], [0], [0], [1], [0, 0, 1, 1], [], []>} : vector<32x64xbf16>, vector<64x64xbf16>, vector<32x64xf32> -> vector<32x64xf32>
    %96 = arith.addf %91, %95 : vector<32x64xf32>
    %97 = vector.extract_strided_slice %82 {offsets = [96, 0], sizes = [32, 64], strides = [1, 1]} : vector<288x64xf32> to vector<32x64xf32>
    %98 = arith.truncf %97 : vector<32x64xf32> to vector<32x64xbf16>
    %c928 = arith.constant 928 : index
    %c0_40 = arith.constant 0 : index
    %99 = vector.load %arg1[%c928, %c0_40] : memref<2464x64xbf16, #tpu.memory_space<vmem>>, vector<64x64xbf16>
    %cst_41 = arith.constant dense<0.000000e+00> : vector<32x64xf32>
    %100 = tpu.matmul %98, %99, %cst_41 {dimension_numbers = #tpu.dot_dimension_numbers<[1], [0], [0], [1], [0, 0, 1, 1], [], []>} : vector<32x64xbf16>, vector<64x64xbf16>, vector<32x64xf32> -> vector<32x64xf32>
    %101 = arith.addf %96, %100 : vector<32x64xf32>
    %102 = vector.extract_strided_slice %82 {offsets = [128, 0], sizes = [32, 64], strides = [1, 1]} : vector<288x64xf32> to vector<32x64xf32>
    %103 = arith.truncf %102 : vector<32x64xf32> to vector<32x64xbf16>
    %c992 = arith.constant 992 : index
    %c0_42 = arith.constant 0 : index
    %104 = vector.load %arg1[%c992, %c0_42] : memref<2464x64xbf16, #tpu.memory_space<vmem>>, vector<64x64xbf16>
    %cst_43 = arith.constant dense<0.000000e+00> : vector<32x64xf32>
    %105 = tpu.matmul %103, %104, %cst_43 {dimension_numbers = #tpu.dot_dimension_numbers<[1], [0], [0], [1], [0, 0, 1, 1], [], []>} : vector<32x64xbf16>, vector<64x64xbf16>, vector<32x64xf32> -> vector<32x64xf32>
    %106 = arith.addf %101, %105 : vector<32x64xf32>
    %107 = vector.extract_strided_slice %82 {offsets = [160, 0], sizes = [32, 64], strides = [1, 1]} : vector<288x64xf32> to vector<32x64xf32>
    %108 = arith.truncf %107 : vector<32x64xf32> to vector<32x64xbf16>
    %c1056 = arith.constant 1056 : index
    %c0_44 = arith.constant 0 : index
    %109 = vector.load %arg1[%c1056, %c0_44] : memref<2464x64xbf16, #tpu.memory_space<vmem>>, vector<64x64xbf16>
    %cst_45 = arith.constant dense<0.000000e+00> : vector<32x64xf32>
    %110 = tpu.matmul %108, %109, %cst_45 {dimension_numbers = #tpu.dot_dimension_numbers<[1], [0], [0], [1], [0, 0, 1, 1], [], []>} : vector<32x64xbf16>, vector<64x64xbf16>, vector<32x64xf32> -> vector<32x64xf32>
    %111 = arith.addf %106, %110 : vector<32x64xf32>
    %112 = vector.extract_strided_slice %82 {offsets = [192, 0], sizes = [32, 64], strides = [1, 1]} : vector<288x64xf32> to vector<32x64xf32>
    %113 = arith.truncf %112 : vector<32x64xf32> to vector<32x64xbf16>
    %c1120 = arith.constant 1120 : index
    %c0_46 = arith.constant 0 : index
    %114 = vector.load %arg1[%c1120, %c0_46] : memref<2464x64xbf16, #tpu.memory_space<vmem>>, vector<64x64xbf16>
    %cst_47 = arith.constant dense<0.000000e+00> : vector<32x64xf32>
    %115 = tpu.matmul %113, %114, %cst_47 {dimension_numbers = #tpu.dot_dimension_numbers<[1], [0], [0], [1], [0, 0, 1, 1], [], []>} : vector<32x64xbf16>, vector<64x64xbf16>, vector<32x64xf32> -> vector<32x64xf32>
    %116 = arith.addf %111, %115 : vector<32x64xf32>
    %117 = vector.extract_strided_slice %82 {offsets = [224, 0], sizes = [32, 64], strides = [1, 1]} : vector<288x64xf32> to vector<32x64xf32>
    %118 = arith.truncf %117 : vector<32x64xf32> to vector<32x64xbf16>
    %c1184 = arith.constant 1184 : index
    %c0_48 = arith.constant 0 : index
    %119 = vector.load %arg1[%c1184, %c0_48] : memref<2464x64xbf16, #tpu.memory_space<vmem>>, vector<64x64xbf16>
    %cst_49 = arith.constant dense<0.000000e+00> : vector<32x64xf32>
    %120 = tpu.matmul %118, %119, %cst_49 {dimension_numbers = #tpu.dot_dimension_numbers<[1], [0], [0], [1], [0, 0, 1, 1], [], []>} : vector<32x64xbf16>, vector<64x64xbf16>, vector<32x64xf32> -> vector<32x64xf32>
    %121 = arith.addf %116, %120 : vector<32x64xf32>
    %122 = vector.extract_strided_slice %82 {offsets = [256, 0], sizes = [32, 64], strides = [1, 1]} : vector<288x64xf32> to vector<32x64xf32>
    %123 = arith.truncf %122 : vector<32x64xf32> to vector<32x64xbf16>
    %c1248 = arith.constant 1248 : index
    %c0_50 = arith.constant 0 : index
    %124 = vector.load %arg1[%c1248, %c0_50] : memref<2464x64xbf16, #tpu.memory_space<vmem>>, vector<64x64xbf16>
    %cst_51 = arith.constant dense<0.000000e+00> : vector<32x64xf32>
    %125 = tpu.matmul %123, %124, %cst_51 {dimension_numbers = #tpu.dot_dimension_numbers<[1], [0], [0], [1], [0, 0, 1, 1], [], []>} : vector<32x64xbf16>, vector<64x64xbf16>, vector<32x64xf32> -> vector<32x64xf32>
    %126 = arith.addf %121, %125 : vector<32x64xf32>
    %c2 = arith.constant 2 : index
    %c0_52 = arith.constant 0 : index
    %127 = vector.load %arg4[%c2, %c0_52] : memref<5x64xf32, #tpu.memory_space<vmem>>, vector<1x64xf32>
    %128 = vector.broadcast %127 : vector<1x64xf32> to vector<32x64xf32>
    %129 = arith.addf %126, %128 : vector<32x64xf32>
    %130 = arith.addf %129, %27 : vector<32x64xf32>
    %cst_53 = arith.constant 0.000000e+00 : f32
    %131 = vector.broadcast %cst_53 : f32 to vector<32x64xf32>
    %132 = arith.maximumf %130, %131 : vector<32x64xf32>
    %133 = arith.truncf %132 : vector<32x64xf32> to vector<32x64xbf16>
    %c864_54 = arith.constant 864 : index
    %c0_55 = arith.constant 0 : index
    %134 = vector.load %arg7[%c864_54, %c0_55] : memref<1808x128xbf16, #tpu.memory_space<vmem>>, vector<288x32xbf16>
    %cst_56 = arith.constant dense<0.000000e+00> : vector<288x64xf32>
    %135 = tpu.matmul %134, %133, %cst_56 {dimension_numbers = #tpu.dot_dimension_numbers<[1], [0], [0], [1], [0, 0, 1, 1], [], []>} : vector<288x32xbf16>, vector<32x64xbf16>, vector<288x64xf32> -> vector<288x64xf32>
    %136 = vector.extract_strided_slice %135 {offsets = [0, 0], sizes = [32, 64], strides = [1, 1]} : vector<288x64xf32> to vector<32x64xf32>
    %137 = arith.truncf %136 : vector<32x64xf32> to vector<32x64xbf16>
    %c1312 = arith.constant 1312 : index
    %c0_57 = arith.constant 0 : index
    %138 = vector.load %arg1[%c1312, %c0_57] : memref<2464x64xbf16, #tpu.memory_space<vmem>>, vector<64x64xbf16>
    %cst_58 = arith.constant dense<0.000000e+00> : vector<32x64xf32>
    %139 = tpu.matmul %137, %138, %cst_58 {dimension_numbers = #tpu.dot_dimension_numbers<[1], [0], [0], [1], [0, 0, 1, 1], [], []>} : vector<32x64xbf16>, vector<64x64xbf16>, vector<32x64xf32> -> vector<32x64xf32>
    %140 = vector.extract_strided_slice %135 {offsets = [32, 0], sizes = [32, 64], strides = [1, 1]} : vector<288x64xf32> to vector<32x64xf32>
    %141 = arith.truncf %140 : vector<32x64xf32> to vector<32x64xbf16>
    %c1376 = arith.constant 1376 : index
    %c0_59 = arith.constant 0 : index
    %142 = vector.load %arg1[%c1376, %c0_59] : memref<2464x64xbf16, #tpu.memory_space<vmem>>, vector<64x64xbf16>
    %cst_60 = arith.constant dense<0.000000e+00> : vector<32x64xf32>
    %143 = tpu.matmul %141, %142, %cst_60 {dimension_numbers = #tpu.dot_dimension_numbers<[1], [0], [0], [1], [0, 0, 1, 1], [], []>} : vector<32x64xbf16>, vector<64x64xbf16>, vector<32x64xf32> -> vector<32x64xf32>
    %144 = arith.addf %139, %143 : vector<32x64xf32>
    %145 = vector.extract_strided_slice %135 {offsets = [64, 0], sizes = [32, 64], strides = [1, 1]} : vector<288x64xf32> to vector<32x64xf32>
    %146 = arith.truncf %145 : vector<32x64xf32> to vector<32x64xbf16>
    %c1440 = arith.constant 1440 : index
    %c0_61 = arith.constant 0 : index
    %147 = vector.load %arg1[%c1440, %c0_61] : memref<2464x64xbf16, #tpu.memory_space<vmem>>, vector<64x64xbf16>
    %cst_62 = arith.constant dense<0.000000e+00> : vector<32x64xf32>
    %148 = tpu.matmul %146, %147, %cst_62 {dimension_numbers = #tpu.dot_dimension_numbers<[1], [0], [0], [1], [0, 0, 1, 1], [], []>} : vector<32x64xbf16>, vector<64x64xbf16>, vector<32x64xf32> -> vector<32x64xf32>
    %149 = arith.addf %144, %148 : vector<32x64xf32>
    %150 = vector.extract_strided_slice %135 {offsets = [96, 0], sizes = [32, 64], strides = [1, 1]} : vector<288x64xf32> to vector<32x64xf32>
    %151 = arith.truncf %150 : vector<32x64xf32> to vector<32x64xbf16>
    %c1504 = arith.constant 1504 : index
    %c0_63 = arith.constant 0 : index
    %152 = vector.load %arg1[%c1504, %c0_63] : memref<2464x64xbf16, #tpu.memory_space<vmem>>, vector<64x64xbf16>
    %cst_64 = arith.constant dense<0.000000e+00> : vector<32x64xf32>
    %153 = tpu.matmul %151, %152, %cst_64 {dimension_numbers = #tpu.dot_dimension_numbers<[1], [0], [0], [1], [0, 0, 1, 1], [], []>} : vector<32x64xbf16>, vector<64x64xbf16>, vector<32x64xf32> -> vector<32x64xf32>
    %154 = arith.addf %149, %153 : vector<32x64xf32>
    %155 = vector.extract_strided_slice %135 {offsets = [128, 0], sizes = [32, 64], strides = [1, 1]} : vector<288x64xf32> to vector<32x64xf32>
    %156 = arith.truncf %155 : vector<32x64xf32> to vector<32x64xbf16>
    %c1568 = arith.constant 1568 : index
    %c0_65 = arith.constant 0 : index
    %157 = vector.load %arg1[%c1568, %c0_65] : memref<2464x64xbf16, #tpu.memory_space<vmem>>, vector<64x64xbf16>
    %cst_66 = arith.constant dense<0.000000e+00> : vector<32x64xf32>
    %158 = tpu.matmul %156, %157, %cst_66 {dimension_numbers = #tpu.dot_dimension_numbers<[1], [0], [0], [1], [0, 0, 1, 1], [], []>} : vector<32x64xbf16>, vector<64x64xbf16>, vector<32x64xf32> -> vector<32x64xf32>
    %159 = arith.addf %154, %158 : vector<32x64xf32>
    %160 = vector.extract_strided_slice %135 {offsets = [160, 0], sizes = [32, 64], strides = [1, 1]} : vector<288x64xf32> to vector<32x64xf32>
    %161 = arith.truncf %160 : vector<32x64xf32> to vector<32x64xbf16>
    %c1632 = arith.constant 1632 : index
    %c0_67 = arith.constant 0 : index
    %162 = vector.load %arg1[%c1632, %c0_67] : memref<2464x64xbf16, #tpu.memory_space<vmem>>, vector<64x64xbf16>
    %cst_68 = arith.constant dense<0.000000e+00> : vector<32x64xf32>
    %163 = tpu.matmul %161, %162, %cst_68 {dimension_numbers = #tpu.dot_dimension_numbers<[1], [0], [0], [1], [0, 0, 1, 1], [], []>} : vector<32x64xbf16>, vector<64x64xbf16>, vector<32x64xf32> -> vector<32x64xf32>
    %164 = arith.addf %159, %163 : vector<32x64xf32>
    %165 = vector.extract_strided_slice %135 {offsets = [192, 0], sizes = [32, 64], strides = [1, 1]} : vector<288x64xf32> to vector<32x64xf32>
    %166 = arith.truncf %165 : vector<32x64xf32> to vector<32x64xbf16>
    %c1696 = arith.constant 1696 : index
    %c0_69 = arith.constant 0 : index
    %167 = vector.load %arg1[%c1696, %c0_69] : memref<2464x64xbf16, #tpu.memory_space<vmem>>, vector<64x64xbf16>
    %cst_70 = arith.constant dense<0.000000e+00> : vector<32x64xf32>
    %168 = tpu.matmul %166, %167, %cst_70 {dimension_numbers = #tpu.dot_dimension_numbers<[1], [0], [0], [1], [0, 0, 1, 1], [], []>} : vector<32x64xbf16>, vector<64x64xbf16>, vector<32x64xf32> -> vector<32x64xf32>
    %169 = arith.addf %164, %168 : vector<32x64xf32>
    %170 = vector.extract_strided_slice %135 {offsets = [224, 0], sizes = [32, 64], strides = [1, 1]} : vector<288x64xf32> to vector<32x64xf32>
    %171 = arith.truncf %170 : vector<32x64xf32> to vector<32x64xbf16>
    %c1760 = arith.constant 1760 : index
    %c0_71 = arith.constant 0 : index
    %172 = vector.load %arg1[%c1760, %c0_71] : memref<2464x64xbf16, #tpu.memory_space<vmem>>, vector<64x64xbf16>
    %cst_72 = arith.constant dense<0.000000e+00> : vector<32x64xf32>
    %173 = tpu.matmul %171, %172, %cst_72 {dimension_numbers = #tpu.dot_dimension_numbers<[1], [0], [0], [1], [0, 0, 1, 1], [], []>} : vector<32x64xbf16>, vector<64x64xbf16>, vector<32x64xf32> -> vector<32x64xf32>
    %174 = arith.addf %169, %173 : vector<32x64xf32>
    %175 = vector.extract_strided_slice %135 {offsets = [256, 0], sizes = [32, 64], strides = [1, 1]} : vector<288x64xf32> to vector<32x64xf32>
    %176 = arith.truncf %175 : vector<32x64xf32> to vector<32x64xbf16>
    %c1824 = arith.constant 1824 : index
    %c0_73 = arith.constant 0 : index
    %177 = vector.load %arg1[%c1824, %c0_73] : memref<2464x64xbf16, #tpu.memory_space<vmem>>, vector<64x64xbf16>
    %cst_74 = arith.constant dense<0.000000e+00> : vector<32x64xf32>
    %178 = tpu.matmul %176, %177, %cst_74 {dimension_numbers = #tpu.dot_dimension_numbers<[1], [0], [0], [1], [0, 0, 1, 1], [], []>} : vector<32x64xbf16>, vector<64x64xbf16>, vector<32x64xf32> -> vector<32x64xf32>
    %179 = arith.addf %174, %178 : vector<32x64xf32>
    %c3 = arith.constant 3 : index
    %c0_75 = arith.constant 0 : index
    %180 = vector.load %arg4[%c3, %c0_75] : memref<5x64xf32, #tpu.memory_space<vmem>>, vector<1x64xf32>
    %181 = vector.broadcast %180 : vector<1x64xf32> to vector<32x64xf32>
    %182 = arith.addf %179, %181 : vector<32x64xf32>
    %cst_76 = arith.constant 0.000000e+00 : f32
    %183 = vector.broadcast %cst_76 : f32 to vector<32x64xf32>
    %184 = arith.maximumf %182, %183 : vector<32x64xf32>
    %185 = arith.truncf %184 : vector<32x64xf32> to vector<32x64xbf16>
    %c1152 = arith.constant 1152 : index
    %c0_77 = arith.constant 0 : index
    %186 = vector.load %arg7[%c1152, %c0_77] : memref<1808x128xbf16, #tpu.memory_space<vmem>>, vector<288x32xbf16>
    %cst_78 = arith.constant dense<0.000000e+00> : vector<288x64xf32>
    %187 = tpu.matmul %186, %185, %cst_78 {dimension_numbers = #tpu.dot_dimension_numbers<[1], [0], [0], [1], [0, 0, 1, 1], [], []>} : vector<288x32xbf16>, vector<32x64xbf16>, vector<288x64xf32> -> vector<288x64xf32>
    %188 = vector.extract_strided_slice %187 {offsets = [0, 0], sizes = [32, 64], strides = [1, 1]} : vector<288x64xf32> to vector<32x64xf32>
    %189 = arith.truncf %188 : vector<32x64xf32> to vector<32x64xbf16>
    %c1888 = arith.constant 1888 : index
    %c0_79 = arith.constant 0 : index
    %190 = vector.load %arg1[%c1888, %c0_79] : memref<2464x64xbf16, #tpu.memory_space<vmem>>, vector<64x64xbf16>
    %cst_80 = arith.constant dense<0.000000e+00> : vector<32x64xf32>
    %191 = tpu.matmul %189, %190, %cst_80 {dimension_numbers = #tpu.dot_dimension_numbers<[1], [0], [0], [1], [0, 0, 1, 1], [], []>} : vector<32x64xbf16>, vector<64x64xbf16>, vector<32x64xf32> -> vector<32x64xf32>
    %192 = vector.extract_strided_slice %187 {offsets = [32, 0], sizes = [32, 64], strides = [1, 1]} : vector<288x64xf32> to vector<32x64xf32>
    %193 = arith.truncf %192 : vector<32x64xf32> to vector<32x64xbf16>
    %c1952 = arith.constant 1952 : index
    %c0_81 = arith.constant 0 : index
    %194 = vector.load %arg1[%c1952, %c0_81] : memref<2464x64xbf16, #tpu.memory_space<vmem>>, vector<64x64xbf16>
    %cst_82 = arith.constant dense<0.000000e+00> : vector<32x64xf32>
    %195 = tpu.matmul %193, %194, %cst_82 {dimension_numbers = #tpu.dot_dimension_numbers<[1], [0], [0], [1], [0, 0, 1, 1], [], []>} : vector<32x64xbf16>, vector<64x64xbf16>, vector<32x64xf32> -> vector<32x64xf32>
    %196 = arith.addf %191, %195 : vector<32x64xf32>
    %197 = vector.extract_strided_slice %187 {offsets = [64, 0], sizes = [32, 64], strides = [1, 1]} : vector<288x64xf32> to vector<32x64xf32>
    %198 = arith.truncf %197 : vector<32x64xf32> to vector<32x64xbf16>
    %c2016 = arith.constant 2016 : index
    %c0_83 = arith.constant 0 : index
    %199 = vector.load %arg1[%c2016, %c0_83] : memref<2464x64xbf16, #tpu.memory_space<vmem>>, vector<64x64xbf16>
    %cst_84 = arith.constant dense<0.000000e+00> : vector<32x64xf32>
    %200 = tpu.matmul %198, %199, %cst_84 {dimension_numbers = #tpu.dot_dimension_numbers<[1], [0], [0], [1], [0, 0, 1, 1], [], []>} : vector<32x64xbf16>, vector<64x64xbf16>, vector<32x64xf32> -> vector<32x64xf32>
    %201 = arith.addf %196, %200 : vector<32x64xf32>
    %202 = vector.extract_strided_slice %187 {offsets = [96, 0], sizes = [32, 64], strides = [1, 1]} : vector<288x64xf32> to vector<32x64xf32>
    %203 = arith.truncf %202 : vector<32x64xf32> to vector<32x64xbf16>
    %c2080 = arith.constant 2080 : index
    %c0_85 = arith.constant 0 : index
    %204 = vector.load %arg1[%c2080, %c0_85] : memref<2464x64xbf16, #tpu.memory_space<vmem>>, vector<64x64xbf16>
    %cst_86 = arith.constant dense<0.000000e+00> : vector<32x64xf32>
    %205 = tpu.matmul %203, %204, %cst_86 {dimension_numbers = #tpu.dot_dimension_numbers<[1], [0], [0], [1], [0, 0, 1, 1], [], []>} : vector<32x64xbf16>, vector<64x64xbf16>, vector<32x64xf32> -> vector<32x64xf32>
    %206 = arith.addf %201, %205 : vector<32x64xf32>
    %207 = vector.extract_strided_slice %187 {offsets = [128, 0], sizes = [32, 64], strides = [1, 1]} : vector<288x64xf32> to vector<32x64xf32>
    %208 = arith.truncf %207 : vector<32x64xf32> to vector<32x64xbf16>
    %c2144 = arith.constant 2144 : index
    %c0_87 = arith.constant 0 : index
    %209 = vector.load %arg1[%c2144, %c0_87] : memref<2464x64xbf16, #tpu.memory_space<vmem>>, vector<64x64xbf16>
    %cst_88 = arith.constant dense<0.000000e+00> : vector<32x64xf32>
    %210 = tpu.matmul %208, %209, %cst_88 {dimension_numbers = #tpu.dot_dimension_numbers<[1], [0], [0], [1], [0, 0, 1, 1], [], []>} : vector<32x64xbf16>, vector<64x64xbf16>, vector<32x64xf32> -> vector<32x64xf32>
    %211 = arith.addf %206, %210 : vector<32x64xf32>
    %212 = vector.extract_strided_slice %187 {offsets = [160, 0], sizes = [32, 64], strides = [1, 1]} : vector<288x64xf32> to vector<32x64xf32>
    %213 = arith.truncf %212 : vector<32x64xf32> to vector<32x64xbf16>
    %c2208 = arith.constant 2208 : index
    %c0_89 = arith.constant 0 : index
    %214 = vector.load %arg1[%c2208, %c0_89] : memref<2464x64xbf16, #tpu.memory_space<vmem>>, vector<64x64xbf16>
    %cst_90 = arith.constant dense<0.000000e+00> : vector<32x64xf32>
    %215 = tpu.matmul %213, %214, %cst_90 {dimension_numbers = #tpu.dot_dimension_numbers<[1], [0], [0], [1], [0, 0, 1, 1], [], []>} : vector<32x64xbf16>, vector<64x64xbf16>, vector<32x64xf32> -> vector<32x64xf32>
    %216 = arith.addf %211, %215 : vector<32x64xf32>
    %217 = vector.extract_strided_slice %187 {offsets = [192, 0], sizes = [32, 64], strides = [1, 1]} : vector<288x64xf32> to vector<32x64xf32>
    %218 = arith.truncf %217 : vector<32x64xf32> to vector<32x64xbf16>
    %c2272 = arith.constant 2272 : index
    %c0_91 = arith.constant 0 : index
    %219 = vector.load %arg1[%c2272, %c0_91] : memref<2464x64xbf16, #tpu.memory_space<vmem>>, vector<64x64xbf16>
    %cst_92 = arith.constant dense<0.000000e+00> : vector<32x64xf32>
    %220 = tpu.matmul %218, %219, %cst_92 {dimension_numbers = #tpu.dot_dimension_numbers<[1], [0], [0], [1], [0, 0, 1, 1], [], []>} : vector<32x64xbf16>, vector<64x64xbf16>, vector<32x64xf32> -> vector<32x64xf32>
    %221 = arith.addf %216, %220 : vector<32x64xf32>
    %222 = vector.extract_strided_slice %187 {offsets = [224, 0], sizes = [32, 64], strides = [1, 1]} : vector<288x64xf32> to vector<32x64xf32>
    %223 = arith.truncf %222 : vector<32x64xf32> to vector<32x64xbf16>
    %c2336 = arith.constant 2336 : index
    %c0_93 = arith.constant 0 : index
    %224 = vector.load %arg1[%c2336, %c0_93] : memref<2464x64xbf16, #tpu.memory_space<vmem>>, vector<64x64xbf16>
    %cst_94 = arith.constant dense<0.000000e+00> : vector<32x64xf32>
    %225 = tpu.matmul %223, %224, %cst_94 {dimension_numbers = #tpu.dot_dimension_numbers<[1], [0], [0], [1], [0, 0, 1, 1], [], []>} : vector<32x64xbf16>, vector<64x64xbf16>, vector<32x64xf32> -> vector<32x64xf32>
    %226 = arith.addf %221, %225 : vector<32x64xf32>
    %227 = vector.extract_strided_slice %187 {offsets = [256, 0], sizes = [32, 64], strides = [1, 1]} : vector<288x64xf32> to vector<32x64xf32>
    %228 = arith.truncf %227 : vector<32x64xf32> to vector<32x64xbf16>
    %c2400 = arith.constant 2400 : index
    %c0_95 = arith.constant 0 : index
    %229 = vector.load %arg1[%c2400, %c0_95] : memref<2464x64xbf16, #tpu.memory_space<vmem>>, vector<64x64xbf16>
    %cst_96 = arith.constant dense<0.000000e+00> : vector<32x64xf32>
    %230 = tpu.matmul %228, %229, %cst_96 {dimension_numbers = #tpu.dot_dimension_numbers<[1], [0], [0], [1], [0, 0, 1, 1], [], []>} : vector<32x64xbf16>, vector<64x64xbf16>, vector<32x64xf32> -> vector<32x64xf32>
    %231 = arith.addf %226, %230 : vector<32x64xf32>
    %c4 = arith.constant 4 : index
    %c0_97 = arith.constant 0 : index
    %232 = vector.load %arg4[%c4, %c0_97] : memref<5x64xf32, #tpu.memory_space<vmem>>, vector<1x64xf32>
    %233 = vector.broadcast %232 : vector<1x64xf32> to vector<32x64xf32>
    %234 = arith.addf %231, %233 : vector<32x64xf32>
    %235 = arith.addf %234, %132 : vector<32x64xf32>
    %cst_98 = arith.constant 0.000000e+00 : f32
    %236 = vector.broadcast %cst_98 : f32 to vector<32x64xf32>
    %237 = arith.maximumf %235, %236 : vector<32x64xf32>
    %238 = arith.truncf %237 : vector<32x64xf32> to vector<32x64xbf16>
    %c1440_99 = arith.constant 1440 : index
    %c0_100 = arith.constant 0 : index
    %239 = vector.load %arg7[%c1440_99, %c0_100] : memref<1808x128xbf16, #tpu.memory_space<vmem>>, vector<72x32xbf16>
    %cst_101 = arith.constant dense<0.000000e+00> : vector<72x64xf32>
    %240 = tpu.matmul %239, %238, %cst_101 {dimension_numbers = #tpu.dot_dimension_numbers<[1], [0], [0], [1], [0, 0, 1, 1], [], []>} : vector<72x32xbf16>, vector<32x64xbf16>, vector<72x64xf32> -> vector<72x64xf32>
    %241 = vector.extract_strided_slice %240 {offsets = [0, 0], sizes = [8, 64], strides = [1, 1]} : vector<72x64xf32> to vector<8x64xf32>
    %242 = arith.truncf %241 : vector<8x64xf32> to vector<8x64xbf16>
    %c0_102 = arith.constant 0 : index
    %c0_103 = arith.constant 0 : index
    %243 = vector.load %arg2[%c0_102, %c0_103] : memref<4096x128xbf16, #tpu.memory_space<vmem>>, vector<64x128xbf16>
    %cst_104 = arith.constant dense<0.000000e+00> : vector<8x128xf32>
    %244 = tpu.matmul %242, %243, %cst_104 {dimension_numbers = #tpu.dot_dimension_numbers<[1], [0], [0], [1], [0, 0, 1, 1], [], []>} : vector<8x64xbf16>, vector<64x128xbf16>, vector<8x128xf32> -> vector<8x128xf32>
    %245 = vector.extract_strided_slice %240 {offsets = [8, 0], sizes = [8, 64], strides = [1, 1]} : vector<72x64xf32> to vector<8x64xf32>
    %246 = arith.truncf %245 : vector<8x64xf32> to vector<8x64xbf16>
    %c64 = arith.constant 64 : index
    %c0_105 = arith.constant 0 : index
    %247 = vector.load %arg2[%c64, %c0_105] : memref<4096x128xbf16, #tpu.memory_space<vmem>>, vector<64x128xbf16>
    %cst_106 = arith.constant dense<0.000000e+00> : vector<8x128xf32>
    %248 = tpu.matmul %246, %247, %cst_106 {dimension_numbers = #tpu.dot_dimension_numbers<[1], [0], [0], [1], [0, 0, 1, 1], [], []>} : vector<8x64xbf16>, vector<64x128xbf16>, vector<8x128xf32> -> vector<8x128xf32>
    %249 = arith.addf %244, %248 : vector<8x128xf32>
    %250 = vector.extract_strided_slice %240 {offsets = [16, 0], sizes = [8, 64], strides = [1, 1]} : vector<72x64xf32> to vector<8x64xf32>
    %251 = arith.truncf %250 : vector<8x64xf32> to vector<8x64xbf16>
    %c128 = arith.constant 128 : index
    %c0_107 = arith.constant 0 : index
    %252 = vector.load %arg2[%c128, %c0_107] : memref<4096x128xbf16, #tpu.memory_space<vmem>>, vector<64x128xbf16>
    %cst_108 = arith.constant dense<0.000000e+00> : vector<8x128xf32>
    %253 = tpu.matmul %251, %252, %cst_108 {dimension_numbers = #tpu.dot_dimension_numbers<[1], [0], [0], [1], [0, 0, 1, 1], [], []>} : vector<8x64xbf16>, vector<64x128xbf16>, vector<8x128xf32> -> vector<8x128xf32>
    %254 = arith.addf %249, %253 : vector<8x128xf32>
    %255 = vector.extract_strided_slice %240 {offsets = [24, 0], sizes = [8, 64], strides = [1, 1]} : vector<72x64xf32> to vector<8x64xf32>
    %256 = arith.truncf %255 : vector<8x64xf32> to vector<8x64xbf16>
    %c192 = arith.constant 192 : index
    %c0_109 = arith.constant 0 : index
    %257 = vector.load %arg2[%c192, %c0_109] : memref<4096x128xbf16, #tpu.memory_space<vmem>>, vector<64x128xbf16>
    %cst_110 = arith.constant dense<0.000000e+00> : vector<8x128xf32>
    %258 = tpu.matmul %256, %257, %cst_110 {dimension_numbers = #tpu.dot_dimension_numbers<[1], [0], [0], [1], [0, 0, 1, 1], [], []>} : vector<8x64xbf16>, vector<64x128xbf16>, vector<8x128xf32> -> vector<8x128xf32>
    %259 = arith.addf %254, %258 : vector<8x128xf32>
    %260 = vector.extract_strided_slice %240 {offsets = [32, 0], sizes = [8, 64], strides = [1, 1]} : vector<72x64xf32> to vector<8x64xf32>
    %261 = arith.truncf %260 : vector<8x64xf32> to vector<8x64xbf16>
    %c256 = arith.constant 256 : index
    %c0_111 = arith.constant 0 : index
    %262 = vector.load %arg2[%c256, %c0_111] : memref<4096x128xbf16, #tpu.memory_space<vmem>>, vector<64x128xbf16>
    %cst_112 = arith.constant dense<0.000000e+00> : vector<8x128xf32>
    %263 = tpu.matmul %261, %262, %cst_112 {dimension_numbers = #tpu.dot_dimension_numbers<[1], [0], [0], [1], [0, 0, 1, 1], [], []>} : vector<8x64xbf16>, vector<64x128xbf16>, vector<8x128xf32> -> vector<8x128xf32>
    %264 = arith.addf %259, %263 : vector<8x128xf32>
    %265 = vector.extract_strided_slice %240 {offsets = [40, 0], sizes = [8, 64], strides = [1, 1]} : vector<72x64xf32> to vector<8x64xf32>
    %266 = arith.truncf %265 : vector<8x64xf32> to vector<8x64xbf16>
    %c320 = arith.constant 320 : index
    %c0_113 = arith.constant 0 : index
    %267 = vector.load %arg2[%c320, %c0_113] : memref<4096x128xbf16, #tpu.memory_space<vmem>>, vector<64x128xbf16>
    %cst_114 = arith.constant dense<0.000000e+00> : vector<8x128xf32>
    %268 = tpu.matmul %266, %267, %cst_114 {dimension_numbers = #tpu.dot_dimension_numbers<[1], [0], [0], [1], [0, 0, 1, 1], [], []>} : vector<8x64xbf16>, vector<64x128xbf16>, vector<8x128xf32> -> vector<8x128xf32>
    %269 = arith.addf %264, %268 : vector<8x128xf32>
    %270 = vector.extract_strided_slice %240 {offsets = [48, 0], sizes = [8, 64], strides = [1, 1]} : vector<72x64xf32> to vector<8x64xf32>
    %271 = arith.truncf %270 : vector<8x64xf32> to vector<8x64xbf16>
    %c384 = arith.constant 384 : index
    %c0_115 = arith.constant 0 : index
    %272 = vector.load %arg2[%c384, %c0_115] : memref<4096x128xbf16, #tpu.memory_space<vmem>>, vector<64x128xbf16>
    %cst_116 = arith.constant dense<0.000000e+00> : vector<8x128xf32>
    %273 = tpu.matmul %271, %272, %cst_116 {dimension_numbers = #tpu.dot_dimension_numbers<[1], [0], [0], [1], [0, 0, 1, 1], [], []>} : vector<8x64xbf16>, vector<64x128xbf16>, vector<8x128xf32> -> vector<8x128xf32>
    %274 = arith.addf %269, %273 : vector<8x128xf32>
    %275 = vector.extract_strided_slice %240 {offsets = [56, 0], sizes = [8, 64], strides = [1, 1]} : vector<72x64xf32> to vector<8x64xf32>
    %276 = arith.truncf %275 : vector<8x64xf32> to vector<8x64xbf16>
    %c448 = arith.constant 448 : index
    %c0_117 = arith.constant 0 : index
    %277 = vector.load %arg2[%c448, %c0_117] : memref<4096x128xbf16, #tpu.memory_space<vmem>>, vector<64x128xbf16>
    %cst_118 = arith.constant dense<0.000000e+00> : vector<8x128xf32>
    %278 = tpu.matmul %276, %277, %cst_118 {dimension_numbers = #tpu.dot_dimension_numbers<[1], [0], [0], [1], [0, 0, 1, 1], [], []>} : vector<8x64xbf16>, vector<64x128xbf16>, vector<8x128xf32> -> vector<8x128xf32>
    %279 = arith.addf %274, %278 : vector<8x128xf32>
    %280 = vector.extract_strided_slice %240 {offsets = [64, 0], sizes = [8, 64], strides = [1, 1]} : vector<72x64xf32> to vector<8x64xf32>
    %281 = arith.truncf %280 : vector<8x64xf32> to vector<8x64xbf16>
    %c512 = arith.constant 512 : index
    %c0_119 = arith.constant 0 : index
    %282 = vector.load %arg2[%c512, %c0_119] : memref<4096x128xbf16, #tpu.memory_space<vmem>>, vector<64x128xbf16>
    %cst_120 = arith.constant dense<0.000000e+00> : vector<8x128xf32>
    %283 = tpu.matmul %281, %282, %cst_120 {dimension_numbers = #tpu.dot_dimension_numbers<[1], [0], [0], [1], [0, 0, 1, 1], [], []>} : vector<8x64xbf16>, vector<64x128xbf16>, vector<8x128xf32> -> vector<8x128xf32>
    %284 = arith.addf %279, %283 : vector<8x128xf32>
    %c0_121 = arith.constant 0 : index
    %c0_122 = arith.constant 0 : index
    %285 = vector.load %arg5[%c0_121, %c0_122] : memref<5x128xf32, #tpu.memory_space<vmem>>, vector<1x128xf32>
    %286 = vector.broadcast %285 : vector<1x128xf32> to vector<8x128xf32>
    %287 = arith.addf %284, %286 : vector<8x128xf32>
    %cst_123 = arith.constant 0.000000e+00 : f32
    %288 = vector.broadcast %cst_123 : f32 to vector<8x128xf32>
    %289 = arith.maximumf %287, %288 : vector<8x128xf32>
    %290 = arith.truncf %237 : vector<32x64xf32> to vector<32x64xbf16>
    %c1600 = arith.constant 1600 : index
    %c0_124 = arith.constant 0 : index
    %291 = vector.load %arg7[%c1600, %c0_124] : memref<1808x128xbf16, #tpu.memory_space<vmem>>, vector<8x32xbf16>
    %cst_125 = arith.constant dense<0.000000e+00> : vector<8x64xf32>
    %292 = tpu.matmul %291, %290, %cst_125 {dimension_numbers = #tpu.dot_dimension_numbers<[1], [0], [0], [1], [0, 0, 1, 1], [], []>} : vector<8x32xbf16>, vector<32x64xbf16>, vector<8x64xf32> -> vector<8x64xf32>
    %293 = arith.truncf %292 : vector<8x64xf32> to vector<8x64xbf16>
    %c1728 = arith.constant 1728 : index
    %c0_126 = arith.constant 0 : index
    %294 = vector.load %arg2[%c1728, %c0_126] : memref<4096x128xbf16, #tpu.memory_space<vmem>>, vector<64x128xbf16>
    %cst_127 = arith.constant dense<0.000000e+00> : vector<8x128xf32>
    %295 = tpu.matmul %293, %294, %cst_127 {dimension_numbers = #tpu.dot_dimension_numbers<[1], [0], [0], [1], [0, 0, 1, 1], [], []>} : vector<8x64xbf16>, vector<64x128xbf16>, vector<8x128xf32> -> vector<8x128xf32>
    %c2_128 = arith.constant 2 : index
    %c0_129 = arith.constant 0 : index
    %296 = vector.load %arg5[%c2_128, %c0_129] : memref<5x128xf32, #tpu.memory_space<vmem>>, vector<1x128xf32>
    %297 = vector.broadcast %296 : vector<1x128xf32> to vector<8x128xf32>
    %298 = arith.addf %295, %297 : vector<8x128xf32>
    %299 = arith.truncf %289 : vector<8x128xf32> to vector<8x128xbf16>
    %c1520 = arith.constant 1520 : index
    %c0_130 = arith.constant 0 : index
    %300 = vector.load %arg7[%c1520, %c0_130] : memref<1808x128xbf16, #tpu.memory_space<vmem>>, vector<72x8xbf16>
    %cst_131 = arith.constant dense<0.000000e+00> : vector<72x128xf32>
    %301 = tpu.matmul %300, %299, %cst_131 {dimension_numbers = #tpu.dot_dimension_numbers<[1], [0], [0], [1], [0, 0, 1, 1], [], []>} : vector<72x8xbf16>, vector<8x128xbf16>, vector<72x128xf32> -> vector<72x128xf32>
    %302 = vector.extract_strided_slice %301 {offsets = [0, 0], sizes = [8, 128], strides = [1, 1]} : vector<72x128xf32> to vector<8x128xf32>
    %303 = arith.truncf %302 : vector<8x128xf32> to vector<8x128xbf16>
    %c576_132 = arith.constant 576 : index
    %c0_133 = arith.constant 0 : index
    %304 = vector.load %arg2[%c576_132, %c0_133] : memref<4096x128xbf16, #tpu.memory_space<vmem>>, vector<128x128xbf16>
    %cst_134 = arith.constant dense<0.000000e+00> : vector<8x128xf32>
    %305 = tpu.matmul %303, %304, %cst_134 {dimension_numbers = #tpu.dot_dimension_numbers<[1], [0], [0], [1], [0, 0, 1, 1], [], []>} : vector<8x128xbf16>, vector<128x128xbf16>, vector<8x128xf32> -> vector<8x128xf32>
    %306 = vector.extract_strided_slice %301 {offsets = [8, 0], sizes = [8, 128], strides = [1, 1]} : vector<72x128xf32> to vector<8x128xf32>
    %307 = arith.truncf %306 : vector<8x128xf32> to vector<8x128xbf16>
    %c704 = arith.constant 704 : index
    %c0_135 = arith.constant 0 : index
    %308 = vector.load %arg2[%c704, %c0_135] : memref<4096x128xbf16, #tpu.memory_space<vmem>>, vector<128x128xbf16>
    %cst_136 = arith.constant dense<0.000000e+00> : vector<8x128xf32>
    %309 = tpu.matmul %307, %308, %cst_136 {dimension_numbers = #tpu.dot_dimension_numbers<[1], [0], [0], [1], [0, 0, 1, 1], [], []>} : vector<8x128xbf16>, vector<128x128xbf16>, vector<8x128xf32> -> vector<8x128xf32>
    %310 = arith.addf %305, %309 : vector<8x128xf32>
    %311 = vector.extract_strided_slice %301 {offsets = [16, 0], sizes = [8, 128], strides = [1, 1]} : vector<72x128xf32> to vector<8x128xf32>
    %312 = arith.truncf %311 : vector<8x128xf32> to vector<8x128xbf16>
    %c832 = arith.constant 832 : index
    %c0_137 = arith.constant 0 : index
    %313 = vector.load %arg2[%c832, %c0_137] : memref<4096x128xbf16, #tpu.memory_space<vmem>>, vector<128x128xbf16>
    %cst_138 = arith.constant dense<0.000000e+00> : vector<8x128xf32>
    %314 = tpu.matmul %312, %313, %cst_138 {dimension_numbers = #tpu.dot_dimension_numbers<[1], [0], [0], [1], [0, 0, 1, 1], [], []>} : vector<8x128xbf16>, vector<128x128xbf16>, vector<8x128xf32> -> vector<8x128xf32>
    %315 = arith.addf %310, %314 : vector<8x128xf32>
    %316 = vector.extract_strided_slice %301 {offsets = [24, 0], sizes = [8, 128], strides = [1, 1]} : vector<72x128xf32> to vector<8x128xf32>
    %317 = arith.truncf %316 : vector<8x128xf32> to vector<8x128xbf16>
    %c960 = arith.constant 960 : index
    %c0_139 = arith.constant 0 : index
    %318 = vector.load %arg2[%c960, %c0_139] : memref<4096x128xbf16, #tpu.memory_space<vmem>>, vector<128x128xbf16>
    %cst_140 = arith.constant dense<0.000000e+00> : vector<8x128xf32>
    %319 = tpu.matmul %317, %318, %cst_140 {dimension_numbers = #tpu.dot_dimension_numbers<[1], [0], [0], [1], [0, 0, 1, 1], [], []>} : vector<8x128xbf16>, vector<128x128xbf16>, vector<8x128xf32> -> vector<8x128xf32>
    %320 = arith.addf %315, %319 : vector<8x128xf32>
    %321 = vector.extract_strided_slice %301 {offsets = [32, 0], sizes = [8, 128], strides = [1, 1]} : vector<72x128xf32> to vector<8x128xf32>
    %322 = arith.truncf %321 : vector<8x128xf32> to vector<8x128xbf16>
    %c1088 = arith.constant 1088 : index
    %c0_141 = arith.constant 0 : index
    %323 = vector.load %arg2[%c1088, %c0_141] : memref<4096x128xbf16, #tpu.memory_space<vmem>>, vector<128x128xbf16>
    %cst_142 = arith.constant dense<0.000000e+00> : vector<8x128xf32>
    %324 = tpu.matmul %322, %323, %cst_142 {dimension_numbers = #tpu.dot_dimension_numbers<[1], [0], [0], [1], [0, 0, 1, 1], [], []>} : vector<8x128xbf16>, vector<128x128xbf16>, vector<8x128xf32> -> vector<8x128xf32>
    %325 = arith.addf %320, %324 : vector<8x128xf32>
    %326 = vector.extract_strided_slice %301 {offsets = [40, 0], sizes = [8, 128], strides = [1, 1]} : vector<72x128xf32> to vector<8x128xf32>
    %327 = arith.truncf %326 : vector<8x128xf32> to vector<8x128xbf16>
    %c1216 = arith.constant 1216 : index
    %c0_143 = arith.constant 0 : index
    %328 = vector.load %arg2[%c1216, %c0_143] : memref<4096x128xbf16, #tpu.memory_space<vmem>>, vector<128x128xbf16>
    %cst_144 = arith.constant dense<0.000000e+00> : vector<8x128xf32>
    %329 = tpu.matmul %327, %328, %cst_144 {dimension_numbers = #tpu.dot_dimension_numbers<[1], [0], [0], [1], [0, 0, 1, 1], [], []>} : vector<8x128xbf16>, vector<128x128xbf16>, vector<8x128xf32> -> vector<8x128xf32>
    %330 = arith.addf %325, %329 : vector<8x128xf32>
    %331 = vector.extract_strided_slice %301 {offsets = [48, 0], sizes = [8, 128], strides = [1, 1]} : vector<72x128xf32> to vector<8x128xf32>
    %332 = arith.truncf %331 : vector<8x128xf32> to vector<8x128xbf16>
    %c1344 = arith.constant 1344 : index
    %c0_145 = arith.constant 0 : index
    %333 = vector.load %arg2[%c1344, %c0_145] : memref<4096x128xbf16, #tpu.memory_space<vmem>>, vector<128x128xbf16>
    %cst_146 = arith.constant dense<0.000000e+00> : vector<8x128xf32>
    %334 = tpu.matmul %332, %333, %cst_146 {dimension_numbers = #tpu.dot_dimension_numbers<[1], [0], [0], [1], [0, 0, 1, 1], [], []>} : vector<8x128xbf16>, vector<128x128xbf16>, vector<8x128xf32> -> vector<8x128xf32>
    %335 = arith.addf %330, %334 : vector<8x128xf32>
    %336 = vector.extract_strided_slice %301 {offsets = [56, 0], sizes = [8, 128], strides = [1, 1]} : vector<72x128xf32> to vector<8x128xf32>
    %337 = arith.truncf %336 : vector<8x128xf32> to vector<8x128xbf16>
    %c1472 = arith.constant 1472 : index
    %c0_147 = arith.constant 0 : index
    %338 = vector.load %arg2[%c1472, %c0_147] : memref<4096x128xbf16, #tpu.memory_space<vmem>>, vector<128x128xbf16>
    %cst_148 = arith.constant dense<0.000000e+00> : vector<8x128xf32>
    %339 = tpu.matmul %337, %338, %cst_148 {dimension_numbers = #tpu.dot_dimension_numbers<[1], [0], [0], [1], [0, 0, 1, 1], [], []>} : vector<8x128xbf16>, vector<128x128xbf16>, vector<8x128xf32> -> vector<8x128xf32>
    %340 = arith.addf %335, %339 : vector<8x128xf32>
    %341 = vector.extract_strided_slice %301 {offsets = [64, 0], sizes = [8, 128], strides = [1, 1]} : vector<72x128xf32> to vector<8x128xf32>
    %342 = arith.truncf %341 : vector<8x128xf32> to vector<8x128xbf16>
    %c1600_149 = arith.constant 1600 : index
    %c0_150 = arith.constant 0 : index
    %343 = vector.load %arg2[%c1600_149, %c0_150] : memref<4096x128xbf16, #tpu.memory_space<vmem>>, vector<128x128xbf16>
    %cst_151 = arith.constant dense<0.000000e+00> : vector<8x128xf32>
    %344 = tpu.matmul %342, %343, %cst_151 {dimension_numbers = #tpu.dot_dimension_numbers<[1], [0], [0], [1], [0, 0, 1, 1], [], []>} : vector<8x128xbf16>, vector<128x128xbf16>, vector<8x128xf32> -> vector<8x128xf32>
    %345 = arith.addf %340, %344 : vector<8x128xf32>
    %c1_152 = arith.constant 1 : index
    %c0_153 = arith.constant 0 : index
    %346 = vector.load %arg5[%c1_152, %c0_153] : memref<5x128xf32, #tpu.memory_space<vmem>>, vector<1x128xf32>
    %347 = vector.broadcast %346 : vector<1x128xf32> to vector<8x128xf32>
    %348 = arith.addf %345, %347 : vector<8x128xf32>
    %349 = arith.addf %348, %298 : vector<8x128xf32>
    %cst_154 = arith.constant 0.000000e+00 : f32
    %350 = vector.broadcast %cst_154 : f32 to vector<8x128xf32>
    %351 = arith.maximumf %349, %350 : vector<8x128xf32>
    %352 = arith.truncf %351 : vector<8x128xf32> to vector<8x128xbf16>
    %c1616 = arith.constant 1616 : index
    %c0_155 = arith.constant 0 : index
    %353 = vector.load %arg7[%c1616, %c0_155] : memref<1808x128xbf16, #tpu.memory_space<vmem>>, vector<72x8xbf16>
    %cst_156 = arith.constant dense<0.000000e+00> : vector<72x128xf32>
    %354 = tpu.matmul %353, %352, %cst_156 {dimension_numbers = #tpu.dot_dimension_numbers<[1], [0], [0], [1], [0, 0, 1, 1], [], []>} : vector<72x8xbf16>, vector<8x128xbf16>, vector<72x128xf32> -> vector<72x128xf32>
    %355 = vector.extract_strided_slice %354 {offsets = [0, 0], sizes = [8, 128], strides = [1, 1]} : vector<72x128xf32> to vector<8x128xf32>
    %356 = arith.truncf %355 : vector<8x128xf32> to vector<8x128xbf16>
    %c1792 = arith.constant 1792 : index
    %c0_157 = arith.constant 0 : index
    %357 = vector.load %arg2[%c1792, %c0_157] : memref<4096x128xbf16, #tpu.memory_space<vmem>>, vector<128x128xbf16>
    %cst_158 = arith.constant dense<0.000000e+00> : vector<8x128xf32>
    %358 = tpu.matmul %356, %357, %cst_158 {dimension_numbers = #tpu.dot_dimension_numbers<[1], [0], [0], [1], [0, 0, 1, 1], [], []>} : vector<8x128xbf16>, vector<128x128xbf16>, vector<8x128xf32> -> vector<8x128xf32>
    %359 = vector.extract_strided_slice %354 {offsets = [8, 0], sizes = [8, 128], strides = [1, 1]} : vector<72x128xf32> to vector<8x128xf32>
    %360 = arith.truncf %359 : vector<8x128xf32> to vector<8x128xbf16>
    %c1920 = arith.constant 1920 : index
    %c0_159 = arith.constant 0 : index
    %361 = vector.load %arg2[%c1920, %c0_159] : memref<4096x128xbf16, #tpu.memory_space<vmem>>, vector<128x128xbf16>
    %cst_160 = arith.constant dense<0.000000e+00> : vector<8x128xf32>
    %362 = tpu.matmul %360, %361, %cst_160 {dimension_numbers = #tpu.dot_dimension_numbers<[1], [0], [0], [1], [0, 0, 1, 1], [], []>} : vector<8x128xbf16>, vector<128x128xbf16>, vector<8x128xf32> -> vector<8x128xf32>
    %363 = arith.addf %358, %362 : vector<8x128xf32>
    %364 = vector.extract_strided_slice %354 {offsets = [16, 0], sizes = [8, 128], strides = [1, 1]} : vector<72x128xf32> to vector<8x128xf32>
    %365 = arith.truncf %364 : vector<8x128xf32> to vector<8x128xbf16>
    %c2048 = arith.constant 2048 : index
    %c0_161 = arith.constant 0 : index
    %366 = vector.load %arg2[%c2048, %c0_161] : memref<4096x128xbf16, #tpu.memory_space<vmem>>, vector<128x128xbf16>
    %cst_162 = arith.constant dense<0.000000e+00> : vector<8x128xf32>
    %367 = tpu.matmul %365, %366, %cst_162 {dimension_numbers = #tpu.dot_dimension_numbers<[1], [0], [0], [1], [0, 0, 1, 1], [], []>} : vector<8x128xbf16>, vector<128x128xbf16>, vector<8x128xf32> -> vector<8x128xf32>
    %368 = arith.addf %363, %367 : vector<8x128xf32>
    %369 = vector.extract_strided_slice %354 {offsets = [24, 0], sizes = [8, 128], strides = [1, 1]} : vector<72x128xf32> to vector<8x128xf32>
    %370 = arith.truncf %369 : vector<8x128xf32> to vector<8x128xbf16>
    %c2176 = arith.constant 2176 : index
    %c0_163 = arith.constant 0 : index
    %371 = vector.load %arg2[%c2176, %c0_163] : memref<4096x128xbf16, #tpu.memory_space<vmem>>, vector<128x128xbf16>
    %cst_164 = arith.constant dense<0.000000e+00> : vector<8x128xf32>
    %372 = tpu.matmul %370, %371, %cst_164 {dimension_numbers = #tpu.dot_dimension_numbers<[1], [0], [0], [1], [0, 0, 1, 1], [], []>} : vector<8x128xbf16>, vector<128x128xbf16>, vector<8x128xf32> -> vector<8x128xf32>
    %373 = arith.addf %368, %372 : vector<8x128xf32>
    %374 = vector.extract_strided_slice %354 {offsets = [32, 0], sizes = [8, 128], strides = [1, 1]} : vector<72x128xf32> to vector<8x128xf32>
    %375 = arith.truncf %374 : vector<8x128xf32> to vector<8x128xbf16>
    %c2304 = arith.constant 2304 : index
    %c0_165 = arith.constant 0 : index
    %376 = vector.load %arg2[%c2304, %c0_165] : memref<4096x128xbf16, #tpu.memory_space<vmem>>, vector<128x128xbf16>
    %cst_166 = arith.constant dense<0.000000e+00> : vector<8x128xf32>
    %377 = tpu.matmul %375, %376, %cst_166 {dimension_numbers = #tpu.dot_dimension_numbers<[1], [0], [0], [1], [0, 0, 1, 1], [], []>} : vector<8x128xbf16>, vector<128x128xbf16>, vector<8x128xf32> -> vector<8x128xf32>
    %378 = arith.addf %373, %377 : vector<8x128xf32>
    %379 = vector.extract_strided_slice %354 {offsets = [40, 0], sizes = [8, 128], strides = [1, 1]} : vector<72x128xf32> to vector<8x128xf32>
    %380 = arith.truncf %379 : vector<8x128xf32> to vector<8x128xbf16>
    %c2432 = arith.constant 2432 : index
    %c0_167 = arith.constant 0 : index
    %381 = vector.load %arg2[%c2432, %c0_167] : memref<4096x128xbf16, #tpu.memory_space<vmem>>, vector<128x128xbf16>
    %cst_168 = arith.constant dense<0.000000e+00> : vector<8x128xf32>
    %382 = tpu.matmul %380, %381, %cst_168 {dimension_numbers = #tpu.dot_dimension_numbers<[1], [0], [0], [1], [0, 0, 1, 1], [], []>} : vector<8x128xbf16>, vector<128x128xbf16>, vector<8x128xf32> -> vector<8x128xf32>
    %383 = arith.addf %378, %382 : vector<8x128xf32>
    %384 = vector.extract_strided_slice %354 {offsets = [48, 0], sizes = [8, 128], strides = [1, 1]} : vector<72x128xf32> to vector<8x128xf32>
    %385 = arith.truncf %384 : vector<8x128xf32> to vector<8x128xbf16>
    %c2560 = arith.constant 2560 : index
    %c0_169 = arith.constant 0 : index
    %386 = vector.load %arg2[%c2560, %c0_169] : memref<4096x128xbf16, #tpu.memory_space<vmem>>, vector<128x128xbf16>
    %cst_170 = arith.constant dense<0.000000e+00> : vector<8x128xf32>
    %387 = tpu.matmul %385, %386, %cst_170 {dimension_numbers = #tpu.dot_dimension_numbers<[1], [0], [0], [1], [0, 0, 1, 1], [], []>} : vector<8x128xbf16>, vector<128x128xbf16>, vector<8x128xf32> -> vector<8x128xf32>
    %388 = arith.addf %383, %387 : vector<8x128xf32>
    %389 = vector.extract_strided_slice %354 {offsets = [56, 0], sizes = [8, 128], strides = [1, 1]} : vector<72x128xf32> to vector<8x128xf32>
    %390 = arith.truncf %389 : vector<8x128xf32> to vector<8x128xbf16>
    %c2688 = arith.constant 2688 : index
    %c0_171 = arith.constant 0 : index
    %391 = vector.load %arg2[%c2688, %c0_171] : memref<4096x128xbf16, #tpu.memory_space<vmem>>, vector<128x128xbf16>
    %cst_172 = arith.constant dense<0.000000e+00> : vector<8x128xf32>
    %392 = tpu.matmul %390, %391, %cst_172 {dimension_numbers = #tpu.dot_dimension_numbers<[1], [0], [0], [1], [0, 0, 1, 1], [], []>} : vector<8x128xbf16>, vector<128x128xbf16>, vector<8x128xf32> -> vector<8x128xf32>
    %393 = arith.addf %388, %392 : vector<8x128xf32>
    %394 = vector.extract_strided_slice %354 {offsets = [64, 0], sizes = [8, 128], strides = [1, 1]} : vector<72x128xf32> to vector<8x128xf32>
    %395 = arith.truncf %394 : vector<8x128xf32> to vector<8x128xbf16>
    %c2816 = arith.constant 2816 : index
    %c0_173 = arith.constant 0 : index
    %396 = vector.load %arg2[%c2816, %c0_173] : memref<4096x128xbf16, #tpu.memory_space<vmem>>, vector<128x128xbf16>
    %cst_174 = arith.constant dense<0.000000e+00> : vector<8x128xf32>
    %397 = tpu.matmul %395, %396, %cst_174 {dimension_numbers = #tpu.dot_dimension_numbers<[1], [0], [0], [1], [0, 0, 1, 1], [], []>} : vector<8x128xbf16>, vector<128x128xbf16>, vector<8x128xf32> -> vector<8x128xf32>
    %398 = arith.addf %393, %397 : vector<8x128xf32>
    %c3_175 = arith.constant 3 : index
    %c0_176 = arith.constant 0 : index
    %399 = vector.load %arg5[%c3_175, %c0_176] : memref<5x128xf32, #tpu.memory_space<vmem>>, vector<1x128xf32>
    %400 = vector.broadcast %399 : vector<1x128xf32> to vector<8x128xf32>
    %401 = arith.addf %398, %400 : vector<8x128xf32>
    %cst_177 = arith.constant 0.000000e+00 : f32
    %402 = vector.broadcast %cst_177 : f32 to vector<8x128xf32>
    %403 = arith.maximumf %401, %402 : vector<8x128xf32>
    %404 = arith.truncf %403 : vector<8x128xf32> to vector<8x128xbf16>
    %c1696_178 = arith.constant 1696 : index
    %c0_179 = arith.constant 0 : index
    %405 = vector.load %arg7[%c1696_178, %c0_179] : memref<1808x128xbf16, #tpu.memory_space<vmem>>, vector<72x8xbf16>
    %cst_180 = arith.constant dense<0.000000e+00> : vector<72x128xf32>
    %406 = tpu.matmul %405, %404, %cst_180 {dimension_numbers = #tpu.dot_dimension_numbers<[1], [0], [0], [1], [0, 0, 1, 1], [], []>} : vector<72x8xbf16>, vector<8x128xbf16>, vector<72x128xf32> -> vector<72x128xf32>
    %407 = vector.extract_strided_slice %406 {offsets = [0, 0], sizes = [8, 128], strides = [1, 1]} : vector<72x128xf32> to vector<8x128xf32>
    %408 = arith.truncf %407 : vector<8x128xf32> to vector<8x128xbf16>
    %c2944 = arith.constant 2944 : index
    %c0_181 = arith.constant 0 : index
    %409 = vector.load %arg2[%c2944, %c0_181] : memref<4096x128xbf16, #tpu.memory_space<vmem>>, vector<128x128xbf16>
    %cst_182 = arith.constant dense<0.000000e+00> : vector<8x128xf32>
    %410 = tpu.matmul %408, %409, %cst_182 {dimension_numbers = #tpu.dot_dimension_numbers<[1], [0], [0], [1], [0, 0, 1, 1], [], []>} : vector<8x128xbf16>, vector<128x128xbf16>, vector<8x128xf32> -> vector<8x128xf32>
    %411 = vector.extract_strided_slice %406 {offsets = [8, 0], sizes = [8, 128], strides = [1, 1]} : vector<72x128xf32> to vector<8x128xf32>
    %412 = arith.truncf %411 : vector<8x128xf32> to vector<8x128xbf16>
    %c3072 = arith.constant 3072 : index
    %c0_183 = arith.constant 0 : index
    %413 = vector.load %arg2[%c3072, %c0_183] : memref<4096x128xbf16, #tpu.memory_space<vmem>>, vector<128x128xbf16>
    %cst_184 = arith.constant dense<0.000000e+00> : vector<8x128xf32>
    %414 = tpu.matmul %412, %413, %cst_184 {dimension_numbers = #tpu.dot_dimension_numbers<[1], [0], [0], [1], [0, 0, 1, 1], [], []>} : vector<8x128xbf16>, vector<128x128xbf16>, vector<8x128xf32> -> vector<8x128xf32>
    %415 = arith.addf %410, %414 : vector<8x128xf32>
    %416 = vector.extract_strided_slice %406 {offsets = [16, 0], sizes = [8, 128], strides = [1, 1]} : vector<72x128xf32> to vector<8x128xf32>
    %417 = arith.truncf %416 : vector<8x128xf32> to vector<8x128xbf16>
    %c3200 = arith.constant 3200 : index
    %c0_185 = arith.constant 0 : index
    %418 = vector.load %arg2[%c3200, %c0_185] : memref<4096x128xbf16, #tpu.memory_space<vmem>>, vector<128x128xbf16>
    %cst_186 = arith.constant dense<0.000000e+00> : vector<8x128xf32>
    %419 = tpu.matmul %417, %418, %cst_186 {dimension_numbers = #tpu.dot_dimension_numbers<[1], [0], [0], [1], [0, 0, 1, 1], [], []>} : vector<8x128xbf16>, vector<128x128xbf16>, vector<8x128xf32> -> vector<8x128xf32>
    %420 = arith.addf %415, %419 : vector<8x128xf32>
    %421 = vector.extract_strided_slice %406 {offsets = [24, 0], sizes = [8, 128], strides = [1, 1]} : vector<72x128xf32> to vector<8x128xf32>
    %422 = arith.truncf %421 : vector<8x128xf32> to vector<8x128xbf16>
    %c3328 = arith.constant 3328 : index
    %c0_187 = arith.constant 0 : index
    %423 = vector.load %arg2[%c3328, %c0_187] : memref<4096x128xbf16, #tpu.memory_space<vmem>>, vector<128x128xbf16>
    %cst_188 = arith.constant dense<0.000000e+00> : vector<8x128xf32>
    %424 = tpu.matmul %422, %423, %cst_188 {dimension_numbers = #tpu.dot_dimension_numbers<[1], [0], [0], [1], [0, 0, 1, 1], [], []>} : vector<8x128xbf16>, vector<128x128xbf16>, vector<8x128xf32> -> vector<8x128xf32>
    %425 = arith.addf %420, %424 : vector<8x128xf32>
    %426 = vector.extract_strided_slice %406 {offsets = [32, 0], sizes = [8, 128], strides = [1, 1]} : vector<72x128xf32> to vector<8x128xf32>
    %427 = arith.truncf %426 : vector<8x128xf32> to vector<8x128xbf16>
    %c3456 = arith.constant 3456 : index
    %c0_189 = arith.constant 0 : index
    %428 = vector.load %arg2[%c3456, %c0_189] : memref<4096x128xbf16, #tpu.memory_space<vmem>>, vector<128x128xbf16>
    %cst_190 = arith.constant dense<0.000000e+00> : vector<8x128xf32>
    %429 = tpu.matmul %427, %428, %cst_190 {dimension_numbers = #tpu.dot_dimension_numbers<[1], [0], [0], [1], [0, 0, 1, 1], [], []>} : vector<8x128xbf16>, vector<128x128xbf16>, vector<8x128xf32> -> vector<8x128xf32>
    %430 = arith.addf %425, %429 : vector<8x128xf32>
    %431 = vector.extract_strided_slice %406 {offsets = [40, 0], sizes = [8, 128], strides = [1, 1]} : vector<72x128xf32> to vector<8x128xf32>
    %432 = arith.truncf %431 : vector<8x128xf32> to vector<8x128xbf16>
    %c3584 = arith.constant 3584 : index
    %c0_191 = arith.constant 0 : index
    %433 = vector.load %arg2[%c3584, %c0_191] : memref<4096x128xbf16, #tpu.memory_space<vmem>>, vector<128x128xbf16>
    %cst_192 = arith.constant dense<0.000000e+00> : vector<8x128xf32>
    %434 = tpu.matmul %432, %433, %cst_192 {dimension_numbers = #tpu.dot_dimension_numbers<[1], [0], [0], [1], [0, 0, 1, 1], [], []>} : vector<8x128xbf16>, vector<128x128xbf16>, vector<8x128xf32> -> vector<8x128xf32>
    %435 = arith.addf %430, %434 : vector<8x128xf32>
    %436 = vector.extract_strided_slice %406 {offsets = [48, 0], sizes = [8, 128], strides = [1, 1]} : vector<72x128xf32> to vector<8x128xf32>
    %437 = arith.truncf %436 : vector<8x128xf32> to vector<8x128xbf16>
    %c3712 = arith.constant 3712 : index
    %c0_193 = arith.constant 0 : index
    %438 = vector.load %arg2[%c3712, %c0_193] : memref<4096x128xbf16, #tpu.memory_space<vmem>>, vector<128x128xbf16>
    %cst_194 = arith.constant dense<0.000000e+00> : vector<8x128xf32>
    %439 = tpu.matmul %437, %438, %cst_194 {dimension_numbers = #tpu.dot_dimension_numbers<[1], [0], [0], [1], [0, 0, 1, 1], [], []>} : vector<8x128xbf16>, vector<128x128xbf16>, vector<8x128xf32> -> vector<8x128xf32>
    %440 = arith.addf %435, %439 : vector<8x128xf32>
    %441 = vector.extract_strided_slice %406 {offsets = [56, 0], sizes = [8, 128], strides = [1, 1]} : vector<72x128xf32> to vector<8x128xf32>
    %442 = arith.truncf %441 : vector<8x128xf32> to vector<8x128xbf16>
    %c3840 = arith.constant 3840 : index
    %c0_195 = arith.constant 0 : index
    %443 = vector.load %arg2[%c3840, %c0_195] : memref<4096x128xbf16, #tpu.memory_space<vmem>>, vector<128x128xbf16>
    %cst_196 = arith.constant dense<0.000000e+00> : vector<8x128xf32>
    %444 = tpu.matmul %442, %443, %cst_196 {dimension_numbers = #tpu.dot_dimension_numbers<[1], [0], [0], [1], [0, 0, 1, 1], [], []>} : vector<8x128xbf16>, vector<128x128xbf16>, vector<8x128xf32> -> vector<8x128xf32>
    %445 = arith.addf %440, %444 : vector<8x128xf32>
    %446 = vector.extract_strided_slice %406 {offsets = [64, 0], sizes = [8, 128], strides = [1, 1]} : vector<72x128xf32> to vector<8x128xf32>
    %447 = arith.truncf %446 : vector<8x128xf32> to vector<8x128xbf16>
    %c3968 = arith.constant 3968 : index
    %c0_197 = arith.constant 0 : index
    %448 = vector.load %arg2[%c3968, %c0_197] : memref<4096x128xbf16, #tpu.memory_space<vmem>>, vector<128x128xbf16>
    %cst_198 = arith.constant dense<0.000000e+00> : vector<8x128xf32>
    %449 = tpu.matmul %447, %448, %cst_198 {dimension_numbers = #tpu.dot_dimension_numbers<[1], [0], [0], [1], [0, 0, 1, 1], [], []>} : vector<8x128xbf16>, vector<128x128xbf16>, vector<8x128xf32> -> vector<8x128xf32>
    %450 = arith.addf %445, %449 : vector<8x128xf32>
    %c4_199 = arith.constant 4 : index
    %c0_200 = arith.constant 0 : index
    %451 = vector.load %arg5[%c4_199, %c0_200] : memref<5x128xf32, #tpu.memory_space<vmem>>, vector<1x128xf32>
    %452 = vector.broadcast %451 : vector<1x128xf32> to vector<8x128xf32>
    %453 = arith.addf %450, %452 : vector<8x128xf32>
    %454 = arith.addf %453, %351 : vector<8x128xf32>
    %cst_201 = arith.constant 0.000000e+00 : f32
    %455 = vector.broadcast %cst_201 : f32 to vector<8x128xf32>
    %456 = arith.maximumf %454, %455 : vector<8x128xf32>
    %457 = arith.truncf %456 : vector<8x128xf32> to vector<8x128xbf16>
    %c1776 = arith.constant 1776 : index
    %c0_202 = arith.constant 0 : index
    %458 = vector.load %arg7[%c1776, %c0_202] : memref<1808x128xbf16, #tpu.memory_space<vmem>>, vector<8x8xbf16>
    %cst_203 = arith.constant dense<0.000000e+00> : vector<8x128xf32>
    %459 = tpu.matmul %458, %457, %cst_203 {dimension_numbers = #tpu.dot_dimension_numbers<[1], [0], [0], [1], [0, 0, 1, 1], [], []>} : vector<8x8xbf16>, vector<8x128xbf16>, vector<8x128xf32> -> vector<8x128xf32>
    %460 = vector.extract_strided_slice %459 {offsets = [0, 0], sizes = [2, 128], strides = [1, 1]} : vector<8x128xf32> to vector<2x128xf32>
    %461 = arith.truncf %460 : vector<2x128xf32> to vector<2x128xbf16>
    %c0_204 = arith.constant 0 : index
    %c0_205 = arith.constant 0 : index
    %462 = vector.load %arg3[%c0_204, %c0_205] : memref<1408x256xbf16, #tpu.memory_space<vmem>>, vector<128x256xbf16>
    %cst_206 = arith.constant dense<0.000000e+00> : vector<2x256xf32>
    %463 = tpu.matmul %461, %462, %cst_206 {dimension_numbers = #tpu.dot_dimension_numbers<[1], [0], [0], [1], [0, 0, 1, 1], [], []>} : vector<2x128xbf16>, vector<128x256xbf16>, vector<2x256xf32> -> vector<2x256xf32>
    %464 = vector.extract_strided_slice %459 {offsets = [2, 0], sizes = [2, 128], strides = [1, 1]} : vector<8x128xf32> to vector<2x128xf32>
    %465 = arith.truncf %464 : vector<2x128xf32> to vector<2x128xbf16>
    %c128_207 = arith.constant 128 : index
    %c0_208 = arith.constant 0 : index
    %466 = vector.load %arg3[%c128_207, %c0_208] : memref<1408x256xbf16, #tpu.memory_space<vmem>>, vector<128x256xbf16>
    %cst_209 = arith.constant dense<0.000000e+00> : vector<2x256xf32>
    %467 = tpu.matmul %465, %466, %cst_209 {dimension_numbers = #tpu.dot_dimension_numbers<[1], [0], [0], [1], [0, 0, 1, 1], [], []>} : vector<2x128xbf16>, vector<128x256xbf16>, vector<2x256xf32> -> vector<2x256xf32>
    %468 = arith.addf %463, %467 : vector<2x256xf32>
    %469 = vector.extract_strided_slice %459 {offsets = [4, 0], sizes = [2, 128], strides = [1, 1]} : vector<8x128xf32> to vector<2x128xf32>
    %470 = arith.truncf %469 : vector<2x128xf32> to vector<2x128xbf16>
    %c256_210 = arith.constant 256 : index
    %c0_211 = arith.constant 0 : index
    %471 = vector.load %arg3[%c256_210, %c0_211] : memref<1408x256xbf16, #tpu.memory_space<vmem>>, vector<128x256xbf16>
    %cst_212 = arith.constant dense<0.000000e+00> : vector<2x256xf32>
    %472 = tpu.matmul %470, %471, %cst_212 {dimension_numbers = #tpu.dot_dimension_numbers<[1], [0], [0], [1], [0, 0, 1, 1], [], []>} : vector<2x128xbf16>, vector<128x256xbf16>, vector<2x256xf32> -> vector<2x256xf32>
    %473 = arith.addf %468, %472 : vector<2x256xf32>
    %474 = vector.extract_strided_slice %459 {offsets = [6, 0], sizes = [2, 128], strides = [1, 1]} : vector<8x128xf32> to vector<2x128xf32>
    %475 = arith.truncf %474 : vector<2x128xf32> to vector<2x128xbf16>
    %c384_213 = arith.constant 384 : index
    %c0_214 = arith.constant 0 : index
    %476 = vector.load %arg3[%c384_213, %c0_214] : memref<1408x256xbf16, #tpu.memory_space<vmem>>, vector<128x256xbf16>
    %cst_215 = arith.constant dense<0.000000e+00> : vector<2x256xf32>
    %477 = tpu.matmul %475, %476, %cst_215 {dimension_numbers = #tpu.dot_dimension_numbers<[1], [0], [0], [1], [0, 0, 1, 1], [], []>} : vector<2x128xbf16>, vector<128x256xbf16>, vector<2x256xf32> -> vector<2x256xf32>
    %478 = arith.addf %473, %477 : vector<2x256xf32>
    %c0_216 = arith.constant 0 : index
    %c0_217 = arith.constant 0 : index
    %479 = vector.load %arg6[%c0_216, %c0_217] : memref<5x256xf32, #tpu.memory_space<vmem>>, vector<1x256xf32>
    %480 = vector.broadcast %479 : vector<1x256xf32> to vector<2x256xf32>
    %481 = arith.addf %478, %480 : vector<2x256xf32>
    %cst_218 = arith.constant 0.000000e+00 : f32
    %482 = vector.broadcast %cst_218 : f32 to vector<2x256xf32>
    %483 = arith.maximumf %481, %482 : vector<2x256xf32>
    %484 = arith.truncf %456 : vector<8x128xf32> to vector<8x128xbf16>
    %c1792_219 = arith.constant 1792 : index
    %c0_220 = arith.constant 0 : index
    %485 = vector.load %arg7[%c1792_219, %c0_220] : memref<1808x128xbf16, #tpu.memory_space<vmem>>, vector<2x8xbf16>
    %cst_221 = arith.constant dense<0.000000e+00> : vector<2x128xf32>
    %486 = tpu.matmul %485, %484, %cst_221 {dimension_numbers = #tpu.dot_dimension_numbers<[1], [0], [0], [1], [0, 0, 1, 1], [], []>} : vector<2x8xbf16>, vector<8x128xbf16>, vector<2x128xf32> -> vector<2x128xf32>
    %487 = arith.truncf %486 : vector<2x128xf32> to vector<2x128xbf16>
    %c768 = arith.constant 768 : index
    %c0_222 = arith.constant 0 : index
    %488 = vector.load %arg3[%c768, %c0_222] : memref<1408x256xbf16, #tpu.memory_space<vmem>>, vector<128x256xbf16>
    %cst_223 = arith.constant dense<0.000000e+00> : vector<2x256xf32>
    %489 = tpu.matmul %487, %488, %cst_223 {dimension_numbers = #tpu.dot_dimension_numbers<[1], [0], [0], [1], [0, 0, 1, 1], [], []>} : vector<2x128xbf16>, vector<128x256xbf16>, vector<2x256xf32> -> vector<2x256xf32>
    %c2_224 = arith.constant 2 : index
    %c0_225 = arith.constant 0 : index
    %490 = vector.load %arg6[%c2_224, %c0_225] : memref<5x256xf32, #tpu.memory_space<vmem>>, vector<1x256xf32>
    %491 = vector.broadcast %490 : vector<1x256xf32> to vector<2x256xf32>
    %492 = arith.addf %489, %491 : vector<2x256xf32>
    %493 = arith.truncf %483 : vector<2x256xf32> to vector<2x256xbf16>
    %c512_226 = arith.constant 512 : index
    %c0_227 = arith.constant 0 : index
    %494 = vector.load %arg3[%c512_226, %c0_227] : memref<1408x256xbf16, #tpu.memory_space<vmem>>, vector<256x256xbf16>
    %cst_228 = arith.constant dense<0.000000e+00> : vector<2x256xf32>
    %495 = tpu.matmul %493, %494, %cst_228 {dimension_numbers = #tpu.dot_dimension_numbers<[1], [0], [0], [1], [0, 0, 1, 1], [], []>} : vector<2x256xbf16>, vector<256x256xbf16>, vector<2x256xf32> -> vector<2x256xf32>
    %c1_229 = arith.constant 1 : index
    %c0_230 = arith.constant 0 : index
    %496 = vector.load %arg6[%c1_229, %c0_230] : memref<5x256xf32, #tpu.memory_space<vmem>>, vector<1x256xf32>
    %497 = vector.broadcast %496 : vector<1x256xf32> to vector<2x256xf32>
    %498 = arith.addf %495, %497 : vector<2x256xf32>
    %499 = arith.addf %498, %492 : vector<2x256xf32>
    %cst_231 = arith.constant 0.000000e+00 : f32
    %500 = vector.broadcast %cst_231 : f32 to vector<2x256xf32>
    %501 = arith.maximumf %499, %500 : vector<2x256xf32>
    %502 = arith.truncf %501 : vector<2x256xf32> to vector<2x256xbf16>
    %c896 = arith.constant 896 : index
    %c0_232 = arith.constant 0 : index
    %503 = vector.load %arg3[%c896, %c0_232] : memref<1408x256xbf16, #tpu.memory_space<vmem>>, vector<256x256xbf16>
    %cst_233 = arith.constant dense<0.000000e+00> : vector<2x256xf32>
    %504 = tpu.matmul %502, %503, %cst_233 {dimension_numbers = #tpu.dot_dimension_numbers<[1], [0], [0], [1], [0, 0, 1, 1], [], []>} : vector<2x256xbf16>, vector<256x256xbf16>, vector<2x256xf32> -> vector<2x256xf32>
    %c3_234 = arith.constant 3 : index
    %c0_235 = arith.constant 0 : index
    %505 = vector.load %arg6[%c3_234, %c0_235] : memref<5x256xf32, #tpu.memory_space<vmem>>, vector<1x256xf32>
    %506 = vector.broadcast %505 : vector<1x256xf32> to vector<2x256xf32>
    %507 = arith.addf %504, %506 : vector<2x256xf32>
    %cst_236 = arith.constant 0.000000e+00 : f32
    %508 = vector.broadcast %cst_236 : f32 to vector<2x256xf32>
    %509 = arith.maximumf %507, %508 : vector<2x256xf32>
    %510 = arith.truncf %509 : vector<2x256xf32> to vector<2x256xbf16>
    %c1152_237 = arith.constant 1152 : index
    %c0_238 = arith.constant 0 : index
    %511 = vector.load %arg3[%c1152_237, %c0_238] : memref<1408x256xbf16, #tpu.memory_space<vmem>>, vector<256x256xbf16>
    %cst_239 = arith.constant dense<0.000000e+00> : vector<2x256xf32>
    %512 = tpu.matmul %510, %511, %cst_239 {dimension_numbers = #tpu.dot_dimension_numbers<[1], [0], [0], [1], [0, 0, 1, 1], [], []>} : vector<2x256xbf16>, vector<256x256xbf16>, vector<2x256xf32> -> vector<2x256xf32>
    %c4_240 = arith.constant 4 : index
    %c0_241 = arith.constant 0 : index
    %513 = vector.load %arg6[%c4_240, %c0_241] : memref<5x256xf32, #tpu.memory_space<vmem>>, vector<1x256xf32>
    %514 = vector.broadcast %513 : vector<1x256xf32> to vector<2x256xf32>
    %515 = arith.addf %512, %514 : vector<2x256xf32>
    %516 = arith.addf %515, %501 : vector<2x256xf32>
    %cst_242 = arith.constant 0.000000e+00 : f32
    %517 = vector.broadcast %cst_242 : f32 to vector<2x256xf32>
    %518 = arith.maximumf %516, %517 : vector<2x256xf32>
    %519 = arith.mulf %518, %518 : vector<2x256xf32>
    %cst_243 = arith.constant dense<0.000000e+00> : vector<2xf32>
    %520 = vector.multi_reduction <add>, %519, %cst_243 [1] : vector<2x256xf32> to vector<2xf32>
    %521 = vector.shape_cast %520 : vector<2xf32> to vector<2x1xf32>
    %cst_244 = arith.constant 1.000000e-24 : f32
    %522 = vector.broadcast %cst_244 : f32 to vector<2x1xf32>
    %523 = arith.maximumf %521, %522 : vector<2x1xf32>
    %524 = math.rsqrt %523 : vector<2x1xf32>
    %525 = vector.broadcast %524 : vector<2x1xf32> to vector<2x256xf32>
    %526 = arith.mulf %518, %525 : vector<2x256xf32>
    %c0_245 = arith.constant 0 : index
    %c0_246 = arith.constant 0 : index
    %527 = vector.load %arg8[%c0_245, %c0_246] : memref<2x256xf32, #tpu.memory_space<vmem>>, vector<2x256xf32>
    tpu.vector_store %arg8[%c0_245, %c0_246], %526 {strides = array<i32>} : memref<2x256xf32, #tpu.memory_space<vmem>>, vector<2x256xf32>,
    return
  }
}

</mosaic_0001>

<bundles_post_ra>
// kernel: fwd.1
= control target key start
LH: loop header
LB: loop body
LE: loop exit
PB: predicated region body
PF: predicated region fallthrough
CT: control target
= control target key end

     0   :  { %v15138_v1 = vmov 0   ;;  %vm200_vm0 = vcmask 154624   ;;  %vm225_vm1 = vcmask 1040384   ;;  %vm226_vm2 = vcmask 1041408   ;;  %s18251_s0 = inlined_call_operand.vmem [shape: bf16[128,147], index: 0, kind: input, shape index: {}]   ;;  %s18252_s1 = inlined_call_operand.vmem [shape: bf16[2464,64], index: 1, kind: input, shape index: {}]   ;;  %s18253_s2 = inlined_call_operand.vmem [shape: bf16[4096,128], index: 2, kind: input, shape index: {}]   ;;  %s18254_s3 = inlined_call_operand.vmem [shape: bf16[1408,256], index: 3, kind: input, shape index: {}]   ;;  %s18255_s4 = inlined_call_operand.vmem [shape: f32[5,64], index: 4, kind: input, shape index: {}]   ;;  %s18256_s5 = inlined_call_operand.vmem [shape: f32[5,128], index: 5, kind: input, shape index: {}]   ;;  %s18257_s6 = inlined_call_operand.vmem [shape: f32[5,256], index: 6, kind: input, shape index: {}]   ;;  %s18258_s7 = inlined_call_operand.vmem [shape: bf16[1808,128], index: 7, kind: input, shape index: {}]   ;;  %s18259_s8 = inlined_call_operand.hbm [shape: f32[2,256], index: 8, kind: output, shape index: {}]  }
   0x1   :  { %v14306_v0 = vld [vmem:[%s18252_s1 + $0x38] sm:$0xff]   ;;  %232 = vmatprep.subr.bf16.mxu0 %v15138_v1  ;;  %v14307_v2 = vld [vmem:[%s18252_s1 + $0x30] sm:$0xff]   ;;  %v14308_v3 = vld [vmem:[%s18252_s1 + $0x28] sm:$0xff]   ;;  %v15139_v7 = vmov 65535  }
   0x2   :  { %233 = vmatpush1.bf16.msra.mxu0 %v14306_v0  ;;  %v14309_v4 = vld [vmem:[%s18252_s1 + $0x20] sm:$0xff]   ;;  %v14310_v6 = vld [vmem:[%s18252_s1 + $0x18] sm:$0xff]   ;;  %v227_v8 = vsel %vm225_vm1, 4294967295, %v15139_v7  ;;  %v14311_v9 = vld [vmem:[%s18252_s1 + $0x10] sm:$0xff]  }
   0x3   :  { %234 = vmatprep.subr.bf16.mxu0 %v15138_v1  ;;  %v14318_v5 = vld [vmem:[%s18251_s0 + $0x4] ss:$8 sps:$4 sm:$0xff]   ;;  %v228_v11 = vsel %vm226_vm2, %v227_v8, 0  ;;  %v14314_v13 = vld [vmem:[%s18252_s1 + $0x48] ss:$0 sps:$4 sm:$0x33]  }
   0x4   :  { %11351 = vmatprep.mubr.msk.bf16.mxu0 %vm200_vm0, %v14318_v5  ;;  %v14312_v10 = vld [vmem:[%s18252_s1 + $0x8] sm:$0xff]   ;;  %v14313_v12 = vld [vmem:[%s18252_s1] sm:$0xff]   ;;  %v230_v14 = vand.u32 %v14314_v13, %v228_v11  ;;  %v14319_v17 = vld [vmem:[%s18251_s0 + $0x14] ss:$8 sps:$4 sm:$0xff]  }
   0x5   :  { %v14315_v15 = vld [vmem:[%s18252_s1 + $0x40] sm:$0xff]   ;;  %v14321_v18 = vld [vmem:[%s18251_s0 + $0x10] ss:$8 sps:$4 sm:$0xff]   ;;  %v14325_v21 = vld [vmem:[%s18251_s0 + $0x34] ss:$8 sps:$4 sm:$0xff]  }
   0x6   :  { %235 = vmatpush1.bf16.msra.mxu0 %v14307_v2  ;;  %v14316_v16 = vld [vmem:[%s18251_s0] ss:$8 sps:$4 sm:$0xff]   ;;  %v14322_v19 = vld [vmem:[%s18251_s0 + $0x24] ss:$8 sps:$4 sm:$0xff]   ;;  %v14327_v22 = vld [vmem:[%s18251_s0 + $0x30] ss:$8 sps:$4 sm:$0xff]  }
   0x7   :  { %236 = vmatprep.subr.bf16.mxu0 %v15138_v1  ;;  %v14324_v20 = vld [vmem:[%s18251_s0 + $0x20] ss:$8 sps:$4 sm:$0xff]   ;;  %v14328_v23 = vld [vmem:[%s18251_s0 + $0x44] ss:$8 sps:$4 sm:$0xff]   ;;  %v14331_v25 = vld [vmem:[%s18251_s0 + $0x54] ss:$8 sps:$4 sm:$0xff]  }
   0x8   :  { %v14330_v24 = vld [vmem:[%s18251_s0 + $0x40] ss:$8 sps:$4 sm:$0xff]   ;;  %v14333_v26 = vld [vmem:[%s18251_s0 + $0x50] ss:$8 sps:$4 sm:$0xff]   ;;  %v14334_v27 = vld [vmem:[%s18251_s0 + $0x64] ss:$8 sps:$4 sm:$0xff]  }
   0x9   :  { %v14336_v28 = vld [vmem:[%s18251_s0 + $0x60] ss:$8 sps:$4 sm:$0xff]   ;;  %v14337_v29 = vld [vmem:[%s18251_s0 + $0x74] ss:$8 sps:$4 sm:$0xff]   ;;  %v14339_v30 = vld [vmem:[%s18251_s0 + $0x70] ss:$8 sps:$4 sm:$0xff]  }
   0xa   :  { %237 = vmatpush1.bf16.msra.mxu0 %v14308_v3  ;;  %v14340_v31 = vld [vmem:[%s18258_s7] sm:$0xff]  }
   0xb   :  { %238 = vmatprep.subr.bf16.mxu0 %v15138_v1  ;;  %12899 = vmatprep.mubr.bf16.mxu1 %v14340_v31  ;;  %v15291_v32 = vld [vmem:[%s18255_s4] ss:$0 sm:$0xff] }
   0xe   :  { %239 = vmatpush1.bf16.msra.mxu0 %v14309_v4 }
   0xf   :  { %240 = vmatprep.subr.bf16.mxu0 %v15138_v1 }
  0x12   :  { %241 = vmatpush1.bf16.msra.mxu0 %v14310_v6 }
  0x13   :  { %242 = vmatprep.subr.bf16.mxu0 %v15138_v1 }
  0x16   :  { %243 = vmatpush1.bf16.msra.mxu0 %v14311_v9 }
  0x17   :  { %244 = vmatprep.subr.bf16.mxu0 %v15138_v1 }
  0x1a   :  { %245 = vmatpush1.bf16.msra.mxu0 %v14312_v10 }
  0x1b   :  { %246 = vmatprep.subr.bf16.mxu0 %v15138_v1 }
  0x1e   :  { %247 = vmatpush1.bf16.msra.mxu0 %v14313_v12 }
  0x1f   :  { %260 = vmatprep.subr.bf16.mxu0 %v15138_v1 }
  0x22   :  { %261 = vmatpush2.bf16.msra.mxu0 %v230_v14 }
  0x23   :  { %262 = vmatprep.subr.bf16.mxu0 %v15138_v1 }
  0x26   :  { %263 = vmatpush2.bf16.msra.mxu0 %v14315_v15 }
  0x29   :  { %265 = vmatmul.mubr.bf16.vlgmr.msra.gmra.mxu0 %v14316_v16 }
  0x2a   :  { %11352 = vmatprep.mubr.msk.bf16.mxu0 %vm200_vm0, %v14319_v17 }
  0x31   :  { %273 = vmatmul.mubr.bf16.gmra.mxu0 %v14321_v18 }
  0x32   :  { %11353 = vmatprep.mubr.msk.bf16.mxu0 %vm200_vm0, %v14322_v19 }
  0x39   :  { %281 = vmatmul.mubr.bf16.gmra.mxu0 %v14324_v20 }
  0x3a   :  { %11354 = vmatprep.mubr.msk.bf16.mxu0 %vm200_vm0, %v14325_v21 }
  0x41   :  { %289 = vmatmul.mubr.bf16.gmra.mxu0 %v14327_v22 }
  0x42   :  { %11355 = vmatprep.mubr.msk.bf16.mxu0 %vm200_vm0, %v14328_v23 }
  0x49   :  { %297 = vmatmul.mubr.bf16.gmra.mxu0 %v14330_v24 }
  0x4a   :  { %11356 = vmatprep.mubr.msk.bf16.mxu0 %vm200_vm0, %v14331_v25 }
  0x51   :  { %305 = vmatmul.mubr.bf16.gmra.mxu0 %v14333_v26 }
  0x52   :  { %11357 = vmatprep.mubr.msk.bf16.mxu0 %vm200_vm0, %v14334_v27 }
  0x59   :  { %313 = vmatmul.mubr.bf16.gmra.mxu0 %v14336_v28 }
  0x5a   :  { %11358 = vmatprep.mubr.msk.bf16.mxu0 %vm200_vm0, %v14337_v29 }
  0x61   :  { %321 = vmatmul.mubr.bf16.gmra.mxu0 %v14339_v30 }
  0xe9   :  { %v266_v33 = vpop.f32.mrf.mxu0 }
  0xea   :  { %v267_v34 = vadd.f32 %v15291_v32, %v266_v33 }
  0xeb   :  { %v268_v35 = vpop.f32.mrf.mxu0 }
  0xec   :  { %v329_v36 = vmax.f32 %v267_v34, 0.0 }
  0xed   :  { %v269_v37 = vpop.f32.mrf.mxu0 }
  0xee   :  { %v270_v38 = vadd.f32 %v15291_v32, %v269_v37 }
  0xef   :  { %v271_v39 = vpop.f32.mrf.mxu0 }
  0xf0   :  { %v330_v40 = vmax.f32 %v270_v38, 0.0 }
  0xf1   :  { %v274_v41 = vpop.f32.mrf.mxu0 }
  0xf2   :  { %v15295_v42 = vpack.c.bf16 %v330_v40, %v329_v36  ;;  %v275_v43 = vadd.f32 %v15291_v32, %v274_v41 }
  0xf3   :  { %v276_v44 = vpop.f32.mrf.mxu0 }
  0xf4   :  { %v331_v45 = vmax.f32 %v275_v43, 0.0  ;;  %v14342_v44 = vld [vmem:[%s18258_s7 + $0x10] sm:$0xff]  }
  0xf5   :  { %v277_v46 = vpop.f32.mrf.mxu0 }
  0xf6   :  { %v278_v47 = vadd.f32 %v15291_v32, %v277_v46  ;;  %v14344_v46 = vld [vmem:[%s18258_s7 + $0x20] sm:$0xff]  }
  0xf7   :  { %v279_v48 = vpop.f32.mrf.mxu0 }
  0xf8   :  { %v332_v49 = vmax.f32 %v278_v47, 0.0  ;;  %v14345_v47 = vld [vmem:[%s18258_s7 + $0x28] sm:$0xff]   ;;  %v14347_v48 = vld [vmem:[%s18258_s7 + $0x38] sm:$0xff]  }
  0xf9   :  { %v282_v50 = vpop.f32.mrf.mxu0 }
  0xfa   :  { %v15299_v51 = vpack.c.bf16 %v332_v49, %v331_v45  ;;  %v283_v55 = vadd.f32 %v15291_v32, %v282_v50  ;;  %v14343_v45 = vld [vmem:[%s18258_s7 + $0x18] sm:$0xff]   ;;  %v14348_v49 = vld [vmem:[%s18258_s7 + $0x40] sm:$0xff]   ;;  %v14349_v50 = vld [vmem:[%s18258_s7 + $0x48] sm:$0xff]  }
  0xfb   :  { %v284_v52 = vpop.f32.mrf.mxu0 }
  0xfc   :  { %v333_v60 = vmax.f32 %v283_v55, 0.0  ;;  %v14351_v52 = vld [vmem:[%s18258_s7 + $0x58] sm:$0xff]   ;;  %v14354_v55 = vld [vmem:[%s18258_s7 + $0x70] sm:$0xff]  }
  0xfd   :  { %v285_v53 = vpop.f32.mrf.mxu0 }
  0xfe   :  { %v286_v56 = vadd.f32 %v15291_v32, %v285_v53  ;;  %v14352_v53 = vld [vmem:[%s18258_s7 + $0x60] sm:$0xff]  }
  0xff   :  { %v287_v54 = vpop.f32.mrf.mxu0 }
 0x100   :  { %v334_v61 = vmax.f32 %v286_v56, 0.0  ;;  %v14353_v54 = vld [vmem:[%s18258_s7 + $0x68] sm:$0xff]   ;;  %v14355_v56 = vld [vmem:[%s18258_s7 + $0x78] sm:$0xff]  }
 0x101   :  { %v290_v57 = vpop.f32.mrf.mxu0 }
 0x102   :  { %v291_v58 = vadd.f32 %v15291_v32, %v290_v57  ;;  %v347_v43 = vpack.c.bf16 %v334_v61, %v333_v60  ;;  %v14356_v57 = vld [vmem:[%s18258_s7 + $0x80] sm:$0xff]  }
 0x103   :  { %v292_v59 = vpop.f32.mrf.mxu0 }
 0x104   :  { %v335_v62 = vmax.f32 %v291_v58, 0.0  ;;  %v14357_v58 = vld [vmem:[%s18258_s7 + $0x88] sm:$0xff]  }
 0x105   :  { %v293_v63 = vpop.f32.mrf.mxu0 }
 0x106   :  { %v294_v0 = vadd.f32 %v15291_v32, %v293_v63 }
 0x107   :  { %v295_v2 = vpop.f32.mrf.mxu0 }
 0x108   :  { %v336_v3 = vmax.f32 %v294_v0, 0.0 }
 0x109   :  { %v298_v4 = vpop.f32.mrf.mxu0 }
 0x10a   :  { %v299_v5 = vadd.f32 %v15291_v32, %v298_v4  ;;  %v348_v41 = vpack.c.bf16 %v336_v3, %v335_v62 }
 0x10b   :  { %v300_v6 = vpop.f32.mrf.mxu0 }
 0x10c   :  { %v337_v7 = vmax.f32 %v299_v5, 0.0 }
 0x10d   :  { %v301_v8 = vpop.f32.mrf.mxu0 }
 0x10e   :  { %v302_v9 = vadd.f32 %v15291_v32, %v301_v8 }
 0x10f   :  { %v303_v10 = vpop.f32.mrf.mxu0 }
 0x110   :  { %v338_v11 = vmax.f32 %v302_v9, 0.0 }
 0x111   :  { %v306_v12 = vpop.f32.mrf.mxu0 }
 0x112   :  { %v307_v13 = vadd.f32 %v15291_v32, %v306_v12  ;;  %v349_v40 = vpack.c.bf16 %v338_v11, %v337_v7 }
 0x113   :  { %v308_v14 = vpop.f32.mrf.mxu0 }
 0x114   :  { %v339_v15 = vmax.f32 %v307_v13, 0.0 }
 0x115   :  { %v309_v16 = vpop.f32.mrf.mxu0 }
 0x116   :  { %v310_v17 = vadd.f32 %v15291_v32, %v309_v16 }
 0x117   :  { %v311_v18 = vpop.f32.mrf.mxu0 }
 0x118   :  { %v340_v19 = vmax.f32 %v310_v17, 0.0 }
 0x119   :  { %v314_v20 = vpop.f32.mrf.mxu0 }
 0x11a   :  { %v315_v21 = vadd.f32 %v15291_v32, %v314_v20  ;;  %v350_v39 = vpack.c.bf16 %v340_v19, %v339_v15 }
 0x11b   :  { %v316_v22 = vpop.f32.mrf.mxu0 }
 0x11c   :  { %v341_v23 = vmax.f32 %v315_v21, 0.0 }
 0x11d   :  { %v317_v24 = vpop.f32.mrf.mxu0 }
 0x11e   :  { %v318_v25 = vadd.f32 %v15291_v32, %v317_v24 }
 0x11f   :  { %v319_v26 = vpop.f32.mrf.mxu0 }
 0x120   :  { %v342_v27 = vmax.f32 %v318_v25, 0.0 }
 0x121   :  { %v322_v28 = vpop.f32.mrf.mxu0 }
 0x122   :  { %v323_v29 = vadd.f32 %v15291_v32, %v322_v28  ;;  %v351_v38 = vpack.c.bf16 %v342_v27, %v341_v23 }
 0x123   :  { %v324_v30 = vpop.f32.mrf.mxu0 }
 0x124   :  { %v343_v31 = vmax.f32 %v323_v29, 0.0 }
 0x125   :  { %v325_v33 = vpop.f32.mrf.mxu0 }
 0x126   :  { %v326_v34 = vadd.f32 %v15291_v32, %v325_v33  ;;  %v14341_v32 = vld [vmem:[%s18258_s7 + $0x8] sm:$0xff]  }
 0x127   :  { %v327_v35 = vpop.f32.mrf.mxu0 }
 0x128   :  { %v344_v36 = vmax.f32 %v326_v34, 0.0 }
 0x12a   :  { %v352_v37 = vpack.c.bf16 %v344_v36, %v343_v31 }
 0x12c   :  { %12883 = vmatprep.subr.bf16.mxu1 %v352_v37 }
 0x12d   :  { %12884 = vmatpush3.bf16.msra.mxu1 %v352_v37 }
 0x12e   :  { %12885 = vmatprep.subr.bf16.mxu1 %v351_v38 }
 0x131   :  { %12886 = vmatpush3.bf16.msra.mxu1 %v351_v38 }
 0x132   :  { %12887 = vmatprep.subr.bf16.mxu1 %v350_v39 }
 0x135   :  { %12888 = vmatpush3.bf16.msra.mxu1 %v350_v39 }
 0x136   :  { %12889 = vmatprep.subr.bf16.mxu1 %v349_v40 }
 0x139   :  { %12890 = vmatpush3.bf16.msra.mxu1 %v349_v40 }
 0x13a   :  { %12891 = vmatprep.subr.bf16.mxu1 %v348_v41 }
 0x13d   :  { %12892 = vmatpush3.bf16.msra.mxu1 %v348_v41 }
 0x13e   :  { %12893 = vmatprep.subr.bf16.mxu1 %v347_v43 }
 0x141   :  { %12894 = vmatpush3.bf16.msra.mxu1 %v347_v43 }
 0x142   :  { %12895 = vmatprep.subr.bf16.mxu1 %v15299_v51 }
 0x145   :  { %12896 = vmatpush3.bf16.msra.mxu1 %v15299_v51  ;;  %v14350_v51 = vld [vmem:[%s18258_s7 + $0x50] sm:$0xff]  }
 0x146   :  { %12897 = vmatprep.subr.bf16.mxu1 %v15295_v42 }
 0x149   :  { %12898 = vmatpush3.bf16.msra.mxu1 %v15295_v42  ;;  %v14346_v42 = vld [vmem:[%s18258_s7 + $0x30] sm:$0xff]  }
 0x14c   :  { %12900 = vmatmul.mubr.bf16.vlgmr.msra.gmra.mxu1 %v14341_v32 }
 0x14d   :  { %12903 = vmatprep.mubr.bf16.mxu1 %v14342_v44 }
 0x154   :  { %12904 = vmatmul.mubr.bf16.gmra.mxu1 %v14343_v45 }
 0x155   :  { %12907 = vmatprep.mubr.bf16.mxu1 %v14344_v46 }
 0x15c   :  { %12908 = vmatmul.mubr.bf16.gmra.mxu1 %v14345_v47 }
 0x15d   :  { %12911 = vmatprep.mubr.bf16.mxu1 %v14346_v42 }
 0x164   :  { %12912 = vmatmul.mubr.bf16.gmra.mxu1 %v14347_v48 }
 0x165   :  { %12915 = vmatprep.mubr.bf16.mxu1 %v14348_v49 }
 0x16c   :  { %12916 = vmatmul.mubr.bf16.gmra.mxu1 %v14349_v50 }
 0x16d   :  { %12919 = vmatprep.mubr.bf16.mxu1 %v14350_v51 }
 0x174   :  { %12920 = vmatmul.mubr.bf16.gmra.mxu1 %v14351_v52 }
 0x175   :  { %12923 = vmatprep.mubr.bf16.mxu1 %v14352_v53 }
 0x17c   :  { %12924 = vmatmul.mubr.bf16.gmra.mxu1 %v14353_v54 }
 0x17d   :  { %12927 = vmatprep.mubr.bf16.mxu1 %v14354_v55 }
 0x184   :  { %12928 = vmatmul.mubr.bf16.gmra.mxu1 %v14355_v56 }
 0x185   :  { %12931 = vmatprep.mubr.bf16.mxu1 %v14356_v57 }
 0x18c   :  { %12932 = vmatmul.mubr.bf16.gmra.mxu1 %v14357_v58 }
 0x18d   :  { %13 = vsyncpa [#allocation3], 0  ;;  %v14358_v59 = vld [vmem:[%s18258_s7 + $0x90] sm:$0xff]   ;;  %vm834_vm3 = vcmask 261120   ;;  %vm1110_vm4 = vcmask 523264   ;;  %vm15141_vm5 = vmmov 0  }
 0x18e   :  { %12939 = vmatprep.mubr.msk.bf16.mxu0 %vm834_vm3, %v14358_v59  ;;  %v14370_v60 = vld [vmem:[%s18258_s7 + $0xf0] sm:$0xff]   ;;  %vm6513_vm6 = vcmask 1043456   ;;  %vm6497_vm7 = vcmask 64512  }
 0x18f   :  { %12963 = vmatprep.mubr.msk.bf16.mxu1 %vm834_vm3, %v14370_v60 }
 0x20c   :  { %v12901_v61 = vpop.f32.mrf.mxu1 }
 0x20e   :  { %v531_v62 = vpop.f32.mrf.mxu1 }
 0x210   :  { %v12902_v63 = vpop.f32.mrf.mxu1 }
 0x212   :  { %v534_v0 = vpop.f32.mrf.mxu1 }
 0x214   :  { %v12905_v2 = vpop.f32.mrf.mxu1 }
 0x215   :  { %v676_v26 = vmax.f32 %v12901_v61, %v12905_v2 }
 0x216   :  { %v547_v3 = vpop.f32.mrf.mxu1 }
 0x217   :  { %v674_v29 = vmax.f32 %v531_v62, %v547_v3 }
 0x218   :  { %v12906_v4 = vpop.f32.mrf.mxu1 }
 0x219   :  { %v677_v27 = vmax.f32 %v12902_v63, %v12906_v4 }
 0x21a   :  { %v550_v5 = vpop.f32.mrf.mxu1 }
 0x21b   :  { %v675_v30 = vmax.f32 %v534_v0, %v550_v5  ;;  %v14359_v5 = vld [vmem:[%s18258_s7 + $0x98] sm:$0xff]  }
 0x21c   :  { %v12909_v6 = vpop.f32.mrf.mxu1 }
 0x21d   :  { %v680_v31 = vmax.f32 %v676_v26, %v12909_v6  ;;  %v14371_v6 = vld [vmem:[%s18258_s7 + $0xf8] sm:$0xff]   ;;  %v14393_v26 = vld [vmem:[%s18252_s1 + $0x108] sm:$0xff]  }
 0x21e   :  { %v563_v7 = vpop.f32.mrf.mxu1 }
 0x21f   :  { %v678_v35 = vmax.f32 %v674_v29, %v563_v7  ;;  %v14360_v7 = vld [vmem:[%s18258_s7 + $0xa0] sm:$0xff]   ;;  %v14399_v29 = vld [vmem:[%s18252_s1 + $0xf0] sm:$0xff]  }
 0x220   :  { %v12910_v8 = vpop.f32.mrf.mxu1 }
 0x221   :  { %v681_v33 = vmax.f32 %v677_v27, %v12910_v8  ;;  %v14372_v8 = vld [vmem:[%s18258_s7 + $0x100] sm:$0xff]  }
 0x222   :  { %v566_v9 = vpop.f32.mrf.mxu1  ;;  %v14395_v27 = vld [vmem:[%s18252_s1 + $0x100] sm:$0xff]  }
 0x223   :  { %v679_v36 = vmax.f32 %v675_v30, %v566_v9  ;;  %v14361_v9 = vld [vmem:[%s18258_s7 + $0xa8] sm:$0xff]  }
 0x224   :  { %v12913_v10 = vpop.f32.mrf.mxu1  ;;  %v15482_v30 = vld [vmem:[%s18252_s1 + $0x148] sm:$0xff]  }
 0x225   :  { %v684_v37 = vmax.f32 %v680_v31, %v12913_v10  ;;  %v14373_v10 = vld [vmem:[%s18258_s7 + $0x108] sm:$0xff]  }
 0x226   :  { %v579_v11 = vpop.f32.mrf.mxu1 }
 0x227   :  { %v682_v40 = vmax.f32 %v678_v35, %v579_v11  ;;  %v14362_v11 = vld [vmem:[%s18258_s7 + $0xb0] sm:$0xff]  }
 0x228   :  { %v12914_v12 = vpop.f32.mrf.mxu1 }
 0x229   :  { %v685_v38 = vmax.f32 %v681_v33, %v12914_v12  ;;  %v14374_v12 = vld [vmem:[%s18258_s7 + $0x110] sm:$0xff]  }
 0x22a   :  { %v582_v13 = vpop.f32.mrf.mxu1 }
 0x22b   :  { %v683_v41 = vmax.f32 %v679_v36, %v582_v13  ;;  %v14363_v13 = vld [vmem:[%s18258_s7 + $0xb8] sm:$0xff]  }
 0x22c   :  { %v12917_v14 = vpop.f32.mrf.mxu1 }
 0x22d   :  { %v688_v43 = vmax.f32 %v684_v37, %v12917_v14  ;;  %v14375_v14 = vld [vmem:[%s18258_s7 + $0x118] sm:$0xff]  }
 0x22e   :  { %v595_v15 = vpop.f32.mrf.mxu1 }
 0x22f   :  { %v686_v45 = vmax.f32 %v682_v40, %v595_v15  ;;  %v14364_v15 = vld [vmem:[%s18258_s7 + $0xc0] sm:$0xff]  }
 0x230   :  { %v12918_v16 = vpop.f32.mrf.mxu1 }
 0x231   :  { %v689_v32 = vmax.f32 %v685_v38, %v12918_v16  ;;  %v14365_v16 = vld [vmem:[%s18258_s7 + $0xc8] sm:$0xff]  }
 0x232   :  { %v598_v17 = vpop.f32.mrf.mxu1 }
 0x233   :  { %v687_v46 = vmax.f32 %v683_v41, %v598_v17  ;;  %v14366_v17 = vld [vmem:[%s18258_s7 + $0xd0] sm:$0xff]  }
 0x234   :  { %v12921_v18 = vpop.f32.mrf.mxu1 }
 0x235   :  { %v692_v47 = vmax.f32 %v688_v43, %v12921_v18  ;;  %v14367_v18 = vld [vmem:[%s18258_s7 + $0xd8] sm:$0xff]   ;;  %v14381_v43 = vld [vmem:[%s18252_s1 + $0x60] sm:$0xff]  }
 0x236   :  { %v611_v19 = vpop.f32.mrf.mxu1 }
 0x237   :  { %v690_v49 = vmax.f32 %v686_v45, %v611_v19  ;;  %v14368_v19 = vld [vmem:[%s18258_s7 + $0xe0] sm:$0xff]  }
 0x238   :  { %v12922_v20 = vpop.f32.mrf.mxu1 }
 0x239   :  { %v693_v42 = vmax.f32 %v689_v32, %v12922_v20  ;;  %v14369_v20 = vld [vmem:[%s18258_s7 + $0xe8] sm:$0xff]  }
 0x23a   :  { %v614_v21 = vpop.f32.mrf.mxu1 }
 0x23b   :  { %v691_v50 = vmax.f32 %v687_v46, %v614_v21  ;;  %v14376_v21 = vld [vmem:[%s18252_s1 + $0x88] sm:$0xff]  }
 0x23c   :  { %v12925_v22 = vpop.f32.mrf.mxu1 }
 0x23d   :  { %v696_v51 = vmax.f32 %v692_v47, %v12925_v22  ;;  %v14377_v22 = vld [vmem:[%s18252_s1 + $0x80] sm:$0xff]   ;;  %v14382_v47 = vld [vmem:[%s18252_s1 + $0x58] sm:$0xff]  }
 0x23e   :  { %v627_v23 = vpop.f32.mrf.mxu1 }
 0x23f   :  { %v694_v54 = vmax.f32 %v690_v49, %v627_v23  ;;  %v14378_v23 = vld [vmem:[%s18252_s1 + $0x78] sm:$0xff]  }
 0x240   :  { %v12926_v24 = vpop.f32.mrf.mxu1 }
 0x241   :  { %v697_v52 = vmax.f32 %v693_v42, %v12926_v24  ;;  %v14379_v24 = vld [vmem:[%s18252_s1 + $0x70] sm:$0xff]  }
 0x242   :  { %v630_v25 = vpop.f32.mrf.mxu1 }
 0x243   :  { %v695_v55 = vmax.f32 %v691_v50, %v630_v25  ;;  %v14380_v25 = vld [vmem:[%s18252_s1 + $0x68] sm:$0xff]   ;;  %v14383_v50 = vld [vmem:[%s18252_s1 + $0x50] sm:$0xff]  }
 0x244   :  { %v12929_v28 = vpop.f32.mrf.mxu1 }
 0x245   :  { %v700_v56 = vmax.f32 %v696_v51, %v12929_v28  ;;  %v14397_v28 = vld [vmem:[%s18252_s1 + $0xf8] sm:$0xff]  }
 0x246   :  { %v643_v34 = vpop.f32.mrf.mxu1 }
 0x247   :  { %v698_v59 = vmax.f32 %v694_v54, %v643_v34  ;;  %v14384_v54 = vld [vmem:[%s18252_s1 + $0xa8] sm:$0xff]  }
 0x248   :  { %v12930_v39 = vpop.f32.mrf.mxu1 }
 0x249   :  { %v701_v57 = vmax.f32 %v697_v52, %v12930_v39 }
 0x24a   :  { %v646_v44 = vpop.f32.mrf.mxu1 }
 0x24b   :  { %v699_v60 = vmax.f32 %v695_v55, %v646_v44 }
 0x24c   :  { %v12933_v48 = vpop.f32.mrf.mxu1 }
 0x24d   :  { %v15376_v61 = vmax.f32 %v700_v56, %v12933_v48 }
 0x24e   :  { %v659_v53 = vpop.f32.mrf.mxu1 }
 0x24f   :  { %v15380_v0 = vmax.f32 %v698_v59, %v659_v53 }
 0x250   :  { %v12934_v58 = vpop.f32.mrf.mxu1 }
 0x251   :  { %v15378_v62 = vmax.f32 %v701_v57, %v12934_v58 }
 0x252   :  { %v662_v63 = vpop.f32.mrf.mxu1 }
 0x253   :  { %v707_v2 = vpack.c.bf16 %v15378_v62, %v15376_v61  ;;  %v15384_v3 = vmax.f32 %v699_v60, %v662_v63  ;;  %v14385_v60 = vld [vmem:[%s18252_s1 + $0xa0] sm:$0xff]  }
 0x255   :  { %v706_v4 = vpack.c.bf16 %v15384_v3, %v15380_v0  ;;  %12935 = vmatprep.subr.bf16.mxu0 %v707_v2  ;;  %14297 = vmatprep.subr.bf16.mxu1 %v707_v2 }
 0x256   :  { %12936 = vmatpush3.bf16.msra.mxu0 %v707_v2  ;;  %14299 = vmatpush3.bf16.msra.mxu1 %v707_v2 }
 0x257   :  { %12937 = vmatprep.subr.bf16.mxu0 %v706_v4  ;;  %14298 = vmatprep.subr.bf16.mxu1 %v706_v4 }
 0x25a   :  { %12938 = vmatpush3.bf16.msra.mxu0 %v706_v4  ;;  %14300 = vmatpush3.bf16.msra.mxu1 %v706_v4 }
 0x25b   :  { %12975 = vmatprep.subr.bf16.mxu1 %v14376_v21  ;;  %13035 = vmatprep.subr.bf16.mxu0 %v14393_v26 }
 0x25d   :  { %12940 = vmatmul.mubr.msk.bf16.vlgmr.msra.gmra.mxu0 %vm834_vm3, %v14359_v5  ;;  %12964 = vmatmul.mubr.msk.bf16.vlgmr.msra.gmra.mxu1 %vm834_vm3, %v14371_v6  ;;  %v14386_v5 = vld [vmem:[%s18252_s1 + $0x98] sm:$0xff]  }
 0x25e   :  { %12943 = vmatprep.mubr.msk.bf16.mxu0 %vm834_vm3, %v14360_v7  ;;  %12967 = vmatprep.mubr.msk.bf16.mxu1 %vm834_vm3, %v14372_v8 }
 0x25f   :  { %12976 = vmatpush3.bf16.msra.mxu1 %v14376_v21  ;;  %13036 = vmatpush3.bf16.msra.mxu0 %v14393_v26  ;;  %v14389_v21 = vld [vmem:[%s18252_s1 + $0xc0] sm:$0xff]   ;;  %v14391_v26 = vld [vmem:[%s18252_s1 + $0xb0] sm:$0xff]  }
 0x260   :  { %12977 = vmatprep.subr.bf16.mxu1 %v14377_v22  ;;  %13037 = vmatprep.subr.bf16.mxu0 %v14395_v27 }
 0x263   :  { %12978 = vmatpush3.bf16.msra.mxu1 %v14377_v22  ;;  %13038 = vmatpush3.bf16.msra.mxu0 %v14395_v27  ;;  %v14403_v22 = vld [vmem:[%s18252_s1 + $0x140] sm:$0xff]   ;;  %v14407_v27 = vld [vmem:[%s18252_s1 + $0x130] sm:$0xff]  }
 0x264   :  { %12979 = vmatprep.subr.bf16.mxu1 %v14378_v23  ;;  %13039 = vmatprep.subr.bf16.mxu0 %v14397_v28 }
 0x265   :  { %12944 = vmatmul.mubr.msk.bf16.gmra.mxu0 %vm834_vm3, %v14361_v9  ;;  %12968 = vmatmul.mubr.msk.bf16.gmra.mxu1 %vm834_vm3, %v14373_v10  ;;  %v14387_v9 = vld [vmem:[%s18252_s1 + $0x90] sm:$0xff]  }
 0x266   :  { %12947 = vmatprep.mubr.msk.bf16.mxu0 %vm834_vm3, %v14362_v11  ;;  %12971 = vmatprep.mubr.msk.bf16.mxu1 %vm834_vm3, %v14374_v12 }
 0x267   :  { %12980 = vmatpush3.bf16.msra.mxu1 %v14378_v23  ;;  %13040 = vmatpush3.bf16.msra.mxu0 %v14397_v28  ;;  %v14392_v28 = vld [vmem:[%s18252_s1 + $0xe8] sm:$0xff]  }
 0x268   :  { %12981 = vmatprep.subr.bf16.mxu1 %v14379_v24  ;;  %13041 = vmatprep.subr.bf16.mxu0 %v14399_v29 }
 0x26b   :  { %12982 = vmatpush3.bf16.msra.mxu1 %v14379_v24  ;;  %13042 = vmatpush3.bf16.msra.mxu0 %v14399_v29  ;;  %v14390_v24 = vld [vmem:[%s18252_s1 + $0xb8] sm:$0xff]  }
 0x26c   :  { %12987 = vmatprep.subr.bf16.mxu1 %v14380_v25  ;;  %13059 = vmatprep.subr.bf16.mxu0 %v15482_v30 }
 0x26d   :  { %12948 = vmatmul.mubr.msk.bf16.gmra.mxu0 %vm834_vm3, %v14363_v13  ;;  %12972 = vmatmul.mubr.msk.bf16.gmra.mxu1 %vm834_vm3, %v14375_v14  ;;  %v14388_v13 = vld [vmem:[%s18252_s1 + $0xc8] sm:$0xff]  }
 0x26e   :  { %12951 = vmatprep.mubr.msk.bf16.mxu0 %vm834_vm3, %v14364_v15 }
 0x275   :  { %12952 = vmatmul.mubr.msk.bf16.gmra.mxu0 %vm834_vm3, %v14365_v16 }
 0x276   :  { %12955 = vmatprep.mubr.msk.bf16.mxu0 %vm834_vm3, %v14366_v17 }
 0x27d   :  { %12956 = vmatmul.mubr.msk.bf16.gmra.mxu0 %vm834_vm3, %v14367_v18 }
 0x27e   :  { %12959 = vmatprep.mubr.msk.bf16.mxu0 %vm834_vm3, %v14368_v19 }
 0x285   :  { %12960 = vmatmul.mubr.msk.bf16.gmra.mxu0 %vm834_vm3, %v14369_v20 }
 0x31d   :  { %v12941_v31 = vpop.f32.mrf.mxu0  ;;  %v15492_v46 = vpop.f32.mrf.mxu1 }
 0x31f   :  { %v923_v33 = vpop.f32.mrf.mxu0  ;;  %v15498_v49 = vpop.f32.mrf.mxu1 }
 0x321   :  { %v12942_v34 = vpop.f32.mrf.mxu0  ;;  %v15505_v53 = vpop.f32.mrf.mxu1 }
 0x322   :  { %v1067_v59 = vpack.c.bf16 %v12942_v34, %v12941_v31  ;;  %v14394_v31 = vld [vmem:[%s18252_s1 + $0xe0] sm:$0xff]   ;;  %v14396_v34 = vld [vmem:[%s18252_s1 + $0xd8] sm:$0xff]  }
 0x323   :  { %v926_v35 = vpop.f32.mrf.mxu0  ;;  %v15512_v57 = vpop.f32.mrf.mxu1 }
 0x324   :  { %v1066_v44 = vpack.c.bf16 %v926_v35, %v923_v33  ;;  %v14398_v35 = vld [vmem:[%s18252_s1 + $0xd0] sm:$0xff]  }
 0x325   :  { %v12945_v36 = vpop.f32.mrf.mxu0  ;;  %v15520_v4 = vpop.f32.mrf.mxu1 }
 0x327   :  { %v939_v37 = vpop.f32.mrf.mxu0  ;;  %v1035_v8 = vpop.f32.mrf.mxu1 }
 0x329   :  { %v12946_v38 = vpop.f32.mrf.mxu0  ;;  %v12970_v12 = vpop.f32.mrf.mxu1 }
 0x32a   :  { %v1077_v41 = vpack.c.bf16 %v12946_v38, %v12945_v36  ;;  %v1711_v33 = vpack.c.bf16 %v12970_v12, %v15520_v4  ;;  %v14400_v36 = vld [vmem:[%s18252_s1 + $0x128] sm:$0xff]  }
 0x32b   :  { %v942_v39 = vpop.f32.mrf.mxu0  ;;  %v1038_v17 = vpop.f32.mrf.mxu1 }
 0x32c   :  { %v1076_v40 = vpack.c.bf16 %v942_v39, %v939_v37  ;;  %v1710_v23 = vpack.c.bf16 %v1038_v17, %v1035_v8  ;;  %v1617_v37 = vpack.c.bf16 %v15512_v57, %v15498_v49  ;;  %v14402_v39 = vld [vmem:[%s18252_s1 + $0x120] sm:$0xff]  }
 0x32d   :  { %v15488_v32 = vpop.f32.mrf.mxu0  ;;  %v14409_v49 = vld [vmem:[%s18252_s1 + $0x160] sm:$0xff]  }
 0x32e   :  { %12983 = vmatprep.mubr.msk.bf16.mxu1 %vm1110_vm4, %v1076_v40  ;;  %v12973_v40 = vpop.f32.mrf.mxu1 }
 0x32f   :  { %12984 = vmatmul.mubr.msk.bf16.vlgmr.msra.gmra.mxu1 %vm1110_vm4, %v1077_v41  ;;  %v955_v45 = vpop.f32.mrf.mxu0  ;;  %v14404_v41 = vld [vmem:[%s18252_s1 + $0x118] sm:$0xff]  }
 0x330   :  { %12988 = vmatpush3.bf16.msra.mxu1 %v14380_v25  ;;  %12995 = vmatprep.mubr.msk.bf16.mxu1 %vm1110_vm4, %v1066_v44  ;;  %v14405_v25 = vld [vmem:[%s18252_s1 + $0x138] sm:$0xff]  }
 0x331   :  { %12989 = vmatprep.subr.bf16.mxu1 %v14381_v43  ;;  %v12950_v42 = vpop.f32.mrf.mxu0 }
 0x332   :  { %v1246_v20 = vpack.c.bf16 %v12950_v42, %v15488_v32  ;;  %v14406_v32 = vld [vmem:[%s18252_s1 + $0x110] sm:$0xff]  }
 0x333   :  { %v958_v48 = vpop.f32.mrf.mxu0 }
 0x334   :  { %12990 = vmatpush3.bf16.msra.mxu1 %v14381_v43  ;;  %v1245_v58 = vpack.c.bf16 %v958_v48, %v955_v45  ;;  %v1051_v43 = vpop.f32.mrf.mxu1  ;;  %v14408_v45 = vld [vmem:[%s18252_s1 + $0x168] sm:$0xff]   ;;  %v1618_v48 = vpack.c.bf16 %v15505_v53, %v15492_v46  ;;  %v14411_v46 = vld [vmem:[%s18252_s1 + $0x150] sm:$0xff]  }
 0x335   :  { %12991 = vmatprep.subr.bf16.mxu1 %v14382_v47  ;;  %v15503_v51 = vpop.f32.mrf.mxu0 }
 0x336   :  { %v12974_v44 = vpop.f32.mrf.mxu1 }
 0x337   :  { %v971_v52 = vpop.f32.mrf.mxu0 }
 0x338   :  { %12992 = vmatpush3.bf16.msra.mxu1 %v14382_v47  ;;  %v1054_v47 = vpop.f32.mrf.mxu1 }
 0x339   :  { %12993 = vmatprep.subr.bf16.mxu1 %v14383_v50  ;;  %v15510_v55 = vpop.f32.mrf.mxu0  ;;  %v1803_v42 = vpack.c.bf16 %v1054_v47, %v1051_v43 }
 0x33b   :  { %v974_v56 = vpop.f32.mrf.mxu0 }
 0x33c   :  { %12994 = vmatpush3.bf16.msra.mxu1 %v14383_v50  ;;  %v1338_v18 = vpack.c.bf16 %v974_v56, %v971_v52  ;;  %v14410_v50 = vld [vmem:[%s18252_s1 + $0x158] sm:$0xff]   ;;  %v14412_v52 = vld [vmem:[%s18258_s7 + $0x120] sm:$0xff]  }
 0x33d   :  { %12999 = vmatprep.subr.bf16.mxu1 %v14384_v54  ;;  %v15517_v63 = vpop.f32.mrf.mxu0 }
 0x33f   :  { %12996 = vmatmul.mubr.msk.bf16.vlgmr.msra.gmra.mxu1 %vm1110_vm4, %v1067_v59  ;;  %v987_v2 = vpop.f32.mrf.mxu0 }
 0x340   :  { %13000 = vmatpush3.bf16.msra.mxu1 %v14384_v54  ;;  %13007 = vmatprep.mubr.msk.bf16.mxu1 %vm1110_vm4, %v1245_v58 }
 0x341   :  { %13001 = vmatprep.subr.bf16.mxu1 %v14385_v60  ;;  %v15526_v6 = vpop.f32.mrf.mxu0 }
 0x342   :  { %v1432_v38 = vpack.c.bf16 %v15526_v6, %v15517_v63 }
 0x343   :  { %v990_v7 = vpop.f32.mrf.mxu0 }
 0x344   :  { %13002 = vmatpush3.bf16.msra.mxu1 %v14385_v60  ;;  %v1431_v29 = vpack.c.bf16 %v990_v7, %v987_v2 }
 0x345   :  { %13003 = vmatprep.subr.bf16.mxu1 %v14386_v5  ;;  %v12961_v10 = vpop.f32.mrf.mxu0 }
 0x347   :  { %v1003_v11 = vpop.f32.mrf.mxu0 }
 0x348   :  { %13004 = vmatpush3.bf16.msra.mxu1 %v14386_v5 }
 0x349   :  { %13005 = vmatprep.subr.bf16.mxu1 %v14387_v9  ;;  %v12962_v14 = vpop.f32.mrf.mxu0 }
 0x34a   :  { %v1525_v15 = vpack.c.bf16 %v12962_v14, %v12961_v10 }
 0x34b   :  { %v1006_v16 = vpop.f32.mrf.mxu0 }
 0x34c   :  { %13006 = vmatpush3.bf16.msra.mxu1 %v14387_v9  ;;  %v1524_v19 = vpack.c.bf16 %v1006_v16, %v1003_v11 }
 0x34d   :  { %13011 = vmatprep.subr.bf16.mxu1 %v14388_v13 }
 0x34e   :  { %13043 = vmatprep.mubr.msk.bf16.mxu0 %vm1110_vm4, %v1524_v19 }
 0x34f   :  { %13008 = vmatmul.mubr.msk.bf16.vlgmr.msra.gmra.mxu1 %vm1110_vm4, %v1246_v20  ;;  %13044 = vmatmul.mubr.msk.bf16.vlgmr.msra.gmra.mxu0 %vm1110_vm4, %v1525_v15 }
 0x350   :  { %13012 = vmatpush3.bf16.msra.mxu1 %v14388_v13  ;;  %13019 = vmatprep.mubr.msk.bf16.mxu1 %vm1110_vm4, %v1338_v18 }
 0x351   :  { %13013 = vmatprep.subr.bf16.mxu1 %v14389_v21  ;;  %13060 = vmatpush3.bf16.msra.mxu0 %v15482_v30  ;;  %v1339_v30 = vpack.c.bf16 %v15510_v55, %v15503_v51  ;;  %v1804_v51 = vpack.c.bf16 %v12974_v44, %v12973_v40 }
 0x352   :  { %13061 = vmatprep.subr.bf16.mxu0 %v14403_v22  ;;  %13067 = vmatprep.mubr.msk.bf16.mxu0 %vm1110_vm4, %v1710_v23 }
 0x354   :  { %13014 = vmatpush3.bf16.msra.mxu1 %v14389_v21 }
 0x355   :  { %13015 = vmatprep.subr.bf16.mxu1 %v14390_v24  ;;  %13062 = vmatpush3.bf16.msra.mxu0 %v14403_v22 }
 0x356   :  { %13063 = vmatprep.subr.bf16.mxu0 %v14405_v25 }
 0x358   :  { %13016 = vmatpush3.bf16.msra.mxu1 %v14390_v24 }
 0x359   :  { %13017 = vmatprep.subr.bf16.mxu1 %v14391_v26  ;;  %13064 = vmatpush3.bf16.msra.mxu0 %v14405_v25 }
 0x35a   :  { %13065 = vmatprep.subr.bf16.mxu0 %v14407_v27 }
 0x35c   :  { %13018 = vmatpush3.bf16.msra.mxu1 %v14391_v26 }
 0x35d   :  { %13023 = vmatprep.subr.bf16.mxu1 %v14392_v28  ;;  %13066 = vmatpush3.bf16.msra.mxu0 %v14407_v27 }
 0x35f   :  { %13020 = vmatmul.mubr.msk.bf16.vlgmr.msra.gmra.mxu1 %vm1110_vm4, %v1339_v30 }
 0x360   :  { %13024 = vmatpush3.bf16.msra.mxu1 %v14392_v28  ;;  %13031 = vmatprep.mubr.msk.bf16.mxu1 %vm1110_vm4, %v1431_v29 }
 0x361   :  { %13025 = vmatprep.subr.bf16.mxu1 %v14394_v31  ;;  %13068 = vmatmul.mubr.msk.bf16.vlgmr.msra.gmra.mxu0 %vm1110_vm4, %v1711_v33 }
 0x362   :  { %13087 = vmatprep.mubr.msk.bf16.mxu0 %vm834_vm3, %v14412_v52 }
 0x364   :  { %13026 = vmatpush3.bf16.msra.mxu1 %v14394_v31 }
 0x365   :  { %13027 = vmatprep.subr.bf16.mxu1 %v14396_v34 }
 0x368   :  { %13028 = vmatpush3.bf16.msra.mxu1 %v14396_v34 }
 0x369   :  { %13029 = vmatprep.subr.bf16.mxu1 %v14398_v35 }
 0x36c   :  { %13030 = vmatpush3.bf16.msra.mxu1 %v14398_v35 }
 0x36d   :  { %13047 = vmatprep.subr.bf16.mxu1 %v14400_v36 }
 0x36f   :  { %13032 = vmatmul.mubr.msk.bf16.vlgmr.msra.gmra.mxu1 %vm1110_vm4, %v1432_v38 }
 0x370   :  { %13048 = vmatpush3.bf16.msra.mxu1 %v14400_v36  ;;  %13055 = vmatprep.mubr.msk.bf16.mxu1 %vm1110_vm4, %v1617_v37 }
 0x371   :  { %13049 = vmatprep.subr.bf16.mxu1 %v14402_v39 }
 0x374   :  { %13050 = vmatpush3.bf16.msra.mxu1 %v14402_v39 }
 0x375   :  { %13051 = vmatprep.subr.bf16.mxu1 %v14404_v41 }
 0x378   :  { %13052 = vmatpush3.bf16.msra.mxu1 %v14404_v41 }
 0x379   :  { %13053 = vmatprep.subr.bf16.mxu1 %v14406_v32 }
 0x37c   :  { %13054 = vmatpush3.bf16.msra.mxu1 %v14406_v32 }
 0x37d   :  { %13071 = vmatprep.subr.bf16.mxu1 %v14408_v45 }
 0x37f   :  { %13056 = vmatmul.mubr.msk.bf16.vlgmr.msra.gmra.mxu1 %vm1110_vm4, %v1618_v48 }
 0x380   :  { %13072 = vmatpush3.bf16.msra.mxu1 %v14408_v45  ;;  %13079 = vmatprep.mubr.msk.bf16.mxu1 %vm1110_vm4, %v1803_v42 }
 0x381   :  { %13073 = vmatprep.subr.bf16.mxu1 %v14409_v49 }
 0x384   :  { %13074 = vmatpush3.bf16.msra.mxu1 %v14409_v49 }
 0x385   :  { %13075 = vmatprep.subr.bf16.mxu1 %v14410_v50 }
 0x388   :  { %13076 = vmatpush3.bf16.msra.mxu1 %v14410_v50 }
 0x389   :  { %13077 = vmatprep.subr.bf16.mxu1 %v14411_v46 }
 0x38c   :  { %13078 = vmatpush3.bf16.msra.mxu1 %v14411_v46 }
 0x38f   :  { %13080 = vmatmul.mubr.msk.bf16.vlgmr.msra.gmra.mxu1 %vm1110_vm4, %v1804_v51 }
 0x3ef   :  { %v12985_v53 = vpop.f32.mrf.mxu1 }
 0x3f1   :  { %v1151_v54 = vpop.f32.mrf.mxu1 }
 0x3f3   :  { %v12986_v55 = vpop.f32.mrf.mxu1 }
 0x3f5   :  { %v1154_v56 = vpop.f32.mrf.mxu1 }
 0x3ff   :  { %v12997_v57 = vpop.f32.mrf.mxu1 }
 0x400   :  { %v1239_v15 = vadd.f32 %v12997_v57, %v12985_v53  ;;  %v11467_v53 = vld [vmem:[%s18255_s4 + $0x1] ss:$0 sm:$0xff] }
 0x401   :  { %v1230_v58 = vpop.f32.mrf.mxu1 }
 0x402   :  { %v1231_v18 = vadd.f32 %v1230_v58, %v1151_v54 }
 0x403   :  { %v12998_v59 = vpop.f32.mrf.mxu1 }
 0x404   :  { %v1242_v21 = vadd.f32 %v12998_v59, %v12986_v55 }
 0x405   :  { %v1233_v60 = vpop.f32.mrf.mxu1 }
 0x406   :  { %v1234_v25 = vadd.f32 %v1233_v60, %v1154_v56 }
 0x40f   :  { %v13009_v63 = vpop.f32.mrf.mxu1  ;;  %v13045_v12 = vpop.f32.mrf.mxu0 }
 0x410   :  { %v1336_v19 = vadd.f32 %v13009_v63, %v1239_v15  ;;  %v14414_v15 = vld [vmem:[%s18258_s7 + $0x130] sm:$0xff]  }
 0x411   :  { %v1319_v2 = vpop.f32.mrf.mxu1  ;;  %v1598_v14 = vpop.f32.mrf.mxu0 }
 0x412   :  { %v1334_v22 = vadd.f32 %v1319_v2, %v1231_v18  ;;  %v14417_v18 = vld [vmem:[%s18258_s7 + $0x148] sm:$0xff]  }
 0x413   :  { %v13010_v4 = vpop.f32.mrf.mxu1  ;;  %v13046_v17 = vpop.f32.mrf.mxu0 }
 0x414   :  { %v1337_v26 = vadd.f32 %v13010_v4, %v1242_v21  ;;  %v14420_v21 = vld [vmem:[%s18258_s7 + $0x160] sm:$0xff]  }
 0x415   :  { %v1322_v5 = vpop.f32.mrf.mxu1  ;;  %v1601_v24 = vpop.f32.mrf.mxu0 }
 0x416   :  { %v1335_v30 = vadd.f32 %v1322_v5, %v1234_v25  ;;  %v14424_v25 = vld [vmem:[%s18258_s7 + $0x180] sm:$0xff]  }
 0x41f   :  { %v13021_v6 = vpop.f32.mrf.mxu1 }
 0x420   :  { %v1429_v23 = vadd.f32 %v13021_v6, %v1336_v19  ;;  %v14418_v19 = vld [vmem:[%s18258_s7 + $0x150] sm:$0xff]  }
 0x421   :  { %v1412_v7 = vpop.f32.mrf.mxu1  ;;  %v13069_v34 = vpop.f32.mrf.mxu0 }
 0x422   :  { %v1427_v27 = vadd.f32 %v1412_v7, %v1334_v22  ;;  %v14421_v22 = vld [vmem:[%s18258_s7 + $0x168] sm:$0xff]  }
 0x423   :  { %v13022_v8 = vpop.f32.mrf.mxu1  ;;  %v1784_v43 = vpop.f32.mrf.mxu0 }
 0x424   :  { %v1430_v31 = vadd.f32 %v13022_v8, %v1337_v26  ;;  %v14425_v26 = vld [vmem:[%s18258_s7 + $0x188] sm:$0xff]  }
 0x425   :  { %v1415_v9 = vpop.f32.mrf.mxu1  ;;  %v13070_v49 = vpop.f32.mrf.mxu0 }
 0x426   :  { %v1428_v35 = vadd.f32 %v1415_v9, %v1335_v30  ;;  %v14429_v30 = vld [vmem:[%s18258_s7 + $0x1a8] sm:$0xff]  }
 0x427   :  { %v1787_v57 = vpop.f32.mrf.mxu0 }
 0x42f   :  { %v13033_v10 = vpop.f32.mrf.mxu1 }
 0x430   :  { %v1522_v28 = vadd.f32 %v13033_v10, %v1429_v23  ;;  %v14422_v23 = vld [vmem:[%s18258_s7 + $0x170] sm:$0xff]  }
 0x431   :  { %v1505_v11 = vpop.f32.mrf.mxu1 }
 0x432   :  { %v1520_v33 = vadd.f32 %v1505_v11, %v1427_v27  ;;  %v1615_v36 = vadd.f32 %v13045_v12, %v1522_v28  ;;  %v14426_v27 = vld [vmem:[%s18258_s7 + $0x190] sm:$0xff]   ;;  %v14427_v28 = vld [vmem:[%s18258_s7 + $0x198] sm:$0xff]  }
 0x433   :  { %v13034_v13 = vpop.f32.mrf.mxu1 }
 0x434   :  { %v1523_v37 = vadd.f32 %v13034_v13, %v1430_v31  ;;  %v1613_v39 = vadd.f32 %v1598_v14, %v1520_v33  ;;  %v14413_v14 = vld [vmem:[%s18258_s7 + $0x128] sm:$0xff]   ;;  %v14431_v33 = vld [vmem:[%s18252_s1 + $0x1a0] sm:$0xff]  }
 0x435   :  { %v1508_v16 = vpop.f32.mrf.mxu1  ;;  %v14430_v31 = vld [vmem:[%s18252_s1 + $0x1a8] sm:$0xff]  }
 0x436   :  { %v1521_v40 = vadd.f32 %v1508_v16, %v1428_v35  ;;  %v1616_v32 = vadd.f32 %v13046_v17, %v1523_v37  ;;  %v14415_v16 = vld [vmem:[%s18258_s7 + $0x138] sm:$0xff]   ;;  %v14416_v17 = vld [vmem:[%s18258_s7 + $0x140] sm:$0xff]   ;;  %13123 = vmatprep.subr.bf16.mxu1 %v14430_v31  ;;  %v14433_v35 = vld [vmem:[%s18252_s1 + $0x190] sm:$0xff]  }
 0x437   :  { %13124 = vmatpush3.bf16.msra.mxu1 %v14430_v31  ;;  %v14443_v37 = vld [vmem:[%s18252_s1 + $0x208] sm:$0xff]  }
 0x438   :  { %v1614_v47 = vadd.f32 %v1601_v24, %v1521_v40  ;;  %v14423_v24 = vld [vmem:[%s18258_s7 + $0x178] sm:$0xff]   ;;  %13125 = vmatprep.subr.bf16.mxu1 %v14431_v33  ;;  %v14449_v40 = vld [vmem:[%s18252_s1 + $0x1f0] sm:$0xff]   ;;  %v14459_v31 = vld [vmem:[%s18252_s1 + $0x288] sm:$0xff]  }
 0x43b   :  { %13126 = vmatpush3.bf16.msra.mxu1 %v14431_v33 }
 0x43f   :  { %v13057_v20 = vpop.f32.mrf.mxu1 }
 0x440   :  { %v1708_v41 = vadd.f32 %v13057_v20, %v1615_v36  ;;  %v14419_v20 = vld [vmem:[%s18258_s7 + $0x158] sm:$0xff]   ;;  %v14434_v36 = vld [vmem:[%s18252_s1 + $0x188] sm:$0xff]  }
 0x441   :  { %v1691_v29 = vpop.f32.mrf.mxu1 }
 0x442   :  { %v1706_v44 = vadd.f32 %v1691_v29, %v1613_v39  ;;  %v1801_v42 = vadd.f32 %v13069_v34, %v1708_v41  ;;  %v14428_v29 = vld [vmem:[%s18258_s7 + $0x1a0] sm:$0xff]   ;;  %v14432_v34 = vld [vmem:[%s18252_s1 + $0x198] sm:$0xff]   ;;  %v14451_v41 = vld [vmem:[%s18252_s1 + $0x248] sm:$0xff]  }
 0x443   :  { %v13058_v38 = vpop.f32.mrf.mxu1  ;;  %13127 = vmatprep.subr.bf16.mxu1 %v14432_v34  ;;  %v14447_v39 = vld [vmem:[%s18252_s1 + $0x1f8] sm:$0xff]  }
 0x444   :  { %v1709_v48 = vadd.f32 %v13058_v38, %v1616_v32  ;;  %v1799_v46 = vadd.f32 %v1784_v43, %v1706_v44  ;;  %13128 = vmatpush3.bf16.msra.mxu1 %v14432_v34  ;;  %v14445_v38 = vld [vmem:[%s18252_s1 + $0x200] sm:$0xff]  }
 0x445   :  { %v1694_v45 = vpop.f32.mrf.mxu1  ;;  %13129 = vmatprep.subr.bf16.mxu1 %v14433_v35 }
 0x446   :  { %v1707_v51 = vadd.f32 %v1694_v45, %v1614_v47  ;;  %v1802_v55 = vadd.f32 %v13070_v49, %v1709_v48 }
 0x448   :  { %v1800_v59 = vadd.f32 %v1787_v57, %v1707_v51  ;;  %13130 = vmatpush3.bf16.msra.mxu1 %v14433_v35  ;;  %v14435_v51 = vld [vmem:[%s18252_s1 + $0x180] sm:$0xff]  }
 0x449   :  { %13135 = vmatprep.subr.bf16.mxu1 %v14434_v36 }
 0x44f   :  { %v13081_v50 = vpop.f32.mrf.mxu1 }
 0x450   :  { %v1894_v52 = vadd.f32 %v13081_v50, %v1801_v42 }
 0x451   :  { %v1877_v54 = vpop.f32.mrf.mxu1 }
 0x452   :  { %v1892_v56 = vadd.f32 %v1877_v54, %v1799_v46  ;;  %v1903_v60 = vadd.f32 %v11467_v53, %v1894_v52 }
 0x453   :  { %v13082_v58 = vpop.f32.mrf.mxu1 }
 0x454   :  { %v1895_v63 = vadd.f32 %v13082_v58, %v1802_v55  ;;  %v1901_v4 = vadd.f32 %v11467_v53, %v1892_v56  ;;  %v1907_v7 = vmax.f32 %v1903_v60, 0.0  ;;  %v14436_v55 = vld [vmem:[%s18252_s1 + $0x178] sm:$0xff]   ;;  %v14437_v58 = vld [vmem:[%s18252_s1 + $0x170] sm:$0xff]  }
 0x455   :  { %v1880_v2 = vpop.f32.mrf.mxu1 }
 0x456   :  { %v1904_v5 = vadd.f32 %v11467_v53, %v1895_v63  ;;  %v1893_v6 = vadd.f32 %v1880_v2, %v1800_v59  ;;  %v1905_v10 = vmax.f32 %v1901_v4, 0.0  ;;  %v14438_v63 = vld [vmem:[%s18252_s1 + $0x1c8] sm:$0xff]  }
 0x458   :  { %v1908_v8 = vmax.f32 %v1904_v5, 0.0  ;;  %v1902_v9 = vadd.f32 %v11467_v53, %v1893_v6 }
 0x45a   :  { %v1906_v11 = vmax.f32 %v1902_v9, 0.0  ;;  %v1910_v12 = vpack.c.bf16 %v1908_v8, %v1907_v7  ;;  %v14439_v7 = vld [vmem:[%s18252_s1 + $0x1c0] sm:$0xff]  }
 0x45c   :  { %13083 = vmatprep.subr.bf16.mxu0 %v1910_v12  ;;  %v1909_v13 = vpack.c.bf16 %v1906_v11, %v1905_v10  ;;  %v14440_v10 = vld [vmem:[%s18252_s1 + $0x1b8] sm:$0xff]  }
 0x45d   :  { %13084 = vmatpush3.bf16.msra.mxu0 %v1910_v12 }
 0x45e   :  { %13085 = vmatprep.subr.bf16.mxu0 %v1909_v13 }
 0x461   :  { %13086 = vmatpush3.bf16.msra.mxu0 %v1909_v13 }
 0x462   :  { %13171 = vmatprep.subr.bf16.mxu0 %v14443_v37 }
 0x464   :  { %13088 = vmatmul.mubr.msk.bf16.vlgmr.msra.gmra.mxu0 %vm834_vm3, %v14413_v14 }
 0x465   :  { %13091 = vmatprep.mubr.msk.bf16.mxu0 %vm834_vm3, %v14414_v15  ;;  %13172 = vmatpush3.bf16.msra.mxu0 %v14443_v37  ;;  %v14441_v15 = vld [vmem:[%s18252_s1 + $0x1b0] sm:$0xff]  }
 0x466   :  { %13173 = vmatprep.subr.bf16.mxu0 %v14445_v38 }
 0x469   :  { %13174 = vmatpush3.bf16.msra.mxu0 %v14445_v38  ;;  %v14461_v38 = vld [vmem:[%s18252_s1 + $0x280] sm:$0xff]  }
 0x46a   :  { %13175 = vmatprep.subr.bf16.mxu0 %v14447_v39 }
 0x46c   :  { %13092 = vmatmul.mubr.msk.bf16.gmra.mxu0 %vm834_vm3, %v14415_v16 }
 0x46d   :  { %13095 = vmatprep.mubr.msk.bf16.mxu0 %vm834_vm3, %v14416_v17  ;;  %13176 = vmatpush3.bf16.msra.mxu0 %v14447_v39  ;;  %v14453_v17 = vld [vmem:[%s18252_s1 + $0x240] sm:$0xff]  }
 0x46e   :  { %13177 = vmatprep.subr.bf16.mxu0 %v14449_v40 }
 0x471   :  { %13178 = vmatpush3.bf16.msra.mxu0 %v14449_v40  ;;  %v14450_v40 = vld [vmem:[%s18252_s1 + $0x228] sm:$0xff]  }
 0x472   :  { %13195 = vmatprep.subr.bf16.mxu0 %v14451_v41 }
 0x474   :  { %13096 = vmatmul.mubr.msk.bf16.gmra.mxu0 %vm834_vm3, %v14417_v18 }
 0x475   :  { %13099 = vmatprep.mubr.msk.bf16.mxu0 %vm834_vm3, %v14418_v19  ;;  %v14442_v19 = vld [vmem:[%s18252_s1 + $0x1e8] sm:$0xff]  }
 0x47c   :  { %13100 = vmatmul.mubr.msk.bf16.gmra.mxu0 %vm834_vm3, %v14419_v20 }
 0x47d   :  { %13103 = vmatprep.mubr.msk.bf16.mxu0 %vm834_vm3, %v14420_v21  ;;  %v14455_v21 = vld [vmem:[%s18252_s1 + $0x238] sm:$0xff]  }
 0x484   :  { %13104 = vmatmul.mubr.msk.bf16.gmra.mxu0 %vm834_vm3, %v14421_v22 }
 0x485   :  { %13107 = vmatprep.mubr.msk.bf16.mxu0 %vm834_vm3, %v14422_v23 }
 0x48c   :  { %13108 = vmatmul.mubr.msk.bf16.gmra.mxu0 %vm834_vm3, %v14423_v24 }
 0x48d   :  { %13111 = vmatprep.mubr.msk.bf16.mxu0 %vm834_vm3, %v14424_v25  ;;  %v14444_v25 = vld [vmem:[%s18252_s1 + $0x1e0] sm:$0xff]  }
 0x494   :  { %13112 = vmatmul.mubr.msk.bf16.gmra.mxu0 %vm834_vm3, %v14425_v26 }
 0x495   :  { %13115 = vmatprep.mubr.msk.bf16.mxu0 %vm834_vm3, %v14426_v27  ;;  %v14457_v27 = vld [vmem:[%s18252_s1 + $0x230] sm:$0xff]  }
 0x49c   :  { %13116 = vmatmul.mubr.msk.bf16.gmra.mxu0 %vm834_vm3, %v14427_v28 }
 0x49d   :  { %13119 = vmatprep.mubr.msk.bf16.mxu0 %vm834_vm3, %v14428_v29  ;;  %v14446_v29 = vld [vmem:[%s18252_s1 + $0x1d8] sm:$0xff]  }
 0x4a4   :  { %13120 = vmatmul.mubr.msk.bf16.gmra.mxu0 %vm834_vm3, %v14429_v30 }
 0x524   :  { %v13089_v43 = vpop.f32.mrf.mxu0 }
 0x526   :  { %v2125_v32 = vpop.f32.mrf.mxu0 }
 0x528   :  { %v13090_v44 = vpop.f32.mrf.mxu0 }
 0x529   :  { %v2269_v6 = vpack.c.bf16 %v13090_v44, %v13089_v43  ;;  %v14463_v43 = vld [vmem:[%s18252_s1 + $0x278] sm:$0xff]  }
 0x52a   :  { %v2128_v45 = vpop.f32.mrf.mxu0 }
 0x52b   :  { %v2268_v53 = vpack.c.bf16 %v2128_v45, %v2125_v32 }
 0x52c   :  { %v13093_v47 = vpop.f32.mrf.mxu0 }
 0x52e   :  { %v2141_v42 = vpop.f32.mrf.mxu0 }
 0x530   :  { %v13094_v48 = vpop.f32.mrf.mxu0 }
 0x531   :  { %v2279_v46 = vpack.c.bf16 %v13094_v48, %v13093_v47  ;;  %v14452_v47 = vld [vmem:[%s18252_s1 + $0x220] sm:$0xff]   ;;  %v14465_v48 = vld [vmem:[%s18252_s1 + $0x270] sm:$0xff]  }
 0x532   :  { %v2144_v49 = vpop.f32.mrf.mxu0 }
 0x533   :  { %v2278_v50 = vpack.c.bf16 %v2144_v49, %v2141_v42 }
 0x534   :  { %v15720_v52 = vpop.f32.mrf.mxu0 }
 0x535   :  { %13131 = vmatprep.mubr.msk.bf16.mxu1 %vm1110_vm4, %v2278_v50  ;;  %v14454_v50 = vld [vmem:[%s18252_s1 + $0x218] sm:$0xff]  }
 0x536   :  { %13132 = vmatmul.mubr.msk.bf16.vlgmr.msra.gmra.mxu1 %vm1110_vm4, %v2279_v46  ;;  %v2157_v54 = vpop.f32.mrf.mxu0 }
 0x537   :  { %13136 = vmatpush3.bf16.msra.mxu1 %v14434_v36  ;;  %13143 = vmatprep.mubr.msk.bf16.mxu1 %vm1110_vm4, %v2268_v53  ;;  %v14448_v36 = vld [vmem:[%s18252_s1 + $0x1d0] sm:$0xff]  }
 0x538   :  { %13137 = vmatprep.subr.bf16.mxu1 %v14435_v51  ;;  %v13098_v56 = vpop.f32.mrf.mxu0 }
 0x539   :  { %v2447_v24 = vpack.c.bf16 %v13098_v56, %v15720_v52 }
 0x53a   :  { %v2160_v57 = vpop.f32.mrf.mxu0 }
 0x53b   :  { %13138 = vmatpush3.bf16.msra.mxu1 %v14435_v51  ;;  %v2446_v5 = vpack.c.bf16 %v2160_v57, %v2157_v54  ;;  %v14456_v54 = vld [vmem:[%s18252_s1 + $0x210] sm:$0xff]  }
 0x53c   :  { %13139 = vmatprep.subr.bf16.mxu1 %v14436_v55  ;;  %v15731_v59 = vpop.f32.mrf.mxu0 }
 0x53e   :  { %v2173_v60 = vpop.f32.mrf.mxu0 }
 0x53f   :  { %13140 = vmatpush3.bf16.msra.mxu1 %v14436_v55  ;;  %v14458_v55 = vld [vmem:[%s18252_s1 + $0x268] sm:$0xff]  }
 0x540   :  { %13141 = vmatprep.subr.bf16.mxu1 %v14437_v58  ;;  %v15736_v2 = vpop.f32.mrf.mxu0 }
 0x541   :  { %v2540_v45 = vpack.c.bf16 %v15736_v2, %v15731_v59  ;;  %v14462_v59 = vld [vmem:[%s18252_s1 + $0x258] sm:$0xff]   ;;  %v14466_v2 = vld [vmem:[%s18258_s7 + $0x1b0] sm:$0xff]  }
 0x542   :  { %v2176_v4 = vpop.f32.mrf.mxu0 }
 0x543   :  { %13142 = vmatpush3.bf16.msra.mxu1 %v14437_v58  ;;  %v2539_v23 = vpack.c.bf16 %v2176_v4, %v2173_v60  ;;  %v14460_v58 = vld [vmem:[%s18252_s1 + $0x260] sm:$0xff]   ;;  %v14464_v60 = vld [vmem:[%s18252_s1 + $0x250] sm:$0xff]  }
 0x544   :  { %13147 = vmatprep.subr.bf16.mxu1 %v14438_v63  ;;  %v13105_v8 = vpop.f32.mrf.mxu0 }
 0x546   :  { %13144 = vmatmul.mubr.msk.bf16.vlgmr.msra.gmra.mxu1 %vm1110_vm4, %v2269_v6  ;;  %v2189_v9 = vpop.f32.mrf.mxu0 }
 0x547   :  { %13148 = vmatpush3.bf16.msra.mxu1 %v14438_v63  ;;  %13155 = vmatprep.mubr.msk.bf16.mxu1 %vm1110_vm4, %v2446_v5 }
 0x548   :  { %13149 = vmatprep.subr.bf16.mxu1 %v14439_v7  ;;  %v13106_v11 = vpop.f32.mrf.mxu0 }
 0x549   :  { %v2633_v12 = vpack.c.bf16 %v13106_v11, %v13105_v8 }
 0x54a   :  { %v2192_v13 = vpop.f32.mrf.mxu0 }
 0x54b   :  { %13150 = vmatpush3.bf16.msra.mxu1 %v14439_v7  ;;  %v2632_v14 = vpack.c.bf16 %v2192_v13, %v2189_v9 }
 0x54c   :  { %13151 = vmatprep.subr.bf16.mxu1 %v14440_v10  ;;  %v15749_v16 = vpop.f32.mrf.mxu0 }
 0x54d   :  { %13179 = vmatprep.mubr.msk.bf16.mxu0 %vm1110_vm4, %v2632_v14 }
 0x54e   :  { %v15755_v18 = vpop.f32.mrf.mxu0  ;;  %13180 = vmatmul.mubr.msk.bf16.vlgmr.msra.gmra.mxu0 %vm1110_vm4, %v2633_v12 }
 0x54f   :  { %13152 = vmatpush3.bf16.msra.mxu1 %v14440_v10  ;;  %13196 = vmatpush3.bf16.msra.mxu0 %v14451_v41 }
 0x550   :  { %13153 = vmatprep.subr.bf16.mxu1 %v14441_v15  ;;  %v15761_v20 = vpop.f32.mrf.mxu0  ;;  %13197 = vmatprep.subr.bf16.mxu0 %v14453_v17 }
 0x551   :  { %v2726_v57 = vpack.c.bf16 %v15761_v20, %v15749_v16 }
 0x552   :  { %v2208_v22 = vpop.f32.mrf.mxu0 }
 0x553   :  { %13154 = vmatpush3.bf16.msra.mxu1 %v14441_v15  ;;  %13198 = vmatpush3.bf16.msra.mxu0 %v14453_v17  ;;  %v2725_v44 = vpack.c.bf16 %v2208_v22, %v15755_v18 }
 0x554   :  { %13159 = vmatprep.subr.bf16.mxu1 %v14442_v19  ;;  %v13113_v26 = vpop.f32.mrf.mxu0  ;;  %13199 = vmatprep.subr.bf16.mxu0 %v14455_v21 }
 0x556   :  { %13156 = vmatmul.mubr.msk.bf16.vlgmr.msra.gmra.mxu1 %vm1110_vm4, %v2447_v24  ;;  %v2221_v28 = vpop.f32.mrf.mxu0 }
 0x557   :  { %13160 = vmatpush3.bf16.msra.mxu1 %v14442_v19  ;;  %13167 = vmatprep.mubr.msk.bf16.mxu1 %vm1110_vm4, %v2539_v23 }
 0x558   :  { %13161 = vmatprep.subr.bf16.mxu1 %v14444_v25  ;;  %13200 = vmatpush3.bf16.msra.mxu0 %v14455_v21  ;;  %v13114_v30 = vpop.f32.mrf.mxu0 }
 0x559   :  { %13201 = vmatprep.subr.bf16.mxu0 %v14457_v27  ;;  %v2819_v34 = vpack.c.bf16 %v13114_v30, %v13113_v26 }
 0x55a   :  { %v2224_v33 = vpop.f32.mrf.mxu0 }
 0x55b   :  { %13162 = vmatpush3.bf16.msra.mxu1 %v14444_v25  ;;  %v2818_v35 = vpack.c.bf16 %v2224_v33, %v2221_v28 }
 0x55c   :  { %13163 = vmatprep.subr.bf16.mxu1 %v14446_v29  ;;  %13202 = vmatpush3.bf16.msra.mxu0 %v14457_v27  ;;  %v13117_v37 = vpop.f32.mrf.mxu0 }
 0x55d   :  { %13203 = vmatprep.mubr.msk.bf16.mxu0 %vm1110_vm4, %v2818_v35  ;;  %13219 = vmatprep.subr.bf16.mxu0 %v14459_v31 }
 0x55e   :  { %v2237_v39 = vpop.f32.mrf.mxu0 }
 0x55f   :  { %13164 = vmatpush3.bf16.msra.mxu1 %v14446_v29  ;;  %13204 = vmatmul.mubr.msk.bf16.vlgmr.msra.gmra.mxu0 %vm1110_vm4, %v2819_v34 }
 0x560   :  { %13165 = vmatprep.subr.bf16.mxu1 %v14448_v36  ;;  %13220 = vmatpush3.bf16.msra.mxu0 %v14459_v31  ;;  %v13118_v41 = vpop.f32.mrf.mxu0 }
 0x561   :  { %13221 = vmatprep.subr.bf16.mxu0 %v14461_v38  ;;  %v2912_v63 = vpack.c.bf16 %v13118_v41, %v13117_v37 }
 0x562   :  { %v2240_v32 = vpop.f32.mrf.mxu0 }
 0x563   :  { %13166 = vmatpush3.bf16.msra.mxu1 %v14448_v36  ;;  %v2911_v56 = vpack.c.bf16 %v2240_v32, %v2237_v39 }
 0x564   :  { %13183 = vmatprep.subr.bf16.mxu1 %v14450_v40  ;;  %13222 = vmatpush3.bf16.msra.mxu0 %v14461_v38  ;;  %v13121_v42 = vpop.f32.mrf.mxu0 }
 0x565   :  { %13223 = vmatprep.subr.bf16.mxu0 %v14463_v43 }
 0x566   :  { %13168 = vmatmul.mubr.msk.bf16.vlgmr.msra.gmra.mxu1 %vm1110_vm4, %v2540_v45  ;;  %v2253_v49 = vpop.f32.mrf.mxu0 }
 0x567   :  { %13184 = vmatpush3.bf16.msra.mxu1 %v14450_v40  ;;  %13191 = vmatprep.mubr.msk.bf16.mxu1 %vm1110_vm4, %v2725_v44 }
 0x568   :  { %13185 = vmatprep.subr.bf16.mxu1 %v14452_v47  ;;  %13224 = vmatpush3.bf16.msra.mxu0 %v14463_v43  ;;  %v13122_v46 = vpop.f32.mrf.mxu0 }
 0x569   :  { %13225 = vmatprep.subr.bf16.mxu0 %v14465_v48  ;;  %v3005_v52 = vpack.c.bf16 %v13122_v46, %v13121_v42 }
 0x56a   :  { %v2256_v51 = vpop.f32.mrf.mxu0 }
 0x56b   :  { %13186 = vmatpush3.bf16.msra.mxu1 %v14452_v47  ;;  %v3004_v53 = vpack.c.bf16 %v2256_v51, %v2253_v49 }
 0x56c   :  { %13187 = vmatprep.subr.bf16.mxu1 %v14454_v50  ;;  %13226 = vmatpush3.bf16.msra.mxu0 %v14465_v48 }
 0x56d   :  { %13227 = vmatprep.mubr.msk.bf16.mxu0 %vm1110_vm4, %v3004_v53 }
 0x56f   :  { %13188 = vmatpush3.bf16.msra.mxu1 %v14454_v50  ;;  %13228 = vmatmul.mubr.msk.bf16.vlgmr.msra.gmra.mxu0 %vm1110_vm4, %v3005_v52 }
 0x570   :  { %13189 = vmatprep.subr.bf16.mxu1 %v14456_v54 }
 0x573   :  { %13190 = vmatpush3.bf16.msra.mxu1 %v14456_v54 }
 0x574   :  { %13207 = vmatprep.subr.bf16.mxu1 %v14458_v55 }
 0x576   :  { %13192 = vmatmul.mubr.msk.bf16.vlgmr.msra.gmra.mxu1 %vm1110_vm4, %v2726_v57 }
 0x577   :  { %13208 = vmatpush3.bf16.msra.mxu1 %v14458_v55  ;;  %13215 = vmatprep.mubr.msk.bf16.mxu1 %vm1110_vm4, %v2911_v56 }
 0x578   :  { %13209 = vmatprep.subr.bf16.mxu1 %v14460_v58 }
 0x57b   :  { %13210 = vmatpush3.bf16.msra.mxu1 %v14460_v58 }
 0x57c   :  { %13211 = vmatprep.subr.bf16.mxu1 %v14462_v59 }
 0x57f   :  { %13212 = vmatpush3.bf16.msra.mxu1 %v14462_v59  ;;  %v11558_v59 = vld [vmem:[%s18255_s4 + $0x2] ss:$0 sm:$0xff] }
 0x580   :  { %13213 = vmatprep.subr.bf16.mxu1 %v14464_v60 }
 0x583   :  { %13214 = vmatpush3.bf16.msra.mxu1 %v14464_v60 }
 0x586   :  { %13216 = vmatmul.mubr.msk.bf16.vlgmr.msra.gmra.mxu1 %vm1110_vm4, %v2912_v63 }
 0x587   :  { %13235 = vmatprep.mubr.msk.bf16.mxu1 %vm834_vm3, %v14466_v2 }
 0x5f6   :  { %v13133_v4 = vpop.f32.mrf.mxu1 }
 0x5f8   :  { %v2352_v5 = vpop.f32.mrf.mxu1 }
 0x5fa   :  { %v13134_v6 = vpop.f32.mrf.mxu1 }
 0x5fc   :  { %v2355_v7 = vpop.f32.mrf.mxu1 }
 0x606   :  { %v13145_v8 = vpop.f32.mrf.mxu1 }
 0x607   :  { %v2440_v25 = vadd.f32 %v13145_v8, %v13133_v4 }
 0x608   :  { %v2431_v9 = vpop.f32.mrf.mxu1 }
 0x609   :  { %v2432_v28 = vadd.f32 %v2431_v9, %v2352_v5 }
 0x60a   :  { %v13146_v10 = vpop.f32.mrf.mxu1 }
 0x60b   :  { %v2443_v30 = vadd.f32 %v13146_v10, %v13134_v6 }
 0x60c   :  { %v2434_v11 = vpop.f32.mrf.mxu1 }
 0x60d   :  { %v2435_v36 = vadd.f32 %v2434_v11, %v2355_v7 }
 0x60e   :  { %v13181_v15 = vpop.f32.mrf.mxu0 }
 0x610   :  { %v2706_v18 = vpop.f32.mrf.mxu0 }
 0x612   :  { %v13182_v20 = vpop.f32.mrf.mxu0 }
 0x614   :  { %v2709_v22 = vpop.f32.mrf.mxu0 }
 0x616   :  { %v13157_v12 = vpop.f32.mrf.mxu1 }
 0x617   :  { %v2537_v29 = vadd.f32 %v13157_v12, %v2440_v25  ;;  %v14468_v25 = vld [vmem:[%s18258_s7 + $0x1c0] sm:$0xff]  }
 0x618   :  { %v2520_v13 = vpop.f32.mrf.mxu1 }
 0x619   :  { %v2535_v31 = vadd.f32 %v2520_v13, %v2432_v28  ;;  %v14471_v28 = vld [vmem:[%s18258_s7 + $0x1d8] sm:$0xff]  }
 0x61a   :  { %v13158_v14 = vpop.f32.mrf.mxu1 }
 0x61b   :  { %v2538_v37 = vadd.f32 %v13158_v14, %v2443_v30  ;;  %v14473_v30 = vld [vmem:[%s18258_s7 + $0x1e8] sm:$0xff]  }
 0x61c   :  { %v2523_v16 = vpop.f32.mrf.mxu1 }
 0x61d   :  { %v2536_v39 = vadd.f32 %v2523_v16, %v2435_v36  ;;  %v14478_v36 = vld [vmem:[%s18258_s7 + $0x210] sm:$0xff]  }
 0x61f   :  { %v13205_v23 = vpop.f32.mrf.mxu0 }
 0x621   :  { %v2892_v27 = vpop.f32.mrf.mxu0 }
 0x623   :  { %v13206_v35 = vpop.f32.mrf.mxu0 }
 0x625   :  { %v2895_v32 = vpop.f32.mrf.mxu0 }
 0x626   :  { %v13169_v17 = vpop.f32.mrf.mxu1 }
 0x627   :  { %v2630_v33 = vadd.f32 %v13169_v17, %v2537_v29  ;;  %v14472_v29 = vld [vmem:[%s18258_s7 + $0x1e0] sm:$0xff]  }
 0x628   :  { %v2613_v19 = vpop.f32.mrf.mxu1 }
 0x629   :  { %v2628_v38 = vadd.f32 %v2613_v19, %v2535_v31  ;;  %v2723_v40 = vadd.f32 %v13181_v15, %v2630_v33  ;;  %v14474_v31 = vld [vmem:[%s18258_s7 + $0x1f0] sm:$0xff]   ;;  %v14475_v33 = vld [vmem:[%s18258_s7 + $0x1f8] sm:$0xff]  }
 0x62a   :  { %v13170_v21 = vpop.f32.mrf.mxu1 }
 0x62b   :  { %v2631_v41 = vadd.f32 %v13170_v21, %v2538_v37  ;;  %v2721_v44 = vadd.f32 %v2706_v18, %v2628_v38  ;;  %v14479_v37 = vld [vmem:[%s18258_s7 + $0x218] sm:$0xff]   ;;  %v14480_v38 = vld [vmem:[%s18258_s7 + $0x220] sm:$0xff]  }
 0x62c   :  { %v2616_v24 = vpop.f32.mrf.mxu1 }
 0x62d   :  { %v2629_v45 = vadd.f32 %v2616_v24, %v2536_v39  ;;  %v2724_v48 = vadd.f32 %v13182_v20, %v2631_v41  ;;  %v14481_v39 = vld [vmem:[%s18258_s7 + $0x228] sm:$0xff]   ;;  %v14483_v41 = vld [vmem:[%s18258_s7 + $0x238] sm:$0xff]  }
 0x62f   :  { %v13229_v42 = vpop.f32.mrf.mxu0  ;;  %v2722_v46 = vadd.f32 %v2709_v22, %v2629_v45  ;;  %v14487_v45 = vld [vmem:[%s18252_s1 + $0x2b0] sm:$0xff]  }
 0x631   :  { %v3078_v54 = vpop.f32.mrf.mxu0 }
 0x633   :  { %v13230_v5 = vpop.f32.mrf.mxu0 }
 0x635   :  { %v3081_v14 = vpop.f32.mrf.mxu0 }
 0x636   :  { %v13193_v26 = vpop.f32.mrf.mxu1 }
 0x637   :  { %v2816_v47 = vadd.f32 %v13193_v26, %v2723_v40  ;;  %v14469_v26 = vld [vmem:[%s18258_s7 + $0x1c8] sm:$0xff]   ;;  %v14482_v40 = vld [vmem:[%s18258_s7 + $0x230] sm:$0xff]  }
 0x638   :  { %v2799_v34 = vpop.f32.mrf.mxu1 }
 0x639   :  { %v2814_v49 = vadd.f32 %v2799_v34, %v2721_v44  ;;  %v2909_v51 = vadd.f32 %v13205_v23, %v2816_v47  ;;  %v14476_v34 = vld [vmem:[%s18258_s7 + $0x200] sm:$0xff]   ;;  %v14486_v44 = vld [vmem:[%s18252_s1 + $0x2b8] sm:$0xff]   ;;  %v14488_v47 = vld [vmem:[%s18252_s1 + $0x2a8] sm:$0xff]  }
 0x63a   :  { %v13194_v43 = vpop.f32.mrf.mxu1 }
 0x63b   :  { %v2817_v52 = vadd.f32 %v13194_v43, %v2724_v48  ;;  %v2907_v55 = vadd.f32 %v2892_v27, %v2814_v49  ;;  %v14470_v27 = vld [vmem:[%s18258_s7 + $0x1d0] sm:$0xff]   ;;  %v14484_v43 = vld [vmem:[%s18252_s1 + $0x2c8] sm:$0xff]   ;;  %v14499_v48 = vld [vmem:[%s18252_s1 + $0x320] sm:$0xff]  }
 0x63c   :  { %v2802_v50 = vpop.f32.mrf.mxu1  ;;  %13271 = vmatprep.subr.bf16.mxu0 %v14484_v43  ;;  %v14501_v49 = vld [vmem:[%s18252_s1 + $0x318] sm:$0xff]  }
 0x63d   :  { %v2815_v56 = vadd.f32 %v2802_v50, %v2722_v46  ;;  %v2910_v60 = vadd.f32 %v13206_v35, %v2817_v52  ;;  %v14477_v35 = vld [vmem:[%s18258_s7 + $0x208] sm:$0xff]   ;;  %13272 = vmatpush3.bf16.msra.mxu0 %v14484_v43  ;;  %v14503_v50 = vld [vmem:[%s18252_s1 + $0x310] sm:$0xff]  }
 0x63e   :  { %v14505_v46 = vld [vmem:[%s18252_s1 + $0x368] sm:$0xff]   ;;  %v14511_v43 = vld [vmem:[%s18252_s1 + $0x350] sm:$0xff]  }
 0x63f   :  { %v2908_v6 = vadd.f32 %v2895_v32, %v2815_v56  ;;  %v14485_v32 = vld [vmem:[%s18252_s1 + $0x2c0] sm:$0xff]  }
 0x640   :  { %13273 = vmatprep.subr.bf16.mxu0 %v14485_v32 }
 0x641   :  { %13274 = vmatpush3.bf16.msra.mxu0 %v14485_v32 }
 0x642   :  { %13275 = vmatprep.subr.bf16.mxu0 %v14486_v44 }
 0x645   :  { %13276 = vmatpush3.bf16.msra.mxu0 %v14486_v44  ;;  %v14500_v44 = vld [vmem:[%s18252_s1 + $0x2f8] sm:$0xff]  }
 0x646   :  { %v13217_v53 = vpop.f32.mrf.mxu1  ;;  %13277 = vmatprep.subr.bf16.mxu0 %v14487_v45 }
 0x647   :  { %v3002_v57 = vadd.f32 %v13217_v53, %v2909_v51 }
 0x648   :  { %v2985_v58 = vpop.f32.mrf.mxu1 }
 0x649   :  { %v3000_v63 = vadd.f32 %v2985_v58, %v2907_v55  ;;  %v3095_v2 = vadd.f32 %v13229_v42, %v3002_v57  ;;  %13278 = vmatpush3.bf16.msra.mxu0 %v14487_v45  ;;  %v14497_v42 = vld [vmem:[%s18252_s1 + $0x328] sm:$0xff]  }
 0x64a   :  { %v13218_v4 = vpop.f32.mrf.mxu1  ;;  %13283 = vmatprep.subr.bf16.mxu0 %v14488_v47 }
 0x64b   :  { %v3104_v7 = vadd.f32 %v11558_v59, %v3095_v2  ;;  %v3003_v8 = vadd.f32 %v13218_v4, %v2910_v60  ;;  %v3093_v9 = vadd.f32 %v3078_v54, %v3000_v63  ;;  %v14489_v63 = vld [vmem:[%s18252_s1 + $0x2a0] sm:$0xff]  }
 0x64c   :  { %v2988_v10 = vpop.f32.mrf.mxu1 }
 0x64d   :  { %v3102_v11 = vadd.f32 %v11558_v59, %v3093_v9  ;;  %v3001_v12 = vadd.f32 %v2988_v10, %v2908_v6  ;;  %v3096_v13 = vadd.f32 %v13230_v5, %v3003_v8  ;;  %v15839_v15 = vadd.f32 %v3104_v7, %v15376_v61  ;;  %v14490_v6 = vld [vmem:[%s18252_s1 + $0x298] sm:$0xff]   ;;  %v14491_v9 = vld [vmem:[%s18252_s1 + $0x290] sm:$0xff]  }
 0x64f   :  { %v3105_v16 = vadd.f32 %v11558_v59, %v3096_v13  ;;  %v3094_v17 = vadd.f32 %v3081_v14, %v3001_v12  ;;  %v15842_v18 = vadd.f32 %v3102_v11, %v15380_v0  ;;  %v3112_v21 = vmax.f32 %v15839_v15, 0.0  ;;  %v14492_v12 = vld [vmem:[%s18252_s1 + $0x2e8] sm:$0xff]  }
 0x651   :  { %v15845_v19 = vadd.f32 %v3105_v16, %v15378_v62  ;;  %v3103_v20 = vadd.f32 %v11558_v59, %v3094_v17  ;;  %v3110_v24 = vmax.f32 %v15842_v18, 0.0  ;;  %v14575_v18 = vld [vmem:[%s18258_s7 + $0x2d8] sm:$0xff]  }
 0x653   :  { %v3113_v22 = vmax.f32 %v15845_v19, 0.0  ;;  %v15850_v23 = vadd.f32 %v3103_v20, %v15384_v3  ;;  %v14467_v3 = vld [vmem:[%s18258_s7 + $0x1b8] sm:$0xff]   ;;  %v14493_v20 = vld [vmem:[%s18252_s1 + $0x2e0] sm:$0xff]   ;;  %v14574_v19 = vld [vmem:[%s18258_s7 + $0x2d0] sm:$0xff]  }
 0x655   :  { %v3115_v61 = vpack.c.bf16 %v3113_v22, %v3112_v21  ;;  %v3111_v0 = vmax.f32 %v15850_v23, 0.0  ;;  %v14577_v23 = vld [vmem:[%s18258_s7 + $0x2e8] sm:$0xff]  }
 0x657   :  { %13231 = vmatprep.subr.bf16.mxu1 %v3115_v61  ;;  %v3114_v62 = vpack.c.bf16 %v3111_v0, %v3110_v24 }
 0x658   :  { %13232 = vmatpush3.bf16.msra.mxu1 %v3115_v61 }
 0x659   :  { %13233 = vmatprep.subr.bf16.mxu1 %v3114_v62 }
 0x65c   :  { %13234 = vmatpush3.bf16.msra.mxu1 %v3114_v62 }
 0x65d   :  { %13319 = vmatprep.subr.bf16.mxu1 %v14497_v42 }
 0x65f   :  { %13236 = vmatmul.mubr.msk.bf16.vlgmr.msra.gmra.mxu1 %vm834_vm3, %v14467_v3  ;;  %v14494_v3 = vld [vmem:[%s18252_s1 + $0x2d8] sm:$0xff]  }
 0x660   :  { %13239 = vmatprep.mubr.msk.bf16.mxu1 %vm834_vm3, %v14468_v25  ;;  %13320 = vmatpush3.bf16.msra.mxu1 %v14497_v42 }
 0x661   :  { %13321 = vmatprep.subr.bf16.mxu1 %v14499_v48 }
 0x664   :  { %13322 = vmatpush3.bf16.msra.mxu1 %v14499_v48 }
 0x665   :  { %13323 = vmatprep.subr.bf16.mxu1 %v14501_v49 }
 0x667   :  { %13240 = vmatmul.mubr.msk.bf16.gmra.mxu1 %vm834_vm3, %v14469_v26 }
 0x668   :  { %13243 = vmatprep.mubr.msk.bf16.mxu1 %vm834_vm3, %v14470_v27  ;;  %13324 = vmatpush3.bf16.msra.mxu1 %v14501_v49 }
 0x669   :  { %13325 = vmatprep.subr.bf16.mxu1 %v14503_v50 }
 0x66c   :  { %13326 = vmatpush3.bf16.msra.mxu1 %v14503_v50  ;;  %v14502_v50 = vld [vmem:[%s18252_s1 + $0x2f0] sm:$0xff]  }
 0x66d   :  { %13343 = vmatprep.subr.bf16.mxu1 %v14505_v46 }
 0x66f   :  { %13244 = vmatmul.mubr.msk.bf16.gmra.mxu1 %vm834_vm3, %v14471_v28 }
 0x670   :  { %13247 = vmatprep.mubr.msk.bf16.mxu1 %vm834_vm3, %v14472_v29  ;;  %v14495_v29 = vld [vmem:[%s18252_s1 + $0x2d0] sm:$0xff]  }
 0x677   :  { %13248 = vmatmul.mubr.msk.bf16.gmra.mxu1 %vm834_vm3, %v14473_v30 }
 0x678   :  { %13251 = vmatprep.mubr.msk.bf16.mxu1 %vm834_vm3, %v14474_v31  ;;  %v14507_v31 = vld [vmem:[%s18252_s1 + $0x360] sm:$0xff]  }
 0x67f   :  { %13252 = vmatmul.mubr.msk.bf16.gmra.mxu1 %vm834_vm3, %v14475_v33 }
 0x680   :  { %13255 = vmatprep.mubr.msk.bf16.mxu1 %vm834_vm3, %v14476_v34  ;;  %v14496_v34 = vld [vmem:[%s18252_s1 + $0x308] sm:$0xff]  }
 0x687   :  { %13256 = vmatmul.mubr.msk.bf16.gmra.mxu1 %vm834_vm3, %v14477_v35 }
 0x688   :  { %13259 = vmatprep.mubr.msk.bf16.mxu1 %vm834_vm3, %v14478_v36  ;;  %v14509_v36 = vld [vmem:[%s18252_s1 + $0x358] sm:$0xff]  }
 0x68f   :  { %13260 = vmatmul.mubr.msk.bf16.gmra.mxu1 %vm834_vm3, %v14479_v37 }
 0x690   :  { %13263 = vmatprep.mubr.msk.bf16.mxu1 %vm834_vm3, %v14480_v38 }
 0x697   :  { %13264 = vmatmul.mubr.msk.bf16.gmra.mxu1 %vm834_vm3, %v14481_v39 }
 0x698   :  { %13267 = vmatprep.mubr.msk.bf16.mxu1 %vm834_vm3, %v14482_v40  ;;  %v14498_v40 = vld [vmem:[%s18252_s1 + $0x300] sm:$0xff]  }
 0x69f   :  { %13268 = vmatmul.mubr.msk.bf16.gmra.mxu1 %vm834_vm3, %v14483_v41 }
 0x71f   :  { %v13237_v51 = vpop.f32.mrf.mxu1 }
 0x721   :  { %v3330_v52 = vpop.f32.mrf.mxu1 }
 0x723   :  { %v13238_v53 = vpop.f32.mrf.mxu1 }
 0x724   :  { %v3474_v17 = vpack.c.bf16 %v13238_v53, %v13237_v51  ;;  %v14515_v51 = vld [vmem:[%s18252_s1 + $0x3a0] sm:$0xff]   ;;  %v14504_v53 = vld [vmem:[%s18252_s1 + $0x348] sm:$0xff]  }
 0x725   :  { %v3333_v54 = vpop.f32.mrf.mxu1 }
 0x726   :  { %v3473_v4 = vpack.c.bf16 %v3333_v54, %v3330_v52 }
 0x727   :  { %v13241_v55 = vpop.f32.mrf.mxu1 }
 0x729   :  { %v3346_v56 = vpop.f32.mrf.mxu1 }
 0x72b   :  { %v13242_v57 = vpop.f32.mrf.mxu1 }
 0x72c   :  { %v3484_v60 = vpack.c.bf16 %v13242_v57, %v13241_v55  ;;  %v14517_v55 = vld [vmem:[%s18252_s1 + $0x398] sm:$0xff]  }
 0x72d   :  { %v3349_v58 = vpop.f32.mrf.mxu1 }
 0x72e   :  { %v3483_v59 = vpack.c.bf16 %v3349_v58, %v3346_v56 }
 0x72f   :  { %v15963_v2 = vpop.f32.mrf.mxu1 }
 0x730   :  { %13279 = vmatprep.mubr.msk.bf16.mxu0 %vm1110_vm4, %v3483_v59  ;;  %v14506_v59 = vld [vmem:[%s18252_s1 + $0x340] sm:$0xff]  }
 0x731   :  { %13280 = vmatmul.mubr.msk.bf16.vlgmr.msra.gmra.mxu0 %vm1110_vm4, %v3484_v60  ;;  %v3362_v5 = vpop.f32.mrf.mxu1 }
 0x732   :  { %13284 = vmatpush3.bf16.msra.mxu0 %v14488_v47  ;;  %13291 = vmatprep.mubr.msk.bf16.mxu0 %vm1110_vm4, %v3473_v4  ;;  %v14513_v47 = vld [vmem:[%s18252_s1 + $0x3a8] sm:$0xff]   ;;  %v14508_v4 = vld [vmem:[%s18252_s1 + $0x338] sm:$0xff]  }
 0x733   :  { %13285 = vmatprep.subr.bf16.mxu0 %v14489_v63  ;;  %v13246_v7 = vpop.f32.mrf.mxu1 }
 0x734   :  { %v3652_v39 = vpack.c.bf16 %v13246_v7, %v15963_v2 }
 0x735   :  { %v3365_v8 = vpop.f32.mrf.mxu1 }
 0x736   :  { %13286 = vmatpush3.bf16.msra.mxu0 %v14489_v63  ;;  %v3651_v16 = vpack.c.bf16 %v3365_v8, %v3362_v5  ;;  %v14519_v63 = vld [vmem:[%s18252_s1 + $0x390] sm:$0xff]  }
 0x737   :  { %13287 = vmatprep.subr.bf16.mxu0 %v14490_v6  ;;  %v15974_v10 = vpop.f32.mrf.mxu1 }
 0x739   :  { %v3378_v11 = vpop.f32.mrf.mxu1 }
 0x73a   :  { %13288 = vmatpush3.bf16.msra.mxu0 %v14490_v6 }
 0x73b   :  { %13289 = vmatprep.subr.bf16.mxu0 %v14491_v9  ;;  %v15979_v13 = vpop.f32.mrf.mxu1 }
 0x73c   :  { %v3745_v58 = vpack.c.bf16 %v15979_v13, %v15974_v10  ;;  %v14512_v10 = vld [vmem:[%s18252_s1 + $0x388] sm:$0xff]   ;;  %v14514_v13 = vld [vmem:[%s18252_s1 + $0x380] sm:$0xff]  }
 0x73d   :  { %v3381_v14 = vpop.f32.mrf.mxu1 }
 0x73e   :  { %13290 = vmatpush3.bf16.msra.mxu0 %v14491_v9  ;;  %v3744_v38 = vpack.c.bf16 %v3381_v14, %v3378_v11  ;;  %v14510_v9 = vld [vmem:[%s18252_s1 + $0x330] sm:$0xff]   ;;  %v14516_v14 = vld [vmem:[%s18252_s1 + $0x378] sm:$0xff]  }
 0x73f   :  { %13295 = vmatprep.subr.bf16.mxu0 %v14492_v12  ;;  %v13253_v61 = vpop.f32.mrf.mxu1 }
 0x741   :  { %13292 = vmatmul.mubr.msk.bf16.vlgmr.msra.gmra.mxu0 %vm1110_vm4, %v3474_v17  ;;  %v3394_v62 = vpop.f32.mrf.mxu1 }
 0x742   :  { %13296 = vmatpush3.bf16.msra.mxu0 %v14492_v12  ;;  %13303 = vmatprep.mubr.msk.bf16.mxu0 %vm1110_vm4, %v3651_v16  ;;  %v14518_v16 = vld [vmem:[%s18252_s1 + $0x370] sm:$0xff]  }
 0x743   :  { %13297 = vmatprep.subr.bf16.mxu0 %v14493_v20  ;;  %v13254_v25 = vpop.f32.mrf.mxu1 }
 0x744   :  { %v3838_v26 = vpack.c.bf16 %v13254_v25, %v13253_v61 }
 0x745   :  { %v3397_v27 = vpop.f32.mrf.mxu1 }
 0x746   :  { %13298 = vmatpush3.bf16.msra.mxu0 %v14493_v20  ;;  %v3837_v28 = vpack.c.bf16 %v3397_v27, %v3394_v62  ;;  %v14520_v20 = vld [vmem:[%s18258_s7 + $0x240] sm:$0xff]  }
 0x747   :  { %13299 = vmatprep.subr.bf16.mxu0 %v14494_v3  ;;  %v15992_v30 = vpop.f32.mrf.mxu1 }
 0x748   :  { %13327 = vmatprep.mubr.msk.bf16.mxu1 %vm1110_vm4, %v3837_v28 }
 0x749   :  { %v15998_v33 = vpop.f32.mrf.mxu1  ;;  %13328 = vmatmul.mubr.msk.bf16.vlgmr.msra.gmra.mxu1 %vm1110_vm4, %v3838_v26 }
 0x74a   :  { %13300 = vmatpush3.bf16.msra.mxu0 %v14494_v3  ;;  %13344 = vmatpush3.bf16.msra.mxu1 %v14505_v46 }
 0x74b   :  { %13301 = vmatprep.subr.bf16.mxu0 %v14495_v29  ;;  %v16004_v35 = vpop.f32.mrf.mxu1  ;;  %13345 = vmatprep.subr.bf16.mxu1 %v14507_v31 }
 0x74c   :  { %v3931_v12 = vpack.c.bf16 %v16004_v35, %v15992_v30 }
 0x74d   :  { %v3413_v37 = vpop.f32.mrf.mxu1 }
 0x74e   :  { %13302 = vmatpush3.bf16.msra.mxu0 %v14495_v29  ;;  %13346 = vmatpush3.bf16.msra.mxu1 %v14507_v31  ;;  %v3930_v57 = vpack.c.bf16 %v3413_v37, %v15998_v33 }
 0x74f   :  { %13307 = vmatprep.subr.bf16.mxu0 %v14496_v34  ;;  %v13261_v41 = vpop.f32.mrf.mxu1  ;;  %13347 = vmatprep.subr.bf16.mxu1 %v14509_v36 }
 0x751   :  { %13304 = vmatmul.mubr.msk.bf16.vlgmr.msra.gmra.mxu0 %vm1110_vm4, %v3652_v39  ;;  %v3426_v32 = vpop.f32.mrf.mxu1 }
 0x752   :  { %13308 = vmatpush3.bf16.msra.mxu0 %v14496_v34  ;;  %13315 = vmatprep.mubr.msk.bf16.mxu0 %vm1110_vm4, %v3744_v38 }
 0x753   :  { %13309 = vmatprep.subr.bf16.mxu0 %v14498_v40  ;;  %13348 = vmatpush3.bf16.msra.mxu1 %v14509_v36  ;;  %v13262_v45 = vpop.f32.mrf.mxu1 }
 0x754   :  { %13349 = vmatprep.subr.bf16.mxu1 %v14511_v43  ;;  %v4024_v48 = vpack.c.bf16 %v13262_v45, %v13261_v41 }
 0x755   :  { %v3429_v42 = vpop.f32.mrf.mxu1 }
 0x756   :  { %13310 = vmatpush3.bf16.msra.mxu0 %v14498_v40  ;;  %v4023_v49 = vpack.c.bf16 %v3429_v42, %v3426_v32 }
 0x757   :  { %13311 = vmatprep.subr.bf16.mxu0 %v14500_v44  ;;  %13350 = vmatpush3.bf16.msra.mxu1 %v14511_v43  ;;  %v13265_v46 = vpop.f32.mrf.mxu1 }
 0x758   :  { %13351 = vmatprep.mubr.msk.bf16.mxu1 %vm1110_vm4, %v4023_v49  ;;  %13367 = vmatprep.subr.bf16.mxu1 %v14513_v47 }
 0x759   :  { %v3442_v52 = vpop.f32.mrf.mxu1 }
 0x75a   :  { %13312 = vmatpush3.bf16.msra.mxu0 %v14500_v44  ;;  %13352 = vmatmul.mubr.msk.bf16.vlgmr.msra.gmra.mxu1 %vm1110_vm4, %v4024_v48 }
 0x75b   :  { %13313 = vmatprep.subr.bf16.mxu0 %v14502_v50  ;;  %13368 = vmatpush3.bf16.msra.mxu1 %v14513_v47  ;;  %v13266_v54 = vpop.f32.mrf.mxu1 }
 0x75c   :  { %13369 = vmatprep.subr.bf16.mxu1 %v14515_v51  ;;  %v4117_v17 = vpack.c.bf16 %v13266_v54, %v13265_v46 }
 0x75d   :  { %v3445_v56 = vpop.f32.mrf.mxu1 }
 0x75e   :  { %13314 = vmatpush3.bf16.msra.mxu0 %v14502_v50  ;;  %v4116_v11 = vpack.c.bf16 %v3445_v56, %v3442_v52 }
 0x75f   :  { %13331 = vmatprep.subr.bf16.mxu0 %v14504_v53  ;;  %13370 = vmatpush3.bf16.msra.mxu1 %v14515_v51  ;;  %v13269_v60 = vpop.f32.mrf.mxu1 }
 0x760   :  { %13371 = vmatprep.subr.bf16.mxu1 %v14517_v55 }
 0x761   :  { %13316 = vmatmul.mubr.msk.bf16.vlgmr.msra.gmra.mxu0 %vm1110_vm4, %v3745_v58  ;;  %v3458_v2 = vpop.f32.mrf.mxu1 }
 0x762   :  { %13332 = vmatpush3.bf16.msra.mxu0 %v14504_v53  ;;  %13339 = vmatprep.mubr.msk.bf16.mxu0 %vm1110_vm4, %v3930_v57 }
 0x763   :  { %13333 = vmatprep.subr.bf16.mxu0 %v14506_v59  ;;  %13372 = vmatpush3.bf16.msra.mxu1 %v14517_v55  ;;  %v13270_v5 = vpop.f32.mrf.mxu1 }
 0x764   :  { %13373 = vmatprep.subr.bf16.mxu1 %v14519_v63  ;;  %v4210_v7 = vpack.c.bf16 %v13270_v5, %v13269_v60 }
 0x765   :  { %v3461_v6 = vpop.f32.mrf.mxu1 }
 0x766   :  { %13334 = vmatpush3.bf16.msra.mxu0 %v14506_v59  ;;  %v4209_v8 = vpack.c.bf16 %v3461_v6, %v3458_v2 }
 0x767   :  { %13335 = vmatprep.subr.bf16.mxu0 %v14508_v4  ;;  %13374 = vmatpush3.bf16.msra.mxu1 %v14519_v63 }
 0x768   :  { %13375 = vmatprep.mubr.msk.bf16.mxu1 %vm1110_vm4, %v4209_v8 }
 0x76a   :  { %13336 = vmatpush3.bf16.msra.mxu0 %v14508_v4  ;;  %13376 = vmatmul.mubr.msk.bf16.vlgmr.msra.gmra.mxu1 %vm1110_vm4, %v4210_v7 }
 0x76b   :  { %13337 = vmatprep.subr.bf16.mxu0 %v14510_v9 }
 0x76e   :  { %13338 = vmatpush3.bf16.msra.mxu0 %v14510_v9 }
 0x76f   :  { %13355 = vmatprep.subr.bf16.mxu0 %v14512_v10 }
 0x771   :  { %13340 = vmatmul.mubr.msk.bf16.vlgmr.msra.gmra.mxu0 %vm1110_vm4, %v3931_v12 }
 0x772   :  { %13356 = vmatpush3.bf16.msra.mxu0 %v14512_v10  ;;  %13363 = vmatprep.mubr.msk.bf16.mxu0 %vm1110_vm4, %v4116_v11 }
 0x773   :  { %13357 = vmatprep.subr.bf16.mxu0 %v14514_v13 }
 0x776   :  { %13358 = vmatpush3.bf16.msra.mxu0 %v14514_v13 }
 0x777   :  { %13359 = vmatprep.subr.bf16.mxu0 %v14516_v14 }
 0x77a   :  { %13360 = vmatpush3.bf16.msra.mxu0 %v14516_v14 }
 0x77b   :  { %13361 = vmatprep.subr.bf16.mxu0 %v14518_v16 }
 0x77e   :  { %13362 = vmatpush3.bf16.msra.mxu0 %v14518_v16 }
 0x781   :  { %13364 = vmatmul.mubr.msk.bf16.vlgmr.msra.gmra.mxu0 %vm1110_vm4, %v4117_v17 }
 0x782   :  { %13383 = vmatprep.mubr.msk.bf16.mxu0 %vm834_vm3, %v14520_v20 }
 0x7f1   :  { %v13281_v61 = vpop.f32.mrf.mxu0 }
 0x7f3   :  { %v3557_v62 = vpop.f32.mrf.mxu0 }
 0x7f5   :  { %v13282_v3 = vpop.f32.mrf.mxu0 }
 0x7f7   :  { %v3560_v25 = vpop.f32.mrf.mxu0 }
 0x801   :  { %v13293_v26 = vpop.f32.mrf.mxu0 }
 0x802   :  { %v3645_v44 = vadd.f32 %v13293_v26, %v13281_v61 }
 0x803   :  { %v3636_v27 = vpop.f32.mrf.mxu0 }
 0x804   :  { %v3637_v42 = vadd.f32 %v3636_v27, %v3557_v62 }
 0x805   :  { %v13294_v28 = vpop.f32.mrf.mxu0 }
 0x806   :  { %v3648_v49 = vadd.f32 %v13294_v28, %v13282_v3 }
 0x807   :  { %v3639_v29 = vpop.f32.mrf.mxu0 }
 0x808   :  { %v3640_v53 = vadd.f32 %v3639_v29, %v3560_v25  ;;  %v11649_v25 = vld [vmem:[%s18255_s4 + $0x3] ss:$0 sm:$0xff] }
 0x809   :  { %v13329_v34 = vpop.f32.mrf.mxu1 }
 0x80b   :  { %v3911_v37 = vpop.f32.mrf.mxu1 }
 0x80d   :  { %v13330_v39 = vpop.f32.mrf.mxu1 }
 0x80f   :  { %v3914_v41 = vpop.f32.mrf.mxu1 }
 0x811   :  { %v13305_v30 = vpop.f32.mrf.mxu0 }
 0x812   :  { %v3742_v48 = vadd.f32 %v13305_v30, %v3645_v44 }
 0x813   :  { %v3725_v31 = vpop.f32.mrf.mxu0 }
 0x814   :  { %v3740_v50 = vadd.f32 %v3725_v31, %v3637_v42  ;;  %v14521_v42 = vld [vmem:[%s18258_s7 + $0x248] sm:$0xff]  }
 0x815   :  { %v13306_v33 = vpop.f32.mrf.mxu0 }
 0x816   :  { %v3743_v54 = vadd.f32 %v13306_v33, %v3648_v49  ;;  %v14523_v49 = vld [vmem:[%s18258_s7 + $0x258] sm:$0xff]  }
 0x817   :  { %v3728_v35 = vpop.f32.mrf.mxu0 }
 0x818   :  { %v3741_v56 = vadd.f32 %v3728_v35, %v3640_v53  ;;  %v14528_v53 = vld [vmem:[%s18258_s7 + $0x280] sm:$0xff]  }
 0x81a   :  { %v13353_v43 = vpop.f32.mrf.mxu1 }
 0x81c   :  { %v4097_v47 = vpop.f32.mrf.mxu1 }
 0x81e   :  { %v13354_v52 = vpop.f32.mrf.mxu1 }
 0x820   :  { %v4100_v60 = vpop.f32.mrf.mxu1 }
 0x821   :  { %v13317_v36 = vpop.f32.mrf.mxu0 }
 0x822   :  { %v3835_v46 = vadd.f32 %v13317_v36, %v3742_v48  ;;  %v14522_v48 = vld [vmem:[%s18258_s7 + $0x250] sm:$0xff]  }
 0x823   :  { %v3818_v38 = vpop.f32.mrf.mxu0 }
 0x824   :  { %v3833_v55 = vadd.f32 %v3818_v38, %v3740_v50  ;;  %v3928_v57 = vadd.f32 %v13329_v34, %v3835_v46  ;;  %v14524_v50 = vld [vmem:[%s18258_s7 + $0x260] sm:$0xff]   ;;  %v14525_v46 = vld [vmem:[%s18258_s7 + $0x268] sm:$0xff]  }
 0x825   :  { %v13318_v40 = vpop.f32.mrf.mxu0 }
 0x826   :  { %v3836_v58 = vadd.f32 %v13318_v40, %v3743_v54  ;;  %v3926_v63 = vadd.f32 %v3911_v37, %v3833_v55  ;;  %v14529_v54 = vld [vmem:[%s18258_s7 + $0x288] sm:$0xff]   ;;  %v14530_v55 = vld [vmem:[%s18258_s7 + $0x290] sm:$0xff]  }
 0x827   :  { %v3821_v32 = vpop.f32.mrf.mxu0 }
 0x828   :  { %v3834_v2 = vadd.f32 %v3821_v32, %v3741_v56  ;;  %v3929_v6 = vadd.f32 %v13330_v39, %v3836_v58  ;;  %v14531_v56 = vld [vmem:[%s18258_s7 + $0x298] sm:$0xff]   ;;  %v14533_v58 = vld [vmem:[%s18258_s7 + $0x2a8] sm:$0xff]  }
 0x82a   :  { %v13377_v5 = vpop.f32.mrf.mxu1  ;;  %v3927_v9 = vadd.f32 %v3914_v41, %v3834_v2  ;;  %v14537_v2 = vld [vmem:[%s18258_s7 + $0x2c8] sm:$0xff]  }
 0x82c   :  { %v4283_v13 = vpop.f32.mrf.mxu1 }
 0x82e   :  { %v13378_v27 = vpop.f32.mrf.mxu1 }
 0x830   :  { %v4286_v36 = vpop.f32.mrf.mxu1 }
 0x831   :  { %v13341_v45 = vpop.f32.mrf.mxu0 }
 0x832   :  { %v4021_v4 = vadd.f32 %v13341_v45, %v3928_v57  ;;  %v14532_v57 = vld [vmem:[%s18258_s7 + $0x2a0] sm:$0xff]  }
 0x833   :  { %v4004_v51 = vpop.f32.mrf.mxu0 }
 0x834   :  { %v4019_v7 = vadd.f32 %v4004_v51, %v3926_v63  ;;  %v4114_v10 = vadd.f32 %v13353_v43, %v4021_v4  ;;  %v14526_v51 = vld [vmem:[%s18258_s7 + $0x270] sm:$0xff]   ;;  %v14536_v63 = vld [vmem:[%s18258_s7 + $0x2c0] sm:$0xff]   ;;  %v14538_v4 = vld [vmem:[%s18252_s1 + $0x3e8] sm:$0xff]  }
 0x835   :  { %v13342_v59 = vpop.f32.mrf.mxu0  ;;  %13419 = vmatprep.subr.bf16.mxu1 %v14538_v4 }
 0x836   :  { %v4022_v11 = vadd.f32 %v13342_v59, %v3929_v6  ;;  %v4112_v14 = vadd.f32 %v4097_v47, %v4019_v7  ;;  %v14534_v59 = vld [vmem:[%s18258_s7 + $0x2b0] sm:$0xff]   ;;  %13420 = vmatpush3.bf16.msra.mxu1 %v14538_v4  ;;  %v14540_v6 = vld [vmem:[%s18252_s1 + $0x3d8] sm:$0xff]  }
 0x837   :  { %v4007_v8 = vpop.f32.mrf.mxu0  ;;  %v14541_v7 = vld [vmem:[%s18252_s1 + $0x3d0] sm:$0xff]  }
 0x838   :  { %v4020_v16 = vadd.f32 %v4007_v8, %v3927_v9  ;;  %v4115_v61 = vadd.f32 %v13354_v52, %v4022_v11  ;;  %v14527_v52 = vld [vmem:[%s18258_s7 + $0x278] sm:$0xff]   ;;  %v14542_v8 = vld [vmem:[%s18252_s1 + $0x3c8] sm:$0xff]   ;;  %v14565_v4 = vld [vmem:[%s18252_s1 + $0x470] sm:$0xff]  }
 0x839   :  { %v14551_v9 = vld [vmem:[%s18252_s1 + $0x448] sm:$0xff]   ;;  %v14555_v11 = vld [vmem:[%s18252_s1 + $0x438] sm:$0xff]  }
 0x83a   :  { %v4113_v28 = vadd.f32 %v4100_v60, %v4020_v16  ;;  %v14535_v60 = vld [vmem:[%s18258_s7 + $0x2b8] sm:$0xff]  }
 0x841   :  { %v13365_v12 = vpop.f32.mrf.mxu0 }
 0x842   :  { %v4207_v17 = vadd.f32 %v13365_v12, %v4114_v10  ;;  %v14553_v10 = vld [vmem:[%s18252_s1 + $0x440] sm:$0xff]   ;;  %v14557_v12 = vld [vmem:[%s18252_s1 + $0x430] sm:$0xff]  }
 0x843   :  { %v4190_v20 = vpop.f32.mrf.mxu0 }
 0x844   :  { %v4205_v62 = vadd.f32 %v4190_v20, %v4112_v14  ;;  %v4300_v3 = vadd.f32 %v13377_v5, %v4207_v17  ;;  %v14539_v5 = vld [vmem:[%s18252_s1 + $0x3e0] sm:$0xff]  }
 0x845   :  { %v13366_v26 = vpop.f32.mrf.mxu0  ;;  %13421 = vmatprep.subr.bf16.mxu1 %v14539_v5 }
 0x846   :  { %v4208_v29 = vadd.f32 %v13366_v26, %v4115_v61  ;;  %v4298_v30 = vadd.f32 %v4283_v13, %v4205_v62  ;;  %v4309_v33 = vadd.f32 %v11649_v25, %v4300_v3  ;;  %13422 = vmatpush3.bf16.msra.mxu1 %v14539_v5  ;;  %v14559_v13 = vld [vmem:[%s18252_s1 + $0x488] sm:$0xff]  }
 0x847   :  { %v4193_v31 = vpop.f32.mrf.mxu0  ;;  %13423 = vmatprep.subr.bf16.mxu1 %v14540_v6 }
 0x848   :  { %v4206_v34 = vadd.f32 %v4193_v31, %v4113_v28  ;;  %v4301_v35 = vadd.f32 %v13378_v27, %v4208_v29  ;;  %v4307_v37 = vadd.f32 %v11649_v25, %v4298_v30  ;;  %v4313_v40 = vmax.f32 %v4309_v33, 0.0  ;;  %v14543_v28 = vld [vmem:[%s18252_s1 + $0x3c0] sm:$0xff]   ;;  %v14544_v33 = vld [vmem:[%s18252_s1 + $0x3b8] sm:$0xff]  }
 0x84a   :  { %v4310_v38 = vadd.f32 %v11649_v25, %v4301_v35  ;;  %v4299_v39 = vadd.f32 %v4286_v36, %v4206_v34  ;;  %v4311_v32 = vmax.f32 %v4307_v37, 0.0  ;;  %13424 = vmatpush3.bf16.msra.mxu1 %v14540_v6  ;;  %v14545_v36 = vld [vmem:[%s18252_s1 + $0x3b0] sm:$0xff]   ;;  %v14554_v6 = vld [vmem:[%s18252_s1 + $0x418] sm:$0xff]  }
 0x84b   :  { %13425 = vmatprep.subr.bf16.mxu1 %v14541_v7 }
 0x84c   :  { %v4314_v41 = vmax.f32 %v4310_v38, 0.0  ;;  %v4308_v43 = vadd.f32 %v11649_v25, %v4299_v39  ;;  %v14546_v39 = vld [vmem:[%s18252_s1 + $0x408] sm:$0xff]  }
 0x84e   :  { %v4312_v44 = vmax.f32 %v4308_v43, 0.0  ;;  %v4316_v45 = vpack.c.bf16 %v4314_v41, %v4313_v40  ;;  %13426 = vmatpush3.bf16.msra.mxu1 %v14541_v7 }
 0x84f   :  { %13431 = vmatprep.subr.bf16.mxu1 %v14542_v8 }
 0x850   :  { %13379 = vmatprep.subr.bf16.mxu0 %v4316_v45  ;;  %v4315_v47 = vpack.c.bf16 %v4312_v44, %v4311_v32  ;;  %v14547_v44 = vld [vmem:[%s18252_s1 + $0x400] sm:$0xff]  }
 0x851   :  { %13380 = vmatpush3.bf16.msra.mxu0 %v4316_v45 }
 0x852   :  { %13381 = vmatprep.subr.bf16.mxu0 %v4315_v47 }
 0x855   :  { %13382 = vmatpush3.bf16.msra.mxu0 %v4315_v47 }
 0x856   :  { %13467 = vmatprep.subr.bf16.mxu0 %v14551_v9 }
 0x858   :  { %13384 = vmatmul.mubr.msk.bf16.vlgmr.msra.gmra.mxu0 %vm834_vm3, %v14521_v42  ;;  %v14548_v42 = vld [vmem:[%s18252_s1 + $0x3f8] sm:$0xff]  }
 0x859   :  { %13387 = vmatprep.mubr.msk.bf16.mxu0 %vm834_vm3, %v14522_v48  ;;  %13468 = vmatpush3.bf16.msra.mxu0 %v14551_v9 }
 0x85a   :  { %13469 = vmatprep.subr.bf16.mxu0 %v14553_v10 }
 0x85d   :  { %13470 = vmatpush3.bf16.msra.mxu0 %v14553_v10 }
 0x85e   :  { %13471 = vmatprep.subr.bf16.mxu0 %v14555_v11 }
 0x860   :  { %13388 = vmatmul.mubr.msk.bf16.gmra.mxu0 %vm834_vm3, %v14523_v49 }
 0x861   :  { %13391 = vmatprep.mubr.msk.bf16.mxu0 %vm834_vm3, %v14524_v50  ;;  %13472 = vmatpush3.bf16.msra.mxu0 %v14555_v11 }
 0x862   :  { %13473 = vmatprep.subr.bf16.mxu0 %v14557_v12 }
 0x865   :  { %13474 = vmatpush3.bf16.msra.mxu0 %v14557_v12  ;;  %v14556_v12 = vld [vmem:[%s18252_s1 + $0x410] sm:$0xff]  }
 0x866   :  { %13491 = vmatprep.subr.bf16.mxu0 %v14559_v13 }
 0x868   :  { %13392 = vmatmul.mubr.msk.bf16.gmra.mxu0 %vm834_vm3, %v14525_v46 }
 0x869   :  { %13395 = vmatprep.mubr.msk.bf16.mxu0 %vm834_vm3, %v14526_v51  ;;  %v14549_v51 = vld [vmem:[%s18252_s1 + $0x3f0] sm:$0xff]  }
 0x870   :  { %13396 = vmatmul.mubr.msk.bf16.gmra.mxu0 %vm834_vm3, %v14527_v52 }
 0x871   :  { %13399 = vmatprep.mubr.msk.bf16.mxu0 %vm834_vm3, %v14528_v53  ;;  %v14561_v53 = vld [vmem:[%s18252_s1 + $0x480] sm:$0xff]  }
 0x878   :  { %13400 = vmatmul.mubr.msk.bf16.gmra.mxu0 %vm834_vm3, %v14529_v54 }
 0x879   :  { %13403 = vmatprep.mubr.msk.bf16.mxu0 %vm834_vm3, %v14530_v55  ;;  %v14550_v55 = vld [vmem:[%s18252_s1 + $0x428] sm:$0xff]  }
 0x880   :  { %13404 = vmatmul.mubr.msk.bf16.gmra.mxu0 %vm834_vm3, %v14531_v56 }
 0x881   :  { %13407 = vmatprep.mubr.msk.bf16.mxu0 %vm834_vm3, %v14532_v57  ;;  %v14563_v57 = vld [vmem:[%s18252_s1 + $0x478] sm:$0xff]  }
 0x888   :  { %13408 = vmatmul.mubr.msk.bf16.gmra.mxu0 %vm834_vm3, %v14533_v58 }
 0x889   :  { %13411 = vmatprep.mubr.msk.bf16.mxu0 %vm834_vm3, %v14534_v59 }
 0x890   :  { %13412 = vmatmul.mubr.msk.bf16.gmra.mxu0 %vm834_vm3, %v14535_v60 }
 0x891   :  { %13415 = vmatprep.mubr.msk.bf16.mxu0 %vm834_vm3, %v14536_v63  ;;  %v14552_v63 = vld [vmem:[%s18252_s1 + $0x420] sm:$0xff]  }
 0x898   :  { %13416 = vmatmul.mubr.msk.bf16.gmra.mxu0 %vm834_vm3, %v14537_v2 }
 0x918   :  { %v13385_v14 = vpop.f32.mrf.mxu0 }
 0x91a   :  { %v4531_v16 = vpop.f32.mrf.mxu0 }
 0x91c   :  { %v13386_v17 = vpop.f32.mrf.mxu0 }
 0x91d   :  { %v4675_v32 = vpack.c.bf16 %v13386_v17, %v13385_v14  ;;  %v14569_v14 = vld [vmem:[%s18252_s1 + $0x4c0] sm:$0xff]   ;;  %v14558_v17 = vld [vmem:[%s18252_s1 + $0x468] sm:$0xff]  }
 0x91e   :  { %v4534_v20 = vpop.f32.mrf.mxu0 }
 0x91f   :  { %v4674_v30 = vpack.c.bf16 %v4534_v20, %v4531_v16 }
 0x920   :  { %v13389_v61 = vpop.f32.mrf.mxu0 }
 0x922   :  { %v4547_v62 = vpop.f32.mrf.mxu0 }
 0x924   :  { %v13390_v3 = vpop.f32.mrf.mxu0 }
 0x925   :  { %v4685_v27 = vpack.c.bf16 %v13390_v3, %v13389_v61  ;;  %v14571_v61 = vld [vmem:[%s18252_s1 + $0x4b8] sm:$0xff]  }
 0x926   :  { %v4550_v25 = vpop.f32.mrf.mxu0 }
 0x927   :  { %v4684_v26 = vpack.c.bf16 %v4550_v25, %v4547_v62 }
 0x928   :  { %v16182_v29 = vpop.f32.mrf.mxu0 }
 0x929   :  { %13427 = vmatprep.mubr.msk.bf16.mxu1 %vm1110_vm4, %v4684_v26  ;;  %v14560_v26 = vld [vmem:[%s18252_s1 + $0x460] sm:$0xff]  }
 0x92a   :  { %13428 = vmatmul.mubr.msk.bf16.vlgmr.msra.gmra.mxu1 %vm1110_vm4, %v4685_v27  ;;  %v4563_v31 = vpop.f32.mrf.mxu0 }
 0x92b   :  { %13432 = vmatpush3.bf16.msra.mxu1 %v14542_v8  ;;  %13439 = vmatprep.mubr.msk.bf16.mxu1 %vm1110_vm4, %v4674_v30  ;;  %v14567_v8 = vld [vmem:[%s18252_s1 + $0x4c8] sm:$0xff]   ;;  %v14562_v30 = vld [vmem:[%s18252_s1 + $0x458] sm:$0xff]  }
 0x92c   :  { %13433 = vmatprep.subr.bf16.mxu1 %v14543_v28  ;;  %v13394_v34 = vpop.f32.mrf.mxu0 }
 0x92d   :  { %v4853_v60 = vpack.c.bf16 %v13394_v34, %v16182_v29 }
 0x92e   :  { %v4566_v35 = vpop.f32.mrf.mxu0 }
 0x92f   :  { %13434 = vmatpush3.bf16.msra.mxu1 %v14543_v28  ;;  %v4852_v43 = vpack.c.bf16 %v4566_v35, %v4563_v31  ;;  %v14573_v28 = vld [vmem:[%s18252_s1 + $0x4b0] sm:$0xff]  }
 0x930   :  { %13435 = vmatprep.subr.bf16.mxu1 %v14544_v33  ;;  %v16193_v37 = vpop.f32.mrf.mxu0 }
 0x932   :  { %v4579_v38 = vpop.f32.mrf.mxu0 }
 0x933   :  { %13436 = vmatpush3.bf16.msra.mxu1 %v14544_v33 }
 0x934   :  { %13437 = vmatprep.subr.bf16.mxu1 %v14545_v36  ;;  %v16198_v40 = vpop.f32.mrf.mxu0 }
 0x935   :  { %v4946_v25 = vpack.c.bf16 %v16198_v40, %v16193_v37  ;;  %v14566_v37 = vld [vmem:[%s18252_s1 + $0x4a8] sm:$0xff]   ;;  %v14568_v40 = vld [vmem:[%s18252_s1 + $0x4a0] sm:$0xff]  }
 0x936   :  { %v4582_v41 = vpop.f32.mrf.mxu0 }
 0x937   :  { %13438 = vmatpush3.bf16.msra.mxu1 %v14545_v36  ;;  %v4945_v59 = vpack.c.bf16 %v4582_v41, %v4579_v38  ;;  %v14564_v36 = vld [vmem:[%s18252_s1 + $0x450] sm:$0xff]   ;;  %v14570_v41 = vld [vmem:[%s18252_s1 + $0x498] sm:$0xff]  }
 0x938   :  { %13443 = vmatprep.subr.bf16.mxu1 %v14546_v39  ;;  %v13401_v45 = vpop.f32.mrf.mxu0 }
 0x93a   :  { %13440 = vmatmul.mubr.msk.bf16.vlgmr.msra.gmra.mxu1 %vm1110_vm4, %v4675_v32  ;;  %v4595_v47 = vpop.f32.mrf.mxu0 }
 0x93b   :  { %13444 = vmatpush3.bf16.msra.mxu1 %v14546_v39  ;;  %13451 = vmatprep.mubr.msk.bf16.mxu1 %vm1110_vm4, %v4852_v43  ;;  %v14572_v43 = vld [vmem:[%s18252_s1 + $0x490] sm:$0xff]  }
 0x93c   :  { %13445 = vmatprep.subr.bf16.mxu1 %v14547_v44  ;;  %v13402_v48 = vpop.f32.mrf.mxu0 }
 0x93d   :  { %v5039_v49 = vpack.c.bf16 %v13402_v48, %v13401_v45  ;;  %v14579_v45 = vld [vmem:[%s18253_s2 + $0x38] sm:$0xff]  }
 0x93e   :  { %v4598_v50 = vpop.f32.mrf.mxu0 }
 0x93f   :  { %13446 = vmatpush3.bf16.msra.mxu1 %v14547_v44  ;;  %v5038_v46 = vpack.c.bf16 %v4598_v50, %v4595_v47  ;;  %v15140_v44 = vmov 0.0  }
 0x940   :  { %13447 = vmatprep.subr.bf16.mxu1 %v14548_v42  ;;  %v16211_v52 = vpop.f32.mrf.mxu0 }
 0x941   :  { %13475 = vmatprep.mubr.msk.bf16.mxu0 %vm1110_vm4, %v5038_v46 }
 0x942   :  { %v16217_v54 = vpop.f32.mrf.mxu0  ;;  %13476 = vmatmul.mubr.msk.bf16.vlgmr.msra.gmra.mxu0 %vm1110_vm4, %v5039_v49  ;;  %v14581_v49 = vld [vmem:[%s18253_s2 + $0x28] sm:$0xff]  }
 0x943   :  { %13448 = vmatpush3.bf16.msra.mxu1 %v14548_v42  ;;  %13492 = vmatpush3.bf16.msra.mxu0 %v14559_v13  ;;  %v14580_v42 = vld [vmem:[%s18253_s2 + $0x30] sm:$0xff]  }
 0x944   :  { %13449 = vmatprep.subr.bf16.mxu1 %v14549_v51  ;;  %v16223_v56 = vpop.f32.mrf.mxu0  ;;  %13493 = vmatprep.subr.bf16.mxu0 %v14561_v53 }
 0x945   :  { %v5132_v39 = vpack.c.bf16 %v16223_v56, %v16211_v52 }
 0x946   :  { %v4614_v58 = vpop.f32.mrf.mxu0 }
 0x947   :  { %13450 = vmatpush3.bf16.msra.mxu1 %v14549_v51  ;;  %13494 = vmatpush3.bf16.msra.mxu0 %v14561_v53  ;;  %v5131_v3 = vpack.c.bf16 %v4614_v58, %v16217_v54 }
 0x948   :  { %13455 = vmatprep.subr.bf16.mxu1 %v14550_v55  ;;  %v13409_v2 = vpop.f32.mrf.mxu0  ;;  %13495 = vmatprep.subr.bf16.mxu0 %v14563_v57 }
 0x94a   :  { %13452 = vmatmul.mubr.msk.bf16.vlgmr.msra.gmra.mxu1 %vm1110_vm4, %v4853_v60  ;;  %v4627_v5 = vpop.f32.mrf.mxu0 }
 0x94b   :  { %13456 = vmatpush3.bf16.msra.mxu1 %v14550_v55  ;;  %13463 = vmatprep.mubr.msk.bf16.mxu1 %vm1110_vm4, %v4945_v59 }
 0x94c   :  { %13457 = vmatprep.subr.bf16.mxu1 %v14552_v63  ;;  %13496 = vmatpush3.bf16.msra.mxu0 %v14563_v57  ;;  %v13410_v7 = vpop.f32.mrf.mxu0 }
 0x94d   :  { %13497 = vmatprep.subr.bf16.mxu0 %v14565_v4  ;;  %v5225_v10 = vpack.c.bf16 %v13410_v7, %v13409_v2 }
 0x94e   :  { %v4630_v9 = vpop.f32.mrf.mxu0 }
 0x94f   :  { %13458 = vmatpush3.bf16.msra.mxu1 %v14552_v63  ;;  %v5224_v11 = vpack.c.bf16 %v4630_v9, %v4627_v5 }
 0x950   :  { %13459 = vmatprep.subr.bf16.mxu1 %v14554_v6  ;;  %13498 = vmatpush3.bf16.msra.mxu0 %v14565_v4  ;;  %v13413_v13 = vpop.f32.mrf.mxu0 }
 0x951   :  { %13499 = vmatprep.mubr.msk.bf16.mxu0 %vm1110_vm4, %v5224_v11  ;;  %13515 = vmatprep.subr.bf16.mxu0 %v14567_v8 }
 0x952   :  { %v4643_v16 = vpop.f32.mrf.mxu0 }
 0x953   :  { %13460 = vmatpush3.bf16.msra.mxu1 %v14554_v6  ;;  %13500 = vmatmul.mubr.msk.bf16.vlgmr.msra.gmra.mxu0 %vm1110_vm4, %v5225_v10 }
 0x954   :  { %13461 = vmatprep.subr.bf16.mxu1 %v14556_v12  ;;  %13516 = vmatpush3.bf16.msra.mxu0 %v14567_v8  ;;  %v13414_v20 = vpop.f32.mrf.mxu0 }
 0x955   :  { %13517 = vmatprep.subr.bf16.mxu0 %v14569_v14  ;;  %v5318_v32 = vpack.c.bf16 %v13414_v20, %v13413_v13 }
 0x956   :  { %v4646_v62 = vpop.f32.mrf.mxu0 }
 0x957   :  { %13462 = vmatpush3.bf16.msra.mxu1 %v14556_v12  ;;  %v5317_v38 = vpack.c.bf16 %v4646_v62, %v4643_v16 }
 0x958   :  { %13479 = vmatprep.subr.bf16.mxu1 %v14558_v17  ;;  %13518 = vmatpush3.bf16.msra.mxu0 %v14569_v14  ;;  %v13417_v27 = vpop.f32.mrf.mxu0 }
 0x959   :  { %13519 = vmatprep.subr.bf16.mxu0 %v14571_v61 }
 0x95a   :  { %13464 = vmatmul.mubr.msk.bf16.vlgmr.msra.gmra.mxu1 %vm1110_vm4, %v4946_v25  ;;  %v4659_v29 = vpop.f32.mrf.mxu0 }
 0x95b   :  { %13480 = vmatpush3.bf16.msra.mxu1 %v14558_v17  ;;  %13487 = vmatprep.mubr.msk.bf16.mxu1 %vm1110_vm4, %v5131_v3 }
 0x95c   :  { %13481 = vmatprep.subr.bf16.mxu1 %v14560_v26  ;;  %13520 = vmatpush3.bf16.msra.mxu0 %v14571_v61  ;;  %v13418_v31 = vpop.f32.mrf.mxu0 }
 0x95d   :  { %13521 = vmatprep.subr.bf16.mxu0 %v14573_v28  ;;  %v5411_v34 = vpack.c.bf16 %v13418_v31, %v13417_v27 }
 0x95e   :  { %v4662_v33 = vpop.f32.mrf.mxu0 }
 0x95f   :  { %13482 = vmatpush3.bf16.msra.mxu1 %v14560_v26  ;;  %v5410_v35 = vpack.c.bf16 %v4662_v33, %v4659_v29 }
 0x960   :  { %13483 = vmatprep.subr.bf16.mxu1 %v14562_v30  ;;  %13522 = vmatpush3.bf16.msra.mxu0 %v14573_v28 }
 0x961   :  { %13523 = vmatprep.mubr.msk.bf16.mxu0 %vm1110_vm4, %v5410_v35  ;;  %13551 = vmatprep.subr.bf16.mxu0 %v15140_v44 }
 0x963   :  { %13484 = vmatpush3.bf16.msra.mxu1 %v14562_v30  ;;  %13524 = vmatmul.mubr.msk.bf16.vlgmr.msra.gmra.mxu0 %vm1110_vm4, %v5411_v34 }
 0x964   :  { %13485 = vmatprep.subr.bf16.mxu1 %v14564_v36  ;;  %13559 = vmatprep.mubr.msk.bf16.mxu0 %vm15141_vm5, %v15140_v44 }
 0x965   :  { %13552 = vmatpush3.bf16.msra.mxu0 %v14579_v45 }
 0x966   :  { %13553 = vmatprep.subr.bf16.mxu0 %v15140_v44 }
 0x967   :  { %13486 = vmatpush3.bf16.msra.mxu1 %v14564_v36 }
 0x968   :  { %13503 = vmatprep.subr.bf16.mxu1 %v14566_v37 }
 0x969   :  { %13554 = vmatpush3.bf16.msra.mxu0 %v14580_v42 }
 0x96a   :  { %13488 = vmatmul.mubr.msk.bf16.vlgmr.msra.gmra.mxu1 %vm1110_vm4, %v5132_v39  ;;  %13555 = vmatprep.subr.bf16.mxu0 %v15140_v44 }
 0x96b   :  { %13504 = vmatpush3.bf16.msra.mxu1 %v14566_v37  ;;  %13511 = vmatprep.mubr.msk.bf16.mxu1 %vm1110_vm4, %v5317_v38 }
 0x96c   :  { %13505 = vmatprep.subr.bf16.mxu1 %v14568_v40 }
 0x96d   :  { %13556 = vmatpush3.bf16.msra.mxu0 %v14581_v49  ;;  %v11740_v49 = vld [vmem:[%s18255_s4 + $0x4] ss:$0 sm:$0xff] }
 0x96e   :  { %13557 = vmatprep.subr.bf16.mxu0 %v15140_v44 }
 0x96f   :  { %13506 = vmatpush3.bf16.msra.mxu1 %v14568_v40 }
 0x970   :  { %13507 = vmatprep.subr.bf16.mxu1 %v14570_v41 }
 0x973   :  { %13508 = vmatpush3.bf16.msra.mxu1 %v14570_v41 }
 0x974   :  { %13509 = vmatprep.subr.bf16.mxu1 %v14572_v43 }
 0x977   :  { %13510 = vmatpush3.bf16.msra.mxu1 %v14572_v43 }
 0x978   :  { %13527 = vmatprep.subr.bf16.mxu1 %v15140_v44 }
 0x97a   :  { %13512 = vmatmul.mubr.msk.bf16.vlgmr.msra.gmra.mxu1 %vm1110_vm4, %v5318_v32 }
 0x97b   :  { %13531 = vmatprep.mubr.msk.bf16.mxu1 %vm15141_vm5, %v15140_v44 }
 0x9ea   :  { %v13429_v47 = vpop.f32.mrf.mxu1 }
 0x9ec   :  { %v4758_v48 = vpop.f32.mrf.mxu1 }
 0x9ee   :  { %v13430_v50 = vpop.f32.mrf.mxu1 }
 0x9f0   :  { %v4761_v46 = vpop.f32.mrf.mxu1 }
 0x9fa   :  { %v13441_v51 = vpop.f32.mrf.mxu1 }
 0x9fb   :  { %v4846_v9 = vadd.f32 %v13441_v51, %v13429_v47 }
 0x9fc   :  { %v4837_v52 = vpop.f32.mrf.mxu1 }
 0x9fd   :  { %v4838_v12 = vadd.f32 %v4837_v52, %v4758_v48 }
 0x9fe   :  { %v13442_v53 = vpop.f32.mrf.mxu1 }
 0x9ff   :  { %v4849_v14 = vadd.f32 %v13442_v53, %v13430_v50 }
 0xa00   :  { %v4840_v54 = vpop.f32.mrf.mxu1 }
 0xa01   :  { %v4841_v62 = vadd.f32 %v4840_v54, %v4761_v46 }
 0xa02   :  { %v13477_v58 = vpop.f32.mrf.mxu0 }
 0xa04   :  { %v5112_v63 = vpop.f32.mrf.mxu0 }
 0xa06   :  { %v13478_v4 = vpop.f32.mrf.mxu0 }
 0xa08   :  { %v5115_v6 = vpop.f32.mrf.mxu0 }
 0xa0a   :  { %v13453_v55 = vpop.f32.mrf.mxu1 }
 0xa0b   :  { %v4943_v13 = vadd.f32 %v13453_v55, %v4846_v9 }
 0xa0c   :  { %v4926_v56 = vpop.f32.mrf.mxu1 }
 0xa0d   :  { %v4941_v16 = vadd.f32 %v4926_v56, %v4838_v12 }
 0xa0e   :  { %v13454_v57 = vpop.f32.mrf.mxu1 }
 0xa0f   :  { %v4944_v3 = vadd.f32 %v13454_v57, %v4849_v14 }
 0xa10   :  { %v4929_v59 = vpop.f32.mrf.mxu1 }
 0xa11   :  { %v4942_v26 = vadd.f32 %v4929_v59, %v4841_v62 }
 0xa13   :  { %v13501_v7 = vpop.f32.mrf.mxu0 }
 0xa15   :  { %v5298_v11 = vpop.f32.mrf.mxu0 }
 0xa17   :  { %v13502_v61 = vpop.f32.mrf.mxu0 }
 0xa19   :  { %v5301_v30 = vpop.f32.mrf.mxu0 }
 0xa1a   :  { %v13465_v60 = vpop.f32.mrf.mxu1 }
 0xa1b   :  { %v5036_v17 = vadd.f32 %v13465_v60, %v4943_v13 }
 0xa1c   :  { %v5019_v2 = vpop.f32.mrf.mxu1 }
 0xa1d   :  { %v5034_v25 = vadd.f32 %v5019_v2, %v4941_v16  ;;  %v5129_v27 = vadd.f32 %v13477_v58, %v5036_v17  ;;  %v14584_v16 = vld [vmem:[%s18253_s2 + $0x58] sm:$0xff]   ;;  %v14586_v17 = vld [vmem:[%s18253_s2 + $0x50] sm:$0xff]  }
 0xa1e   :  { %v13466_v5 = vpop.f32.mrf.mxu1 }
 0xa1f   :  { %v5037_v28 = vadd.f32 %v13466_v5, %v4944_v3  ;;  %v5127_v31 = vadd.f32 %v5112_v63, %v5034_v25 }
 0xa20   :  { %v5022_v8 = vpop.f32.mrf.mxu1 }
 0xa21   :  { %v5035_v33 = vadd.f32 %v5022_v8, %v4942_v26  ;;  %v5130_v36 = vadd.f32 %v13478_v4, %v5037_v28  ;;  %v14583_v26 = vld [vmem:[%s18253_s2 + $0x18] sm:$0xff]  }
 0xa23   :  { %v13525_v35 = vpop.f32.mrf.mxu0  ;;  %v5128_v39 = vadd.f32 %v5115_v6, %v5035_v33 }
 0xa25   :  { %v5484_v32 = vpop.f32.mrf.mxu0 }
 0xa27   :  { %v13526_v53 = vpop.f32.mrf.mxu0 }
 0xa29   :  { %v5487_v63 = vpop.f32.mrf.mxu0 }
 0xa2a   :  { %v13489_v10 = vpop.f32.mrf.mxu1 }
 0xa2b   :  { %v5222_v34 = vadd.f32 %v13489_v10, %v5129_v27 }
 0xa2c   :  { %v5205_v20 = vpop.f32.mrf.mxu1 }
 0xa2d   :  { %v5220_v37 = vadd.f32 %v5205_v20, %v5127_v31  ;;  %v5315_v40 = vadd.f32 %v13501_v7, %v5222_v34  ;;  %v14588_v20 = vld [vmem:[%s18253_s2 + $0x48] sm:$0xff]   ;;  %v14592_v31 = vld [vmem:[%s18253_s2 + $0x98] sm:$0xff]  }
 0xa2e   :  { %v13490_v29 = vpop.f32.mrf.mxu1 }
 0xa2f   :  { %v5223_v41 = vadd.f32 %v13490_v29, %v5130_v36  ;;  %v5313_v45 = vadd.f32 %v5298_v11, %v5220_v37  ;;  %v14585_v29 = vld [vmem:[%s18253_s2 + $0x10] sm:$0xff]  }
 0xa30   :  { %v5208_v38 = vpop.f32.mrf.mxu1  ;;  %v14594_v36 = vld [vmem:[%s18253_s2 + $0x90] sm:$0xff]  }
 0xa31   :  { %v5221_v47 = vadd.f32 %v5208_v38, %v5128_v39  ;;  %v5316_v50 = vadd.f32 %v13502_v61, %v5223_v41  ;;  %v14590_v61 = vld [vmem:[%s18253_s2 + $0x40] sm:$0xff]  }
 0xa32   :  { %v14589_v39 = vld [vmem:[%s18253_s2] sm:$0xff]  }
 0xa33   :  { %v5314_v54 = vadd.f32 %v5301_v30, %v5221_v47 }
 0xa3a   :  { %v13513_v43 = vpop.f32.mrf.mxu1 }
 0xa3b   :  { %v5408_v42 = vadd.f32 %v13513_v43, %v5315_v40  ;;  %v14596_v40 = vld [vmem:[%s18253_s2 + $0x88] sm:$0xff]  }
 0xa3c   :  { %v5391_v48 = vpop.f32.mrf.mxu1 }
 0xa3d   :  { %v5406_v46 = vadd.f32 %v5391_v48, %v5313_v45  ;;  %v5501_v51 = vadd.f32 %v13525_v35, %v5408_v42  ;;  %v14587_v35 = vld [vmem:[%s18253_s2 + $0x8] sm:$0xff]   ;;  %v14598_v45 = vld [vmem:[%s18253_s2 + $0x80] sm:$0xff]  }
 0xa3e   :  { %v13514_v52 = vpop.f32.mrf.mxu1 }
 0xa3f   :  { %v5510_v55 = vadd.f32 %v11740_v49, %v5501_v51  ;;  %v5409_v56 = vadd.f32 %v13514_v52, %v5316_v50  ;;  %v5499_v57 = vadd.f32 %v5484_v32, %v5406_v46  ;;  %v14591_v32 = vld [vmem:[%s18253_s2 + $0x78] sm:$0xff]   ;;  %v14593_v50 = vld [vmem:[%s18253_s2 + $0x70] sm:$0xff]  }
 0xa40   :  { %v5394_v58 = vpop.f32.mrf.mxu1  ;;  %v14600_v46 = vld [vmem:[%s18253_s2 + $0xd8] sm:$0xff]  }
 0xa41   :  { %v5407_v59 = vadd.f32 %v5394_v58, %v5314_v54  ;;  %v5502_v60 = vadd.f32 %v13526_v53, %v5409_v56  ;;  %v5514_v2 = vadd.f32 %v5510_v55, %v3112_v21  ;;  %v5508_v4 = vadd.f32 %v11740_v49, %v5499_v57  ;;  %v14595_v53 = vld [vmem:[%s18253_s2 + $0x68] sm:$0xff]   ;;  %v14602_v54 = vld [vmem:[%s18253_s2 + $0xd0] sm:$0xff]   ;;  %v14597_v57 = vld [vmem:[%s18253_s2 + $0x60] sm:$0xff]  }
 0xa42   :  { %v14604_v58 = vld [vmem:[%s18253_s2 + $0xc8] sm:$0xff]  }
 0xa43   :  { %v5511_v5 = vadd.f32 %v11740_v49, %v5502_v60  ;;  %v5500_v6 = vadd.f32 %v5487_v63, %v5407_v59  ;;  %v5518_v9 = vmax.f32 %v5514_v2, 0.0  ;;  %v5512_v10 = vadd.f32 %v5508_v4, %v3110_v24  ;;  %v14578_v24 = vld [vmem:[%s18258_s7 + $0x2f0] ss:$0 sps:$4 sm:$0xff]   ;;  %v14599_v63 = vld [vmem:[%s18253_s2 + $0xb8] sm:$0xff]   ;;  %v14606_v2 = vld [vmem:[%s18253_s2 + $0xc0] sm:$0xff]  }
 0xa45   :  { %v5515_v7 = vadd.f32 %v5511_v5, %v3113_v22  ;;  %v5509_v8 = vadd.f32 %v11740_v49, %v5500_v6  ;;  %v5516_v15 = vmax.f32 %v5512_v10, 0.0  ;;  %v14576_v22 = vld [vmem:[%s18258_s7 + $0x2e0] sm:$0xff]   ;;  %v14603_v10 = vld [vmem:[%s18253_s2 + $0xa8] sm:$0xff]  }
 0xa47   :  { %v5519_v11 = vmax.f32 %v5515_v7, 0.0  ;;  %v5513_v12 = vadd.f32 %v5509_v8, %v3111_v0  ;;  %v14582_v0 = vld [vmem:[%s18253_s2 + $0x20] sm:$0xff]   ;;  %v14601_v8 = vld [vmem:[%s18253_s2 + $0xb0] sm:$0xff]  }
 0xa48   :  { %13558 = vmatpush3.bf16.msra.mxu0 %v14582_v0  ;;  %v14613_v0 = vld [vmem:[%s18253_s2 + $0xe0] sm:$0xff]  }
 0xa49   :  { %v16322_v13 = vpack.c.bf16 %v5519_v11, %v5518_v9  ;;  %v5517_v14 = vmax.f32 %v5513_v12, 0.0  ;;  %13563 = vmatprep.subr.bf16.mxu0 %v15140_v44  ;;  %v14608_v9 = vld [vmem:[%s18253_s2 + $0x118] sm:$0xff]   ;;  %v14610_v11 = vld [vmem:[%s18253_s2 + $0x110] sm:$0xff]   ;;  %v14605_v12 = vld [vmem:[%s18253_s2 + $0xa0] sm:$0xff]  }
 0xa4b   :  { %13528 = vmatpush3.bf16.msra.mxu1 %v16322_v13  ;;  %v16326_v21 = vpack.c.bf16 %v5517_v14, %v5516_v15  ;;  %v14612_v14 = vld [vmem:[%s18253_s2 + $0x108] sm:$0xff]   ;;  %v14607_v15 = vld [vmem:[%s18253_s2 + $0xf8] sm:$0xff]  }
 0xa4c   :  { %13529 = vmatprep.subr.bf16.mxu1 %v15140_v44 }
 0xa4f   :  { %13530 = vmatpush3.bf16.msra.mxu1 %v16326_v21 }
 0xa50   :  { %13575 = vmatprep.subr.bf16.mxu1 %v15140_v44 }
 0xa52   :  { %13532 = vmatmul.mubr.msk.bf16.vlgmr.msra.gmra.mxu1 %vm834_vm3, %v14574_v19 }
 0xa53   :  { %13535 = vmatprep.mubr.msk.bf16.mxu1 %vm15141_vm5, %v15140_v44  ;;  %13576 = vmatpush3.bf16.msra.mxu1 %v14584_v16 }
 0xa54   :  { %13577 = vmatprep.subr.bf16.mxu1 %v15140_v44 }
 0xa57   :  { %13578 = vmatpush3.bf16.msra.mxu1 %v14586_v17  ;;  %v6339_v17 = vld [vmem:[%s18258_s7 + $0x320] sm:$0xf] }
 0xa58   :  { %13579 = vmatprep.subr.bf16.mxu1 %v15140_v44 }
 0xa5a   :  { %13536 = vmatmul.mubr.msk.bf16.gmra.mxu1 %vm834_vm3, %v14575_v18  ;;  %v14614_v18 = vld [vmem:[%s18253_s2 + $0x100] sm:$0xff]  }
 0xa5b   :  { %13539 = vmatprep.mubr.msk.bf16.mxu1 %vm15141_vm5, %v15140_v44  ;;  %13580 = vmatpush3.bf16.msra.mxu1 %v14588_v20  ;;  %v14622_v20 = vld [vmem:[%s18253_s2 + $0x368] sm:$0xff]  }
 0xa5c   :  { %13581 = vmatprep.subr.bf16.mxu1 %v15140_v44 }
 0xa5f   :  { %13582 = vmatpush3.bf16.msra.mxu1 %v14590_v61  ;;  %v14623_v61 = vld [vmem:[%s18253_s2 + $0x360] sm:$0xff]  }
 0xa60   :  { %13599 = vmatprep.subr.bf16.mxu1 %v15140_v44 }
 0xa62   :  { %13540 = vmatmul.mubr.msk.bf16.gmra.mxu1 %vm834_vm3, %v14576_v22  ;;  %v14609_v22 = vld [vmem:[%s18253_s2 + $0xf0] sm:$0xff]  }
 0xa63   :  { %13543 = vmatprep.mubr.msk.bf16.mxu1 %vm15141_vm5, %v15140_v44 }
 0xa6a   :  { %13544 = vmatmul.mubr.msk.bf16.gmra.mxu1 %vm834_vm3, %v14577_v23 }
 0xa6b   :  { %13547 = vmatprep.mubr.msk.bf16.mxu1 %vm15141_vm5, %v15140_v44 }
 0xa72   :  { %13548 = vmatmul.mubr.msk.bf16.gmra.mxu1 %vm834_vm3, %v14578_v24  ;;  %v14611_v24 = vld [vmem:[%s18253_s2 + $0xe8] sm:$0xff]  }
 0xa73   :  { %13583 = vmatprep.mubr.msk.bf16.mxu1 %vm15141_vm5, %v15140_v44 }
 0xb12   :  { %v5603_v62 = vpop.f32.mrf.mxu1 }
 0xb13   :  { %v5641_v42 = vpack.c.bf16 %v5603_v62, %v5603_v62 }
 0xb14   :  { %v13533_v3 = vpop.f32.mrf.mxu1 }
 0xb16   :  { %v5606_v25 = vpop.f32.mrf.mxu1 }
 0xb17   :  { %v5650_v27 = vpack.c.bf16 %v5606_v25, %v5606_v25 }
 0xb18   :  { %v13534_v28 = vpop.f32.mrf.mxu1 }
 0xb19   :  { %13560 = vmatmul.mubr.msk.bf16.vlgmr.msra.gmra.mxu0 %vm1110_vm4, %v5650_v27 }
 0xb1a   :  { %13564 = vmatpush3.bf16.msra.mxu0 %v14583_v26  ;;  %v5611_v30 = vpop.f32.mrf.mxu1  ;;  %13571 = vmatprep.mubr.msk.bf16.mxu0 %vm15141_vm5, %v15140_v44 }
 0xb1b   :  { %13565 = vmatprep.subr.bf16.mxu0 %v15140_v44  ;;  %v5793_v33 = vpack.c.bf16 %v5611_v30, %v5611_v30 }
 0xb1c   :  { %v13537_v34 = vpop.f32.mrf.mxu1 }
 0xb1d   :  { %13584 = vmatmul.mubr.msk.bf16.vlgmr.msra.gmra.mxu1 %vm1110_vm4, %v5793_v33 }
 0xb1e   :  { %13566 = vmatpush3.bf16.msra.mxu0 %v14585_v29  ;;  %13600 = vmatpush3.bf16.msra.mxu1 %v14592_v31  ;;  %v5614_v37 = vpop.f32.mrf.mxu1 }
 0xb1f   :  { %13567 = vmatprep.subr.bf16.mxu0 %v15140_v44  ;;  %13601 = vmatprep.subr.bf16.mxu1 %v15140_v44  ;;  %v5870_v5 = vpack.c.bf16 %v5614_v37, %v5614_v37 }
 0xb20   :  { %v13538_v38 = vpop.f32.mrf.mxu1  ;;  %13607 = vmatprep.mubr.msk.bf16.mxu1 %vm15141_vm5, %v15140_v44 }
 0xb22   :  { %13568 = vmatpush3.bf16.msra.mxu0 %v14587_v35  ;;  %13602 = vmatpush3.bf16.msra.mxu1 %v14594_v36  ;;  %v5619_v41 = vpop.f32.mrf.mxu1 }
 0xb23   :  { %13569 = vmatprep.subr.bf16.mxu0 %v15140_v44  ;;  %13603 = vmatprep.subr.bf16.mxu1 %v15140_v44  ;;  %v5947_v49 = vpack.c.bf16 %v5619_v41, %v5619_v41 }
 0xb24   :  { %v13541_v43 = vpop.f32.mrf.mxu1 }
 0xb26   :  { %13570 = vmatpush3.bf16.msra.mxu0 %v14589_v39  ;;  %13604 = vmatpush3.bf16.msra.mxu1 %v14596_v40  ;;  %v16418_v47 = vpop.f32.mrf.mxu1 }
 0xb27   :  { %13587 = vmatprep.subr.bf16.mxu0 %v15140_v44  ;;  %13605 = vmatprep.subr.bf16.mxu1 %v15140_v44  ;;  %v6024_v19 = vpack.c.bf16 %v16418_v47, %v16418_v47 }
 0xb28   :  { %v13542_v48 = vpop.f32.mrf.mxu1 }
 0xb29   :  { %13572 = vmatmul.mubr.msk.bf16.vlgmr.msra.gmra.mxu0 %vm1110_vm4, %v5641_v42 }
 0xb2a   :  { %13588 = vmatpush3.bf16.msra.mxu0 %v14591_v32  ;;  %13606 = vmatpush3.bf16.msra.mxu1 %v14598_v45  ;;  %v5627_v51 = vpop.f32.mrf.mxu1 }
 0xb2b   :  { %13589 = vmatprep.subr.bf16.mxu0 %v15140_v44  ;;  %13595 = vmatprep.mubr.msk.bf16.mxu0 %vm15141_vm5, %v15140_v44  ;;  %v6101_v7 = vpack.c.bf16 %v5627_v51, %v5627_v51 }
 0xb2c   :  { %13623 = vmatprep.subr.bf16.mxu1 %v15140_v44  ;;  %v13545_v52 = vpop.f32.mrf.mxu1 }
 0xb2d   :  { %13608 = vmatmul.mubr.msk.bf16.vlgmr.msra.gmra.mxu1 %vm1110_vm4, %v5947_v49 }
 0xb2e   :  { %13590 = vmatpush3.bf16.msra.mxu0 %v14593_v50  ;;  %13624 = vmatpush3.bf16.msra.mxu1 %v14600_v46  ;;  %v16440_v55 = vpop.f32.mrf.mxu1 }
 0xb2f   :  { %13591 = vmatprep.subr.bf16.mxu0 %v15140_v44  ;;  %13625 = vmatprep.subr.bf16.mxu1 %v15140_v44  ;;  %v6178_v16 = vpack.c.bf16 %v16440_v55, %v16440_v55 }
 0xb30   :  { %13631 = vmatprep.mubr.msk.bf16.mxu1 %vm15141_vm5, %v15140_v44  ;;  %v13546_v56 = vpop.f32.mrf.mxu1 }
 0xb32   :  { %13592 = vmatpush3.bf16.msra.mxu0 %v14595_v53  ;;  %13626 = vmatpush3.bf16.msra.mxu1 %v14602_v54  ;;  %v5635_v59 = vpop.f32.mrf.mxu1 }
 0xb33   :  { %13593 = vmatprep.subr.bf16.mxu0 %v15140_v44  ;;  %13627 = vmatprep.subr.bf16.mxu1 %v15140_v44  ;;  %v6255_v23 = vpack.c.bf16 %v5635_v59, %v5635_v59 }
 0xb34   :  { %v13549_v60 = vpop.f32.mrf.mxu1 }
 0xb36   :  { %13594 = vmatpush3.bf16.msra.mxu0 %v14597_v57  ;;  %13628 = vmatpush3.bf16.msra.mxu1 %v14604_v58  ;;  %v5638_v4 = vpop.f32.mrf.mxu1 }
 0xb37   :  { %13611 = vmatprep.subr.bf16.mxu0 %v15140_v44  ;;  %13629 = vmatprep.subr.bf16.mxu1 %v15140_v44 }
 0xb38   :  { %v13550_v6 = vpop.f32.mrf.mxu1 }
 0xb39   :  { %13596 = vmatmul.mubr.msk.bf16.vlgmr.msra.gmra.mxu0 %vm1110_vm4, %v5870_v5  ;;  %v11796_v5 = vld [vmem:[%s18256_s5] ss:$0 sm:$0xff] }
 0xb3a   :  { %13612 = vmatpush3.bf16.msra.mxu0 %v14599_v63  ;;  %13630 = vmatpush3.bf16.msra.mxu1 %v14606_v2 }
 0xb3b   :  { %13613 = vmatprep.subr.bf16.mxu0 %v15140_v44  ;;  %13619 = vmatprep.mubr.msk.bf16.mxu0 %vm15141_vm5, %v15140_v44 }
 0xb3c   :  { %13647 = vmatprep.subr.bf16.mxu1 %v15140_v44 }
 0xb3d   :  { %13632 = vmatmul.mubr.msk.bf16.vlgmr.msra.gmra.mxu1 %vm1110_vm4, %v6101_v7 }
 0xb3e   :  { %13614 = vmatpush3.bf16.msra.mxu0 %v14601_v8  ;;  %13648 = vmatpush3.bf16.msra.mxu1 %v14608_v9 }
 0xb3f   :  { %13615 = vmatprep.subr.bf16.mxu0 %v15140_v44  ;;  %13649 = vmatprep.subr.bf16.mxu1 %v15140_v44 }
 0xb40   :  { %13655 = vmatprep.mubr.msk.bf16.mxu1 %vm15141_vm5, %v15140_v44 }
 0xb42   :  { %13616 = vmatpush3.bf16.msra.mxu0 %v14603_v10  ;;  %13650 = vmatpush3.bf16.msra.mxu1 %v14610_v11 }
 0xb43   :  { %13617 = vmatprep.subr.bf16.mxu0 %v15140_v44  ;;  %13651 = vmatprep.subr.bf16.mxu1 %v15140_v44 }
 0xb46   :  { %13618 = vmatpush3.bf16.msra.mxu0 %v14605_v12  ;;  %13652 = vmatpush3.bf16.msra.mxu1 %v14612_v14 }
 0xb47   :  { %13635 = vmatprep.subr.bf16.mxu0 %v15140_v44  ;;  %13653 = vmatprep.subr.bf16.mxu1 %v15140_v44 }
 0xb49   :  { %13620 = vmatmul.mubr.msk.bf16.vlgmr.msra.gmra.mxu0 %vm1110_vm4, %v6024_v19  ;;  %v14625_v19 = vld [vmem:[%s18253_s2 + $0x158] sm:$0xff]  }
 0xb4a   :  { %13636 = vmatpush3.bf16.msra.mxu0 %v14607_v15  ;;  %13643 = vmatprep.mubr.msk.bf16.mxu0 %vm15141_vm5, %v15140_v44  ;;  %v14615_v15 = vld [vmem:[%s18258_s7 + $0x2f8] sm:$0xff]  }
 0xb4b   :  { %13637 = vmatprep.subr.bf16.mxu0 %v15140_v44  ;;  %13654 = vmatpush3.bf16.msra.mxu1 %v14614_v18  ;;  %v14627_v18 = vld [vmem:[%s18253_s2 + $0x150] sm:$0xff]  }
 0xb4c   :  { %13679 = vmatprep.subr.bf16.mxu1 %v15140_v44 }
 0xb4e   :  { %13638 = vmatpush3.bf16.msra.mxu0 %v14609_v22  ;;  %13656 = vmatmul.mubr.msk.bf16.vlgmr.msra.gmra.mxu1 %vm1110_vm4, %v6255_v23  ;;  %v14616_v22 = vld [vmem:[%s18258_s7 + $0x300] sm:$0xff]   ;;  %v14629_v23 = vld [vmem:[%s18253_s2 + $0x148] sm:$0xff]  }
 0xb4f   :  { %13639 = vmatprep.subr.bf16.mxu0 %v15140_v44  ;;  %13681 = vmatprep.mubr.msk.bf16.mxu1 %vm15141_vm5, %v15140_v44 }
 0xb52   :  { %13640 = vmatpush3.bf16.msra.mxu0 %v14611_v24  ;;  %v14631_v24 = vld [vmem:[%s18253_s2 + $0x140] sm:$0xff]  }
 0xb53   :  { %13641 = vmatprep.subr.bf16.mxu0 %v15140_v44 }
 0xb56   :  { %13642 = vmatpush3.bf16.msra.mxu0 %v14613_v0  ;;  %v14617_v0 = vld [vmem:[%s18258_s7 + $0x308] sm:$0xff]  }
 0xb57   :  { %13659 = vmatprep.subr.bf16.mxu0 %v15140_v44 }
 0xb59   :  { %13644 = vmatmul.mubr.msk.bf16.vlgmr.msra.gmra.mxu0 %vm1110_vm4, %v6178_v16  ;;  %v14633_v16 = vld [vmem:[%s18253_s2 + $0x138] sm:$0xff]  }
 0xb5a   :  { %13660 = vmatpush3.bf16.msra.mxu0 %v16322_v13  ;;  %13663 = vmatprep.mubr.msk.bf16.mxu0 %vm15141_vm5, %v15140_v44  ;;  %v14620_v13 = vld [vmem:[%s18253_s2 + $0x378] sm:$0xff]  }
 0xb5b   :  { %13661 = vmatprep.subr.bf16.mxu0 %v15140_v44 }
 0xb5e   :  { %13662 = vmatpush3.bf16.msra.mxu0 %v16326_v21  ;;  %v14621_v21 = vld [vmem:[%s18253_s2 + $0x370] sm:$0xff]  }
 0xb5f   :  { %13667 = vmatprep.subr.bf16.mxu0 %v15140_v44 }
 0xb61   :  { %13664 = vmatmul.mubr.msk.bf16.vlgmr.msra.gmra.mxu0 %vm834_vm3, %v6339_v17  ;;  %v14635_v17 = vld [vmem:[%s18253_s2 + $0x130] sm:$0xff]  }
 0xb62   :  { %13675 = vmatprep.mubr.msk.bf16.mxu0 %vm15141_vm5, %v15140_v44  ;;  %13668 = vmatpush3.bf16.msra.mxu0 %v14620_v13  ;;  %v14618_v13 = vld [vmem:[%s18258_s7 + $0x310] sm:$0xff]  }
 0xb63   :  { %13669 = vmatprep.subr.bf16.mxu0 %v15140_v44 }
 0xb66   :  { %13670 = vmatpush3.bf16.msra.mxu0 %v14621_v21 }
 0xb67   :  { %13671 = vmatprep.subr.bf16.mxu0 %v15140_v44 }
 0xb6a   :  { %13672 = vmatpush3.bf16.msra.mxu0 %v14622_v20  ;;  %v14624_v20 = vld [vmem:[%s18253_s2 + $0x198] sm:$0xff]  }
 0xb6b   :  { %13673 = vmatprep.subr.bf16.mxu0 %v15140_v44 }
 0xb6e   :  { %13674 = vmatpush3.bf16.msra.mxu0 %v14623_v61 }
 0xb6f   :  { %13701 = vmatprep.subr.bf16.mxu0 %v15140_v44 }
 0xbd9   :  { %v5720_v62 = vpop.f32.mrf.mxu0 }
 0xbdb   :  { %v13561_v3 = vpop.f32.mrf.mxu0 }
 0xbdc   :  { %v14626_v3 = vld [vmem:[%s18253_s2 + $0x190] sm:$0xff]  }
 0xbdd   :  { %v5723_v25 = vpop.f32.mrf.mxu0  ;;  %v5863_v26 = vpop.f32.mrf.mxu1 }
 0xbdf   :  { %v13562_v27 = vpop.f32.mrf.mxu0  ;;  %v13585_v28 = vpop.f32.mrf.mxu1 }
 0xbe0   :  { %v14619_v27 = vld [vmem:[%s18258_s7 + $0x318] ss:$0 sps:$4 sm:$0xff]   ;;  %v14628_v28 = vld [vmem:[%s18253_s2 + $0x188] sm:$0xff]  }
 0xbe1   :  { %v5866_v29 = vpop.f32.mrf.mxu1 }
 0xbe2   :  { %v14630_v29 = vld [vmem:[%s18253_s2 + $0x180] sm:$0xff]  }
 0xbe3   :  { %v13586_v30 = vpop.f32.mrf.mxu1 }
 0xbe4   :  { %v14632_v30 = vld [vmem:[%s18253_s2 + $0x178] sm:$0xff]  }
 0xbe9   :  { %v5787_v31 = vpop.f32.mrf.mxu0 }
 0xbea   :  { %v5788_v49 = vadd.f32 %v5787_v31, %v5720_v62  ;;  %v14634_v31 = vld [vmem:[%s18253_s2 + $0x170] sm:$0xff]  }
 0xbeb   :  { %v13573_v33 = vpop.f32.mrf.mxu0 }
 0xbec   :  { %v5869_v51 = vadd.f32 %v5863_v26, %v5788_v49  ;;  %v14636_v33 = vld [vmem:[%s18253_s2 + $0x168] sm:$0xff]  }
 0xbed   :  { %v5790_v34 = vpop.f32.mrf.mxu0  ;;  %v6017_v35 = vpop.f32.mrf.mxu1 }
 0xbee   :  { %v14637_v34 = vld [vmem:[%s18253_s2 + $0x128] sm:$0xff]  }
 0xbef   :  { %v13574_v36 = vpop.f32.mrf.mxu0  ;;  %v13609_v37 = vpop.f32.mrf.mxu1 }
 0xbf0   :  { %v14638_v36 = vld [vmem:[%s18253_s2 + $0x160] sm:$0xff]  }
 0xbf1   :  { %v6020_v38 = vpop.f32.mrf.mxu1 }
 0xbf2   :  { %v14641_v38 = vld [vmem:[%s18253_s2 + $0x218] sm:$0xff]  }
 0xbf3   :  { %v13610_v39 = vpop.f32.mrf.mxu1 }
 0xbf9   :  { %v5940_v40 = vpop.f32.mrf.mxu0 }
 0xbfa   :  { %v5946_v53 = vadd.f32 %v5940_v40, %v5869_v51  ;;  %v14647_v51 = vld [vmem:[%s18253_s2 + $0x200] sm:$0xff]  }
 0xbfb   :  { %v13597_v41 = vpop.f32.mrf.mxu0 }
 0xbfc   :  { %v6023_v57 = vadd.f32 %v6017_v35, %v5946_v53  ;;  %v14639_v35 = vld [vmem:[%s18253_s2 + $0x120] sm:$0xff]  }
 0xbfd   :  { %v5943_v43 = vpop.f32.mrf.mxu0  ;;  %v6171_v32 = vpop.f32.mrf.mxu1 }
 0xbfe   :  { %v14640_v43 = vld [vmem:[%s18253_s2 + $0x1d8] sm:$0xff]  }
 0xbff   :  { %v13598_v45 = vpop.f32.mrf.mxu0  ;;  %v13633_v47 = vpop.f32.mrf.mxu1 }
 0xc01   :  { %v6174_v42 = vpop.f32.mrf.mxu1 }
 0xc02   :  { %v14642_v42 = vld [vmem:[%s18253_s2 + $0x1d0] sm:$0xff]  }
 0xc03   :  { %v13634_v48 = vpop.f32.mrf.mxu1 }
 0xc04   :  { %v14645_v48 = vld [vmem:[%s18253_s2 + $0x208] sm:$0xff]  }
 0xc09   :  { %v6094_v50 = vpop.f32.mrf.mxu0 }
 0xc0a   :  { %v6100_v59 = vadd.f32 %v6094_v50, %v6023_v57 }
 0xc0b   :  { %v13621_v46 = vpop.f32.mrf.mxu0 }
 0xc0c   :  { %v6177_v63 = vadd.f32 %v6171_v32, %v6100_v59  ;;  %v14643_v32 = vld [vmem:[%s18253_s2 + $0x210] sm:$0xff]   ;;  %v14644_v46 = vld [vmem:[%s18253_s2 + $0x1c8] sm:$0xff]  }
 0xc0d   :  { %v6097_v52 = vpop.f32.mrf.mxu0  ;;  %v14651_v59 = vld [vmem:[%s18253_s2 + $0x1f0] sm:$0xff]  }
 0xc0e   :  { %v6325_v54 = vpop.f32.mrf.mxu1 }
 0xc0f   :  { %v13622_v55 = vpop.f32.mrf.mxu0 }
 0xc10   :  { %v13657_v56 = vpop.f32.mrf.mxu1  ;;  %v14649_v55 = vld [vmem:[%s18253_s2 + $0x1f8] sm:$0xff]  }
 0xc12   :  { %v6328_v58 = vpop.f32.mrf.mxu1 }
 0xc13   :  { %v14648_v58 = vld [vmem:[%s18253_s2 + $0x1b8] sm:$0xff]  }
 0xc14   :  { %v13658_v60 = vpop.f32.mrf.mxu1 }
 0xc19   :  { %v6248_v2 = vpop.f32.mrf.mxu0 }
 0xc1a   :  { %v6254_v4 = vadd.f32 %v6248_v2, %v6177_v63  ;;  %v14650_v2 = vld [vmem:[%s18253_s2 + $0x1b0] sm:$0xff]  }
 0xc1b   :  { %v13645_v6 = vpop.f32.mrf.mxu0 }
 0xc1c   :  { %v6331_v7 = vadd.f32 %v6325_v54, %v6254_v4  ;;  %v14646_v54 = vld [vmem:[%s18253_s2 + $0x1c0] sm:$0xff]   ;;  %v14653_v4 = vld [vmem:[%s18253_s2 + $0x1e8] sm:$0xff]  }
 0xc1d   :  { %v6251_v8 = vpop.f32.mrf.mxu0 }
 0xc1e   :  { %v6337_v9 = vadd.f32 %v11796_v5, %v6331_v7 }
 0xc1f   :  { %v13646_v10 = vpop.f32.mrf.mxu0 }
 0xc20   :  { %v6338_v11 = vmax.f32 %v6337_v9, 0.0  ;;  %v14652_v9 = vld [vmem:[%s18253_s2 + $0x1a8] sm:$0xff]   ;;  %v14655_v10 = vld [vmem:[%s18253_s2 + $0x1e0] sm:$0xff]  }
 0xc21   :  { %v6377_v21 = vpop.f32.mrf.mxu0 }
 0xc22   :  { %v6464_v12 = vpack.c.bf16 %v6338_v11, %v6338_v11  ;;  %v6383_v61 = vpack.c.bf16 %v6377_v21, %v6377_v21 }
 0xc23   :  { %v13665_v62 = vpop.f32.mrf.mxu0 }
 0xc24   :  { %v6515_v14 = vsel %vm6513_vm6, %v6464_v12, 0  ;;  %13676 = vmatmul.mubr.msk.bf16.vlgmr.msra.gmra.mxu0 %vm1110_vm4, %v6383_v61  ;;  %v14661_v61 = vld [vmem:[%s18253_s2 + $0x288] sm:$0xff]  }
 0xc25   :  { %13680 = vmatpush3.bf16.msra.mxu1 %v6515_v14  ;;  %13702 = vmatpush3.bf16.msra.mxu0 %v14624_v20  ;;  %v6380_v25 = vpop.f32.mrf.mxu0  ;;  %v14658_v20 = vld [vmem:[%s18253_s2 + $0x250] sm:$0xff]   ;;  %v14660_v62 = vld [vmem:[%s18253_s2 + $0x248] sm:$0xff]  }
 0xc26   :  { %13721 = vmatprep.subr.bf16.mxu1 %v15140_v44  ;;  %13703 = vmatprep.subr.bf16.mxu0 %v15140_v44  ;;  %v14662_v25 = vld [vmem:[%s18253_s2 + $0x240] sm:$0xff]  }
 0xc27   :  { %13717 = vmatprep.mubr.msk.bf16.mxu0 %vm15141_vm5, %v15140_v44  ;;  %v13666_v26 = vpop.f32.mrf.mxu0 }
 0xc28   :  { %13682 = vmatmul.mubr.msk.bf16.vlgmr.msra.gmra.mxu1 %vm6497_vm7, %v14615_v15  ;;  %v14665_v26 = vld [vmem:[%s18253_s2 + $0x278] sm:$0xff]  }
 0xc29   :  { %13685 = vmatprep.mubr.msk.bf16.mxu1 %vm15141_vm5, %v15140_v44  ;;  %13722 = vmatpush3.bf16.msra.mxu1 %v14625_v19 }
 0xc2a   :  { %13723 = vmatprep.subr.bf16.mxu1 %v15140_v44  ;;  %13704 = vmatpush3.bf16.msra.mxu0 %v14626_v3  ;;  %v14663_v3 = vld [vmem:[%s18253_s2 + $0x280] sm:$0xff]  }
 0xc2b   :  { %13705 = vmatprep.subr.bf16.mxu0 %v15140_v44 }
 0xc2d   :  { %13724 = vmatpush3.bf16.msra.mxu1 %v14627_v18  ;;  %v14654_v18 = vld [vmem:[%s18253_s2 + $0x1a0] sm:$0xff]  }
 0xc2e   :  { %13725 = vmatprep.subr.bf16.mxu1 %v15140_v44  ;;  %13706 = vmatpush3.bf16.msra.mxu0 %v14628_v28  ;;  %v14667_v28 = vld [vmem:[%s18253_s2 + $0x270] sm:$0xff]  }
 0xc2f   :  { %13707 = vmatprep.subr.bf16.mxu0 %v15140_v44 }
 0xc30   :  { %13686 = vmatmul.mubr.msk.bf16.gmra.mxu1 %vm6497_vm7, %v14616_v22  ;;  %v14657_v22 = vld [vmem:[%s18253_s2 + $0x298] sm:$0xff]  }
 0xc31   :  { %13689 = vmatprep.mubr.msk.bf16.mxu1 %vm15141_vm5, %v15140_v44  ;;  %13726 = vmatpush3.bf16.msra.mxu1 %v14629_v23 }
 0xc32   :  { %13727 = vmatprep.subr.bf16.mxu1 %v15140_v44  ;;  %13708 = vmatpush3.bf16.msra.mxu0 %v14630_v29  ;;  %v14666_v29 = vld [vmem:[%s18253_s2 + $0x230] sm:$0xff]  }
 0xc33   :  { %13709 = vmatprep.subr.bf16.mxu0 %v15140_v44 }
 0xc35   :  { %13728 = vmatpush3.bf16.msra.mxu1 %v14631_v24 }
 0xc36   :  { %13729 = vmatprep.subr.bf16.mxu1 %v15140_v44  ;;  %13710 = vmatpush3.bf16.msra.mxu0 %v14632_v30  ;;  %v14669_v30 = vld [vmem:[%s18253_s2 + $0x268] sm:$0xff]  }
 0xc37   :  { %13711 = vmatprep.subr.bf16.mxu0 %v15140_v44 }
 0xc38   :  { %13690 = vmatmul.mubr.msk.bf16.gmra.mxu1 %vm6497_vm7, %v14617_v0 }
 0xc39   :  { %13693 = vmatprep.mubr.msk.bf16.mxu1 %vm15141_vm5, %v15140_v44  ;;  %13730 = vmatpush3.bf16.msra.mxu1 %v14633_v16  ;;  %v14656_v16 = vld [vmem:[%s18253_s2 + $0x258] sm:$0xff]  }
 0xc3a   :  { %13731 = vmatprep.subr.bf16.mxu1 %v15140_v44  ;;  %13712 = vmatpush3.bf16.msra.mxu0 %v14634_v31  ;;  %v14668_v31 = vld [vmem:[%s18253_s2 + $0x228] sm:$0xff]  }
 0xc3b   :  { %13713 = vmatprep.subr.bf16.mxu0 %v15140_v44 }
 0xc3d   :  { %13732 = vmatpush3.bf16.msra.mxu1 %v14635_v17  ;;  %v14659_v17 = vld [vmem:[%s18253_s2 + $0x290] sm:$0xff]  }
 0xc3e   :  { %13733 = vmatprep.subr.bf16.mxu1 %v15140_v44  ;;  %13714 = vmatpush3.bf16.msra.mxu0 %v14636_v33  ;;  %v14671_v33 = vld [vmem:[%s18253_s2 + $0x260] sm:$0xff]  }
 0xc3f   :  { %13715 = vmatprep.subr.bf16.mxu0 %v15140_v44 }
 0xc40   :  { %13694 = vmatmul.mubr.msk.bf16.gmra.mxu1 %vm6497_vm7, %v14618_v13 }
 0xc41   :  { %13697 = vmatprep.mubr.msk.bf16.mxu1 %vm15141_vm5, %v15140_v44  ;;  %13734 = vmatpush3.bf16.msra.mxu1 %v14637_v34 }
 0xc42   :  { %13735 = vmatprep.subr.bf16.mxu1 %v15140_v44  ;;  %13716 = vmatpush3.bf16.msra.mxu0 %v14638_v36  ;;  %v14673_v36 = vld [vmem:[%s18253_s2 + $0x318] sm:$0xff]  }
 0xc43   :  { %13741 = vmatprep.subr.bf16.mxu0 %v15140_v44 }
 0xc45   :  { %13736 = vmatpush3.bf16.msra.mxu1 %v14639_v35  ;;  %v14670_v35 = vld [vmem:[%s18253_s2 + $0x220] sm:$0xff]  }
 0xc46   :  { %13761 = vmatprep.subr.bf16.mxu1 %v15140_v44 }
 0xc48   :  { %13698 = vmatmul.mubr.msk.bf16.gmra.mxu1 %vm6497_vm7, %v14619_v27  ;;  %v14664_v27 = vld [vmem:[%s18253_s2 + $0x238] sm:$0xff]  }
 0xc49   :  { %13737 = vmatprep.mubr.msk.bf16.mxu1 %vm15141_vm5, %v15140_v44 }
 0xce4   :  { %v16715_v6 = vpop.f32.mrf.mxu0 }
 0xce6   :  { %v13677_v8 = vpop.f32.mrf.mxu0 }
 0xce8   :  { %v6551_v37 = vpop.f32.mrf.mxu1  ;;  %v6461_v12 = vpop.f32.mrf.mxu0 }
 0xce9   :  { %v6589_v39 = vpack.c.bf16 %v6551_v37, %v6551_v37 }
 0xcea   :  { %v13683_v40 = vpop.f32.mrf.mxu1  ;;  %v13678_v15 = vpop.f32.mrf.mxu0 }
 0xceb   :  { %13738 = vmatmul.mubr.bf16.vlgmr.msra.gmra.mxu1 %v6589_v39  ;;  %v14675_v39 = vld [vmem:[%s18253_s2 + $0x310] sm:$0xff]  }
 0xcec   :  { %v6554_v41 = vpop.f32.mrf.mxu1  ;;  %13762 = vmatpush3.bf16.msra.mxu1 %v14641_v38  ;;  %13777 = vmatprep.mubr.msk.bf16.mxu1 %vm15141_vm5, %v15140_v44  ;;  %v14672_v38 = vld [vmem:[%s18253_s2 + $0x2d8] sm:$0xff]   ;;  %v14674_v40 = vld [vmem:[%s18253_s2 + $0x2d0] sm:$0xff]  }
 0xced   :  { %v6606_v45 = vpack.c.bf16 %v6554_v41, %v6554_v41  ;;  %13763 = vmatprep.subr.bf16.mxu1 %v15140_v44  ;;  %v14677_v41 = vld [vmem:[%s18253_s2 + $0x308] sm:$0xff]  }
 0xcee   :  { %v13684_v47 = vpop.f32.mrf.mxu1 }
 0xcef   :  { %13718 = vmatmul.mubr.bf16.vlgmr.msra.gmra.mxu0 %v6606_v45  ;;  %v14678_v45 = vld [vmem:[%s18253_s2 + $0x2c0] sm:$0xff]   ;;  %v14681_v47 = vld [vmem:[%s18253_s2 + $0x2f8] sm:$0xff]  }
 0xcf0   :  { %13742 = vmatpush3.bf16.msra.mxu0 %v14640_v43  ;;  %13764 = vmatpush3.bf16.msra.mxu1 %v14643_v32  ;;  %v16673_v49 = vpop.f32.mrf.mxu1  ;;  %v14676_v43 = vld [vmem:[%s18253_s2 + $0x2c8] sm:$0xff]   ;;  %v14679_v32 = vld [vmem:[%s18253_s2 + $0x300] sm:$0xff]  }
 0xcf1   :  { %13743 = vmatprep.subr.bf16.mxu0 %v15140_v44  ;;  %13765 = vmatprep.subr.bf16.mxu1 %v15140_v44  ;;  %v6799_v0 = vpack.c.bf16 %v16673_v49, %v16673_v49  ;;  %v14682_v49 = vld [vmem:[%s18253_s2 + $0x2b0] sm:$0xff]  }
 0xcf2   :  { %v13687_v50 = vpop.f32.mrf.mxu1  ;;  %13757 = vmatprep.mubr.msk.bf16.mxu0 %vm15141_vm5, %v15140_v44 }
 0xcf3   :  { %v14685_v50 = vld [vmem:[%s18253_s2 + $0x2e8] sm:$0xff]  }
 0xcf4   :  { %13744 = vmatpush3.bf16.msra.mxu0 %v14642_v42  ;;  %13766 = vmatpush3.bf16.msra.mxu1 %v14645_v48  ;;  %v6562_v52 = vpop.f32.mrf.mxu1  ;;  %v14680_v42 = vld [vmem:[%s18253_s2 + $0x2b8] sm:$0xff]   ;;  %v14683_v48 = vld [vmem:[%s18253_s2 + $0x2f0] sm:$0xff]  }
 0xcf5   :  { %13745 = vmatprep.subr.bf16.mxu0 %v15140_v44  ;;  %13767 = vmatprep.subr.bf16.mxu1 %v15140_v44  ;;  %v6905_v19 = vpack.c.bf16 %v6562_v52, %v6562_v52 }
 0xcf6   :  { %v13688_v53 = vpop.f32.mrf.mxu1 }
 0xcf7   :  { %v14686_v53 = vld [vmem:[%s18253_s2 + $0x2a0] sm:$0xff]  }
 0xcf8   :  { %13746 = vmatpush3.bf16.msra.mxu0 %v14644_v46  ;;  %13768 = vmatpush3.bf16.msra.mxu1 %v14647_v51  ;;  %v16693_v56 = vpop.f32.mrf.mxu1  ;;  %v14684_v46 = vld [vmem:[%s18253_s2 + $0x2a8] sm:$0xff]   ;;  %v14687_v51 = vld [vmem:[%s18253_s2 + $0x2e0] sm:$0xff]  }
 0xcf9   :  { %13747 = vmatprep.subr.bf16.mxu0 %v15140_v44  ;;  %13769 = vmatprep.subr.bf16.mxu1 %v15140_v44  ;;  %v7011_v37 = vpack.c.bf16 %v16693_v56, %v16693_v56  ;;  %v14689_v56 = vld [vmem:[%s18253_s2 + $0x350] sm:$0xff]  }
 0xcfa   :  { %v13691_v57 = vpop.f32.mrf.mxu1 }
 0xcfb   :  { %v14690_v57 = vld [vmem:[%s18253_s2 + $0x348] sm:$0xff]  }
 0xcfc   :  { %13748 = vmatpush3.bf16.msra.mxu0 %v14646_v54  ;;  %13770 = vmatpush3.bf16.msra.mxu1 %v14649_v55  ;;  %v16703_v60 = vpop.f32.mrf.mxu1  ;;  %v14688_v55 = vld [vmem:[%s18253_s2 + $0x358] sm:$0xff]  }
 0xcfd   :  { %13749 = vmatprep.subr.bf16.mxu0 %v15140_v44  ;;  %13771 = vmatprep.subr.bf16.mxu1 %v15140_v44  ;;  %v7117_v34 = vpack.c.bf16 %v16703_v60, %v16703_v60  ;;  %v14693_v60 = vld [vmem:[%s18253_s2 + $0x330] sm:$0xff]  }
 0xcfe   :  { %v13692_v63 = vpop.f32.mrf.mxu1 }
 0xcff   :  { %v14694_v63 = vld [vmem:[%s18253_s2 + $0x328] sm:$0xff]  }
 0xd00   :  { %13750 = vmatpush3.bf16.msra.mxu0 %v14648_v58  ;;  %13772 = vmatpush3.bf16.msra.mxu1 %v14651_v59  ;;  %v16713_v5 = vpop.f32.mrf.mxu1  ;;  %v14691_v58 = vld [vmem:[%s18253_s2 + $0x340] sm:$0xff]   ;;  %v14692_v59 = vld [vmem:[%s18253_s2 + $0x338] sm:$0xff]  }
 0xd01   :  { %13751 = vmatprep.subr.bf16.mxu0 %v15140_v44  ;;  %13773 = vmatprep.subr.bf16.mxu1 %v15140_v44  ;;  %v7223_v54 = vpack.c.bf16 %v16713_v5, %v16713_v5 }
 0xd02   :  { %v13695_v7 = vpop.f32.mrf.mxu1 }
 0xd04   :  { %13752 = vmatpush3.bf16.msra.mxu0 %v14650_v2  ;;  %13774 = vmatpush3.bf16.msra.mxu1 %v14653_v4  ;;  %v16725_v11 = vpop.f32.mrf.mxu1  ;;  %v14695_v2 = vld [vmem:[%s18253_s2 + $0x320] sm:$0xff]  }
 0xd05   :  { %13753 = vmatprep.subr.bf16.mxu0 %v15140_v44  ;;  %13775 = vmatprep.subr.bf16.mxu1 %v15140_v44  ;;  %v7329_v52 = vpack.c.bf16 %v16725_v11, %v16725_v11 }
 0xd06   :  { %v13696_v14 = vpop.f32.mrf.mxu1 }
 0xd08   :  { %13754 = vmatpush3.bf16.msra.mxu0 %v14652_v9  ;;  %13776 = vmatpush3.bf16.msra.mxu1 %v14655_v10  ;;  %v16735_v23 = vpop.f32.mrf.mxu1 }
 0xd09   :  { %13755 = vmatprep.subr.bf16.mxu0 %v15140_v44  ;;  %13801 = vmatprep.subr.bf16.mxu1 %v15140_v44  ;;  %v7435_v4 = vpack.c.bf16 %v16735_v23, %v16735_v23 }
 0xd0a   :  { %v13699_v24 = vpop.f32.mrf.mxu1 }
 0xd0b   :  { %13778 = vmatmul.mubr.bf16.vlgmr.msra.gmra.mxu1 %v6905_v19 }
 0xd0c   :  { %13756 = vmatpush3.bf16.msra.mxu0 %v14654_v18  ;;  %13802 = vmatpush3.bf16.msra.mxu1 %v14657_v22  ;;  %v6586_v13 = vpop.f32.mrf.mxu1 }
 0xd0d   :  { %13781 = vmatprep.subr.bf16.mxu0 %v15140_v44  ;;  %13803 = vmatprep.subr.bf16.mxu1 %v15140_v44 }
 0xd0e   :  { %13817 = vmatprep.mubr.msk.bf16.mxu1 %vm15141_vm5, %v15140_v44  ;;  %v13700_v21 = vpop.f32.mrf.mxu1 }
 0xd0f   :  { %13758 = vmatmul.mubr.bf16.vlgmr.msra.gmra.mxu0 %v6799_v0 }
 0xd10   :  { %13782 = vmatpush3.bf16.msra.mxu0 %v14656_v16  ;;  %13804 = vmatpush3.bf16.msra.mxu1 %v14659_v17 }
 0xd11   :  { %13783 = vmatprep.subr.bf16.mxu0 %v15140_v44  ;;  %13805 = vmatprep.subr.bf16.mxu1 %v15140_v44 }
 0xd12   :  { %13797 = vmatprep.mubr.msk.bf16.mxu0 %vm15141_vm5, %v15140_v44 }
 0xd14   :  { %13784 = vmatpush3.bf16.msra.mxu0 %v14658_v20  ;;  %13806 = vmatpush3.bf16.msra.mxu1 %v14661_v61  ;;  %v14702_v20 = vld [vmem:[%s18253_s2 + $0x3b8] sm:$0xff]   ;;  %v14704_v61 = vld [vmem:[%s18253_s2 + $0x3b0] sm:$0xff]  }
 0xd15   :  { %13785 = vmatprep.subr.bf16.mxu0 %v15140_v44  ;;  %13807 = vmatprep.subr.bf16.mxu1 %v15140_v44 }
 0xd18   :  { %13786 = vmatpush3.bf16.msra.mxu0 %v14660_v62  ;;  %13808 = vmatpush3.bf16.msra.mxu1 %v14663_v3  ;;  %v14706_v62 = vld [vmem:[%s18253_s2 + $0x3a8] sm:$0xff]   ;;  %v14708_v3 = vld [vmem:[%s18253_s2 + $0x3a0] sm:$0xff]  }
 0xd19   :  { %13787 = vmatprep.subr.bf16.mxu0 %v15140_v44  ;;  %13809 = vmatprep.subr.bf16.mxu1 %v15140_v44 }
 0xd1c   :  { %13788 = vmatpush3.bf16.msra.mxu0 %v14662_v25  ;;  %13810 = vmatpush3.bf16.msra.mxu1 %v14665_v26  ;;  %v14710_v26 = vld [vmem:[%s18253_s2 + $0x398] sm:$0xff]  }
 0xd1d   :  { %13789 = vmatprep.subr.bf16.mxu0 %v15140_v44  ;;  %13811 = vmatprep.subr.bf16.mxu1 %v15140_v44 }
 0xd20   :  { %13790 = vmatpush3.bf16.msra.mxu0 %v14664_v27  ;;  %13812 = vmatpush3.bf16.msra.mxu1 %v14667_v28 }
 0xd21   :  { %13791 = vmatprep.subr.bf16.mxu0 %v15140_v44  ;;  %13813 = vmatprep.subr.bf16.mxu1 %v15140_v44 }
 0xd24   :  { %13792 = vmatpush3.bf16.msra.mxu0 %v14666_v29  ;;  %13814 = vmatpush3.bf16.msra.mxu1 %v14669_v30  ;;  %v14712_v30 = vld [vmem:[%s18253_s2 + $0x390] sm:$0xff]  }
 0xd25   :  { %13793 = vmatprep.subr.bf16.mxu0 %v15140_v44  ;;  %13815 = vmatprep.subr.bf16.mxu1 %v15140_v44 }
 0xd28   :  { %13794 = vmatpush3.bf16.msra.mxu0 %v14668_v31  ;;  %13816 = vmatpush3.bf16.msra.mxu1 %v14671_v33 }
 0xd29   :  { %13795 = vmatprep.subr.bf16.mxu0 %v15140_v44  ;;  %13841 = vmatprep.subr.bf16.mxu1 %v15140_v44 }
 0xd2b   :  { %13818 = vmatmul.mubr.bf16.vlgmr.msra.gmra.mxu1 %v7117_v34 }
 0xd2c   :  { %13796 = vmatpush3.bf16.msra.mxu0 %v14670_v35  ;;  %13842 = vmatpush3.bf16.msra.mxu1 %v14673_v36 }
 0xd2d   :  { %13821 = vmatprep.subr.bf16.mxu0 %v15140_v44  ;;  %13843 = vmatprep.subr.bf16.mxu1 %v15140_v44 }
 0xd2e   :  { %13857 = vmatprep.mubr.msk.bf16.mxu1 %vm15141_vm5, %v15140_v44 }
 0xd2f   :  { %13798 = vmatmul.mubr.bf16.vlgmr.msra.gmra.mxu0 %v7011_v37 }
 0xd30   :  { %13822 = vmatpush3.bf16.msra.mxu0 %v14672_v38  ;;  %13844 = vmatpush3.bf16.msra.mxu1 %v14675_v39 }
 0xd31   :  { %13823 = vmatprep.subr.bf16.mxu0 %v15140_v44  ;;  %13845 = vmatprep.subr.bf16.mxu1 %v15140_v44 }
 0xd32   :  { %13837 = vmatprep.mubr.msk.bf16.mxu0 %vm15141_vm5, %v15140_v44 }
 0xd34   :  { %13824 = vmatpush3.bf16.msra.mxu0 %v14674_v40  ;;  %13846 = vmatpush3.bf16.msra.mxu1 %v14677_v41 }
 0xd35   :  { %13825 = vmatprep.subr.bf16.mxu0 %v15140_v44  ;;  %13847 = vmatprep.subr.bf16.mxu1 %v15140_v44 }
 0xd38   :  { %13826 = vmatpush3.bf16.msra.mxu0 %v14676_v43  ;;  %13848 = vmatpush3.bf16.msra.mxu1 %v14679_v32 }
 0xd39   :  { %13827 = vmatprep.subr.bf16.mxu0 %v15140_v44  ;;  %13849 = vmatprep.subr.bf16.mxu1 %v15140_v44 }
 0xd3c   :  { %13828 = vmatpush3.bf16.msra.mxu0 %v14678_v45  ;;  %13850 = vmatpush3.bf16.msra.mxu1 %v14681_v47 }
 0xd3d   :  { %13829 = vmatprep.subr.bf16.mxu0 %v15140_v44  ;;  %13851 = vmatprep.subr.bf16.mxu1 %v15140_v44 }
 0xd40   :  { %13830 = vmatpush3.bf16.msra.mxu0 %v14680_v42  ;;  %13852 = vmatpush3.bf16.msra.mxu1 %v14683_v48 }
 0xd41   :  { %13831 = vmatprep.subr.bf16.mxu0 %v15140_v44  ;;  %13853 = vmatprep.subr.bf16.mxu1 %v15140_v44 }
 0xd44   :  { %13832 = vmatpush3.bf16.msra.mxu0 %v14682_v49  ;;  %13854 = vmatpush3.bf16.msra.mxu1 %v14685_v50  ;;  %v11798_v49 = vld [vmem:[%s18256_s5 + $0x2] ss:$0 sm:$0xff] }
 0xd45   :  { %13833 = vmatprep.subr.bf16.mxu0 %v15140_v44  ;;  %13855 = vmatprep.subr.bf16.mxu1 %v15140_v44 }
 0xd48   :  { %13834 = vmatpush3.bf16.msra.mxu0 %v14684_v46  ;;  %13856 = vmatpush3.bf16.msra.mxu1 %v14687_v51  ;;  %v11886_v46 = vld [vmem:[%s18256_s5 + $0x1] ss:$0 sm:$0xff] }
 0xd49   :  { %13835 = vmatprep.subr.bf16.mxu0 %v15140_v44  ;;  %13881 = vmatprep.subr.bf16.mxu1 %v15140_v44 }
 0xd4b   :  { %13858 = vmatmul.mubr.bf16.vlgmr.msra.gmra.mxu1 %v7329_v52 }
 0xd4c   :  { %13836 = vmatpush3.bf16.msra.mxu0 %v14686_v53  ;;  %13883 = vmatprep.mubr.msk.bf16.mxu1 %vm15141_vm5, %v15140_v44  ;;  %v6459_v53 = vadd.f32 %v11798_v49, %v16715_v6  ;;  %v14701_v6 = vld [vmem:[%s18253_s2 + $0x3f8] sm:$0xff]   ;;  %v14731_v49 = vld [vmem:[%s18253_s2 + $0x400] sm:$0xff]  }
 0xd4d   :  { %13861 = vmatprep.subr.bf16.mxu0 %v15140_v44 }
 0xd4f   :  { %13838 = vmatmul.mubr.bf16.vlgmr.msra.gmra.mxu0 %v7223_v54 }
 0xd50   :  { %13862 = vmatpush3.bf16.msra.mxu0 %v14688_v55  ;;  %13877 = vmatprep.mubr.msk.bf16.mxu0 %vm15141_vm5, %v15140_v44 }
 0xd51   :  { %13863 = vmatprep.subr.bf16.mxu0 %v15140_v44 }
 0xd54   :  { %13864 = vmatpush3.bf16.msra.mxu0 %v14689_v56 }
 0xd55   :  { %13865 = vmatprep.subr.bf16.mxu0 %v15140_v44 }
 0xd58   :  { %13866 = vmatpush3.bf16.msra.mxu0 %v14690_v57 }
 0xd59   :  { %13867 = vmatprep.subr.bf16.mxu0 %v15140_v44 }
 0xd5c   :  { %13868 = vmatpush3.bf16.msra.mxu0 %v14691_v58 }
 0xd5d   :  { %13869 = vmatprep.subr.bf16.mxu0 %v15140_v44 }
 0xd60   :  { %13870 = vmatpush3.bf16.msra.mxu0 %v14692_v59 }
 0xd61   :  { %13871 = vmatprep.subr.bf16.mxu0 %v15140_v44 }
 0xd64   :  { %13872 = vmatpush3.bf16.msra.mxu0 %v14693_v60 }
 0xd65   :  { %13873 = vmatprep.subr.bf16.mxu0 %v15140_v44 }
 0xd68   :  { %13874 = vmatpush3.bf16.msra.mxu0 %v14694_v63  ;;  %v14696_v63 = vld [vmem:[%s18258_s7 + $0x328] sm:$0xff]  }
 0xd69   :  { %13875 = vmatprep.subr.bf16.mxu0 %v15140_v44 }
 0xd6c   :  { %13876 = vmatpush3.bf16.msra.mxu0 %v14695_v2  ;;  %v14703_v2 = vld [vmem:[%s18253_s2 + $0x3f0] sm:$0xff]  }
 0xd6d   :  { %13923 = vmatprep.subr.bf16.mxu0 %v15140_v44 }
 0xd6f   :  { %13878 = vmatmul.mubr.bf16.vlgmr.msra.gmra.mxu0 %v7435_v4  ;;  %v14697_v4 = vld [vmem:[%s18258_s7 + $0x330] sm:$0xff]  }
 0xd70   :  { %13939 = vmatprep.mubr.msk.bf16.mxu0 %vm15141_vm5, %v15140_v44  ;;  %13924 = vmatpush3.bf16.msra.mxu0 %v14702_v20 }
 0xd71   :  { %13925 = vmatprep.subr.bf16.mxu0 %v15140_v44 }
 0xd74   :  { %13926 = vmatpush3.bf16.msra.mxu0 %v14704_v61  ;;  %v14719_v61 = vld [vmem:[%s18253_s2 + $0x430] sm:$0xff]  }
 0xd75   :  { %13927 = vmatprep.subr.bf16.mxu0 %v15140_v44 }
 0xd78   :  { %13928 = vmatpush3.bf16.msra.mxu0 %v14706_v62  ;;  %v14722_v62 = vld [vmem:[%s18253_s2 + $0x468] sm:$0xff]  }
 0xd79   :  { %13929 = vmatprep.subr.bf16.mxu0 %v15140_v44 }
 0xd7c   :  { %13930 = vmatpush3.bf16.msra.mxu0 %v14708_v3 }
 0xd7d   :  { %13931 = vmatprep.subr.bf16.mxu0 %v15140_v44 }
 0xd80   :  { %13932 = vmatpush3.bf16.msra.mxu0 %v14710_v26  ;;  %v14721_v26 = vld [vmem:[%s18253_s2 + $0x428] sm:$0xff]  }
 0xd81   :  { %13933 = vmatprep.subr.bf16.mxu0 %v15140_v44 }
 0xd84   :  { %13934 = vmatpush3.bf16.msra.mxu0 %v14712_v30  ;;  %v14723_v30 = vld [vmem:[%s18253_s2 + $0x420] sm:$0xff]  }
 0xd85   :  { %13935 = vmatprep.subr.bf16.mxu0 %v15140_v44 }
 0xdab   :  { %v6793_v5 = vpop.f32.mrf.mxu1 }
 0xdad   :  { %v13739_v7 = vpop.f32.mrf.mxu1 }
 0xdae   :  { %v14707_v7 = vld [vmem:[%s18253_s2 + $0x3e0] sm:$0xff]  }
 0xdaf   :  { %v6705_v8 = vpop.f32.mrf.mxu0  ;;  %v6796_v9 = vpop.f32.mrf.mxu1 }
 0xdb0   :  { %v6794_v10 = vadd.f32 %v6793_v5, %v6705_v8  ;;  %v14705_v5 = vld [vmem:[%s18253_s2 + $0x3e8] sm:$0xff]   ;;  %v14698_v8 = vld [vmem:[%s18258_s7 + $0x338] sm:$0xff]  }
 0xdb1   :  { %v13719_v11 = vpop.f32.mrf.mxu0  ;;  %v13740_v12 = vpop.f32.mrf.mxu1  ;;  %v14709_v9 = vld [vmem:[%s18253_s2 + $0x3d8] sm:$0xff]  }
 0xdb2   :  { %v14699_v11 = vld [vmem:[%s18258_s7 + $0x340] sm:$0xff]   ;;  %v14713_v12 = vld [vmem:[%s18253_s2 + $0x3c8] sm:$0xff]  }
 0xdb3   :  { %v6708_v14 = vpop.f32.mrf.mxu0 }
 0xdb4   :  { %v14700_v14 = vld [vmem:[%s18258_s7 + $0x348] ss:$0 sps:$4 sm:$0xff]  }
 0xdb5   :  { %v13720_v15 = vpop.f32.mrf.mxu0 }
 0xdb6   :  { %v14714_v15 = vld [vmem:[%s18253_s2 + $0x388] sm:$0xff]  }
 0xdb7   :  { %13936 = vmatpush3.bf16.msra.mxu0 %v14714_v15 }
 0xdb8   :  { %13937 = vmatprep.subr.bf16.mxu0 %v15140_v44 }
 0xdcb   :  { %v7004_v19 = vpop.f32.mrf.mxu1 }
 0xdcd   :  { %v13779_v18 = vpop.f32.mrf.mxu1 }
 0xdce   :  { %v14715_v18 = vld [vmem:[%s18253_s2 + $0x3c0] sm:$0xff]  }
 0xdcf   :  { %v6898_v22 = vpop.f32.mrf.mxu0  ;;  %v7007_v23 = vpop.f32.mrf.mxu1 }
 0xdd0   :  { %v6904_v24 = vadd.f32 %v6898_v22, %v6794_v10  ;;  %v14711_v10 = vld [vmem:[%s18253_s2 + $0x3d0] sm:$0xff]   ;;  %v14718_v23 = vld [vmem:[%s18253_s2 + $0x478] sm:$0xff]  }
 0xdd1   :  { %v13759_v0 = vpop.f32.mrf.mxu0  ;;  %v13780_v16 = vpop.f32.mrf.mxu1 }
 0xdd2   :  { %v7010_v17 = vadd.f32 %v7004_v19, %v6904_v24  ;;  %v14716_v19 = vld [vmem:[%s18253_s2 + $0x380] sm:$0xff]  }
 0xdd3   :  { %v6901_v13 = vpop.f32.mrf.mxu0  ;;  %13938 = vmatpush3.bf16.msra.mxu0 %v14716_v19  ;;  %v14749_v19 = vld [vmem:[%s18253_s2 + $0x538] sm:$0xff]  }
 0xdd4   :  { %13963 = vmatprep.subr.bf16.mxu0 %v15140_v44  ;;  %v14720_v13 = vld [vmem:[%s18253_s2 + $0x470] sm:$0xff]  }
 0xdd5   :  { %v13760_v21 = vpop.f32.mrf.mxu0 }
 0xdeb   :  { %v7216_v25 = vpop.f32.mrf.mxu1 }
 0xded   :  { %v13819_v27 = vpop.f32.mrf.mxu1 }
 0xdee   :  { %v14724_v27 = vld [vmem:[%s18253_s2 + $0x460] sm:$0xff]  }
 0xdef   :  { %v7110_v28 = vpop.f32.mrf.mxu0  ;;  %v7219_v29 = vpop.f32.mrf.mxu1 }
 0xdf0   :  { %v7116_v45 = vadd.f32 %v7110_v28, %v7010_v17  ;;  %v14717_v17 = vld [vmem:[%s18253_s2 + $0x438] sm:$0xff]  }
 0xdf1   :  { %v13799_v31 = vpop.f32.mrf.mxu0  ;;  %v13820_v33 = vpop.f32.mrf.mxu1 }
 0xdf2   :  { %v7222_v47 = vadd.f32 %v7216_v25, %v7116_v45  ;;  %v14726_v31 = vld [vmem:[%s18253_s2 + $0x458] sm:$0xff]   ;;  %v14732_v45 = vld [vmem:[%s18253_s2 + $0x440] sm:$0xff]  }
 0xdf3   :  { %v7113_v34 = vpop.f32.mrf.mxu0 }
 0xdf5   :  { %v13800_v35 = vpop.f32.mrf.mxu0 }
 0xdf6   :  { %v14725_v35 = vld [vmem:[%s18253_s2 + $0x418] sm:$0xff]  }
 0xe0b   :  { %v7428_v36 = vpop.f32.mrf.mxu1 }
 0xe0d   :  { %v13859_v37 = vpop.f32.mrf.mxu1 }
 0xe0f   :  { %v7322_v38 = vpop.f32.mrf.mxu0  ;;  %v7431_v39 = vpop.f32.mrf.mxu1 }
 0xe10   :  { %v7328_v42 = vadd.f32 %v7322_v38, %v7222_v47  ;;  %v14727_v39 = vld [vmem:[%s18253_s2 + $0x410] sm:$0xff]  }
 0xe11   :  { %v13839_v40 = vpop.f32.mrf.mxu0  ;;  %v13860_v41 = vpop.f32.mrf.mxu1 }
 0xe12   :  { %v7434_v48 = vadd.f32 %v7428_v36, %v7328_v42  ;;  %v14728_v36 = vld [vmem:[%s18253_s2 + $0x450] sm:$0xff]   ;;  %v14730_v40 = vld [vmem:[%s18253_s2 + $0x448] sm:$0xff]  }
 0xe13   :  { %v7325_v43 = vpop.f32.mrf.mxu0 }
 0xe15   :  { %v13840_v32 = vpop.f32.mrf.mxu0 }
 0xe16   :  { %v14729_v32 = vld [vmem:[%s18253_s2 + $0x408] sm:$0xff]  }
 0xe2f   :  { %v7534_v50 = vpop.f32.mrf.mxu0 }
 0xe30   :  { %v7540_v51 = vadd.f32 %v7534_v50, %v7434_v48  ;;  %v14734_v50 = vld [vmem:[%s18253_s2 + $0x4f8] sm:$0xff]  }
 0xe31   :  { %v13879_v52 = vpop.f32.mrf.mxu0 }
 0xe32   :  { %v7546_v54 = vadd.f32 %v11886_v46, %v7540_v51 }
 0xe33   :  { %v7537_v55 = vpop.f32.mrf.mxu0 }
 0xe34   :  { %v7547_v56 = vadd.f32 %v7546_v54, %v6459_v53  ;;  %v14733_v53 = vld [vmem:[%s18253_s2 + $0x4b8] sm:$0xff]   ;;  %v14736_v54 = vld [vmem:[%s18253_s2 + $0x4f0] sm:$0xff]  }
 0xe35   :  { %v13880_v57 = vpop.f32.mrf.mxu0 }
 0xe36   :  { %v16954_v58 = vmax.f32 %v7547_v56, 0.0  ;;  %v14735_v57 = vld [vmem:[%s18253_s2 + $0x4b0] sm:$0xff]  }
 0xe38   :  { %v7549_v59 = vpack.c.bf16 %v16954_v58, %v16954_v58 }
 0xe3a   :  { %v7598_v60 = vsel %vm6513_vm6, %v7549_v59, 0  ;;  %v14738_v59 = vld [vmem:[%s18253_s2 + $0x4e8] sm:$0xff]  }
 0xe3b   :  { %13882 = vmatpush3.bf16.msra.mxu1 %v7598_v60  ;;  %v14737_v60 = vld [vmem:[%s18253_s2 + $0x4a8] sm:$0xff]  }
 0xe3c   :  { %13903 = vmatprep.subr.bf16.mxu1 %v15140_v44 }
 0xe3e   :  { %13884 = vmatmul.mubr.msk.bf16.vlgmr.msra.gmra.mxu1 %vm6497_vm7, %v14696_v63  ;;  %v14740_v63 = vld [vmem:[%s18253_s2 + $0x4e0] sm:$0xff]  }
 0xe3f   :  { %13887 = vmatprep.mubr.msk.bf16.mxu1 %vm15141_vm5, %v15140_v44  ;;  %13904 = vmatpush3.bf16.msra.mxu1 %v14701_v6  ;;  %v14739_v6 = vld [vmem:[%s18253_s2 + $0x4a0] sm:$0xff]  }
 0xe40   :  { %13905 = vmatprep.subr.bf16.mxu1 %v15140_v44 }
 0xe43   :  { %13906 = vmatpush3.bf16.msra.mxu1 %v14703_v2  ;;  %v14742_v2 = vld [vmem:[%s18253_s2 + $0x4d8] sm:$0xff]  }
 0xe44   :  { %13907 = vmatprep.subr.bf16.mxu1 %v15140_v44 }
 0xe46   :  { %13888 = vmatmul.mubr.msk.bf16.gmra.mxu1 %vm6497_vm7, %v14697_v4  ;;  %v14741_v4 = vld [vmem:[%s18253_s2 + $0x498] sm:$0xff]  }
 0xe47   :  { %13891 = vmatprep.mubr.msk.bf16.mxu1 %vm15141_vm5, %v15140_v44  ;;  %13908 = vmatpush3.bf16.msra.mxu1 %v14705_v5  ;;  %v14744_v5 = vld [vmem:[%s18253_s2 + $0x4d0] sm:$0xff]  }
 0xe48   :  { %13909 = vmatprep.subr.bf16.mxu1 %v15140_v44 }
 0xe4b   :  { %13910 = vmatpush3.bf16.msra.mxu1 %v14707_v7  ;;  %v14743_v7 = vld [vmem:[%s18253_s2 + $0x490] sm:$0xff]  }
 0xe4c   :  { %13911 = vmatprep.subr.bf16.mxu1 %v15140_v44 }
 0xe4e   :  { %13892 = vmatmul.mubr.msk.bf16.gmra.mxu1 %vm6497_vm7, %v14698_v8  ;;  %v14746_v8 = vld [vmem:[%s18253_s2 + $0x4c8] sm:$0xff]  }
 0xe4f   :  { %13895 = vmatprep.mubr.msk.bf16.mxu1 %vm15141_vm5, %v15140_v44  ;;  %13912 = vmatpush3.bf16.msra.mxu1 %v14709_v9  ;;  %v14745_v9 = vld [vmem:[%s18253_s2 + $0x488] sm:$0xff]  }
 0xe50   :  { %13913 = vmatprep.subr.bf16.mxu1 %v15140_v44 }
 0xe53   :  { %13914 = vmatpush3.bf16.msra.mxu1 %v14711_v10  ;;  %v14748_v10 = vld [vmem:[%s18253_s2 + $0x4c0] sm:$0xff]  }
 0xe54   :  { %13915 = vmatprep.subr.bf16.mxu1 %v15140_v44 }
 0xe56   :  { %13896 = vmatmul.mubr.msk.bf16.gmra.mxu1 %vm6497_vm7, %v14699_v11 }
 0xe57   :  { %13899 = vmatprep.mubr.msk.bf16.mxu1 %vm15141_vm5, %v15140_v44  ;;  %13916 = vmatpush3.bf16.msra.mxu1 %v14713_v12  ;;  %v14747_v12 = vld [vmem:[%s18253_s2 + $0x480] sm:$0xff]  }
 0xe58   :  { %13917 = vmatprep.subr.bf16.mxu1 %v15140_v44 }
 0xe5b   :  { %13918 = vmatpush3.bf16.msra.mxu1 %v14715_v18  ;;  %v14752_v18 = vld [vmem:[%s18253_s2 + $0x570] sm:$0xff]  }
 0xe5c   :  { %13943 = vmatprep.subr.bf16.mxu1 %v15140_v44 }
 0xe5e   :  { %13900 = vmatmul.mubr.msk.bf16.gmra.mxu1 %vm6497_vm7, %v14700_v14  ;;  %v14750_v14 = vld [vmem:[%s18253_s2 + $0x578] sm:$0xff]  }
 0xe5f   :  { %13919 = vmatprep.mubr.msk.bf16.mxu1 %vm15141_vm5, %v15140_v44 }
 0xefe   :  { %v7634_v22 = vpop.f32.mrf.mxu1 }
 0xeff   :  { %v7672_v24 = vpack.c.bf16 %v7634_v22, %v7634_v22  ;;  %v14751_v22 = vld [vmem:[%s18253_s2 + $0x530] sm:$0xff]  }
 0xf00   :  { %v13885_v0 = vpop.f32.mrf.mxu1 }
 0xf01   :  { %13940 = vmatmul.mubr.bf16.vlgmr.msra.gmra.mxu0 %v7672_v24  ;;  %v14753_v24 = vld [vmem:[%s18253_s2 + $0x528] sm:$0xff]   ;;  %v14756_v0 = vld [vmem:[%s18253_s2 + $0x560] sm:$0xff]  }
 0xf02   :  { %v7637_v16 = vpop.f32.mrf.mxu1  ;;  %13964 = vmatpush3.bf16.msra.mxu0 %v14718_v23  ;;  %13979 = vmatprep.mubr.msk.bf16.mxu0 %vm15141_vm5, %v15140_v44  ;;  %v14754_v23 = vld [vmem:[%s18253_s2 + $0x568] sm:$0xff]  }
 0xf03   :  { %v7689_v21 = vpack.c.bf16 %v7637_v16, %v7637_v16  ;;  %13965 = vmatprep.subr.bf16.mxu0 %v15140_v44  ;;  %v14755_v16 = vld [vmem:[%s18253_s2 + $0x520] sm:$0xff]  }
 0xf04   :  { %v13886_v20 = vpop.f32.mrf.mxu1 }
 0xf05   :  { %13920 = vmatmul.mubr.bf16.vlgmr.msra.gmra.mxu1 %v7689_v21  ;;  %v14760_v21 = vld [vmem:[%s18253_s2 + $0x550] sm:$0xff]  }
 0xf06   :  { %13944 = vmatpush3.bf16.msra.mxu1 %v14717_v17  ;;  %13966 = vmatpush3.bf16.msra.mxu0 %v14720_v13  ;;  %v17048_v3 = vpop.f32.mrf.mxu1  ;;  %v14758_v17 = vld [vmem:[%s18253_s2 + $0x558] sm:$0xff]   ;;  %v14759_v20 = vld [vmem:[%s18253_s2 + $0x510] sm:$0xff]  }
 0xf07   :  { %13945 = vmatprep.subr.bf16.mxu1 %v15140_v44  ;;  %13967 = vmatprep.subr.bf16.mxu0 %v15140_v44  ;;  %v7882_v52 = vpack.c.bf16 %v17048_v3, %v17048_v3  ;;  %v14757_v13 = vld [vmem:[%s18253_s2 + $0x518] sm:$0xff]   ;;  %v14764_v3 = vld [vmem:[%s18253_s2 + $0x540] sm:$0xff]  }
 0xf08   :  { %v13889_v25 = vpop.f32.mrf.mxu1  ;;  %13959 = vmatprep.mubr.msk.bf16.mxu1 %vm15141_vm5, %v15140_v44 }
 0xf0a   :  { %13946 = vmatpush3.bf16.msra.mxu1 %v14719_v61  ;;  %13968 = vmatpush3.bf16.msra.mxu0 %v14722_v62  ;;  %v7645_v28 = vpop.f32.mrf.mxu1  ;;  %v14762_v61 = vld [vmem:[%s18253_s2 + $0x548] sm:$0xff]  }
 0xf0b   :  { %13947 = vmatprep.subr.bf16.mxu1 %v15140_v44  ;;  %13969 = vmatprep.subr.bf16.mxu0 %v15140_v44  ;;  %v7988_v48 = vpack.c.bf16 %v7645_v28, %v7645_v28  ;;  %v14761_v62 = vld [vmem:[%s18253_s2 + $0x508] sm:$0xff]   ;;  %v14765_v28 = vld [vmem:[%s18253_s2 + $0x5b8] sm:$0xff]  }
 0xf0c   :  { %v13890_v29 = vpop.f32.mrf.mxu1 }
 0xf0d   :  { %v14766_v29 = vld [vmem:[%s18253_s2 + $0x5b0] sm:$0xff]  }
 0xf0e   :  { %13948 = vmatpush3.bf16.msra.mxu1 %v14721_v26  ;;  %13970 = vmatpush3.bf16.msra.mxu0 %v14724_v27  ;;  %v17068_v33 = vpop.f32.mrf.mxu1  ;;  %v14763_v26 = vld [vmem:[%s18253_s2 + $0x500] sm:$0xff]  }
 0xf0f   :  { %13949 = vmatprep.subr.bf16.mxu1 %v15140_v44  ;;  %13971 = vmatprep.subr.bf16.mxu0 %v15140_v44  ;;  %v8094_v15 = vpack.c.bf16 %v17068_v33, %v17068_v33  ;;  %v14769_v33 = vld [vmem:[%s18253_s2 + $0x598] sm:$0xff]  }
 0xf10   :  { %v13893_v34 = vpop.f32.mrf.mxu1 }
 0xf11   :  { %v14770_v34 = vld [vmem:[%s18253_s2 + $0x590] sm:$0xff]  }
 0xf12   :  { %13950 = vmatpush3.bf16.msra.mxu1 %v14723_v30  ;;  %13972 = vmatpush3.bf16.msra.mxu0 %v14726_v31  ;;  %v17078_v37 = vpop.f32.mrf.mxu1  ;;  %v14767_v30 = vld [vmem:[%s18253_s2 + $0x5a8] sm:$0xff]   ;;  %v14768_v31 = vld [vmem:[%s18253_s2 + $0x5a0] sm:$0xff]  }
 0xf13   :  { %13951 = vmatprep.subr.bf16.mxu1 %v15140_v44  ;;  %13973 = vmatprep.subr.bf16.mxu0 %v15140_v44  ;;  %v8200_v11 = vpack.c.bf16 %v17078_v37, %v17078_v37 }
 0xf14   :  { %v13894_v38 = vpop.f32.mrf.mxu1 }
 0xf16   :  { %13952 = vmatpush3.bf16.msra.mxu1 %v14725_v35  ;;  %13974 = vmatpush3.bf16.msra.mxu0 %v14728_v36  ;;  %v17088_v41 = vpop.f32.mrf.mxu1  ;;  %v14771_v35 = vld [vmem:[%s18253_s2 + $0x588] sm:$0xff]   ;;  %v14772_v36 = vld [vmem:[%s18253_s2 + $0x580] sm:$0xff]  }
 0xf17   :  { %13953 = vmatprep.subr.bf16.mxu1 %v15140_v44  ;;  %13975 = vmatprep.subr.bf16.mxu0 %v15140_v44  ;;  %v8306_v27 = vpack.c.bf16 %v17088_v41, %v17088_v41 }
 0xf18   :  { %v13897_v43 = vpop.f32.mrf.mxu1 }
 0xf1a   :  { %13954 = vmatpush3.bf16.msra.mxu1 %v14727_v39  ;;  %13976 = vmatpush3.bf16.msra.mxu0 %v14730_v40  ;;  %v17098_v47 = vpop.f32.mrf.mxu1 }
 0xf1b   :  { %13955 = vmatprep.subr.bf16.mxu1 %v15140_v44  ;;  %13977 = vmatprep.subr.bf16.mxu0 %v15140_v44  ;;  %v8412_v25 = vpack.c.bf16 %v17098_v47, %v17098_v47 }
 0xf1c   :  { %v13898_v42 = vpop.f32.mrf.mxu1 }
 0xf1e   :  { %13956 = vmatpush3.bf16.msra.mxu1 %v14729_v32  ;;  %13978 = vmatpush3.bf16.msra.mxu0 %v14732_v45  ;;  %v17108_v46 = vpop.f32.mrf.mxu1 }
 0xf1f   :  { %13957 = vmatprep.subr.bf16.mxu1 %v15140_v44  ;;  %14003 = vmatprep.subr.bf16.mxu0 %v15140_v44  ;;  %v8518_v37 = vpack.c.bf16 %v17108_v46, %v17108_v46 }
 0xf20   :  { %v13901_v51 = vpop.f32.mrf.mxu1 }
 0xf21   :  { %13980 = vmatmul.mubr.bf16.vlgmr.msra.gmra.mxu0 %v7988_v48 }
 0xf22   :  { %13958 = vmatpush3.bf16.msra.mxu1 %v14731_v49  ;;  %14004 = vmatpush3.bf16.msra.mxu0 %v14734_v50  ;;  %v7669_v55 = vpop.f32.mrf.mxu1 }
 0xf23   :  { %13983 = vmatprep.subr.bf16.mxu1 %v15140_v44  ;;  %14005 = vmatprep.subr.bf16.mxu0 %v15140_v44 }
 0xf24   :  { %14019 = vmatprep.mubr.msk.bf16.mxu0 %vm15141_vm5, %v15140_v44  ;;  %v13902_v56 = vpop.f32.mrf.mxu1 }
 0xf25   :  { %13960 = vmatmul.mubr.bf16.vlgmr.msra.gmra.mxu1 %v7882_v52 }
 0xf26   :  { %13984 = vmatpush3.bf16.msra.mxu1 %v14733_v53  ;;  %14006 = vmatpush3.bf16.msra.mxu0 %v14736_v54 }
 0xf27   :  { %13985 = vmatprep.subr.bf16.mxu1 %v15140_v44  ;;  %14007 = vmatprep.subr.bf16.mxu0 %v15140_v44 }
 0xf28   :  { %13999 = vmatprep.mubr.msk.bf16.mxu1 %vm15141_vm5, %v15140_v44 }
 0xf2a   :  { %13986 = vmatpush3.bf16.msra.mxu1 %v14735_v57  ;;  %14008 = vmatpush3.bf16.msra.mxu0 %v14738_v59  ;;  %v14779_v57 = vld [vmem:[%s18253_s2 + $0x5f8] sm:$0xff]   ;;  %v14781_v59 = vld [vmem:[%s18253_s2 + $0x5f0] sm:$0xff]  }
 0xf2b   :  { %13987 = vmatprep.subr.bf16.mxu1 %v15140_v44  ;;  %14009 = vmatprep.subr.bf16.mxu0 %v15140_v44 }
 0xf2e   :  { %13988 = vmatpush3.bf16.msra.mxu1 %v14737_v60  ;;  %14010 = vmatpush3.bf16.msra.mxu0 %v14740_v63  ;;  %v14783_v60 = vld [vmem:[%s18253_s2 + $0x5e8] sm:$0xff]   ;;  %v14785_v63 = vld [vmem:[%s18253_s2 + $0x5e0] sm:$0xff]  }
 0xf2f   :  { %13989 = vmatprep.subr.bf16.mxu1 %v15140_v44  ;;  %14011 = vmatprep.subr.bf16.mxu0 %v15140_v44 }
 0xf32   :  { %13990 = vmatpush3.bf16.msra.mxu1 %v14739_v6  ;;  %14012 = vmatpush3.bf16.msra.mxu0 %v14742_v2  ;;  %v14787_v6 = vld [vmem:[%s18253_s2 + $0x5d8] sm:$0xff]  }
 0xf33   :  { %13991 = vmatprep.subr.bf16.mxu1 %v15140_v44  ;;  %14013 = vmatprep.subr.bf16.mxu0 %v15140_v44 }
 0xf36   :  { %13992 = vmatpush3.bf16.msra.mxu1 %v14741_v4  ;;  %14014 = vmatpush3.bf16.msra.mxu0 %v14744_v5  ;;  %v14789_v5 = vld [vmem:[%s18253_s2 + $0x5d0] sm:$0xff]  }
 0xf37   :  { %13993 = vmatprep.subr.bf16.mxu1 %v15140_v44  ;;  %14015 = vmatprep.subr.bf16.mxu0 %v15140_v44 }
 0xf3a   :  { %13994 = vmatpush3.bf16.msra.mxu1 %v14743_v7  ;;  %14016 = vmatpush3.bf16.msra.mxu0 %v14746_v8 }
 0xf3b   :  { %13995 = vmatprep.subr.bf16.mxu1 %v15140_v44  ;;  %14017 = vmatprep.subr.bf16.mxu0 %v15140_v44 }
 0xf3e   :  { %13996 = vmatpush3.bf16.msra.mxu1 %v14745_v9  ;;  %14018 = vmatpush3.bf16.msra.mxu0 %v14748_v10 }
 0xf3f   :  { %13997 = vmatprep.subr.bf16.mxu1 %v15140_v44  ;;  %14043 = vmatprep.subr.bf16.mxu0 %v15140_v44 }
 0xf41   :  { %14020 = vmatmul.mubr.bf16.vlgmr.msra.gmra.mxu0 %v8200_v11 }
 0xf42   :  { %13998 = vmatpush3.bf16.msra.mxu1 %v14747_v12  ;;  %14044 = vmatpush3.bf16.msra.mxu0 %v14750_v14 }
 0xf43   :  { %14023 = vmatprep.subr.bf16.mxu1 %v15140_v44  ;;  %14045 = vmatprep.subr.bf16.mxu0 %v15140_v44 }
 0xf44   :  { %14059 = vmatprep.mubr.msk.bf16.mxu0 %vm15141_vm5, %v15140_v44 }
 0xf45   :  { %14000 = vmatmul.mubr.bf16.vlgmr.msra.gmra.mxu1 %v8094_v15 }
 0xf46   :  { %14024 = vmatpush3.bf16.msra.mxu1 %v14749_v19  ;;  %14046 = vmatpush3.bf16.msra.mxu0 %v14752_v18 }
 0xf47   :  { %14025 = vmatprep.subr.bf16.mxu1 %v15140_v44  ;;  %14047 = vmatprep.subr.bf16.mxu0 %v15140_v44 }
 0xf48   :  { %14039 = vmatprep.mubr.msk.bf16.mxu1 %vm15141_vm5, %v15140_v44 }
 0xf4a   :  { %14026 = vmatpush3.bf16.msra.mxu1 %v14751_v22  ;;  %14048 = vmatpush3.bf16.msra.mxu0 %v14754_v23 }
 0xf4b   :  { %14027 = vmatprep.subr.bf16.mxu1 %v15140_v44  ;;  %14049 = vmatprep.subr.bf16.mxu0 %v15140_v44 }
 0xf4e   :  { %14028 = vmatpush3.bf16.msra.mxu1 %v14753_v24  ;;  %14050 = vmatpush3.bf16.msra.mxu0 %v14756_v0 }
 0xf4f   :  { %14029 = vmatprep.subr.bf16.mxu1 %v15140_v44  ;;  %14051 = vmatprep.subr.bf16.mxu0 %v15140_v44 }
 0xf52   :  { %14030 = vmatpush3.bf16.msra.mxu1 %v14755_v16  ;;  %14052 = vmatpush3.bf16.msra.mxu0 %v14758_v17 }
 0xf53   :  { %14031 = vmatprep.subr.bf16.mxu1 %v15140_v44  ;;  %14053 = vmatprep.subr.bf16.mxu0 %v15140_v44 }
 0xf56   :  { %14032 = vmatpush3.bf16.msra.mxu1 %v14757_v13  ;;  %14054 = vmatpush3.bf16.msra.mxu0 %v14760_v21 }
 0xf57   :  { %14033 = vmatprep.subr.bf16.mxu1 %v15140_v44  ;;  %14055 = vmatprep.subr.bf16.mxu0 %v15140_v44 }
 0xf5a   :  { %14034 = vmatpush3.bf16.msra.mxu1 %v14759_v20  ;;  %14056 = vmatpush3.bf16.msra.mxu0 %v14762_v61  ;;  %v11969_v61 = vld [vmem:[%s18256_s5 + $0x3] ss:$0 sm:$0xff] }
 0xf5b   :  { %14035 = vmatprep.subr.bf16.mxu1 %v15140_v44  ;;  %14057 = vmatprep.subr.bf16.mxu0 %v15140_v44 }
 0xf5e   :  { %14036 = vmatpush3.bf16.msra.mxu1 %v14761_v62  ;;  %14058 = vmatpush3.bf16.msra.mxu0 %v14764_v3 }
 0xf5f   :  { %14037 = vmatprep.subr.bf16.mxu1 %v15140_v44  ;;  %14083 = vmatprep.subr.bf16.mxu0 %v15140_v44 }
 0xf61   :  { %14060 = vmatmul.mubr.bf16.vlgmr.msra.gmra.mxu0 %v8412_v25 }
 0xf62   :  { %14038 = vmatpush3.bf16.msra.mxu1 %v14763_v26  ;;  %14085 = vmatprep.mubr.msk.bf16.mxu0 %vm15141_vm5, %v15140_v44 }
 0xf63   :  { %14063 = vmatprep.subr.bf16.mxu1 %v15140_v44 }
 0xf65   :  { %14040 = vmatmul.mubr.bf16.vlgmr.msra.gmra.mxu1 %v8306_v27 }
 0xf66   :  { %14064 = vmatpush3.bf16.msra.mxu1 %v14765_v28  ;;  %14079 = vmatprep.mubr.msk.bf16.mxu1 %vm15141_vm5, %v15140_v44 }
 0xf67   :  { %14065 = vmatprep.subr.bf16.mxu1 %v15140_v44 }
 0xf6a   :  { %14066 = vmatpush3.bf16.msra.mxu1 %v14766_v29 }
 0xf6b   :  { %14067 = vmatprep.subr.bf16.mxu1 %v15140_v44 }
 0xf6e   :  { %14068 = vmatpush3.bf16.msra.mxu1 %v14767_v30 }
 0xf6f   :  { %14069 = vmatprep.subr.bf16.mxu1 %v15140_v44 }
 0xf72   :  { %14070 = vmatpush3.bf16.msra.mxu1 %v14768_v31  ;;  %v14773_v31 = vld [vmem:[%s18258_s7 + $0x350] sm:$0xff]  }
 0xf73   :  { %14071 = vmatprep.subr.bf16.mxu1 %v15140_v44 }
 0xf76   :  { %14072 = vmatpush3.bf16.msra.mxu1 %v14769_v33  ;;  %v14778_v33 = vld [vmem:[%s18253_s2 + $0x638] sm:$0xff]  }
 0xf77   :  { %14073 = vmatprep.subr.bf16.mxu1 %v15140_v44 }
 0xf7a   :  { %14074 = vmatpush3.bf16.msra.mxu1 %v14770_v34  ;;  %v14780_v34 = vld [vmem:[%s18253_s2 + $0x630] sm:$0xff]  }
 0xf7b   :  { %14075 = vmatprep.subr.bf16.mxu1 %v15140_v44 }
 0xf7e   :  { %14076 = vmatpush3.bf16.msra.mxu1 %v14771_v35  ;;  %v14774_v35 = vld [vmem:[%s18258_s7 + $0x358] sm:$0xff]  }
 0xf7f   :  { %14077 = vmatprep.subr.bf16.mxu1 %v15140_v44 }
 0xf82   :  { %14078 = vmatpush3.bf16.msra.mxu1 %v14772_v36  ;;  %v14782_v36 = vld [vmem:[%s18253_s2 + $0x628] sm:$0xff]  }
 0xf83   :  { %14125 = vmatprep.subr.bf16.mxu1 %v15140_v44 }
 0xf85   :  { %14080 = vmatmul.mubr.bf16.vlgmr.msra.gmra.mxu1 %v8518_v37  ;;  %v14784_v37 = vld [vmem:[%s18253_s2 + $0x620] sm:$0xff]  }
 0xf86   :  { %14141 = vmatprep.mubr.msk.bf16.mxu1 %vm15141_vm5, %v15140_v44  ;;  %14126 = vmatpush3.bf16.msra.mxu1 %v14779_v57  ;;  %v14799_v57 = vld [vmem:[%s18253_s2 + $0x6a8] sm:$0xff]  }
 0xf87   :  { %14127 = vmatprep.subr.bf16.mxu1 %v15140_v44 }
 0xf8a   :  { %14128 = vmatpush3.bf16.msra.mxu1 %v14781_v59 }
 0xf8b   :  { %14129 = vmatprep.subr.bf16.mxu1 %v15140_v44 }
 0xf8e   :  { %14130 = vmatpush3.bf16.msra.mxu1 %v14783_v60 }
 0xf8f   :  { %14131 = vmatprep.subr.bf16.mxu1 %v15140_v44 }
 0xf92   :  { %14132 = vmatpush3.bf16.msra.mxu1 %v14785_v63  ;;  %v14798_v63 = vld [vmem:[%s18253_s2 + $0x668] sm:$0xff]  }
 0xf93   :  { %14133 = vmatprep.subr.bf16.mxu1 %v15140_v44 }
 0xf96   :  { %14134 = vmatpush3.bf16.msra.mxu1 %v14787_v6  ;;  %v14801_v6 = vld [vmem:[%s18253_s2 + $0x6a0] sm:$0xff]  }
 0xf97   :  { %14135 = vmatprep.subr.bf16.mxu1 %v15140_v44 }
 0xf9a   :  { %14136 = vmatpush3.bf16.msra.mxu1 %v14789_v5  ;;  %v14800_v5 = vld [vmem:[%s18253_s2 + $0x660] sm:$0xff]  }
 0xf9b   :  { %14137 = vmatprep.subr.bf16.mxu1 %v15140_v44 }
 0xfc1   :  { %v7876_v38 = vpop.f32.mrf.mxu0 }
 0xfc3   :  { %v13941_v39 = vpop.f32.mrf.mxu0 }
 0xfc4   :  { %v14786_v39 = vld [vmem:[%s18253_s2 + $0x618] sm:$0xff]  }
 0xfc5   :  { %v7788_v40 = vpop.f32.mrf.mxu1  ;;  %v7879_v41 = vpop.f32.mrf.mxu0 }
 0xfc6   :  { %v7877_v43 = vadd.f32 %v7876_v38, %v7788_v40  ;;  %v14775_v38 = vld [vmem:[%s18258_s7 + $0x360] sm:$0xff]   ;;  %v14788_v40 = vld [vmem:[%s18253_s2 + $0x610] sm:$0xff]   ;;  %v14776_v41 = vld [vmem:[%s18258_s7 + $0x368] sm:$0xff]  }
 0xfc7   :  { %v13921_v32 = vpop.f32.mrf.mxu1  ;;  %v13942_v45 = vpop.f32.mrf.mxu0 }
 0xfc8   :  { %v14777_v32 = vld [vmem:[%s18258_s7 + $0x370] ss:$0 sps:$4 sm:$0xff]   ;;  %v14791_v45 = vld [vmem:[%s18253_s2 + $0x5c8] sm:$0xff]  }
 0xfc9   :  { %v7791_v47 = vpop.f32.mrf.mxu1  ;;  %14138 = vmatpush3.bf16.msra.mxu1 %v14791_v45 }
 0xfca   :  { %14139 = vmatprep.subr.bf16.mxu1 %v15140_v44  ;;  %v14793_v47 = vld [vmem:[%s18253_s2 + $0x5c0] sm:$0xff]  }
 0xfcb   :  { %v13922_v42 = vpop.f32.mrf.mxu1 }
 0xfcc   :  { %v14792_v42 = vld [vmem:[%s18253_s2 + $0x600] sm:$0xff]  }
 0xfcd   :  { %14140 = vmatpush3.bf16.msra.mxu1 %v14793_v47  ;;  %v14826_v47 = vld [vmem:[%s18253_s2 + $0x778] sm:$0xff]  }
 0xfce   :  { %14165 = vmatprep.subr.bf16.mxu1 %v15140_v44 }
 0xfe1   :  { %v8087_v48 = vpop.f32.mrf.mxu0 }
 0xfe3   :  { %v13981_v49 = vpop.f32.mrf.mxu0 }
 0xfe4   :  { %v14795_v49 = vld [vmem:[%s18253_s2 + $0x6b8] sm:$0xff]  }
 0xfe5   :  { %v7981_v50 = vpop.f32.mrf.mxu1  ;;  %v8090_v46 = vpop.f32.mrf.mxu0 }
 0xfe6   :  { %v7987_v51 = vadd.f32 %v7981_v50, %v7877_v43  ;;  %v14790_v43 = vld [vmem:[%s18253_s2 + $0x608] sm:$0xff]  }
 0xfe7   :  { %v13961_v52 = vpop.f32.mrf.mxu1  ;;  %v13982_v53 = vpop.f32.mrf.mxu0 }
 0xfe8   :  { %v8093_v54 = vadd.f32 %v8087_v48, %v7987_v51  ;;  %v14794_v52 = vld [vmem:[%s18253_s2 + $0x678] sm:$0xff]   ;;  %v14797_v53 = vld [vmem:[%s18253_s2 + $0x6b0] sm:$0xff]  }
 0xfe9   :  { %v7984_v55 = vpop.f32.mrf.mxu1 }
 0xfeb   :  { %v13962_v56 = vpop.f32.mrf.mxu1 }
 0xfec   :  { %v14796_v56 = vld [vmem:[%s18253_s2 + $0x670] sm:$0xff]  }
0x1001   :  { %v8299_v2 = vpop.f32.mrf.mxu0 }
0x1003   :  { %v14021_v4 = vpop.f32.mrf.mxu0 }
0x1005   :  { %v8193_v7 = vpop.f32.mrf.mxu1  ;;  %v8302_v8 = vpop.f32.mrf.mxu0 }
0x1006   :  { %v8199_v16 = vadd.f32 %v8193_v7, %v8093_v54  ;;  %v14803_v7 = vld [vmem:[%s18253_s2 + $0x698] sm:$0xff]  }
0x1007   :  { %v14001_v9 = vpop.f32.mrf.mxu1  ;;  %v14022_v10 = vpop.f32.mrf.mxu0 }
0x1008   :  { %v8305_v17 = vadd.f32 %v8299_v2, %v8199_v16  ;;  %v14802_v10 = vld [vmem:[%s18253_s2 + $0x658] sm:$0xff]  }
0x1009   :  { %v8196_v11 = vpop.f32.mrf.mxu1 }
0x100a   :  { %v14805_v11 = vld [vmem:[%s18253_s2 + $0x690] sm:$0xff]  }
0x100b   :  { %v14002_v12 = vpop.f32.mrf.mxu1 }
0x1021   :  { %v8511_v14 = vpop.f32.mrf.mxu0 }
0x1023   :  { %v14061_v15 = vpop.f32.mrf.mxu0 }
0x1024   :  { %v14804_v15 = vld [vmem:[%s18253_s2 + $0x650] sm:$0xff]  }
0x1025   :  { %v8405_v19 = vpop.f32.mrf.mxu1  ;;  %v8514_v18 = vpop.f32.mrf.mxu0 }
0x1026   :  { %v8411_v13 = vadd.f32 %v8405_v19, %v8305_v17  ;;  %v14807_v19 = vld [vmem:[%s18253_s2 + $0x688] sm:$0xff]  }
0x1027   :  { %v14041_v22 = vpop.f32.mrf.mxu1  ;;  %v14062_v23 = vpop.f32.mrf.mxu0 }
0x1028   :  { %v8517_v21 = vadd.f32 %v8511_v14, %v8411_v13  ;;  %v14806_v23 = vld [vmem:[%s18253_s2 + $0x648] sm:$0xff]   ;;  %v14808_v13 = vld [vmem:[%s18253_s2 + $0x640] sm:$0xff]  }
0x1029   :  { %v8408_v24 = vpop.f32.mrf.mxu1 }
0x102a   :  { %v14809_v24 = vld [vmem:[%s18253_s2 + $0x680] sm:$0xff]  }
0x102b   :  { %v14042_v0 = vpop.f32.mrf.mxu1 }
0x1045   :  { %v8617_v20 = vpop.f32.mrf.mxu1 }
0x1046   :  { %v8623_v62 = vadd.f32 %v8617_v20, %v8517_v21  ;;  %v14811_v21 = vld [vmem:[%s18253_s2 + $0x738] sm:$0xff]  }
0x1047   :  { %v14081_v3 = vpop.f32.mrf.mxu1 }
0x1048   :  { %v8629_v25 = vadd.f32 %v11969_v61, %v8623_v62  ;;  %v14810_v3 = vld [vmem:[%s18253_s2 + $0x6f8] sm:$0xff]  }
0x1049   :  { %v8620_v26 = vpop.f32.mrf.mxu1 }
0x104a   :  { %v8630_v27 = vmax.f32 %v8629_v25, 0.0  ;;  %v14813_v25 = vld [vmem:[%s18253_s2 + $0x730] sm:$0xff]  }
0x104b   :  { %v14082_v28 = vpop.f32.mrf.mxu1 }
0x104c   :  { %v8631_v29 = vpack.c.bf16 %v8630_v27, %v8630_v27  ;;  %v14812_v28 = vld [vmem:[%s18253_s2 + $0x6f0] sm:$0xff]  }
0x104e   :  { %v8680_v30 = vsel %vm6513_vm6, %v8631_v29, 0  ;;  %v14815_v29 = vld [vmem:[%s18253_s2 + $0x728] sm:$0xff]  }
0x104f   :  { %14084 = vmatpush3.bf16.msra.mxu0 %v8680_v30  ;;  %v14814_v30 = vld [vmem:[%s18253_s2 + $0x6e8] sm:$0xff]  }
0x1050   :  { %14105 = vmatprep.subr.bf16.mxu0 %v15140_v44 }
0x1052   :  { %14086 = vmatmul.mubr.msk.bf16.vlgmr.msra.gmra.mxu0 %vm6497_vm7, %v14773_v31  ;;  %v14817_v31 = vld [vmem:[%s18253_s2 + $0x720] sm:$0xff]  }
0x1053   :  { %14089 = vmatprep.mubr.msk.bf16.mxu0 %vm15141_vm5, %v15140_v44  ;;  %14106 = vmatpush3.bf16.msra.mxu0 %v14778_v33  ;;  %v14816_v33 = vld [vmem:[%s18253_s2 + $0x6e0] sm:$0xff]  }
0x1054   :  { %14107 = vmatprep.subr.bf16.mxu0 %v15140_v44 }
0x1057   :  { %14108 = vmatpush3.bf16.msra.mxu0 %v14780_v34  ;;  %v14819_v34 = vld [vmem:[%s18253_s2 + $0x718] sm:$0xff]  }
0x1058   :  { %14109 = vmatprep.subr.bf16.mxu0 %v15140_v44 }
0x105a   :  { %14090 = vmatmul.mubr.msk.bf16.gmra.mxu0 %vm6497_vm7, %v14774_v35  ;;  %v14818_v35 = vld [vmem:[%s18253_s2 + $0x6d8] sm:$0xff]  }
0x105b   :  { %14093 = vmatprep.mubr.msk.bf16.mxu0 %vm15141_vm5, %v15140_v44  ;;  %14110 = vmatpush3.bf16.msra.mxu0 %v14782_v36  ;;  %v14821_v36 = vld [vmem:[%s18253_s2 + $0x710] sm:$0xff]  }
0x105c   :  { %14111 = vmatprep.subr.bf16.mxu0 %v15140_v44 }
0x105f   :  { %14112 = vmatpush3.bf16.msra.mxu0 %v14784_v37  ;;  %v14820_v37 = vld [vmem:[%s18253_s2 + $0x6d0] sm:$0xff]  }
0x1060   :  { %14113 = vmatprep.subr.bf16.mxu0 %v15140_v44 }
0x1062   :  { %14094 = vmatmul.mubr.msk.bf16.gmra.mxu0 %vm6497_vm7, %v14775_v38  ;;  %v14823_v38 = vld [vmem:[%s18253_s2 + $0x708] sm:$0xff]  }
0x1063   :  { %14097 = vmatprep.mubr.msk.bf16.mxu0 %vm15141_vm5, %v15140_v44  ;;  %14114 = vmatpush3.bf16.msra.mxu0 %v14786_v39  ;;  %v14822_v39 = vld [vmem:[%s18253_s2 + $0x6c8] sm:$0xff]  }
0x1064   :  { %14115 = vmatprep.subr.bf16.mxu0 %v15140_v44 }
0x1067   :  { %14116 = vmatpush3.bf16.msra.mxu0 %v14788_v40  ;;  %v14825_v40 = vld [vmem:[%s18253_s2 + $0x700] sm:$0xff]  }
0x1068   :  { %14117 = vmatprep.subr.bf16.mxu0 %v15140_v44 }
0x106a   :  { %14098 = vmatmul.mubr.msk.bf16.gmra.mxu0 %vm6497_vm7, %v14776_v41 }
0x106b   :  { %14101 = vmatprep.mubr.msk.bf16.mxu0 %vm15141_vm5, %v15140_v44  ;;  %14118 = vmatpush3.bf16.msra.mxu0 %v14790_v43  ;;  %v14824_v43 = vld [vmem:[%s18253_s2 + $0x6c0] sm:$0xff]  }
0x106c   :  { %14119 = vmatprep.subr.bf16.mxu0 %v15140_v44 }
0x106f   :  { %14120 = vmatpush3.bf16.msra.mxu0 %v14792_v42  ;;  %v14829_v42 = vld [vmem:[%s18253_s2 + $0x7b0] sm:$0xff]  }
0x1070   :  { %14145 = vmatprep.subr.bf16.mxu0 %v15140_v44 }
0x1072   :  { %14102 = vmatmul.mubr.msk.bf16.gmra.mxu0 %vm6497_vm7, %v14777_v32  ;;  %v14827_v32 = vld [vmem:[%s18253_s2 + $0x7b8] sm:$0xff]  }
0x1073   :  { %14121 = vmatprep.mubr.msk.bf16.mxu0 %vm15141_vm5, %v15140_v44 }
0x1112   :  { %v8716_v48 = vpop.f32.mrf.mxu0 }
0x1113   :  { %v8754_v50 = vpack.c.bf16 %v8716_v48, %v8716_v48  ;;  %v14828_v48 = vld [vmem:[%s18253_s2 + $0x770] sm:$0xff]  }
0x1114   :  { %v14087_v46 = vpop.f32.mrf.mxu0 }
0x1115   :  { %14142 = vmatmul.mubr.bf16.vlgmr.msra.gmra.mxu1 %v8754_v50  ;;  %v14830_v50 = vld [vmem:[%s18253_s2 + $0x768] sm:$0xff]   ;;  %v14833_v46 = vld [vmem:[%s18253_s2 + $0x7a0] sm:$0xff]  }
0x1116   :  { %v8719_v51 = vpop.f32.mrf.mxu0  ;;  %14166 = vmatpush3.bf16.msra.mxu1 %v14795_v49  ;;  %14181 = vmatprep.mubr.msk.bf16.mxu1 %vm15141_vm5, %v15140_v44  ;;  %v14831_v49 = vld [vmem:[%s18253_s2 + $0x7a8] sm:$0xff]  }
0x1117   :  { %v8771_v54 = vpack.c.bf16 %v8719_v51, %v8719_v51  ;;  %14167 = vmatprep.subr.bf16.mxu1 %v15140_v44  ;;  %v14832_v51 = vld [vmem:[%s18253_s2 + $0x760] sm:$0xff]  }
0x1118   :  { %v14088_v55 = vpop.f32.mrf.mxu0 }
0x1119   :  { %14122 = vmatmul.mubr.bf16.vlgmr.msra.gmra.mxu0 %v8771_v54  ;;  %v14837_v54 = vld [vmem:[%s18253_s2 + $0x790] sm:$0xff]  }
0x111a   :  { %14146 = vmatpush3.bf16.msra.mxu0 %v14794_v52  ;;  %14168 = vmatpush3.bf16.msra.mxu1 %v14797_v53  ;;  %v17413_v59 = vpop.f32.mrf.mxu0  ;;  %v14835_v52 = vld [vmem:[%s18253_s2 + $0x798] sm:$0xff]   ;;  %v14836_v55 = vld [vmem:[%s18253_s2 + $0x750] sm:$0xff]  }
0x111b   :  { %14147 = vmatprep.subr.bf16.mxu0 %v15140_v44  ;;  %14169 = vmatprep.subr.bf16.mxu1 %v15140_v44  ;;  %v8964_v62 = vpack.c.bf16 %v17413_v59, %v17413_v59  ;;  %v14834_v53 = vld [vmem:[%s18253_s2 + $0x758] sm:$0xff]   ;;  %v14841_v59 = vld [vmem:[%s18253_s2 + $0x780] sm:$0xff]  }
0x111c   :  { %v14091_v60 = vpop.f32.mrf.mxu0  ;;  %14161 = vmatprep.mubr.msk.bf16.mxu0 %vm15141_vm5, %v15140_v44 }
0x111e   :  { %14148 = vmatpush3.bf16.msra.mxu0 %v14796_v56  ;;  %14170 = vmatpush3.bf16.msra.mxu1 %v14799_v57  ;;  %v8727_v2 = vpop.f32.mrf.mxu0  ;;  %v14839_v56 = vld [vmem:[%s18253_s2 + $0x788] sm:$0xff]  }
0x111f   :  { %14149 = vmatprep.subr.bf16.mxu0 %v15140_v44  ;;  %14171 = vmatprep.subr.bf16.mxu1 %v15140_v44  ;;  %v9070_v17 = vpack.c.bf16 %v8727_v2, %v8727_v2  ;;  %v14838_v57 = vld [vmem:[%s18253_s2 + $0x748] sm:$0xff]   ;;  %v14842_v2 = vld [vmem:[%s18253_s2 + $0x7f8] sm:$0xff]  }
0x1120   :  { %v14092_v4 = vpop.f32.mrf.mxu0 }
0x1121   :  { %v14843_v4 = vld [vmem:[%s18253_s2 + $0x7f0] sm:$0xff]  }
0x1122   :  { %14150 = vmatpush3.bf16.msra.mxu0 %v14798_v63  ;;  %14172 = vmatpush3.bf16.msra.mxu1 %v14801_v6  ;;  %v17433_v8 = vpop.f32.mrf.mxu0  ;;  %v14840_v63 = vld [vmem:[%s18253_s2 + $0x740] sm:$0xff]  }
0x1123   :  { %14151 = vmatprep.subr.bf16.mxu0 %v15140_v44  ;;  %14173 = vmatprep.subr.bf16.mxu1 %v15140_v44  ;;  %v9176_v45 = vpack.c.bf16 %v17433_v8, %v17433_v8  ;;  %v14846_v8 = vld [vmem:[%s18253_s2 + $0x7d8] sm:$0xff]  }
0x1124   :  { %v14095_v9 = vpop.f32.mrf.mxu0 }
0x1125   :  { %v14847_v9 = vld [vmem:[%s18253_s2 + $0x7d0] sm:$0xff]  }
0x1126   :  { %14152 = vmatpush3.bf16.msra.mxu0 %v14800_v5  ;;  %14174 = vmatpush3.bf16.msra.mxu1 %v14803_v7  ;;  %v17443_v12 = vpop.f32.mrf.mxu0  ;;  %v14844_v5 = vld [vmem:[%s18253_s2 + $0x7e8] sm:$0xff]   ;;  %v14845_v7 = vld [vmem:[%s18253_s2 + $0x7e0] sm:$0xff]  }
0x1127   :  { %14153 = vmatprep.subr.bf16.mxu0 %v15140_v44  ;;  %14175 = vmatprep.subr.bf16.mxu1 %v15140_v44  ;;  %v9282_v41 = vpack.c.bf16 %v17443_v12, %v17443_v12 }
0x1128   :  { %v14096_v14 = vpop.f32.mrf.mxu0 }
0x112a   :  { %14154 = vmatpush3.bf16.msra.mxu0 %v14802_v10  ;;  %14176 = vmatpush3.bf16.msra.mxu1 %v14805_v11  ;;  %v17453_v18 = vpop.f32.mrf.mxu0  ;;  %v14848_v10 = vld [vmem:[%s18253_s2 + $0x7c8] sm:$0xff]   ;;  %v14849_v11 = vld [vmem:[%s18253_s2 + $0x7c0] sm:$0xff]  }
0x112b   :  { %14155 = vmatprep.subr.bf16.mxu0 %v15140_v44  ;;  %14177 = vmatprep.subr.bf16.mxu1 %v15140_v44  ;;  %v9388_v6 = vpack.c.bf16 %v17453_v18, %v17453_v18 }
0x112c   :  { %v14099_v22 = vpop.f32.mrf.mxu0 }
0x112e   :  { %14156 = vmatpush3.bf16.msra.mxu0 %v14804_v15  ;;  %14178 = vmatpush3.bf16.msra.mxu1 %v14807_v19  ;;  %v17463_v0 = vpop.f32.mrf.mxu0 }
0x112f   :  { %14157 = vmatprep.subr.bf16.mxu0 %v15140_v44  ;;  %14179 = vmatprep.subr.bf16.mxu1 %v15140_v44  ;;  %v9494_v60 = vpack.c.bf16 %v17463_v0, %v17463_v0 }
0x1130   :  { %v14100_v16 = vpop.f32.mrf.mxu0 }
0x1132   :  { %14158 = vmatpush3.bf16.msra.mxu0 %v14806_v23  ;;  %14180 = vmatpush3.bf16.msra.mxu1 %v14809_v24  ;;  %v17473_v20 = vpop.f32.mrf.mxu0 }
0x1133   :  { %14159 = vmatprep.subr.bf16.mxu0 %v15140_v44  ;;  %14205 = vmatprep.subr.bf16.mxu1 %v15140_v44  ;;  %v9600_v12 = vpack.c.bf16 %v17473_v20, %v17473_v20  ;;  %v14861_v20 = vld [vmem:[%s18254_s3 + $0x64] ss:$8 sps:$4 sm:$0xff]  }
0x1134   :  { %v14103_v61 = vpop.f32.mrf.mxu0 }
0x1135   :  { %14182 = vmatmul.mubr.bf16.vlgmr.msra.gmra.mxu1 %v9070_v17  ;;  %v14853_v17 = vld [vmem:[%s18254_s3 + $0x70] ss:$8 sps:$4 sm:$0xff]  }
0x1136   :  { %14160 = vmatpush3.bf16.msra.mxu0 %v14808_v13  ;;  %14206 = vmatpush3.bf16.msra.mxu1 %v14811_v21  ;;  %v8751_v26 = vpop.f32.mrf.mxu0  ;;  %v14855_v13 = vld [vmem:[%s18254_s3 + $0x74] ss:$8 sps:$4 sm:$0xff]   ;;  %v14859_v21 = vld [vmem:[%s18254_s3 + $0x60] ss:$8 sps:$4 sm:$0xff]   ;;  %v14865_v61 = vld [vmem:[%s18254_s3 + $0x50] ss:$8 sps:$4 sm:$0xff]  }
0x1137   :  { %14185 = vmatprep.subr.bf16.mxu0 %v15140_v44  ;;  %14207 = vmatprep.subr.bf16.mxu1 %v15140_v44  ;;  %v14873_v26 = vld [vmem:[%s18254_s3 + $0x44] ss:$8 sps:$4 sm:$0xff]  }
0x1138   :  { %14221 = vmatprep.mubr.msk.bf16.mxu1 %vm15141_vm5, %v15140_v44  ;;  %v14104_v27 = vpop.f32.mrf.mxu0 }
0x1139   :  { %14162 = vmatmul.mubr.bf16.vlgmr.msra.gmra.mxu0 %v8964_v62  ;;  %v14867_v62 = vld [vmem:[%s18254_s3 + $0x54] ss:$8 sps:$4 sm:$0xff]  }
0x113a   :  { %14186 = vmatpush3.bf16.msra.mxu0 %v14810_v3  ;;  %14208 = vmatpush3.bf16.msra.mxu1 %v14813_v25  ;;  %v14871_v25 = vld [vmem:[%s18254_s3 + $0x40] ss:$8 sps:$4 sm:$0xff]  }
0x113b   :  { %14187 = vmatprep.subr.bf16.mxu0 %v15140_v44  ;;  %14209 = vmatprep.subr.bf16.mxu1 %v15140_v44 }
0x113c   :  { %14201 = vmatprep.mubr.msk.bf16.mxu0 %vm15141_vm5, %v15140_v44 }
0x113e   :  { %14188 = vmatpush3.bf16.msra.mxu0 %v14812_v28  ;;  %14210 = vmatpush3.bf16.msra.mxu1 %v14815_v29 }
0x113f   :  { %14189 = vmatprep.subr.bf16.mxu0 %v15140_v44  ;;  %14211 = vmatprep.subr.bf16.mxu1 %v15140_v44 }
0x1142   :  { %14190 = vmatpush3.bf16.msra.mxu0 %v14814_v30  ;;  %14212 = vmatpush3.bf16.msra.mxu1 %v14817_v31  ;;  %v14877_v30 = vld [vmem:[%s18254_s3 + $0x30] ss:$8 sps:$4 sm:$0xff]   ;;  %v14879_v31 = vld [vmem:[%s18254_s3 + $0x34] ss:$8 sps:$4 sm:$0xff]  }
0x1143   :  { %14191 = vmatprep.subr.bf16.mxu0 %v15140_v44  ;;  %14213 = vmatprep.subr.bf16.mxu1 %v15140_v44 }
0x1146   :  { %14192 = vmatpush3.bf16.msra.mxu0 %v14816_v33  ;;  %14214 = vmatpush3.bf16.msra.mxu1 %v14819_v34 }
0x1147   :  { %14193 = vmatprep.subr.bf16.mxu0 %v15140_v44  ;;  %14215 = vmatprep.subr.bf16.mxu1 %v15140_v44 }
0x114a   :  { %14194 = vmatpush3.bf16.msra.mxu0 %v14818_v35  ;;  %14216 = vmatpush3.bf16.msra.mxu1 %v14821_v36 }
0x114b   :  { %14195 = vmatprep.subr.bf16.mxu0 %v15140_v44  ;;  %14217 = vmatprep.subr.bf16.mxu1 %v15140_v44 }
0x114e   :  { %14196 = vmatpush3.bf16.msra.mxu0 %v14820_v37  ;;  %14218 = vmatpush3.bf16.msra.mxu1 %v14823_v38  ;;  %v14883_v38 = vld [vmem:[%s18254_s3 + $0x20] ss:$8 sps:$4 sm:$0xff]  }
0x114f   :  { %14197 = vmatprep.subr.bf16.mxu0 %v15140_v44  ;;  %14219 = vmatprep.subr.bf16.mxu1 %v15140_v44 }
0x1152   :  { %14198 = vmatpush3.bf16.msra.mxu0 %v14822_v39  ;;  %14220 = vmatpush3.bf16.msra.mxu1 %v14825_v40  ;;  %v14885_v39 = vld [vmem:[%s18254_s3 + $0x24] ss:$8 sps:$4 sm:$0xff]  }
0x1153   :  { %14199 = vmatprep.subr.bf16.mxu0 %v15140_v44  ;;  %14245 = vmatprep.subr.bf16.mxu1 %v15140_v44 }
0x1155   :  { %14222 = vmatmul.mubr.bf16.vlgmr.msra.gmra.mxu1 %v9282_v41  ;;  %v14889_v41 = vld [vmem:[%s18254_s3 + $0x10] ss:$8 sps:$4 sm:$0xff]  }
0x1156   :  { %14200 = vmatpush3.bf16.msra.mxu0 %v14824_v43  ;;  %14246 = vmatpush3.bf16.msra.mxu1 %v14827_v32  ;;  %v14891_v43 = vld [vmem:[%s18254_s3 + $0x14] ss:$8 sps:$4 sm:$0xff]  }
0x1157   :  { %14225 = vmatprep.subr.bf16.mxu0 %v15140_v44  ;;  %14247 = vmatprep.subr.bf16.mxu1 %v15140_v44 }
0x1158   :  { %14261 = vmatprep.mubr.msk.bf16.mxu1 %vm15141_vm5, %v15140_v44 }
0x1159   :  { %14202 = vmatmul.mubr.bf16.vlgmr.msra.gmra.mxu0 %v9176_v45 }
0x115a   :  { %14226 = vmatpush3.bf16.msra.mxu0 %v14826_v47  ;;  %14248 = vmatpush3.bf16.msra.mxu1 %v14829_v42 }
0x115b   :  { %14227 = vmatprep.subr.bf16.mxu0 %v15140_v44  ;;  %14249 = vmatprep.subr.bf16.mxu1 %v15140_v44 }
0x115c   :  { %14241 = vmatprep.mubr.msk.bf16.mxu0 %vm15141_vm5, %v15140_v44 }
0x115e   :  { %14228 = vmatpush3.bf16.msra.mxu0 %v14828_v48  ;;  %14250 = vmatpush3.bf16.msra.mxu1 %v14831_v49 }
0x115f   :  { %14229 = vmatprep.subr.bf16.mxu0 %v15140_v44  ;;  %14251 = vmatprep.subr.bf16.mxu1 %v15140_v44 }
0x1162   :  { %14230 = vmatpush3.bf16.msra.mxu0 %v14830_v50  ;;  %14252 = vmatpush3.bf16.msra.mxu1 %v14833_v46 }
0x1163   :  { %14231 = vmatprep.subr.bf16.mxu0 %v15140_v44  ;;  %14253 = vmatprep.subr.bf16.mxu1 %v15140_v44 }
0x1166   :  { %14232 = vmatpush3.bf16.msra.mxu0 %v14832_v51  ;;  %14254 = vmatpush3.bf16.msra.mxu1 %v14835_v52 }
0x1167   :  { %14233 = vmatprep.subr.bf16.mxu0 %v15140_v44  ;;  %14255 = vmatprep.subr.bf16.mxu1 %v15140_v44 }
0x116a   :  { %14234 = vmatpush3.bf16.msra.mxu0 %v14834_v53  ;;  %14256 = vmatpush3.bf16.msra.mxu1 %v14837_v54 }
0x116b   :  { %14235 = vmatprep.subr.bf16.mxu0 %v15140_v44  ;;  %14257 = vmatprep.subr.bf16.mxu1 %v15140_v44 }
0x116e   :  { %14236 = vmatpush3.bf16.msra.mxu0 %v14836_v55  ;;  %14258 = vmatpush3.bf16.msra.mxu1 %v14839_v56 }
0x116f   :  { %14237 = vmatprep.subr.bf16.mxu0 %v15140_v44  ;;  %14259 = vmatprep.subr.bf16.mxu1 %v15140_v44 }
0x1172   :  { %14238 = vmatpush3.bf16.msra.mxu0 %v14838_v57  ;;  %14260 = vmatpush3.bf16.msra.mxu1 %v14841_v59 }
0x1173   :  { %14239 = vmatprep.subr.bf16.mxu0 %v15140_v44  ;;  %14285 = vmatprep.subr.bf16.mxu1 %v15140_v44 }
0x1175   :  { %14262 = vmatmul.mubr.bf16.vlgmr.msra.gmra.mxu1 %v9494_v60 }
0x1176   :  { %14240 = vmatpush3.bf16.msra.mxu0 %v14840_v63  ;;  %14287 = vmatprep.mubr.msk.bf16.mxu1 %vm15141_vm5, %v15140_v44 }
0x1177   :  { %14265 = vmatprep.subr.bf16.mxu0 %v15140_v44 }
0x1179   :  { %14242 = vmatmul.mubr.bf16.vlgmr.msra.gmra.mxu0 %v9388_v6 }
0x117a   :  { %14266 = vmatpush3.bf16.msra.mxu0 %v14842_v2  ;;  %14281 = vmatprep.mubr.msk.bf16.mxu0 %vm15141_vm5, %v15140_v44 }
0x117b   :  { %14267 = vmatprep.subr.bf16.mxu0 %v15140_v44 }
0x117e   :  { %14268 = vmatpush3.bf16.msra.mxu0 %v14843_v4 }
0x117f   :  { %14269 = vmatprep.subr.bf16.mxu0 %v15140_v44 }
0x1182   :  { %14270 = vmatpush3.bf16.msra.mxu0 %v14844_v5  ;;  %v12052_v5 = vld [vmem:[%s18256_s5 + $0x4] ss:$0 sm:$0xff] }
0x1183   :  { %14271 = vmatprep.subr.bf16.mxu0 %v15140_v44 }
0x1186   :  { %14272 = vmatpush3.bf16.msra.mxu0 %v14845_v7 }
0x1187   :  { %14273 = vmatprep.subr.bf16.mxu0 %v15140_v44 }
0x118a   :  { %14274 = vmatpush3.bf16.msra.mxu0 %v14846_v8 }
0x118b   :  { %14275 = vmatprep.subr.bf16.mxu0 %v15140_v44 }
0x118e   :  { %14276 = vmatpush3.bf16.msra.mxu0 %v14847_v9 }
0x118f   :  { %14277 = vmatprep.subr.bf16.mxu0 %v15140_v44 }
0x1192   :  { %14278 = vmatpush3.bf16.msra.mxu0 %v14848_v10 }
0x1193   :  { %14279 = vmatprep.subr.bf16.mxu0 %v15140_v44 }
0x1196   :  { %14280 = vmatpush3.bf16.msra.mxu0 %v14849_v11 }
0x1197   :  { %9999 = vmatprep.subr.bf16.mxu0 %v14855_v13  ;;  %v14868_v13 = vld [vmem:[%s18254_s3 + $0xc0] ss:$8 sps:$4 sm:$0xff]  }
0x1199   :  { %14282 = vmatmul.mubr.bf16.vlgmr.msra.gmra.mxu0 %v9600_v12 }
0x119a   :  { %10031 = vmatprep.mubr.bf16.mxu0 %v15138_v1  ;;  %10000 = vmatpush1.bf16.msra.mxu0 %v14853_v17  ;;  %v14870_v17 = vld [vmem:[%s18254_s3 + $0xc4] ss:$8 sps:$4 sm:$0xff]  }
0x119b   :  { %10001 = vmatprep.subr.bf16.mxu0 %v14861_v20  ;;  %v14874_v20 = vld [vmem:[%s18254_s3 + $0xb0] ss:$8 sps:$4 sm:$0xff]  }
0x119e   :  { %10002 = vmatpush1.bf16.msra.mxu0 %v14859_v21  ;;  %v14876_v21 = vld [vmem:[%s18254_s3 + $0xb4] ss:$8 sps:$4 sm:$0xff]  }
0x119f   :  { %10003 = vmatprep.subr.bf16.mxu0 %v14867_v62  ;;  %v14880_v62 = vld [vmem:[%s18254_s3 + $0xa0] ss:$8 sps:$4 sm:$0xff]  }
0x11a2   :  { %10004 = vmatpush1.bf16.msra.mxu0 %v14865_v61  ;;  %v14882_v61 = vld [vmem:[%s18254_s3 + $0xa4] ss:$8 sps:$4 sm:$0xff]  }
0x11a3   :  { %10005 = vmatprep.subr.bf16.mxu0 %v14873_v26  ;;  %v14897_v26 = vld [vmem:[%s18254_s3 + $0x4] ss:$8 sps:$4 sm:$0xff]  }
0x11a6   :  { %10006 = vmatpush1.bf16.msra.mxu0 %v14871_v25  ;;  %v14886_v25 = vld [vmem:[%s18254_s3 + $0x90] ss:$8 sps:$4 sm:$0xff]  }
0x11a7   :  { %10007 = vmatprep.subr.bf16.mxu0 %v14879_v31  ;;  %v14900_v31 = vld [vmem:[%s18254_s3 + $0x174] ss:$8 sps:$4 sm:$0xff]  }
0x11aa   :  { %10008 = vmatpush1.bf16.msra.mxu0 %v14877_v30  ;;  %v14903_v30 = vld [vmem:[%s18254_s3 + $0x1f4] ss:$8 sps:$4 sm:$0xff]  }
0x11ab   :  { %10009 = vmatprep.subr.bf16.mxu0 %v14885_v39 }
0x11ae   :  { %10010 = vmatpush1.bf16.msra.mxu0 %v14883_v38 }
0x11af   :  { %10011 = vmatprep.subr.bf16.mxu0 %v14891_v43 }
0x11b2   :  { %10012 = vmatpush1.bf16.msra.mxu0 %v14889_v41  ;;  %v14907_v41 = vld [vmem:[%s18254_s3 + $0x1e0] ss:$8 sps:$4 sm:$0xff]  }
0x11b3   :  { %10013 = vmatprep.subr.bf16.mxu0 %v14897_v26  ;;  %v14964_v26 = vld [vmem:[%s18254_s3 + $0x210] ss:$8 sps:$4 sm:$0xff]  }
0x11d5   :  { %v8958_v14 = vpop.f32.mrf.mxu1 }
0x11d7   :  { %v14143_v15 = vpop.f32.mrf.mxu1 }
0x11d9   :  { %v8870_v19 = vpop.f32.mrf.mxu0  ;;  %v8961_v18 = vpop.f32.mrf.mxu1 }
0x11da   :  { %v8959_v22 = vadd.f32 %v8958_v14, %v8870_v19  ;;  %v14852_v19 = vld [vmem:[%s18254_s3 + $0xf4] ss:$8 sps:$4 sm:$0xff]  }
0x11db   :  { %v14123_v23 = vpop.f32.mrf.mxu0  ;;  %v14144_v24 = vpop.f32.mrf.mxu1 }
0x11dc   :  { %v14858_v23 = vld [vmem:[%s18254_s3 + $0xe4] ss:$8 sps:$4 sm:$0xff]   ;;  %v14856_v24 = vld [vmem:[%s18254_s3 + $0xe0] ss:$8 sps:$4 sm:$0xff]  }
0x11dd   :  { %v8873_v0 = vpop.f32.mrf.mxu0 }
0x11de   :  { %v14864_v0 = vld [vmem:[%s18254_s3 + $0xd4] ss:$8 sps:$4 sm:$0xff]  }
0x11df   :  { %v14124_v16 = vpop.f32.mrf.mxu0 }
0x11e0   :  { %v14862_v16 = vld [vmem:[%s18254_s3 + $0xd0] ss:$8 sps:$4 sm:$0xff]  }
0x11f5   :  { %v9169_v3 = vpop.f32.mrf.mxu1 }
0x11f7   :  { %v14183_v27 = vpop.f32.mrf.mxu1 }
0x11f8   :  { %v14895_v27 = vld [vmem:[%s18254_s3] ss:$8 sps:$4 sm:$0xff]  }
0x11f9   :  { %v9063_v28 = vpop.f32.mrf.mxu0  ;;  %v9172_v29 = vpop.f32.mrf.mxu1  ;;  %10014 = vmatpush1.bf16.msra.mxu0 %v14895_v27  ;;  %v14969_v27 = vld [vmem:[%s18254_s3 + $0x204] ss:$8 sps:$4 sm:$0xff]  }
0x11fa   :  { %v9069_v33 = vadd.f32 %v9063_v28, %v8959_v22  ;;  %v9715_v22 = vld [vmem:[%s18258_s7 + $0x378] sm:$0xf]  ;;  %v14894_v28 = vld [vmem:[%s18254_s3 + $0x84] ss:$8 sps:$4 sm:$0xff]   ;;  %v14892_v29 = vld [vmem:[%s18254_s3 + $0x80] ss:$8 sps:$4 sm:$0xff]   ;;  %10279 = vmatprep.subr.bf16.mxu0 %v14903_v30 }
0x11fb   :  { %v14163_v34 = vpop.f32.mrf.mxu0  ;;  %v14184_v35 = vpop.f32.mrf.mxu1  ;;  %v14973_v30 = vld [vmem:[%s18254_s3 + $0x2f0] ss:$8 sps:$4 sm:$0xff]  }
0x11fc   :  { %v9175_v36 = vadd.f32 %v9169_v3, %v9069_v33  ;;  %v14888_v3 = vld [vmem:[%s18254_s3 + $0x94] ss:$8 sps:$4 sm:$0xff]   ;;  %v14901_v34 = vld [vmem:[%s18254_s3 + $0x1f0] ss:$8 sps:$4 sm:$0xff]  }
0x11fd   :  { %v9066_v37 = vpop.f32.mrf.mxu0 }
0x11fe   :  { %v14898_v37 = vld [vmem:[%s18254_s3 + $0x170] ss:$8 sps:$4 sm:$0xff]  }
0x11ff   :  { %v14164_v40 = vpop.f32.mrf.mxu0 }
0x1200   :  { %v14906_v40 = vld [vmem:[%s18254_s3 + $0x164] ss:$8 sps:$4 sm:$0xff]  }
0x1215   :  { %v9381_v32 = vpop.f32.mrf.mxu1 }
0x1217   :  { %v14223_v45 = vpop.f32.mrf.mxu1 }
0x1218   :  { %v14904_v45 = vld [vmem:[%s18254_s3 + $0x160] ss:$8 sps:$4 sm:$0xff]  }
0x1219   :  { %v9275_v47 = vpop.f32.mrf.mxu0  ;;  %v9384_v42 = vpop.f32.mrf.mxu1 }
0x121a   :  { %v9281_v60 = vadd.f32 %v9275_v47, %v9175_v36  ;;  %v14909_v36 = vld [vmem:[%s18254_s3 + $0x1e4] ss:$8 sps:$4 sm:$0xff]   ;;  %v14912_v42 = vld [vmem:[%s18254_s3 + $0x154] ss:$8 sps:$4 sm:$0xff]  }
0x121b   :  { %v14203_v48 = vpop.f32.mrf.mxu0  ;;  %v14224_v49 = vpop.f32.mrf.mxu1 }
0x121c   :  { %v9387_v63 = vadd.f32 %v9381_v32, %v9281_v60  ;;  %v14915_v32 = vld [vmem:[%s18254_s3 + $0x1d4] ss:$8 sps:$4 sm:$0xff]   ;;  %v14913_v48 = vld [vmem:[%s18254_s3 + $0x1d0] ss:$8 sps:$4 sm:$0xff]   ;;  %v14921_v49 = vld [vmem:[%s18254_s3 + $0x1c4] ss:$8 sps:$4 sm:$0xff]  }
0x121d   :  { %v9278_v50 = vpop.f32.mrf.mxu0  ;;  %v14931_v60 = vld [vmem:[%s18254_s3 + $0x1a0] ss:$8 sps:$4 sm:$0xff]  }
0x121e   :  { %v14910_v50 = vld [vmem:[%s18254_s3 + $0x150] ss:$8 sps:$4 sm:$0xff]  }
0x121f   :  { %v14204_v46 = vpop.f32.mrf.mxu0 }
0x1220   :  { %v14918_v46 = vld [vmem:[%s18254_s3 + $0x144] ss:$8 sps:$4 sm:$0xff]  }
0x1235   :  { %v9593_v51 = vpop.f32.mrf.mxu1 }
0x1237   :  { %v14263_v52 = vpop.f32.mrf.mxu1 }
0x1238   :  { %v14927_v52 = vld [vmem:[%s18254_s3 + $0x1b4] ss:$8 sps:$4 sm:$0xff]  }
0x1239   :  { %v9487_v53 = vpop.f32.mrf.mxu0  ;;  %v9596_v54 = vpop.f32.mrf.mxu1 }
0x123a   :  { %v9493_v6 = vadd.f32 %v9487_v53, %v9387_v63  ;;  %v14916_v53 = vld [vmem:[%s18254_s3 + $0x140] ss:$8 sps:$4 sm:$0xff]   ;;  %v14924_v54 = vld [vmem:[%s18254_s3 + $0x134] ss:$8 sps:$4 sm:$0xff]  }
0x123b   :  { %v14243_v55 = vpop.f32.mrf.mxu0  ;;  %v14264_v56 = vpop.f32.mrf.mxu1  ;;  %v14939_v63 = vld [vmem:[%s18254_s3 + $0x194] ss:$8 sps:$4 sm:$0xff]  }
0x123c   :  { %v9599_v2 = vadd.f32 %v9593_v51, %v9493_v6  ;;  %v14919_v51 = vld [vmem:[%s18254_s3 + $0x1c0] ss:$8 sps:$4 sm:$0xff]   ;;  %v14925_v55 = vld [vmem:[%s18254_s3 + $0x1b0] ss:$8 sps:$4 sm:$0xff]   ;;  %v14933_v56 = vld [vmem:[%s18254_s3 + $0x1a4] ss:$8 sps:$4 sm:$0xff]  }
0x123d   :  { %v9490_v57 = vpop.f32.mrf.mxu0  ;;  %v14928_v6 = vld [vmem:[%s18254_s3 + $0x120] ss:$8 sps:$4 sm:$0xff]  }
0x123e   :  { %v14922_v57 = vld [vmem:[%s18254_s3 + $0x130] ss:$8 sps:$4 sm:$0xff]  }
0x123f   :  { %v14244_v59 = vpop.f32.mrf.mxu0 }
0x1240   :  { %v14930_v59 = vld [vmem:[%s18254_s3 + $0x124] ss:$8 sps:$4 sm:$0xff]  }
0x1259   :  { %v9699_v4 = vpop.f32.mrf.mxu0 }
0x125a   :  { %v9705_v7 = vadd.f32 %v9699_v4, %v9599_v2  ;;  %v14936_v2 = vld [vmem:[%s18254_s3 + $0x114] ss:$8 sps:$4 sm:$0xff]   ;;  %v14937_v4 = vld [vmem:[%s18254_s3 + $0x190] ss:$8 sps:$4 sm:$0xff]  }
0x125b   :  { %v14283_v8 = vpop.f32.mrf.mxu0 }
0x125c   :  { %v9711_v9 = vadd.f32 %v12052_v5, %v9705_v7  ;;  %v14945_v5 = vld [vmem:[%s18254_s3 + $0x184] ss:$8 sps:$4 sm:$0xff]   ;;  %v14934_v7 = vld [vmem:[%s18254_s3 + $0x110] ss:$8 sps:$4 sm:$0xff]  }
0x125d   :  { %v9702_v10 = vpop.f32.mrf.mxu0  ;;  %v14942_v8 = vld [vmem:[%s18254_s3 + $0x104] ss:$8 sps:$4 sm:$0xff]  }
0x125e   :  { %v9712_v11 = vadd.f32 %v9711_v9, %v16954_v58  ;;  %v14850_v58 = vld [vmem:[%s18254_s3 + $0xf0] ss:$8 sps:$4 sm:$0xff]   ;;  %v14943_v9 = vld [vmem:[%s18254_s3 + $0x180] ss:$8 sps:$4 sm:$0xff]   ;;  %v14948_v10 = vld [vmem:[%s18254_s3 + $0x274] ss:$8 sps:$4 sm:$0xff]  }
0x125f   :  { %v14284_v12 = vpop.f32.mrf.mxu0 }
0x1260   :  { %v9713_v14 = vmax.f32 %v9712_v11, 0.0  ;;  %v14940_v11 = vld [vmem:[%s18254_s3 + $0x100] ss:$8 sps:$4 sm:$0xff]   ;;  %v14946_v12 = vld [vmem:[%s18254_s3 + $0x270] ss:$8 sps:$4 sm:$0xff]  }
0x1262   :  { %v9714_v15 = vpack.c.bf16 %v9713_v14, %v9713_v14 }
0x1264   :  { %v17709_v18 = vsel %vm6513_vm6, %v9714_v15, 0  ;;  %v14951_v15 = vld [vmem:[%s18254_s3 + $0x264] ss:$8 sps:$4 sm:$0xff]  }
0x1265   :  { %14286 = vmatpush3.bf16.msra.mxu1 %v17709_v18 }
0x1266   :  { %9878 = vmatprep.subr.bf16.mxu1 %v14852_v19 }
0x1268   :  { %14288 = vmatmul.mubr.msk.bf16.vlgmr.msra.gmra.mxu1 %vm6497_vm7, %v9715_v22  ;;  %v14972_v22 = vld [vmem:[%s18254_s3 + $0x374] ss:$8 sps:$4 sm:$0xff]  }
0x1269   :  { %9879 = vmatpush1.bf16.msra.mxu1 %v14850_v58  ;;  %9910 = vmatprep.mubr.bf16.mxu1 %v15138_v1  ;;  %v14949_v58 = vld [vmem:[%s18254_s3 + $0x260] ss:$8 sps:$4 sm:$0xff]  }
0x126a   :  { %9880 = vmatprep.subr.bf16.mxu1 %v14858_v23  ;;  %v14954_v23 = vld [vmem:[%s18254_s3 + $0x254] ss:$8 sps:$4 sm:$0xff]  }
0x126d   :  { %9881 = vmatpush1.bf16.msra.mxu1 %v14856_v24  ;;  %v14952_v24 = vld [vmem:[%s18254_s3 + $0x250] ss:$8 sps:$4 sm:$0xff]  }
0x126e   :  { %9882 = vmatprep.subr.bf16.mxu1 %v14864_v0  ;;  %v14957_v0 = vld [vmem:[%s18254_s3 + $0x244] ss:$8 sps:$4 sm:$0xff]  }
0x1271   :  { %9883 = vmatpush1.bf16.msra.mxu1 %v14862_v16  ;;  %v10338_v16 = vld [vmem:[%s18258_s7 + $0x380] sm:$0x1] }
0x1272   :  { %9884 = vmatprep.subr.bf16.mxu1 %v14870_v17  ;;  %v14955_v17 = vld [vmem:[%s18254_s3 + $0x240] ss:$8 sps:$4 sm:$0xff]  }
0x1275   :  { %9885 = vmatpush1.bf16.msra.mxu1 %v14868_v13  ;;  %v14960_v13 = vld [vmem:[%s18254_s3 + $0x234] ss:$8 sps:$4 sm:$0xff]  }
0x1276   :  { %9886 = vmatprep.subr.bf16.mxu1 %v14876_v21  ;;  %v14976_v21 = vld [vmem:[%s18254_s3 + $0x360] ss:$8 sps:$4 sm:$0xff]  }
0x1279   :  { %9887 = vmatpush1.bf16.msra.mxu1 %v14874_v20  ;;  %v14984_v20 = vld [vmem:[%s18254_s3 + $0x354] ss:$8 sps:$4 sm:$0xff]  }
0x127a   :  { %9888 = vmatprep.subr.bf16.mxu1 %v14882_v61  ;;  %v14958_v61 = vld [vmem:[%s18254_s3 + $0x230] ss:$8 sps:$4 sm:$0xff]  }
0x127d   :  { %9889 = vmatpush1.bf16.msra.mxu1 %v14880_v62  ;;  %v14963_v62 = vld [vmem:[%s18254_s3 + $0x224] ss:$8 sps:$4 sm:$0xff]  }
0x127e   :  { %9890 = vmatprep.subr.bf16.mxu1 %v14888_v3  ;;  %v14961_v3 = vld [vmem:[%s18254_s3 + $0x220] ss:$8 sps:$4 sm:$0xff]  }
0x1281   :  { %9891 = vmatpush1.bf16.msra.mxu1 %v14886_v25  ;;  %v14966_v25 = vld [vmem:[%s18254_s3 + $0x214] ss:$8 sps:$4 sm:$0xff]  }
0x1282   :  { %9892 = vmatprep.subr.bf16.mxu1 %v14894_v28  ;;  %v14967_v28 = vld [vmem:[%s18254_s3 + $0x200] ss:$8 sps:$4 sm:$0xff]  }
0x1285   :  { %9893 = vmatpush1.bf16.msra.mxu1 %v14892_v29  ;;  %v14975_v29 = vld [vmem:[%s18254_s3 + $0x2f4] ss:$8 sps:$4 sm:$0xff]  }
0x1286   :  { %10138 = vmatprep.subr.bf16.mxu1 %v14900_v31  ;;  %v14981_v31 = vld [vmem:[%s18254_s3 + $0x2e4] ss:$8 sps:$4 sm:$0xff]  }
0x1328   :  { %v9756_v33 = vpop.f32.mrf.mxu1 }
0x1329   :  { %v17777_v35 = vpack.c.bf16 %v9756_v33, %v9756_v33  ;;  %v14979_v33 = vld [vmem:[%s18254_s3 + $0x2e0] ss:$8 sps:$4 sm:$0xff]  }
0x132a   :  { %v14289_v38 = vpop.f32.mrf.mxu1 }
0x132b   :  { %v9796_v39 = vrot.slane %v17777_v35, 1  ;;  %10032 = vmatmul.mubr.bf16.vlgmr.msra.gmra.mxu0 %v17777_v35  ;;  %v10197_v14 = vrot.slane %v17777_v35, 3  ;;  %v10056_v19 = vrot.slane %v17777_v35, 2  ;;  %v14988_v35 = vld [vmem:[%s18254_s3 + $0x340] ss:$8 sps:$4 sm:$0xff]  }
0x132c   :  { %10280 = vmatpush1.bf16.msra.mxu0 %v14901_v34  ;;  %10311 = vmatprep.mubr.bf16.mxu0 %v15138_v1  ;;  %v9759_v43 = vpop.f32.mrf.mxu1  ;;  %v14987_v34 = vld [vmem:[%s18254_s3 + $0x2d4] ss:$8 sps:$4 sm:$0xff]   ;;  %v14993_v38 = vld [vmem:[%s18254_s3 + $0x2c4] ss:$8 sps:$4 sm:$0xff]  }
0x132d   :  { %9911 = vmatmul.mubr.bf16.vlgmr.msra.gmra.mxu1 %v9796_v39  ;;  %10281 = vmatprep.subr.bf16.mxu0 %v14909_v36  ;;  %v14990_v36 = vld [vmem:[%s18254_s3 + $0x344] ss:$8 sps:$4 sm:$0xff]   ;;  %v14994_v39 = vld [vmem:[%s18254_s3 + $0x330] ss:$8 sps:$4 sm:$0xff]   ;;  %v14999_v43 = vld [vmem:[%s18254_s3 + $0x2b4] ss:$8 sps:$4 sm:$0xff]  }
0x132e   :  { %10139 = vmatpush1.bf16.msra.mxu1 %v14898_v37  ;;  %10170 = vmatprep.mubr.bf16.mxu1 %v15138_v1  ;;  %v14290_v47 = vpop.f32.mrf.mxu1  ;;  %v14985_v37 = vld [vmem:[%s18254_s3 + $0x2d0] ss:$8 sps:$4 sm:$0xff]  }
0x132f   :  { %10140 = vmatprep.subr.bf16.mxu1 %v14906_v40  ;;  %v14996_v40 = vld [vmem:[%s18254_s3 + $0x334] ss:$8 sps:$4 sm:$0xff]   ;;  %v15000_v47 = vld [vmem:[%s18254_s3 + $0x320] ss:$8 sps:$4 sm:$0xff]  }
0x1330   :  { %10282 = vmatpush1.bf16.msra.mxu0 %v14907_v41  ;;  %v14991_v41 = vld [vmem:[%s18254_s3 + $0x2c0] ss:$8 sps:$4 sm:$0xff]  }
0x1331   :  { %10283 = vmatprep.subr.bf16.mxu0 %v14915_v32  ;;  %v14997_v32 = vld [vmem:[%s18254_s3 + $0x2b0] ss:$8 sps:$4 sm:$0xff]  }
0x1332   :  { %10141 = vmatpush1.bf16.msra.mxu1 %v14904_v45  ;;  %v15002_v45 = vld [vmem:[%s18254_s3 + $0x324] ss:$8 sps:$4 sm:$0xff]  }
0x1333   :  { %10142 = vmatprep.subr.bf16.mxu1 %v14912_v42  ;;  %v15005_v42 = vld [vmem:[%s18254_s3 + $0x2a4] ss:$8 sps:$4 sm:$0xff]  }
0x1334   :  { %10284 = vmatpush1.bf16.msra.mxu0 %v14913_v48  ;;  %v15003_v48 = vld [vmem:[%s18254_s3 + $0x2a0] ss:$8 sps:$4 sm:$0xff]  }
0x1335   :  { %10285 = vmatprep.subr.bf16.mxu0 %v14921_v49  ;;  %v15008_v49 = vld [vmem:[%s18254_s3 + $0x314] ss:$8 sps:$4 sm:$0xff]  }
0x1336   :  { %10143 = vmatpush1.bf16.msra.mxu1 %v14910_v50  ;;  %v15006_v50 = vld [vmem:[%s18254_s3 + $0x310] ss:$8 sps:$4 sm:$0xff]  }
0x1337   :  { %10144 = vmatprep.subr.bf16.mxu1 %v14918_v46  ;;  %v15011_v46 = vld [vmem:[%s18254_s3 + $0x294] ss:$8 sps:$4 sm:$0xff]  }
0x1338   :  { %10286 = vmatpush1.bf16.msra.mxu0 %v14919_v51  ;;  %v15009_v51 = vld [vmem:[%s18254_s3 + $0x290] ss:$8 sps:$4 sm:$0xff]  }
0x1339   :  { %10287 = vmatprep.subr.bf16.mxu0 %v14927_v52  ;;  %v15014_v52 = vld [vmem:[%s18254_s3 + $0x304] ss:$8 sps:$4 sm:$0xff]  }
0x133a   :  { %10145 = vmatpush1.bf16.msra.mxu1 %v14916_v53  ;;  %v15012_v53 = vld [vmem:[%s18254_s3 + $0x300] ss:$8 sps:$4 sm:$0xff]  }
0x133b   :  { %10146 = vmatprep.subr.bf16.mxu1 %v14924_v54  ;;  %v15017_v54 = vld [vmem:[%s18254_s3 + $0x284] ss:$8 sps:$4 sm:$0xff]  }
0x133c   :  { %10288 = vmatpush1.bf16.msra.mxu0 %v14925_v55  ;;  %v15015_v55 = vld [vmem:[%s18254_s3 + $0x280] ss:$8 sps:$4 sm:$0xff]  }
0x133d   :  { %10289 = vmatprep.subr.bf16.mxu0 %v14933_v56  ;;  %v15020_v56 = vld [vmem:[%s18254_s3 + $0x3f4] ss:$8 sps:$4 sm:$0xff]  }
0x133e   :  { %10147 = vmatpush1.bf16.msra.mxu1 %v14922_v57 }
0x133f   :  { %10148 = vmatprep.subr.bf16.mxu1 %v14930_v59 }
0x1340   :  { %10290 = vmatpush1.bf16.msra.mxu0 %v14931_v60 }
0x1341   :  { %10291 = vmatprep.subr.bf16.mxu0 %v14939_v63 }
0x1342   :  { %10149 = vmatpush1.bf16.msra.mxu1 %v14928_v6 }
0x1343   :  { %10150 = vmatprep.subr.bf16.mxu1 %v14936_v2 }
0x1344   :  { %10292 = vmatpush1.bf16.msra.mxu0 %v14937_v4 }
0x1345   :  { %10293 = vmatprep.subr.bf16.mxu0 %v14945_v5 }
0x1346   :  { %10151 = vmatpush1.bf16.msra.mxu1 %v14934_v7  ;;  %v10324_v7 = vlaneseq }
0x1347   :  { %10152 = vmatprep.subr.bf16.mxu1 %v14942_v8 }
0x1348   :  { %10294 = vmatpush1.bf16.msra.mxu0 %v14943_v9  ;;  %v10325_v8 = vshrl.u32 %v10324_v7, 7  ;;  %v15068_v7 = vld [vmem:[%s18254_s3 + $0x4f4] ss:$8 sps:$4 sm:$0xff]  }
0x1349   :  { %10740 = vmatprep.subr.bf16.mxu0 %v14948_v10 }
0x134a   :  { %10153 = vmatpush1.bf16.msra.mxu1 %v14940_v11  ;;  %v18028_v9 = vsub.s32 0, %v10325_v8  ;;  %v10322_v11 = vld [vmem:[%s18257_s6] ss:$8 sm:$0x3] }
0x134b   :  { %14291 = vmatprep.subr.bf16.mxu1 %v15140_v44  ;;  %10312 = vmatmul.mubr.bf16.vlgmr.msra.gmra.mxu0 %v10197_v14  ;;  %v18033_v14 = vsub.s32 1, %v10325_v8  ;;  %v15071_v8 = vld [vmem:[%s18254_s3 + $0x4e4] ss:$8 sps:$4 sm:$0xff]  }
0x134c   :  { %10741 = vmatpush1.bf16.msra.mxu0 %v14946_v12 }
0x134d   :  { %10171 = vmatmul.mubr.bf16.vlgmr.msra.gmra.mxu1 %v10056_v19  ;;  %10742 = vmatprep.subr.bf16.mxu0 %v14951_v15 }
0x134e   :  { %14292 = vmatpush3.bf16.msra.mxu1 %v17709_v18  ;;  %14293 = vmatprep.mubr.msk.bf16.mxu1 %vm15141_vm5, %v15140_v44  ;;  %v14970_v18 = vld [vmem:[%s18254_s3 + $0x370] ss:$8 sps:$4 sm:$0xff]   ;;  %v14978_v44 = vld [vmem:[%s18254_s3 + $0x364] ss:$8 sps:$4 sm:$0xff]  }
0x134f   :  { %10492 = vmatprep.subr.bf16.mxu1 %v14972_v22 }
0x1350   :  { %10743 = vmatpush1.bf16.msra.mxu0 %v14949_v58 }
0x1351   :  { %10744 = vmatprep.subr.bf16.mxu0 %v14954_v23  ;;  %v10327_v23 = vrot.slane %v10322_v11, %v18028_v9 }
0x1354   :  { %10745 = vmatpush1.bf16.msra.mxu0 %v14952_v24 }
0x1355   :  { %14294 = vmatmul.mubr.msk.bf16.vlgmr.msra.gmra.mxu1 %vm6497_vm7, %v10338_v16  ;;  %10746 = vmatprep.subr.bf16.mxu0 %v14957_v0 }
0x1356   :  { %10493 = vmatpush1.bf16.msra.mxu1 %v14970_v18  ;;  %10524 = vmatprep.mubr.bf16.mxu1 %v15138_v1  ;;  %v14982_v1 = vld [vmem:[%s18254_s3 + $0x350] ss:$8 sps:$4 sm:$0xff]  }
0x1357   :  { %10494 = vmatprep.subr.bf16.mxu1 %v14978_v44  ;;  %v10331_v44 = vrot.slane %v10322_v11, %v18033_v14  ;;  %v15074_v11 = vld [vmem:[%s18254_s3 + $0x4d4] ss:$8 sps:$4 sm:$0xff]  }
0x1358   :  { %10747 = vmatpush1.bf16.msra.mxu0 %v14955_v17 }
0x1359   :  { %10748 = vmatprep.subr.bf16.mxu0 %v14960_v13 }
0x135a   :  { %10495 = vmatpush1.bf16.msra.mxu1 %v14976_v21 }
0x135b   :  { %10496 = vmatprep.subr.bf16.mxu1 %v14984_v20 }
0x135c   :  { %10749 = vmatpush1.bf16.msra.mxu0 %v14958_v61 }
0x135d   :  { %10750 = vmatprep.subr.bf16.mxu0 %v14963_v62 }
0x135e   :  { %10497 = vmatpush1.bf16.msra.mxu1 %v14982_v1 }
0x135f   :  { %10498 = vmatprep.subr.bf16.mxu1 %v14990_v36 }
0x1360   :  { %10751 = vmatpush1.bf16.msra.mxu0 %v14961_v3 }
0x1361   :  { %10752 = vmatprep.subr.bf16.mxu0 %v14966_v25  ;;  %v15018_v25 = vld [vmem:[%s18254_s3 + $0x3f0] ss:$8 sps:$4 sm:$0xff]  }
0x1362   :  { %10499 = vmatpush1.bf16.msra.mxu1 %v14988_v35  ;;  %v15026_v35 = vld [vmem:[%s18254_s3 + $0x3d4] ss:$8 sps:$4 sm:$0xff]  }
0x1363   :  { %10500 = vmatprep.subr.bf16.mxu1 %v14996_v40  ;;  %v15032_v40 = vld [vmem:[%s18254_s3 + $0x3b4] ss:$8 sps:$4 sm:$0xff]  }
0x1364   :  { %10753 = vmatpush1.bf16.msra.mxu0 %v14964_v26 }
0x1365   :  { %10754 = vmatprep.subr.bf16.mxu0 %v14969_v27 }
0x1366   :  { %10501 = vmatpush1.bf16.msra.mxu1 %v14994_v39  ;;  %v15027_v39 = vld [vmem:[%s18254_s3 + $0x3c0] ss:$8 sps:$4 sm:$0xff]  }
0x1367   :  { %10502 = vmatprep.subr.bf16.mxu1 %v15002_v45  ;;  %v15038_v45 = vld [vmem:[%s18254_s3 + $0x394] ss:$8 sps:$4 sm:$0xff]  }
0x1368   :  { %10755 = vmatpush1.bf16.msra.mxu0 %v14967_v28  ;;  %v15023_v28 = vld [vmem:[%s18254_s3 + $0x3e4] ss:$8 sps:$4 sm:$0xff]  }
0x1369   :  { %10756 = vmatprep.subr.bf16.mxu0 %v14975_v29 }
0x136a   :  { %10503 = vmatpush1.bf16.msra.mxu1 %v15000_v47  ;;  %v15036_v47 = vld [vmem:[%s18254_s3 + $0x390] ss:$8 sps:$4 sm:$0xff]  }
0x136b   :  { %10504 = vmatprep.subr.bf16.mxu1 %v15008_v49  ;;  %v15044_v49 = vld [vmem:[%s18254_s3 + $0x474] ss:$8 sps:$4 sm:$0xff]  }
0x136c   :  { %10757 = vmatpush2.bf16.msra.mxu0 %v14973_v30 }
0x136d   :  { %10758 = vmatprep.subr.bf16.mxu0 %v14981_v31 }
0x136e   :  { %10505 = vmatpush1.bf16.msra.mxu1 %v15006_v50  ;;  %v15042_v50 = vld [vmem:[%s18254_s3 + $0x470] ss:$8 sps:$4 sm:$0xff]  }
0x136f   :  { %10506 = vmatprep.subr.bf16.mxu1 %v15014_v52  ;;  %v15050_v52 = vld [vmem:[%s18254_s3 + $0x454] ss:$8 sps:$4 sm:$0xff]  }
0x1370   :  { %10759 = vmatpush2.bf16.msra.mxu0 %v14979_v33 }
0x1371   :  { %10760 = vmatprep.subr.bf16.mxu0 %v14987_v34  ;;  %v15021_v34 = vld [vmem:[%s18254_s3 + $0x3e0] ss:$8 sps:$4 sm:$0xff]  }
0x1372   :  { %10507 = vmatpush1.bf16.msra.mxu1 %v15012_v53  ;;  %v15048_v53 = vld [vmem:[%s18254_s3 + $0x450] ss:$8 sps:$4 sm:$0xff]  }
0x1373   :  { %10992 = vmatprep.subr.bf16.mxu1 %v15020_v56  ;;  %v15056_v56 = vld [vmem:[%s18254_s3 + $0x434] ss:$8 sps:$4 sm:$0xff]  }
0x1374   :  { %10761 = vmatpush2.bf16.msra.mxu0 %v14985_v37  ;;  %v15024_v37 = vld [vmem:[%s18254_s3 + $0x3d0] ss:$8 sps:$4 sm:$0xff]  }
0x1375   :  { %10762 = vmatprep.subr.bf16.mxu0 %v14993_v38  ;;  %v15029_v38 = vld [vmem:[%s18254_s3 + $0x3c4] ss:$8 sps:$4 sm:$0xff]  }
0x1378   :  { %10763 = vmatpush2.bf16.msra.mxu0 %v14991_v41  ;;  %v15030_v41 = vld [vmem:[%s18254_s3 + $0x3b0] ss:$8 sps:$4 sm:$0xff]  }
0x1379   :  { %10764 = vmatprep.subr.bf16.mxu0 %v14999_v43  ;;  %v15035_v43 = vld [vmem:[%s18254_s3 + $0x3a4] ss:$8 sps:$4 sm:$0xff]  }
0x137c   :  { %10765 = vmatpush2.bf16.msra.mxu0 %v14997_v32  ;;  %v15033_v32 = vld [vmem:[%s18254_s3 + $0x3a0] ss:$8 sps:$4 sm:$0xff]  }
0x137d   :  { %10766 = vmatprep.subr.bf16.mxu0 %v15005_v42  ;;  %v15041_v42 = vld [vmem:[%s18254_s3 + $0x384] ss:$8 sps:$4 sm:$0xff]  }
0x1380   :  { %10767 = vmatpush2.bf16.msra.mxu0 %v15003_v48  ;;  %v15039_v48 = vld [vmem:[%s18254_s3 + $0x380] ss:$8 sps:$4 sm:$0xff]  }
0x1381   :  { %10768 = vmatprep.subr.bf16.mxu0 %v15011_v46  ;;  %v15047_v46 = vld [vmem:[%s18254_s3 + $0x464] ss:$8 sps:$4 sm:$0xff]  }
0x1384   :  { %10769 = vmatpush2.bf16.msra.mxu0 %v15009_v51  ;;  %v15045_v51 = vld [vmem:[%s18254_s3 + $0x460] ss:$8 sps:$4 sm:$0xff]  }
0x1385   :  { %10770 = vmatprep.subr.bf16.mxu0 %v15017_v54  ;;  %v15053_v54 = vld [vmem:[%s18254_s3 + $0x444] ss:$8 sps:$4 sm:$0xff]  }
0x1388   :  { %10771 = vmatpush2.bf16.msra.mxu0 %v15015_v55  ;;  %v15051_v55 = vld [vmem:[%s18254_s3 + $0x440] ss:$8 sps:$4 sm:$0xff]  }
0x1389   :  { %11242 = vmatprep.subr.bf16.mxu0 %v15068_v7 }
0x13eb   :  { %v10033_v57 = vpop.f32.mrf.mxu0 }
0x13ed   :  { %v9912_v59 = vpop.f32.mrf.mxu1  ;;  %v10035_v60 = vpop.f32.mrf.mxu0 }
0x13ee   :  { %v10034_v12 = vadd.f32 %v10033_v57, %v9912_v59  ;;  %v15054_v57 = vld [vmem:[%s18254_s3 + $0x430] ss:$8 sps:$4 sm:$0xff]   ;;  %v15059_v59 = vld [vmem:[%s18254_s3 + $0x424] ss:$8 sps:$4 sm:$0xff]  }
0x13ef   :  { %v9914_v63 = vpop.f32.mrf.mxu1  ;;  %v10037_v6 = vpop.f32.mrf.mxu0 }
0x13f0   :  { %v10036_v22 = vadd.f32 %v10035_v60, %v9914_v63  ;;  %v15057_v60 = vld [vmem:[%s18254_s3 + $0x420] ss:$8 sps:$4 sm:$0xff]   ;;  %v15062_v63 = vld [vmem:[%s18254_s3 + $0x414] ss:$8 sps:$4 sm:$0xff]   ;;  %v15060_v6 = vld [vmem:[%s18254_s3 + $0x410] ss:$8 sps:$4 sm:$0xff]  }
0x13f1   :  { %v9916_v2 = vpop.f32.mrf.mxu1  ;;  %v10038_v4 = vpop.f32.mrf.mxu0 }
0x13f2   :  { %v15065_v2 = vld [vmem:[%s18254_s3 + $0x404] ss:$8 sps:$4 sm:$0xff]   ;;  %v15063_v4 = vld [vmem:[%s18254_s3 + $0x400] ss:$8 sps:$4 sm:$0xff]  }
0x13f3   :  { %v9917_v5 = vpop.f32.mrf.mxu1 }
0x13f4   :  { %v15066_v5 = vld [vmem:[%s18254_s3 + $0x4f0] ss:$8 sps:$4 sm:$0xff]  }
0x140b   :  { %v10313_v10 = vpop.f32.mrf.mxu0 }
0x140d   :  { %v10172_v15 = vpop.f32.mrf.mxu1  ;;  %v10315_v19 = vpop.f32.mrf.mxu0 }
0x140e   :  { %v10179_v58 = vadd.f32 %v10172_v15, %v10034_v12  ;;  %v15072_v12 = vld [vmem:[%s18254_s3 + $0x4d0] ss:$8 sps:$4 sm:$0xff]   ;;  %v15077_v15 = vld [vmem:[%s18254_s3 + $0x4c4] ss:$8 sps:$4 sm:$0xff]  }
0x140f   :  { %v10174_v24 = vpop.f32.mrf.mxu1  ;;  %v10317_v0 = vpop.f32.mrf.mxu0 }
0x1410   :  { %v10180_v16 = vadd.f32 %v10174_v24, %v10036_v22  ;;  %v10320_v18 = vadd.f32 %v10313_v10, %v10179_v58  ;;  %v15069_v10 = vld [vmem:[%s18254_s3 + $0x4e0] ss:$8 sps:$4 sm:$0xff]   ;;  %v15080_v22 = vld [vmem:[%s18254_s3 + $0x4b4] ss:$8 sps:$4 sm:$0xff]   ;;  %v15078_v58 = vld [vmem:[%s18254_s3 + $0x4b0] ss:$8 sps:$4 sm:$0xff]  }
0x1411   :  { %v10176_v17 = vpop.f32.mrf.mxu1  ;;  %v10318_v13 = vpop.f32.mrf.mxu0  ;;  %v15081_v24 = vld [vmem:[%s18254_s3 + $0x4a0] ss:$8 sps:$4 sm:$0xff]   ;;  %v15086_v0 = vld [vmem:[%s18254_s3 + $0x494] ss:$8 sps:$4 sm:$0xff]  }
0x1412   :  { %v10334_v21 = vadd.f32 %v10327_v23, %v10320_v18  ;;  %v10321_v20 = vadd.f32 %v10315_v19, %v10180_v16  ;;  %v15075_v19 = vld [vmem:[%s18254_s3 + $0x4c0] ss:$8 sps:$4 sm:$0xff]   ;;  %v15083_v23 = vld [vmem:[%s18254_s3 + $0x4a4] ss:$8 sps:$4 sm:$0xff]   ;;  %v15084_v16 = vld [vmem:[%s18254_s3 + $0x490] ss:$8 sps:$4 sm:$0xff]  }
0x1413   :  { %v10177_v61 = vpop.f32.mrf.mxu1  ;;  %v15089_v18 = vld [vmem:[%s18254_s3 + $0x484] ss:$8 sps:$4 sm:$0xff]   ;;  %v15092_v17 = vld [vmem:[%s18254_s3 + $0x574] ss:$8 sps:$4 sm:$0xff]   ;;  %v15090_v13 = vld [vmem:[%s18254_s3 + $0x570] ss:$8 sps:$4 sm:$0xff]  }
0x1414   :  { %v10335_v62 = vadd.f32 %v10331_v44, %v10321_v20  ;;  %v10336_v1 = vmax.f32 %v10334_v21, 0.0  ;;  %v15087_v44 = vld [vmem:[%s18254_s3 + $0x480] ss:$8 sps:$4 sm:$0xff]   ;;  %v15095_v21 = vld [vmem:[%s18254_s3 + $0x564] ss:$8 sps:$4 sm:$0xff]  }
0x1415   :  { %v10376_v3 = vpop.f32.mrf.mxu1  ;;  %v15093_v20 = vld [vmem:[%s18254_s3 + $0x560] ss:$8 sps:$4 sm:$0xff]   ;;  %v15098_v61 = vld [vmem:[%s18254_s3 + $0x554] ss:$8 sps:$4 sm:$0xff]  }
0x1416   :  { %v10337_v26 = vmax.f32 %v10335_v62, 0.0  ;;  %v10382_v27 = vpack.c.bf16 %v10376_v3, %v10376_v3  ;;  %v10533_v31 = vpack.c.bf16 %v10336_v1, %v10336_v1  ;;  %v15096_v62 = vld [vmem:[%s18254_s3 + $0x550] ss:$8 sps:$4 sm:$0xff]   ;;  %v15101_v1 = vld [vmem:[%s18254_s3 + $0x544] ss:$8 sps:$4 sm:$0xff]  }
0x1417   :  { %v14295_v29 = vpop.f32.mrf.mxu1  ;;  %v15099_v3 = vld [vmem:[%s18254_s3 + $0x540] ss:$8 sps:$4 sm:$0xff]  }
0x1418   :  { %v10534_v30 = vpack.c.bf16 %v10337_v26, %v10337_v26  ;;  %10525 = vmatmul.mubr.bf16.vlgmr.msra.gmra.mxu1 %v10382_v27  ;;  %v15102_v26 = vld [vmem:[%s18254_s3 + $0x530] ss:$8 sps:$4 sm:$0xff]   ;;  %v15107_v27 = vld [vmem:[%s18254_s3 + $0x524] ss:$8 sps:$4 sm:$0xff]  }
0x1419   :  { %v10379_v33 = vpop.f32.mrf.mxu1  ;;  %10993 = vmatpush1.bf16.msra.mxu1 %v15018_v25  ;;  %v15104_v25 = vld [vmem:[%s18254_s3 + $0x534] ss:$8 sps:$4 sm:$0xff]   ;;  %v12119_v29 = vld [vmem:[%s18257_s6 + $0x2] ss:$8 sm:$0x3] }
0x141a   :  { %10772 = vmatprep.mubr.bf16.mxu0 %v10534_v30  ;;  %10994 = vmatprep.subr.bf16.mxu1 %v15023_v28  ;;  %v15105_v28 = vld [vmem:[%s18254_s3 + $0x520] ss:$8 sps:$4 sm:$0xff]  }
0x141b   :  { %10773 = vmatmul.mubr.bf16.vlgmr.msra.gmra.mxu0 %v10533_v31  ;;  %v14296_v36 = vpop.f32.mrf.mxu1  ;;  %v12136_v30 = vld [vmem:[%s18257_s6 + $0x1] ss:$8 sm:$0x3]  ;;  %v10405_v31 = vrot.slane %v12119_v29, %v18028_v9 }
0x141c   :  { %11243 = vmatpush1.bf16.msra.mxu0 %v15066_v5  ;;  %v10409_v36 = vrot.slane %v12119_v29, %v18033_v14 }
0x141d   :  { %10995 = vmatpush1.bf16.msra.mxu1 %v15021_v34  ;;  %11244 = vmatprep.subr.bf16.mxu0 %v15071_v8  ;;  %v10573_v34 = vrot.slane %v12136_v30, %v18028_v9 }
0x141e   :  { %10996 = vmatprep.subr.bf16.mxu1 %v15026_v35 }
0x1420   :  { %11245 = vmatpush1.bf16.msra.mxu0 %v15069_v10 }
0x1421   :  { %10997 = vmatpush1.bf16.msra.mxu1 %v15024_v37  ;;  %11246 = vmatprep.subr.bf16.mxu0 %v15074_v11 }
0x1422   :  { %10998 = vmatprep.subr.bf16.mxu1 %v15029_v38  ;;  %v10577_v38 = vrot.slane %v12136_v30, %v18033_v14 }
0x1424   :  { %11247 = vmatpush1.bf16.msra.mxu0 %v15072_v12 }
0x1425   :  { %10999 = vmatpush1.bf16.msra.mxu1 %v15027_v39  ;;  %11248 = vmatprep.subr.bf16.mxu0 %v15077_v15 }
0x1426   :  { %11000 = vmatprep.subr.bf16.mxu1 %v15032_v40 }
0x1428   :  { %11249 = vmatpush1.bf16.msra.mxu0 %v15075_v19  ;;  %v12202_v19 = vld [vmem:[%s18257_s6 + $0x4] ss:$8 sm:$0x3] }
0x1429   :  { %11001 = vmatpush1.bf16.msra.mxu1 %v15030_v41  ;;  %11250 = vmatprep.subr.bf16.mxu0 %v15080_v22  ;;  %v11075_v22 = vrot.slane %v12202_v19, %v18028_v9 }
0x142a   :  { %11002 = vmatprep.subr.bf16.mxu1 %v15035_v43 }
0x142c   :  { %11251 = vmatpush1.bf16.msra.mxu0 %v15078_v58  ;;  %v11079_v58 = vrot.slane %v12202_v19, %v18033_v14 }
0x142d   :  { %11003 = vmatpush1.bf16.msra.mxu1 %v15033_v32  ;;  %11252 = vmatprep.subr.bf16.mxu0 %v15083_v23 }
0x142e   :  { %11004 = vmatprep.subr.bf16.mxu1 %v15038_v45 }
0x1430   :  { %11253 = vmatpush1.bf16.msra.mxu0 %v15081_v24 }
0x1431   :  { %11005 = vmatpush1.bf16.msra.mxu1 %v15036_v47  ;;  %11254 = vmatprep.subr.bf16.mxu0 %v15086_v0 }
0x1432   :  { %11006 = vmatprep.subr.bf16.mxu1 %v15041_v42 }
0x1434   :  { %11255 = vmatpush1.bf16.msra.mxu0 %v15084_v16 }
0x1435   :  { %11007 = vmatpush1.bf16.msra.mxu1 %v15039_v48  ;;  %11256 = vmatprep.subr.bf16.mxu0 %v15089_v18 }
0x1436   :  { %11008 = vmatprep.subr.bf16.mxu1 %v15044_v49 }
0x1438   :  { %11257 = vmatpush1.bf16.msra.mxu0 %v15087_v44 }
0x1439   :  { %11009 = vmatpush2.bf16.msra.mxu1 %v15042_v50  ;;  %11258 = vmatprep.subr.bf16.mxu0 %v15092_v17 }
0x143a   :  { %11010 = vmatprep.subr.bf16.mxu1 %v15047_v46 }
0x143c   :  { %11259 = vmatpush2.bf16.msra.mxu0 %v15090_v13 }
0x143d   :  { %11011 = vmatpush2.bf16.msra.mxu1 %v15045_v51  ;;  %11260 = vmatprep.subr.bf16.mxu0 %v15095_v21 }
0x143e   :  { %11012 = vmatprep.subr.bf16.mxu1 %v15050_v52 }
0x1440   :  { %11261 = vmatpush2.bf16.msra.mxu0 %v15093_v20 }
0x1441   :  { %11013 = vmatpush2.bf16.msra.mxu1 %v15048_v53  ;;  %11262 = vmatprep.subr.bf16.mxu0 %v15098_v61 }
0x1442   :  { %11014 = vmatprep.subr.bf16.mxu1 %v15053_v54  ;;  %v15110_v54 = vld [vmem:[%s18254_s3 + $0x514] ss:$8 sps:$4 sm:$0xff]  }
0x1444   :  { %11263 = vmatpush2.bf16.msra.mxu0 %v15096_v62 }
0x1445   :  { %11015 = vmatpush2.bf16.msra.mxu1 %v15051_v55  ;;  %11264 = vmatprep.subr.bf16.mxu0 %v15101_v1  ;;  %v15108_v55 = vld [vmem:[%s18254_s3 + $0x510] ss:$8 sps:$4 sm:$0xff]  }
0x1446   :  { %11016 = vmatprep.subr.bf16.mxu1 %v15056_v56  ;;  %v15113_v56 = vld [vmem:[%s18254_s3 + $0x504] ss:$8 sps:$4 sm:$0xff]  }
0x1448   :  { %11265 = vmatpush2.bf16.msra.mxu0 %v15099_v3 }
0x1449   :  { %11017 = vmatpush2.bf16.msra.mxu1 %v15054_v57  ;;  %11266 = vmatprep.subr.bf16.mxu0 %v15104_v25  ;;  %v15111_v57 = vld [vmem:[%s18254_s3 + $0x500] ss:$8 sps:$4 sm:$0xff]  }
0x144a   :  { %11018 = vmatprep.subr.bf16.mxu1 %v15059_v59  ;;  %v12169_v59 = vld [vmem:[%s18257_s6 + $0x3] ss:$8 sm:$0x3]  ;;  %s15142_s6 = smov [#allocation2]  }
0x144b   :  { %s11316_s24 = sshll.u32 %s15142_s6, 4  ;;  %s11317_s24 = int_to_ptr.vmem [resolvable:$true] %s11316_s24 }
0x144c   :  { %11267 = vmatpush2.bf16.msra.mxu0 %v15102_v26  ;;  %s15116_s25 = scalar_lea.vmem %s11317_s24, 64  ;;  %p15121_p1 = scmp.lt.s32.totalorder %s11317_s24, %s11317_s24 }
0x144d   :  { %11019 = vmatpush2.bf16.msra.mxu1 %v15057_v60  ;;  %11268 = vmatprep.subr.bf16.mxu0 %v15107_v27  ;;  %v10825_v60 = vrot.slane %v12169_v59, %v18028_v9  ;;  %p15117_p0 = scmp.ne.s32.totalorder %s11317_s24, %s15116_s25  ;;  %p15122_p2 = scmp.lt.s32.totalorder %s15116_s25, %s15116_s25 }
0x144e   :  { %11020 = vmatprep.subr.bf16.mxu1 %v15062_v63  ;;  %v10829_v63 = vrot.slane %v12169_v59, %v18033_v14 }
0x144f   :  { %p15123_p3 = por %p15122_p2, %p15121_p1 }
0x1450   :  { %11269 = vmatpush2.bf16.msra.mxu0 %v15105_v28 }
0x1451   :  { %11021 = vmatpush2.bf16.msra.mxu1 %v15060_v6  ;;  %11270 = vmatprep.subr.bf16.mxu0 %v15110_v54  ;;  %p15124_p4 = pnand %p15123_p3, %p15117_p0 }
0x1452   :  { %11022 = vmatprep.subr.bf16.mxu1 %v15065_v2 }
0x1454   :  { %11271 = vmatpush2.bf16.msra.mxu0 %v15108_v55 }
0x1455   :  { %11023 = vmatpush2.bf16.msra.mxu1 %v15063_v4  ;;  %11272 = vmatprep.subr.bf16.mxu0 %v15113_v56 }
0x1458   :  { %11273 = vmatpush2.bf16.msra.mxu0 %v15111_v57 }
0x14d8   :  { %v10526_v33 = vpop.f32.mrf.mxu1 }
0x14d9   :  { %v10527_v35 = vadd.f32 %v10526_v33, %v10405_v31 }
0x14da   :  { %v10528_v37 = vpop.f32.mrf.mxu1 }
0x14db   :  { %v10774_v39 = vpop.f32.mrf.mxu0  ;;  %v10529_v45 = vadd.f32 %v10528_v37, %v10409_v36 }
0x14dc   :  { %v10775_v40 = vadd.f32 %v10774_v39, %v10573_v34  ;;  %v10530_v41 = vpop.f32.mrf.mxu1 }
0x14dd   :  { %v10776_v43 = vpop.f32.mrf.mxu0 }
0x14de   :  { %v10781_v32 = vadd.f32 %v10775_v40, %v10527_v35  ;;  %v10777_v47 = vadd.f32 %v10776_v43, %v10577_v38  ;;  %v10531_v42 = vpop.f32.mrf.mxu1 }
0x14df   :  { %v10778_v48 = vpop.f32.mrf.mxu0 }
0x14e0   :  { %v10782_v49 = vadd.f32 %v10777_v47, %v10529_v45  ;;  %v10783_v50 = vmax.f32 %v10781_v32, 0.0 }
0x14e1   :  { %v10779_v46 = vpop.f32.mrf.mxu0 }
0x14e2   :  { %v10784_v51 = vmax.f32 %v10782_v49, 0.0  ;;  %v10785_v53 = vpack.c.bf16 %v10783_v50, %v10783_v50 }
0x14e4   :  { %v10786_v52 = vpack.c.bf16 %v10784_v51, %v10784_v51 }
0x14e6   :  { %11024 = vmatprep.mubr.bf16.mxu1 %v10786_v52 }
0x14e7   :  { %11025 = vmatmul.mubr.bf16.vlgmr.msra.gmra.mxu1 %v10785_v53 }
0x15a7   :  { %v11026_v6 = vpop.f32.mrf.mxu1 }
0x15a8   :  { %v11027_v2 = vadd.f32 %v11026_v6, %v10825_v60 }
0x15a9   :  { %v11028_v4 = vpop.f32.mrf.mxu1 }
0x15aa   :  { %v11029_v5 = vadd.f32 %v11028_v4, %v10829_v63  ;;  %v11033_v7 = vmax.f32 %v11027_v2, 0.0 }
0x15ab   :  { %v11030_v8 = vpop.f32.mrf.mxu1 }
0x15ac   :  { %v11034_v10 = vmax.f32 %v11029_v5, 0.0  ;;  %v11035_v15 = vpack.c.bf16 %v11033_v7, %v11033_v7 }
0x15ad   :  { %v11031_v11 = vpop.f32.mrf.mxu1 }
0x15ae   :  { %v11036_v12 = vpack.c.bf16 %v11034_v10, %v11034_v10 }
0x15b0   :  { %11274 = vmatprep.mubr.bf16.mxu0 %v11036_v12 }
0x15b1   :  { %11275 = vmatmul.mubr.bf16.vlgmr.msra.gmra.mxu0 %v11035_v15 }
0x1671   :  { %v11276_v23 = vpop.f32.mrf.mxu0 }
0x1672   :  { %v11277_v24 = vadd.f32 %v11276_v23, %v11075_v22 }
0x1673   :  { %v11278_v0 = vpop.f32.mrf.mxu0 }
0x1674   :  { %v11283_v16 = vadd.f32 %v11277_v24, %v10783_v50  ;;  %v11279_v18 = vadd.f32 %v11278_v0, %v11079_v58 }
0x1675   :  { %v11280_v44 = vpop.f32.mrf.mxu0 }
0x1676   :  { %v11285_v17 = vmax.f32 %v11283_v16, 0.0  ;;  %v11284_v13 = vadd.f32 %v11279_v18, %v10784_v51 }
0x1677   :  { %v11281_v21 = vpop.f32.mrf.mxu0 }
0x1678   :  { %v11286_v20 = vmax.f32 %v11284_v13, 0.0  ;;  %v11287_v61 = vmul.f32 %v11285_v17, %v11285_v17 }
0x167a   :  { %v11288_v62 = vmul.f32 %v11286_v20, %v11286_v20  ;;  %v11289_v1 = vsel %vm226_vm2, %v11287_v61, 0.0 }
0x167c   :  { %v11290_v3 = vsel %vm226_vm2, %v11288_v62, 0.0 }
0x167d   :  { %v11291_v25 = vadd.f32 %v11290_v3, %v11289_v1 }
0x167f   :  { %11292 = vadd.xlane.f32.xlu0 %v11291_v25 }
0x1708   :  { %v11293_v9 = vpop.xlane.xlu0 %11292 }
0x1709   :  { %v11294_v14 = vmax.f32 %v11293_v9, 1e-24 }
0x170b   :  { %15114 = vrsqrt.f32 %v11294_v14 }
0x1718   :  { %v15115_v26 = vpop.eup %15114 }
0x1719   :  { %v11296_v27 = vmul.f32 %v15115_v26, %v11285_v17  ;;  %v11297_v28 = vmul.f32 %v15115_v26, %v11286_v20 }
0x171b   :  { %v11300_v29 = vcombine.low %v11296_v27, %v11297_v28 }
0x171d   :  { %12235 = vst.sshfl [vmem:[#allocation2] sm:$0x33 pattern:$0x76325410] %v11300_v29 }
0x171e   :  { %15127 = shalt.err (!%p15124_p4)
}
0x171f   :  { %11319 = dma.vmem_to_hbm [thread:$0]  %s11317_s24, 64, %s18259_s8, [#allocation3]  }
0x1720   :  { %15136 = dma.done.wait [#allocation3], 64  }
0x1721   :  { %15137 = vsyncadd [#allocation3], 4294967232 }
0x1722   :  { %11323 = vsyncpa [#allocation3], 1 }

</bundles_post_ra>
